<compile_context>
chip_gen: v5e
topology: v5e:2x2
jax: 0.10.0
libtpu: 0.0.40
codegen_flags: <defaults>
</compile_context>

<pallas_src>
import functools

import jax
import jax.numpy as jnp
from jax.experimental import pallas as pl
from jax.experimental.pallas import tpu as pltpu

N_INPUT = 256     # real model: 32*32*3 = 3072
N_HIDDEN = 128    # real model: 512
N_CLASSES = 10


def _round_up(x, m):
    return (x + m - 1) // m * m


def rnn_kernel(gx1_ref, whh1_ref, w2_ref, b2_ref, wfc_ref, bfc_ref,
               out_ref,
               c1, c2, hh,
               *, seq_len, chunk):
    """Recurrent part of the model for one (batch-tile, time-chunk) grid cell.

    gx1_ref : (Tc, Bt, 4H) bf16  precomputed x_t @ W_ih1 + b1 for this chunk
    whh1_ref: (H, 4H)      f32   layer-1 recurrent weights
    w2_ref  : (2H, 4H)     f32   stacked [W_ih2; W_hh2]
    b2_ref  : (1, 4H)      f32   combined layer-2 bias
    wfc_ref : (H, CP)      f32   lane-padded FC weights
    bfc_ref : (1, CP)      f32   lane-padded FC bias
    out_ref : (Bt, CP)     f32   logits for this batch tile (padded)
    c1, c2  : (Bt, H)      f32   persistent cell state (layers 1 & 2)
    hh      : (Bt, 2H)     f32   persistent [h1 | h2] hidden state
    """
    t_idx = pl.program_id(1)                  # time-chunk axis
    Tc = gx1_ref.shape[0]
    Bt, H = c1.shape
    needs_mask = (seq_len % chunk) != 0       # static Python bool

    @pl.when(t_idx == 0)
    def _():
        c1[...] = jnp.zeros_like(c1)
        c2[...] = jnp.zeros_like(c2)
        hh[...] = jnp.zeros_like(hh)

    # Hoist the (1,4H)->(Bt,4H) broadcast out of the unrolled loop
    # (JAX does not CSE broadcast_in_dim).
    b2b = jnp.broadcast_to(b2_ref[...], (Bt, 4 * H))

    def gates_to_hc(gates, c_prev):
        i_g = jax.nn.sigmoid(gates[:, 0 * H:1 * H])
        f_g = jax.nn.sigmoid(gates[:, 1 * H:2 * H])
        g_g = jnp.tanh(gates[:, 2 * H:3 * H])
        o_g = jax.nn.sigmoid(gates[:, 3 * H:4 * H])
        c_new = f_g * c_prev + i_g * g_g
        h_new = o_g * jnp.tanh(c_new)
        return h_new, c_new

    def body(t, carry):
        c1v, c2v = carry
        h1_prev = hh[:, 0:H]
        # Layer 1: input projection already folded into gx1 (streamed bf16).
        gates1 = gx1_ref[t].astype(jnp.float32) + jnp.dot(
            h1_prev, whh1_ref[...], preferred_element_type=jnp.float32)
        h1n, c1n = gates_to_hc(gates1, c1v)

        if needs_mask:  # only emitted when the last chunk has padded steps
            valid = (t_idx * chunk + t) < seq_len
            h1n = jnp.where(valid, h1n, h1_prev)
            c1n = jnp.where(valid, c1n, c1v)

        hh[:, 0:H] = h1n          # hh now holds [h1_t | h2_{t-1}]

        # Layer 2: single fused dot over [h1_t, h2_{t-1}] (no concat/copy).
        gates2 = jnp.dot(hh[...], w2_ref[...],
                         preferred_element_type=jnp.float32) + b2b
        h2n, c2n = gates_to_hc(gates2, c2v)

        if needs_mask:
            h2n = jnp.where(valid, h2n, hh[:, H:2 * H])
            c2n = jnp.where(valid, c2n, c2v)

        hh[:, H:2 * H] = h2n
        return (c1n, c2n)

    carry = jax.lax.fori_loop(0, Tc, body, (c1[...], c2[...]), unroll=True)
    c1[...], c2[...] = carry

    # Final linear head on the last valid time step's layer-2 hidden state.
    @pl.when(t_idx == pl.num_programs(1) - 1)
    def _():
        logits = jnp.dot(hh[:, H:2 * H], wfc_ref[...],
                         preferred_element_type=jnp.float32) + bfc_ref[...]
        out_ref[...] = logits.astype(out_ref.dtype)


@functools.partial(jax.jit, static_argnames=("time_chunk", "batch_tile"))
def rnn_model_forward(x, params, time_chunk=8, batch_tile=128):
    """x: (B, T, N_INPUT) f32. Returns logits (B, N_CLASSES) f32."""
    (wih1, whh1, b1, wih2, whh2, b2, wfc, bfc) = params
    B, T, D = x.shape
    H = whh1.shape[0]
    C = wfc.shape[1]
    f32 = jnp.float32

    # --- Padding / tiling ----------------------------------------------------
    # Batch: multiple of 8 sublanes; large batches are split into tiles so a
    # leading "parallel" grid axis can feed both v7x TensorCores. For real
    # deployments, a per-tile batch of 128 fills the MXU's M dimension.
    Bp = max(8, _round_up(B, 8))
    if Bp <= batch_tile:
        Bt = Bp
    else:
        Bt = batch_tile
        Bp = _round_up(Bp, Bt)
    # Time: chunk Tc amortises per-grid-step overhead; a T that doesn't divide
    # Tc is padded up and masked in-kernel (no collapse to Tc=1).
    Tc = min(time_chunk, T)
    Tp = _round_up(T, Tc)
    # Lane-dense FC head.
    CP = max(128, _round_up(C, 128))

    x_p = jnp.pad(x.astype(f32), ((0, Bp - B), (0, 0), (0, 0)))

    # Hoisted layer-1 input projection: one big GEMM, emitted time-major and
    # streamed to the kernel in bf16 (halves HBM traffic + double-buffered
    # VMEM of the only per-step streamed tensor). All dots are f32 x f32.
    gx1 = jnp.einsum("btd,dg->tbg", x_p, wih1.astype(f32),
                     preferred_element_type=f32) + b1.astype(f32)
    gx1 = gx1.astype(jnp.bfloat16)
    gx1 = jnp.pad(gx1, ((0, Tp - T), (0, 0), (0, 0)))              # (Tp,Bp,4H)

    # Fused layer-2 weights (single K=2H dot per step).
    w2 = jnp.concatenate([wih2, whh2], axis=0).astype(f32)          # (2H, 4H)
    whh1_f = whh1.astype(f32)
    b2_f = b2.astype(f32)

    # Lane-padded FC head.
    wfc_p = jnp.zeros((H, CP), f32).at[:, :C].set(wfc.astype(f32))
    bfc_p = jnp.zeros((1, CP), f32).at[:, :C].set(bfc.astype(f32))

    grid = (Bp // Bt, Tp // Tc)

    grid_spec = pltpu.PrefetchScalarGridSpec(
        num_scalar_prefetch=0,
        grid=grid,
        in_specs=[
            pl.BlockSpec((Tc, Bt, 4 * H), lambda b, t: (t, b, 0)),   # gx1 chunk
            pl.BlockSpec((H, 4 * H), lambda b, t: (0, 0)),           # W_hh1
            pl.BlockSpec((2 * H, 4 * H), lambda b, t: (0, 0)),       # [W_ih2;W_hh2]
            pl.BlockSpec((1, 4 * H), lambda b, t: (0, 0)),           # b2
            pl.BlockSpec((H, CP), lambda b, t: (0, 0)),              # fc weight
            pl.BlockSpec((1, CP), lambda b, t: (0, 0)),              # fc bias
        ],
        out_specs=pl.BlockSpec((Bt, CP), lambda b, t: (b, 0)),
        scratch_shapes=[
            pltpu.VMEM((Bt, H), f32),        # c1
            pltpu.VMEM((Bt, H), f32),        # c2
            pltpu.VMEM((Bt, 2 * H), f32),    # [h1 | h2]
        ],
    )

    # Right-size the VMEM budget from actual block sizes (double-buffered
    # streamed/weight blocks) instead of a blanket limit.
    gx1_blk = Tc * Bt * 4 * H * 2                                     # bf16
    weights = (H * 4 * H + 2 * H * 4 * H + 4 * H + H * CP + CP) * 4   # f32
    out_blk = Bt * CP * 4
    scratch = (2 * Bt * H + Bt * 2 * H) * 4
    vmem_limit = int(min(max(2 * (gx1_blk + weights + out_blk) + scratch
                             + (8 << 20), 24 << 20), 96 << 20))

    kernel = functools.partial(rnn_kernel, seq_len=T, chunk=Tc)

    out_padded = pl.pallas_call(
        kernel,
        out_shape=jax.ShapeDtypeStruct((Bp, CP), f32),
        grid_spec=grid_spec,
        compiler_params=pltpu.CompilerParams(
            # batch tiles are independent (megacore); time is the recurrence
            dimension_semantics=("parallel", "arbitrary"),
            vmem_limit_bytes=vmem_limit,
        ),
    )(gx1, whh1_f, w2, b2_f, wfc_p, bfc_p)

    return out_padded[:B, :C]


def rnn_model_reference(x, params):
    """Pure-JAX reference (PyTorch LSTM semantics, gate order i,f,g,o).

    All matmuls are f32; the layer-1 input projection is rounded to bf16 to
    mirror the kernel's bf16 streaming of gx1.
    """
    (wih1, whh1, b1, wih2, whh2, b2, wfc, bfc) = params
    B, T, D = x.shape
    H = whh1.shape[0]
    f32 = jnp.float32

    def run_lstm_from_gates(gates_x, whh):
        def step(carry, gx_t):
            h, c = carry
            gates = gx_t + jnp.dot(h, whh, preferred_element_type=f32)
            i = jax.nn.sigmoid(gates[:, 0 * H:1 * H])
            f = jax.nn.sigmoid(gates[:, 1 * H:2 * H])
            g = jnp.tanh(gates[:, 2 * H:3 * H])
            o = jax.nn.sigmoid(gates[:, 3 * H:4 * H])
            c = f * c + i * g
            h = o * jnp.tanh(c)
            return (h, c), h

        init = (jnp.zeros((B, H), f32), jnp.zeros((B, H), f32))
        _, hs = jax.lax.scan(step, init, jnp.swapaxes(gates_x, 0, 1))
        return jnp.swapaxes(hs, 0, 1)

    gx1 = jnp.einsum("btd,dg->btg", x.astype(f32), wih1.astype(f32),
                     preferred_element_type=f32) + b1.astype(f32)
    gx1 = gx1.astype(jnp.bfloat16).astype(f32)     # mirror kernel streaming
    h1 = run_lstm_from_gates(gx1, whh1.astype(f32))

    gx2 = jnp.einsum("bth,hg->btg", h1, wih2.astype(f32),
                     preferred_element_type=f32) + b2.astype(f32)
    h2 = run_lstm_from_gates(gx2, whh2.astype(f32))

    return jnp.dot(h2[:, -1, :], wfc.astype(f32),
                   preferred_element_type=f32) + bfc.astype(f32)


def init_params(key, d_in, h, n_classes):
    ks = jax.random.split(key, 8)
    scale = 1.0 / jnp.sqrt(h)
    u = lambda k, shape: jax.random.uniform(k, shape, jnp.float32, -scale, scale)
    wih1 = u(ks[0], (d_in, 4 * h))
    whh1 = u(ks[1], (h, 4 * h))
    b1 = u(ks[2], (1, 4 * h))      # combined b_ih + b_hh
    wih2 = u(ks[3], (h, 4 * h))
    whh2 = u(ks[4], (h, 4 * h))
    b2 = u(ks[5], (1, 4 * h))
    wfc = u(ks[6], (h, n_classes))
    bfc = u(ks[7], (1, n_classes))
    return (wih1, whh1, b1, wih2, whh2, b2, wfc, bfc)


if __name__ == "__main__":
    key = jax.random.PRNGKey(0)
    k_x, k_p = jax.random.split(key)

    params = init_params(k_p, N_INPUT, N_HIDDEN, N_CLASSES)

    # Case 1: T divisible by the time chunk (fast path, no in-kernel masking).
    B, T = 2, 8
    x = jax.random.normal(k_x, (B, T, N_INPUT), dtype=jnp.float32)
    out = jax.block_until_ready(rnn_model_forward(x, params))
    ref = rnn_model_reference(x, params)
    assert out.shape == (B, N_CLASSES), out.shape
    err = jnp.max(jnp.abs(out - ref))
    assert jnp.allclose(out, ref, atol=5e-3, rtol=5e-3), (
        f"mismatch (T=8): max abs err {err}")

    # Case 2: T not divisible by the chunk (exercises the padded/masked tail
    # instead of collapsing to a per-step grid).
    T2 = 11
    x2 = jax.random.normal(jax.random.PRNGKey(1), (B, T2, N_INPUT),
                           dtype=jnp.float32)
    out2 = jax.block_until_ready(rnn_model_forward(x2, params))
    ref2 = rnn_model_reference(x2, params)
    err2 = jnp.max(jnp.abs(out2 - ref2))
    assert jnp.allclose(out2, ref2, atol=5e-3, rtol=5e-3), (
        f"mismatch (T=11): max abs err {err2}")

    print("KERNEL_OK")
</pallas_src>

<mosaic_0001>
module attributes {stable_mosaic.version = 11 : i64} {
  func.func @rnn_kernel(%arg0: i32, %arg1: i32, %arg2: memref<8x8x512xbf16, #tpu.memory_space<vmem>>, %arg3: memref<128x512xf32, #tpu.memory_space<vmem>>, %arg4: memref<256x512xf32, #tpu.memory_space<vmem>>, %arg5: memref<1x512xf32, #tpu.memory_space<vmem>>, %arg6: memref<128x128xf32, #tpu.memory_space<vmem>>, %arg7: memref<1x128xf32, #tpu.memory_space<vmem>>, %arg8: memref<8x128xf32, #tpu.memory_space<vmem>>, %arg9: memref<8x128xf32, #tpu.memory_space<vmem>>, %arg10: memref<8x128xf32, #tpu.memory_space<vmem>>, %arg11: memref<8x256xf32, #tpu.memory_space<vmem>>) attributes {dimension_semantics = [#tpu.dimension_semantics<parallel>, #tpu.dimension_semantics<arbitrary>], iteration_bounds = array<i64: 1, 1>, scalar_prefetch = 0 : i64, scratch_operands = 3 : i64, tpu.core_type = #tpu.core_type<tc>, window_params = [{transform_indices = @transform_0, window_bounds = array<i64: 8, 8, 512>}, {pipeline_mode = #tpu.pipeline_mode<synchronous>, transform_indices = @transform_1, window_bounds = array<i64: 128, 512>}, {pipeline_mode = #tpu.pipeline_mode<synchronous>, transform_indices = @transform_2, window_bounds = array<i64: 256, 512>}, {pipeline_mode = #tpu.pipeline_mode<synchronous>, transform_indices = @transform_3, window_bounds = array<i64: 1, 512>}, {pipeline_mode = #tpu.pipeline_mode<synchronous>, transform_indices = @transform_4, window_bounds = array<i64: 128, 128>}, {pipeline_mode = #tpu.pipeline_mode<synchronous>, transform_indices = @transform_5, window_bounds = array<i64: 1, 128>}, {transform_indices = @transform_6, window_bounds = array<i64: 8, 128>}]} {
    %c0_i32 = arith.constant 0 : i32
    %0 = arith.cmpi eq, %arg1, %c0_i32 : i32
    %1 = arith.extui %0 : i1 to i32
    %c0_i32_0 = arith.constant 0 : i32
    %2 = arith.cmpi ne, %1, %c0_i32_0 : i32
    scf.if %2 {
      %cst_187 = arith.constant 0.000000e+00 : f32
      %525 = vector.broadcast %cst_187 : f32 to vector<8x128xf32>
      %c0_188 = arith.constant 0 : index
      %c0_189 = arith.constant 0 : index
      %526 = vector.load %arg9[%c0_188, %c0_189] : memref<8x128xf32, #tpu.memory_space<vmem>>, vector<8x128xf32>
      tpu.vector_store %arg9[%c0_188, %c0_189], %525 {strides = array<i32>} : memref<8x128xf32, #tpu.memory_space<vmem>>, vector<8x128xf32>,
      %cst_190 = arith.constant 0.000000e+00 : f32
      %527 = vector.broadcast %cst_190 : f32 to vector<8x128xf32>
      %c0_191 = arith.constant 0 : index
      %c0_192 = arith.constant 0 : index
      %528 = vector.load %arg10[%c0_191, %c0_192] : memref<8x128xf32, #tpu.memory_space<vmem>>, vector<8x128xf32>
      tpu.vector_store %arg10[%c0_191, %c0_192], %527 {strides = array<i32>} : memref<8x128xf32, #tpu.memory_space<vmem>>, vector<8x128xf32>,
      %cst_193 = arith.constant 0.000000e+00 : f32
      %529 = vector.broadcast %cst_193 : f32 to vector<8x256xf32>
      %c0_194 = arith.constant 0 : index
      %c0_195 = arith.constant 0 : index
      %530 = vector.load %arg11[%c0_194, %c0_195] : memref<8x256xf32, #tpu.memory_space<vmem>>, vector<8x256xf32>
      tpu.vector_store %arg11[%c0_194, %c0_195], %529 {strides = array<i32>} : memref<8x256xf32, #tpu.memory_space<vmem>>, vector<8x256xf32>,
    } else {
    }
    %c0 = arith.constant 0 : index
    %c0_1 = arith.constant 0 : index
    %3 = vector.load %arg5[%c0, %c0_1] : memref<1x512xf32, #tpu.memory_space<vmem>>, vector<1x512xf32>
    %4 = vector.shape_cast %3 : vector<1x512xf32> to vector<1x512xf32>
    %5 = vector.broadcast %4 : vector<1x512xf32> to vector<8x512xf32>
    %c0_2 = arith.constant 0 : index
    %c0_3 = arith.constant 0 : index
    %6 = vector.load %arg9[%c0_2, %c0_3] : memref<8x128xf32, #tpu.memory_space<vmem>>, vector<8x128xf32>
    %c0_4 = arith.constant 0 : index
    %c0_5 = arith.constant 0 : index
    %7 = vector.load %arg10[%c0_4, %c0_5] : memref<8x128xf32, #tpu.memory_space<vmem>>, vector<8x128xf32>
    %c0_i32_6 = arith.constant 0 : i32
    %c0_7 = arith.constant 0 : index
    %c0_8 = arith.constant 0 : index
    %8 = vector.load %arg11[%c0_7, %c0_8] : memref<8x256xf32, #tpu.memory_space<vmem>>, vector<8x128xf32>
    %9 = arith.index_cast %c0_i32_6 : i32 to index
    %c0_9 = arith.constant 0 : index
    %c0_10 = arith.constant 0 : index
    %10 = vector.load %arg2[%9, %c0_9, %c0_10] : memref<8x8x512xbf16, #tpu.memory_space<vmem>>, vector<1x8x512xbf16>
    %11 = vector.shape_cast %10 : vector<1x8x512xbf16> to vector<8x512xbf16>
    %12 = arith.extf %11 : vector<8x512xbf16> to vector<8x512xf32>
    %c0_11 = arith.constant 0 : index
    %c0_12 = arith.constant 0 : index
    %13 = vector.load %arg3[%c0_11, %c0_12] : memref<128x512xf32, #tpu.memory_space<vmem>>, vector<128x512xf32>
    %cst = arith.constant dense<0.000000e+00> : vector<8x512xf32>
    %14 = tpu.matmul %8, %13, %cst {dimension_numbers = #tpu.dot_dimension_numbers<[1], [0], [0], [1], [0, 0, 1, 1], [], []>} : vector<8x128xf32>, vector<128x512xf32>, vector<8x512xf32> -> vector<8x512xf32>
    %15 = arith.addf %12, %14 : vector<8x512xf32>
    %16 = vector.extract_strided_slice %15 {offsets = [0, 0], sizes = [8, 128], strides = [1, 1]} : vector<8x512xf32> to vector<8x128xf32>
    %17 = arith.negf %16 : vector<8x128xf32>
    %18 = math.exp %17 : vector<8x128xf32>
    %cst_13 = arith.constant 1.000000e+00 : f32
    %19 = vector.broadcast %cst_13 : f32 to vector<8x128xf32>
    %20 = arith.addf %19, %18 : vector<8x128xf32>
    %21 = arith.divf %19, %20 : vector<8x128xf32>
    %22 = vector.extract_strided_slice %15 {offsets = [0, 128], sizes = [8, 128], strides = [1, 1]} : vector<8x512xf32> to vector<8x128xf32>
    %23 = arith.negf %22 : vector<8x128xf32>
    %24 = math.exp %23 : vector<8x128xf32>
    %cst_14 = arith.constant 1.000000e+00 : f32
    %25 = vector.broadcast %cst_14 : f32 to vector<8x128xf32>
    %26 = arith.addf %25, %24 : vector<8x128xf32>
    %27 = arith.divf %25, %26 : vector<8x128xf32>
    %28 = vector.extract_strided_slice %15 {offsets = [0, 256], sizes = [8, 128], strides = [1, 1]} : vector<8x512xf32> to vector<8x128xf32>
    %29 = math.tanh %28 : vector<8x128xf32>
    %30 = vector.extract_strided_slice %15 {offsets = [0, 384], sizes = [8, 128], strides = [1, 1]} : vector<8x512xf32> to vector<8x128xf32>
    %31 = arith.negf %30 : vector<8x128xf32>
    %32 = math.exp %31 : vector<8x128xf32>
    %cst_15 = arith.constant 1.000000e+00 : f32
    %33 = vector.broadcast %cst_15 : f32 to vector<8x128xf32>
    %34 = arith.addf %33, %32 : vector<8x128xf32>
    %35 = arith.divf %33, %34 : vector<8x128xf32>
    %36 = arith.mulf %27, %6 : vector<8x128xf32>
    %37 = arith.mulf %21, %29 : vector<8x128xf32>
    %38 = arith.addf %36, %37 : vector<8x128xf32>
    %39 = math.tanh %38 : vector<8x128xf32>
    %40 = arith.mulf %35, %39 : vector<8x128xf32>
    %c0_16 = arith.constant 0 : index
    %c0_17 = arith.constant 0 : index
    %41 = vector.load %arg11[%c0_16, %c0_17] : memref<8x256xf32, #tpu.memory_space<vmem>>, vector<8x128xf32>
    tpu.vector_store %arg11[%c0_16, %c0_17], %40 {strides = array<i32>} : memref<8x256xf32, #tpu.memory_space<vmem>>, vector<8x128xf32>,
    %c0_18 = arith.constant 0 : index
    %c0_19 = arith.constant 0 : index
    %42 = vector.load %arg11[%c0_18, %c0_19] : memref<8x256xf32, #tpu.memory_space<vmem>>, vector<8x256xf32>
    %c0_20 = arith.constant 0 : index
    %c0_21 = arith.constant 0 : index
    %43 = vector.load %arg4[%c0_20, %c0_21] : memref<256x512xf32, #tpu.memory_space<vmem>>, vector<256x512xf32>
    %cst_22 = arith.constant dense<0.000000e+00> : vector<8x512xf32>
    %44 = tpu.matmul %42, %43, %cst_22 {dimension_numbers = #tpu.dot_dimension_numbers<[1], [0], [0], [1], [0, 0, 1, 1], [], []>} : vector<8x256xf32>, vector<256x512xf32>, vector<8x512xf32> -> vector<8x512xf32>
    %45 = arith.addf %44, %5 : vector<8x512xf32>
    %46 = vector.extract_strided_slice %45 {offsets = [0, 0], sizes = [8, 128], strides = [1, 1]} : vector<8x512xf32> to vector<8x128xf32>
    %47 = arith.negf %46 : vector<8x128xf32>
    %48 = math.exp %47 : vector<8x128xf32>
    %cst_23 = arith.constant 1.000000e+00 : f32
    %49 = vector.broadcast %cst_23 : f32 to vector<8x128xf32>
    %50 = arith.addf %49, %48 : vector<8x128xf32>
    %51 = arith.divf %49, %50 : vector<8x128xf32>
    %52 = vector.extract_strided_slice %45 {offsets = [0, 128], sizes = [8, 128], strides = [1, 1]} : vector<8x512xf32> to vector<8x128xf32>
    %53 = arith.negf %52 : vector<8x128xf32>
    %54 = math.exp %53 : vector<8x128xf32>
    %cst_24 = arith.constant 1.000000e+00 : f32
    %55 = vector.broadcast %cst_24 : f32 to vector<8x128xf32>
    %56 = arith.addf %55, %54 : vector<8x128xf32>
    %57 = arith.divf %55, %56 : vector<8x128xf32>
    %58 = vector.extract_strided_slice %45 {offsets = [0, 256], sizes = [8, 128], strides = [1, 1]} : vector<8x512xf32> to vector<8x128xf32>
    %59 = math.tanh %58 : vector<8x128xf32>
    %60 = vector.extract_strided_slice %45 {offsets = [0, 384], sizes = [8, 128], strides = [1, 1]} : vector<8x512xf32> to vector<8x128xf32>
    %61 = arith.negf %60 : vector<8x128xf32>
    %62 = math.exp %61 : vector<8x128xf32>
    %cst_25 = arith.constant 1.000000e+00 : f32
    %63 = vector.broadcast %cst_25 : f32 to vector<8x128xf32>
    %64 = arith.addf %63, %62 : vector<8x128xf32>
    %65 = arith.divf %63, %64 : vector<8x128xf32>
    %66 = arith.mulf %57, %7 : vector<8x128xf32>
    %67 = arith.mulf %51, %59 : vector<8x128xf32>
    %68 = arith.addf %66, %67 : vector<8x128xf32>
    %69 = math.tanh %68 : vector<8x128xf32>
    %70 = arith.mulf %65, %69 : vector<8x128xf32>
    %c0_26 = arith.constant 0 : index
    %c128 = arith.constant 128 : index
    %71 = vector.load %arg11[%c0_26, %c128] : memref<8x256xf32, #tpu.memory_space<vmem>>, vector<8x128xf32>
    tpu.vector_store %arg11[%c0_26, %c128], %70 {strides = array<i32>} : memref<8x256xf32, #tpu.memory_space<vmem>>, vector<8x128xf32>,
    %c1_i32 = arith.constant 1 : i32
    %c0_27 = arith.constant 0 : index
    %c0_28 = arith.constant 0 : index
    %72 = vector.load %arg11[%c0_27, %c0_28] : memref<8x256xf32, #tpu.memory_space<vmem>>, vector<8x128xf32>
    %73 = arith.index_cast %c1_i32 : i32 to index
    %c0_29 = arith.constant 0 : index
    %c0_30 = arith.constant 0 : index
    %74 = vector.load %arg2[%73, %c0_29, %c0_30] : memref<8x8x512xbf16, #tpu.memory_space<vmem>>, vector<1x8x512xbf16>
    %75 = vector.shape_cast %74 : vector<1x8x512xbf16> to vector<8x512xbf16>
    %76 = arith.extf %75 : vector<8x512xbf16> to vector<8x512xf32>
    %c0_31 = arith.constant 0 : index
    %c0_32 = arith.constant 0 : index
    %77 = vector.load %arg3[%c0_31, %c0_32] : memref<128x512xf32, #tpu.memory_space<vmem>>, vector<128x512xf32>
    %cst_33 = arith.constant dense<0.000000e+00> : vector<8x512xf32>
    %78 = tpu.matmul %72, %77, %cst_33 {dimension_numbers = #tpu.dot_dimension_numbers<[1], [0], [0], [1], [0, 0, 1, 1], [], []>} : vector<8x128xf32>, vector<128x512xf32>, vector<8x512xf32> -> vector<8x512xf32>
    %79 = arith.addf %76, %78 : vector<8x512xf32>
    %80 = vector.extract_strided_slice %79 {offsets = [0, 0], sizes = [8, 128], strides = [1, 1]} : vector<8x512xf32> to vector<8x128xf32>
    %81 = arith.negf %80 : vector<8x128xf32>
    %82 = math.exp %81 : vector<8x128xf32>
    %cst_34 = arith.constant 1.000000e+00 : f32
    %83 = vector.broadcast %cst_34 : f32 to vector<8x128xf32>
    %84 = arith.addf %83, %82 : vector<8x128xf32>
    %85 = arith.divf %83, %84 : vector<8x128xf32>
    %86 = vector.extract_strided_slice %79 {offsets = [0, 128], sizes = [8, 128], strides = [1, 1]} : vector<8x512xf32> to vector<8x128xf32>
    %87 = arith.negf %86 : vector<8x128xf32>
    %88 = math.exp %87 : vector<8x128xf32>
    %cst_35 = arith.constant 1.000000e+00 : f32
    %89 = vector.broadcast %cst_35 : f32 to vector<8x128xf32>
    %90 = arith.addf %89, %88 : vector<8x128xf32>
    %91 = arith.divf %89, %90 : vector<8x128xf32>
    %92 = vector.extract_strided_slice %79 {offsets = [0, 256], sizes = [8, 128], strides = [1, 1]} : vector<8x512xf32> to vector<8x128xf32>
    %93 = math.tanh %92 : vector<8x128xf32>
    %94 = vector.extract_strided_slice %79 {offsets = [0, 384], sizes = [8, 128], strides = [1, 1]} : vector<8x512xf32> to vector<8x128xf32>
    %95 = arith.negf %94 : vector<8x128xf32>
    %96 = math.exp %95 : vector<8x128xf32>
    %cst_36 = arith.constant 1.000000e+00 : f32
    %97 = vector.broadcast %cst_36 : f32 to vector<8x128xf32>
    %98 = arith.addf %97, %96 : vector<8x128xf32>
    %99 = arith.divf %97, %98 : vector<8x128xf32>
    %100 = arith.mulf %91, %38 : vector<8x128xf32>
    %101 = arith.mulf %85, %93 : vector<8x128xf32>
    %102 = arith.addf %100, %101 : vector<8x128xf32>
    %103 = math.tanh %102 : vector<8x128xf32>
    %104 = arith.mulf %99, %103 : vector<8x128xf32>
    %c0_37 = arith.constant 0 : index
    %c0_38 = arith.constant 0 : index
    %105 = vector.load %arg11[%c0_37, %c0_38] : memref<8x256xf32, #tpu.memory_space<vmem>>, vector<8x128xf32>
    tpu.vector_store %arg11[%c0_37, %c0_38], %104 {strides = array<i32>} : memref<8x256xf32, #tpu.memory_space<vmem>>, vector<8x128xf32>,
    %c0_39 = arith.constant 0 : index
    %c0_40 = arith.constant 0 : index
    %106 = vector.load %arg11[%c0_39, %c0_40] : memref<8x256xf32, #tpu.memory_space<vmem>>, vector<8x256xf32>
    %c0_41 = arith.constant 0 : index
    %c0_42 = arith.constant 0 : index
    %107 = vector.load %arg4[%c0_41, %c0_42] : memref<256x512xf32, #tpu.memory_space<vmem>>, vector<256x512xf32>
    %cst_43 = arith.constant dense<0.000000e+00> : vector<8x512xf32>
    %108 = tpu.matmul %106, %107, %cst_43 {dimension_numbers = #tpu.dot_dimension_numbers<[1], [0], [0], [1], [0, 0, 1, 1], [], []>} : vector<8x256xf32>, vector<256x512xf32>, vector<8x512xf32> -> vector<8x512xf32>
    %109 = arith.addf %108, %5 : vector<8x512xf32>
    %110 = vector.extract_strided_slice %109 {offsets = [0, 0], sizes = [8, 128], strides = [1, 1]} : vector<8x512xf32> to vector<8x128xf32>
    %111 = arith.negf %110 : vector<8x128xf32>
    %112 = math.exp %111 : vector<8x128xf32>
    %cst_44 = arith.constant 1.000000e+00 : f32
    %113 = vector.broadcast %cst_44 : f32 to vector<8x128xf32>
    %114 = arith.addf %113, %112 : vector<8x128xf32>
    %115 = arith.divf %113, %114 : vector<8x128xf32>
    %116 = vector.extract_strided_slice %109 {offsets = [0, 128], sizes = [8, 128], strides = [1, 1]} : vector<8x512xf32> to vector<8x128xf32>
    %117 = arith.negf %116 : vector<8x128xf32>
    %118 = math.exp %117 : vector<8x128xf32>
    %cst_45 = arith.constant 1.000000e+00 : f32
    %119 = vector.broadcast %cst_45 : f32 to vector<8x128xf32>
    %120 = arith.addf %119, %118 : vector<8x128xf32>
    %121 = arith.divf %119, %120 : vector<8x128xf32>
    %122 = vector.extract_strided_slice %109 {offsets = [0, 256], sizes = [8, 128], strides = [1, 1]} : vector<8x512xf32> to vector<8x128xf32>
    %123 = math.tanh %122 : vector<8x128xf32>
    %124 = vector.extract_strided_slice %109 {offsets = [0, 384], sizes = [8, 128], strides = [1, 1]} : vector<8x512xf32> to vector<8x128xf32>
    %125 = arith.negf %124 : vector<8x128xf32>
    %126 = math.exp %125 : vector<8x128xf32>
    %cst_46 = arith.constant 1.000000e+00 : f32
    %127 = vector.broadcast %cst_46 : f32 to vector<8x128xf32>
    %128 = arith.addf %127, %126 : vector<8x128xf32>
    %129 = arith.divf %127, %128 : vector<8x128xf32>
    %130 = arith.mulf %121, %68 : vector<8x128xf32>
    %131 = arith.mulf %115, %123 : vector<8x128xf32>
    %132 = arith.addf %130, %131 : vector<8x128xf32>
    %133 = math.tanh %132 : vector<8x128xf32>
    %134 = arith.mulf %129, %133 : vector<8x128xf32>
    %c0_47 = arith.constant 0 : index
    %c128_48 = arith.constant 128 : index
    %135 = vector.load %arg11[%c0_47, %c128_48] : memref<8x256xf32, #tpu.memory_space<vmem>>, vector<8x128xf32>
    tpu.vector_store %arg11[%c0_47, %c128_48], %134 {strides = array<i32>} : memref<8x256xf32, #tpu.memory_space<vmem>>, vector<8x128xf32>,
    %c2_i32 = arith.constant 2 : i32
    %c0_49 = arith.constant 0 : index
    %c0_50 = arith.constant 0 : index
    %136 = vector.load %arg11[%c0_49, %c0_50] : memref<8x256xf32, #tpu.memory_space<vmem>>, vector<8x128xf32>
    %137 = arith.index_cast %c2_i32 : i32 to index
    %c0_51 = arith.constant 0 : index
    %c0_52 = arith.constant 0 : index
    %138 = vector.load %arg2[%137, %c0_51, %c0_52] : memref<8x8x512xbf16, #tpu.memory_space<vmem>>, vector<1x8x512xbf16>
    %139 = vector.shape_cast %138 : vector<1x8x512xbf16> to vector<8x512xbf16>
    %140 = arith.extf %139 : vector<8x512xbf16> to vector<8x512xf32>
    %c0_53 = arith.constant 0 : index
    %c0_54 = arith.constant 0 : index
    %141 = vector.load %arg3[%c0_53, %c0_54] : memref<128x512xf32, #tpu.memory_space<vmem>>, vector<128x512xf32>
    %cst_55 = arith.constant dense<0.000000e+00> : vector<8x512xf32>
    %142 = tpu.matmul %136, %141, %cst_55 {dimension_numbers = #tpu.dot_dimension_numbers<[1], [0], [0], [1], [0, 0, 1, 1], [], []>} : vector<8x128xf32>, vector<128x512xf32>, vector<8x512xf32> -> vector<8x512xf32>
    %143 = arith.addf %140, %142 : vector<8x512xf32>
    %144 = vector.extract_strided_slice %143 {offsets = [0, 0], sizes = [8, 128], strides = [1, 1]} : vector<8x512xf32> to vector<8x128xf32>
    %145 = arith.negf %144 : vector<8x128xf32>
    %146 = math.exp %145 : vector<8x128xf32>
    %cst_56 = arith.constant 1.000000e+00 : f32
    %147 = vector.broadcast %cst_56 : f32 to vector<8x128xf32>
    %148 = arith.addf %147, %146 : vector<8x128xf32>
    %149 = arith.divf %147, %148 : vector<8x128xf32>
    %150 = vector.extract_strided_slice %143 {offsets = [0, 128], sizes = [8, 128], strides = [1, 1]} : vector<8x512xf32> to vector<8x128xf32>
    %151 = arith.negf %150 : vector<8x128xf32>
    %152 = math.exp %151 : vector<8x128xf32>
    %cst_57 = arith.constant 1.000000e+00 : f32
    %153 = vector.broadcast %cst_57 : f32 to vector<8x128xf32>
    %154 = arith.addf %153, %152 : vector<8x128xf32>
    %155 = arith.divf %153, %154 : vector<8x128xf32>
    %156 = vector.extract_strided_slice %143 {offsets = [0, 256], sizes = [8, 128], strides = [1, 1]} : vector<8x512xf32> to vector<8x128xf32>
    %157 = math.tanh %156 : vector<8x128xf32>
    %158 = vector.extract_strided_slice %143 {offsets = [0, 384], sizes = [8, 128], strides = [1, 1]} : vector<8x512xf32> to vector<8x128xf32>
    %159 = arith.negf %158 : vector<8x128xf32>
    %160 = math.exp %159 : vector<8x128xf32>
    %cst_58 = arith.constant 1.000000e+00 : f32
    %161 = vector.broadcast %cst_58 : f32 to vector<8x128xf32>
    %162 = arith.addf %161, %160 : vector<8x128xf32>
    %163 = arith.divf %161, %162 : vector<8x128xf32>
    %164 = arith.mulf %155, %102 : vector<8x128xf32>
    %165 = arith.mulf %149, %157 : vector<8x128xf32>
    %166 = arith.addf %164, %165 : vector<8x128xf32>
    %167 = math.tanh %166 : vector<8x128xf32>
    %168 = arith.mulf %163, %167 : vector<8x128xf32>
    %c0_59 = arith.constant 0 : index
    %c0_60 = arith.constant 0 : index
    %169 = vector.load %arg11[%c0_59, %c0_60] : memref<8x256xf32, #tpu.memory_space<vmem>>, vector<8x128xf32>
    tpu.vector_store %arg11[%c0_59, %c0_60], %168 {strides = array<i32>} : memref<8x256xf32, #tpu.memory_space<vmem>>, vector<8x128xf32>,
    %c0_61 = arith.constant 0 : index
    %c0_62 = arith.constant 0 : index
    %170 = vector.load %arg11[%c0_61, %c0_62] : memref<8x256xf32, #tpu.memory_space<vmem>>, vector<8x256xf32>
    %c0_63 = arith.constant 0 : index
    %c0_64 = arith.constant 0 : index
    %171 = vector.load %arg4[%c0_63, %c0_64] : memref<256x512xf32, #tpu.memory_space<vmem>>, vector<256x512xf32>
    %cst_65 = arith.constant dense<0.000000e+00> : vector<8x512xf32>
    %172 = tpu.matmul %170, %171, %cst_65 {dimension_numbers = #tpu.dot_dimension_numbers<[1], [0], [0], [1], [0, 0, 1, 1], [], []>} : vector<8x256xf32>, vector<256x512xf32>, vector<8x512xf32> -> vector<8x512xf32>
    %173 = arith.addf %172, %5 : vector<8x512xf32>
    %174 = vector.extract_strided_slice %173 {offsets = [0, 0], sizes = [8, 128], strides = [1, 1]} : vector<8x512xf32> to vector<8x128xf32>
    %175 = arith.negf %174 : vector<8x128xf32>
    %176 = math.exp %175 : vector<8x128xf32>
    %cst_66 = arith.constant 1.000000e+00 : f32
    %177 = vector.broadcast %cst_66 : f32 to vector<8x128xf32>
    %178 = arith.addf %177, %176 : vector<8x128xf32>
    %179 = arith.divf %177, %178 : vector<8x128xf32>
    %180 = vector.extract_strided_slice %173 {offsets = [0, 128], sizes = [8, 128], strides = [1, 1]} : vector<8x512xf32> to vector<8x128xf32>
    %181 = arith.negf %180 : vector<8x128xf32>
    %182 = math.exp %181 : vector<8x128xf32>
    %cst_67 = arith.constant 1.000000e+00 : f32
    %183 = vector.broadcast %cst_67 : f32 to vector<8x128xf32>
    %184 = arith.addf %183, %182 : vector<8x128xf32>
    %185 = arith.divf %183, %184 : vector<8x128xf32>
    %186 = vector.extract_strided_slice %173 {offsets = [0, 256], sizes = [8, 128], strides = [1, 1]} : vector<8x512xf32> to vector<8x128xf32>
    %187 = math.tanh %186 : vector<8x128xf32>
    %188 = vector.extract_strided_slice %173 {offsets = [0, 384], sizes = [8, 128], strides = [1, 1]} : vector<8x512xf32> to vector<8x128xf32>
    %189 = arith.negf %188 : vector<8x128xf32>
    %190 = math.exp %189 : vector<8x128xf32>
    %cst_68 = arith.constant 1.000000e+00 : f32
    %191 = vector.broadcast %cst_68 : f32 to vector<8x128xf32>
    %192 = arith.addf %191, %190 : vector<8x128xf32>
    %193 = arith.divf %191, %192 : vector<8x128xf32>
    %194 = arith.mulf %185, %132 : vector<8x128xf32>
    %195 = arith.mulf %179, %187 : vector<8x128xf32>
    %196 = arith.addf %194, %195 : vector<8x128xf32>
    %197 = math.tanh %196 : vector<8x128xf32>
    %198 = arith.mulf %193, %197 : vector<8x128xf32>
    %c0_69 = arith.constant 0 : index
    %c128_70 = arith.constant 128 : index
    %199 = vector.load %arg11[%c0_69, %c128_70] : memref<8x256xf32, #tpu.memory_space<vmem>>, vector<8x128xf32>
    tpu.vector_store %arg11[%c0_69, %c128_70], %198 {strides = array<i32>} : memref<8x256xf32, #tpu.memory_space<vmem>>, vector<8x128xf32>,
    %c3_i32 = arith.constant 3 : i32
    %c0_71 = arith.constant 0 : index
    %c0_72 = arith.constant 0 : index
    %200 = vector.load %arg11[%c0_71, %c0_72] : memref<8x256xf32, #tpu.memory_space<vmem>>, vector<8x128xf32>
    %201 = arith.index_cast %c3_i32 : i32 to index
    %c0_73 = arith.constant 0 : index
    %c0_74 = arith.constant 0 : index
    %202 = vector.load %arg2[%201, %c0_73, %c0_74] : memref<8x8x512xbf16, #tpu.memory_space<vmem>>, vector<1x8x512xbf16>
    %203 = vector.shape_cast %202 : vector<1x8x512xbf16> to vector<8x512xbf16>
    %204 = arith.extf %203 : vector<8x512xbf16> to vector<8x512xf32>
    %c0_75 = arith.constant 0 : index
    %c0_76 = arith.constant 0 : index
    %205 = vector.load %arg3[%c0_75, %c0_76] : memref<128x512xf32, #tpu.memory_space<vmem>>, vector<128x512xf32>
    %cst_77 = arith.constant dense<0.000000e+00> : vector<8x512xf32>
    %206 = tpu.matmul %200, %205, %cst_77 {dimension_numbers = #tpu.dot_dimension_numbers<[1], [0], [0], [1], [0, 0, 1, 1], [], []>} : vector<8x128xf32>, vector<128x512xf32>, vector<8x512xf32> -> vector<8x512xf32>
    %207 = arith.addf %204, %206 : vector<8x512xf32>
    %208 = vector.extract_strided_slice %207 {offsets = [0, 0], sizes = [8, 128], strides = [1, 1]} : vector<8x512xf32> to vector<8x128xf32>
    %209 = arith.negf %208 : vector<8x128xf32>
    %210 = math.exp %209 : vector<8x128xf32>
    %cst_78 = arith.constant 1.000000e+00 : f32
    %211 = vector.broadcast %cst_78 : f32 to vector<8x128xf32>
    %212 = arith.addf %211, %210 : vector<8x128xf32>
    %213 = arith.divf %211, %212 : vector<8x128xf32>
    %214 = vector.extract_strided_slice %207 {offsets = [0, 128], sizes = [8, 128], strides = [1, 1]} : vector<8x512xf32> to vector<8x128xf32>
    %215 = arith.negf %214 : vector<8x128xf32>
    %216 = math.exp %215 : vector<8x128xf32>
    %cst_79 = arith.constant 1.000000e+00 : f32
    %217 = vector.broadcast %cst_79 : f32 to vector<8x128xf32>
    %218 = arith.addf %217, %216 : vector<8x128xf32>
    %219 = arith.divf %217, %218 : vector<8x128xf32>
    %220 = vector.extract_strided_slice %207 {offsets = [0, 256], sizes = [8, 128], strides = [1, 1]} : vector<8x512xf32> to vector<8x128xf32>
    %221 = math.tanh %220 : vector<8x128xf32>
    %222 = vector.extract_strided_slice %207 {offsets = [0, 384], sizes = [8, 128], strides = [1, 1]} : vector<8x512xf32> to vector<8x128xf32>
    %223 = arith.negf %222 : vector<8x128xf32>
    %224 = math.exp %223 : vector<8x128xf32>
    %cst_80 = arith.constant 1.000000e+00 : f32
    %225 = vector.broadcast %cst_80 : f32 to vector<8x128xf32>
    %226 = arith.addf %225, %224 : vector<8x128xf32>
    %227 = arith.divf %225, %226 : vector<8x128xf32>
    %228 = arith.mulf %219, %166 : vector<8x128xf32>
    %229 = arith.mulf %213, %221 : vector<8x128xf32>
    %230 = arith.addf %228, %229 : vector<8x128xf32>
    %231 = math.tanh %230 : vector<8x128xf32>
    %232 = arith.mulf %227, %231 : vector<8x128xf32>
    %c0_81 = arith.constant 0 : index
    %c0_82 = arith.constant 0 : index
    %233 = vector.load %arg11[%c0_81, %c0_82] : memref<8x256xf32, #tpu.memory_space<vmem>>, vector<8x128xf32>
    tpu.vector_store %arg11[%c0_81, %c0_82], %232 {strides = array<i32>} : memref<8x256xf32, #tpu.memory_space<vmem>>, vector<8x128xf32>,
    %c0_83 = arith.constant 0 : index
    %c0_84 = arith.constant 0 : index
    %234 = vector.load %arg11[%c0_83, %c0_84] : memref<8x256xf32, #tpu.memory_space<vmem>>, vector<8x256xf32>
    %c0_85 = arith.constant 0 : index
    %c0_86 = arith.constant 0 : index
    %235 = vector.load %arg4[%c0_85, %c0_86] : memref<256x512xf32, #tpu.memory_space<vmem>>, vector<256x512xf32>
    %cst_87 = arith.constant dense<0.000000e+00> : vector<8x512xf32>
    %236 = tpu.matmul %234, %235, %cst_87 {dimension_numbers = #tpu.dot_dimension_numbers<[1], [0], [0], [1], [0, 0, 1, 1], [], []>} : vector<8x256xf32>, vector<256x512xf32>, vector<8x512xf32> -> vector<8x512xf32>
    %237 = arith.addf %236, %5 : vector<8x512xf32>
    %238 = vector.extract_strided_slice %237 {offsets = [0, 0], sizes = [8, 128], strides = [1, 1]} : vector<8x512xf32> to vector<8x128xf32>
    %239 = arith.negf %238 : vector<8x128xf32>
    %240 = math.exp %239 : vector<8x128xf32>
    %cst_88 = arith.constant 1.000000e+00 : f32
    %241 = vector.broadcast %cst_88 : f32 to vector<8x128xf32>
    %242 = arith.addf %241, %240 : vector<8x128xf32>
    %243 = arith.divf %241, %242 : vector<8x128xf32>
    %244 = vector.extract_strided_slice %237 {offsets = [0, 128], sizes = [8, 128], strides = [1, 1]} : vector<8x512xf32> to vector<8x128xf32>
    %245 = arith.negf %244 : vector<8x128xf32>
    %246 = math.exp %245 : vector<8x128xf32>
    %cst_89 = arith.constant 1.000000e+00 : f32
    %247 = vector.broadcast %cst_89 : f32 to vector<8x128xf32>
    %248 = arith.addf %247, %246 : vector<8x128xf32>
    %249 = arith.divf %247, %248 : vector<8x128xf32>
    %250 = vector.extract_strided_slice %237 {offsets = [0, 256], sizes = [8, 128], strides = [1, 1]} : vector<8x512xf32> to vector<8x128xf32>
    %251 = math.tanh %250 : vector<8x128xf32>
    %252 = vector.extract_strided_slice %237 {offsets = [0, 384], sizes = [8, 128], strides = [1, 1]} : vector<8x512xf32> to vector<8x128xf32>
    %253 = arith.negf %252 : vector<8x128xf32>
    %254 = math.exp %253 : vector<8x128xf32>
    %cst_90 = arith.constant 1.000000e+00 : f32
    %255 = vector.broadcast %cst_90 : f32 to vector<8x128xf32>
    %256 = arith.addf %255, %254 : vector<8x128xf32>
    %257 = arith.divf %255, %256 : vector<8x128xf32>
    %258 = arith.mulf %249, %196 : vector<8x128xf32>
    %259 = arith.mulf %243, %251 : vector<8x128xf32>
    %260 = arith.addf %258, %259 : vector<8x128xf32>
    %261 = math.tanh %260 : vector<8x128xf32>
    %262 = arith.mulf %257, %261 : vector<8x128xf32>
    %c0_91 = arith.constant 0 : index
    %c128_92 = arith.constant 128 : index
    %263 = vector.load %arg11[%c0_91, %c128_92] : memref<8x256xf32, #tpu.memory_space<vmem>>, vector<8x128xf32>
    tpu.vector_store %arg11[%c0_91, %c128_92], %262 {strides = array<i32>} : memref<8x256xf32, #tpu.memory_space<vmem>>, vector<8x128xf32>,
    %c4_i32 = arith.constant 4 : i32
    %c0_93 = arith.constant 0 : index
    %c0_94 = arith.constant 0 : index
    %264 = vector.load %arg11[%c0_93, %c0_94] : memref<8x256xf32, #tpu.memory_space<vmem>>, vector<8x128xf32>
    %265 = arith.index_cast %c4_i32 : i32 to index
    %c0_95 = arith.constant 0 : index
    %c0_96 = arith.constant 0 : index
    %266 = vector.load %arg2[%265, %c0_95, %c0_96] : memref<8x8x512xbf16, #tpu.memory_space<vmem>>, vector<1x8x512xbf16>
    %267 = vector.shape_cast %266 : vector<1x8x512xbf16> to vector<8x512xbf16>
    %268 = arith.extf %267 : vector<8x512xbf16> to vector<8x512xf32>
    %c0_97 = arith.constant 0 : index
    %c0_98 = arith.constant 0 : index
    %269 = vector.load %arg3[%c0_97, %c0_98] : memref<128x512xf32, #tpu.memory_space<vmem>>, vector<128x512xf32>
    %cst_99 = arith.constant dense<0.000000e+00> : vector<8x512xf32>
    %270 = tpu.matmul %264, %269, %cst_99 {dimension_numbers = #tpu.dot_dimension_numbers<[1], [0], [0], [1], [0, 0, 1, 1], [], []>} : vector<8x128xf32>, vector<128x512xf32>, vector<8x512xf32> -> vector<8x512xf32>
    %271 = arith.addf %268, %270 : vector<8x512xf32>
    %272 = vector.extract_strided_slice %271 {offsets = [0, 0], sizes = [8, 128], strides = [1, 1]} : vector<8x512xf32> to vector<8x128xf32>
    %273 = arith.negf %272 : vector<8x128xf32>
    %274 = math.exp %273 : vector<8x128xf32>
    %cst_100 = arith.constant 1.000000e+00 : f32
    %275 = vector.broadcast %cst_100 : f32 to vector<8x128xf32>
    %276 = arith.addf %275, %274 : vector<8x128xf32>
    %277 = arith.divf %275, %276 : vector<8x128xf32>
    %278 = vector.extract_strided_slice %271 {offsets = [0, 128], sizes = [8, 128], strides = [1, 1]} : vector<8x512xf32> to vector<8x128xf32>
    %279 = arith.negf %278 : vector<8x128xf32>
    %280 = math.exp %279 : vector<8x128xf32>
    %cst_101 = arith.constant 1.000000e+00 : f32
    %281 = vector.broadcast %cst_101 : f32 to vector<8x128xf32>
    %282 = arith.addf %281, %280 : vector<8x128xf32>
    %283 = arith.divf %281, %282 : vector<8x128xf32>
    %284 = vector.extract_strided_slice %271 {offsets = [0, 256], sizes = [8, 128], strides = [1, 1]} : vector<8x512xf32> to vector<8x128xf32>
    %285 = math.tanh %284 : vector<8x128xf32>
    %286 = vector.extract_strided_slice %271 {offsets = [0, 384], sizes = [8, 128], strides = [1, 1]} : vector<8x512xf32> to vector<8x128xf32>
    %287 = arith.negf %286 : vector<8x128xf32>
    %288 = math.exp %287 : vector<8x128xf32>
    %cst_102 = arith.constant 1.000000e+00 : f32
    %289 = vector.broadcast %cst_102 : f32 to vector<8x128xf32>
    %290 = arith.addf %289, %288 : vector<8x128xf32>
    %291 = arith.divf %289, %290 : vector<8x128xf32>
    %292 = arith.mulf %283, %230 : vector<8x128xf32>
    %293 = arith.mulf %277, %285 : vector<8x128xf32>
    %294 = arith.addf %292, %293 : vector<8x128xf32>
    %295 = math.tanh %294 : vector<8x128xf32>
    %296 = arith.mulf %291, %295 : vector<8x128xf32>
    %c0_103 = arith.constant 0 : index
    %c0_104 = arith.constant 0 : index
    %297 = vector.load %arg11[%c0_103, %c0_104] : memref<8x256xf32, #tpu.memory_space<vmem>>, vector<8x128xf32>
    tpu.vector_store %arg11[%c0_103, %c0_104], %296 {strides = array<i32>} : memref<8x256xf32, #tpu.memory_space<vmem>>, vector<8x128xf32>,
    %c0_105 = arith.constant 0 : index
    %c0_106 = arith.constant 0 : index
    %298 = vector.load %arg11[%c0_105, %c0_106] : memref<8x256xf32, #tpu.memory_space<vmem>>, vector<8x256xf32>
    %c0_107 = arith.constant 0 : index
    %c0_108 = arith.constant 0 : index
    %299 = vector.load %arg4[%c0_107, %c0_108] : memref<256x512xf32, #tpu.memory_space<vmem>>, vector<256x512xf32>
    %cst_109 = arith.constant dense<0.000000e+00> : vector<8x512xf32>
    %300 = tpu.matmul %298, %299, %cst_109 {dimension_numbers = #tpu.dot_dimension_numbers<[1], [0], [0], [1], [0, 0, 1, 1], [], []>} : vector<8x256xf32>, vector<256x512xf32>, vector<8x512xf32> -> vector<8x512xf32>
    %301 = arith.addf %300, %5 : vector<8x512xf32>
    %302 = vector.extract_strided_slice %301 {offsets = [0, 0], sizes = [8, 128], strides = [1, 1]} : vector<8x512xf32> to vector<8x128xf32>
    %303 = arith.negf %302 : vector<8x128xf32>
    %304 = math.exp %303 : vector<8x128xf32>
    %cst_110 = arith.constant 1.000000e+00 : f32
    %305 = vector.broadcast %cst_110 : f32 to vector<8x128xf32>
    %306 = arith.addf %305, %304 : vector<8x128xf32>
    %307 = arith.divf %305, %306 : vector<8x128xf32>
    %308 = vector.extract_strided_slice %301 {offsets = [0, 128], sizes = [8, 128], strides = [1, 1]} : vector<8x512xf32> to vector<8x128xf32>
    %309 = arith.negf %308 : vector<8x128xf32>
    %310 = math.exp %309 : vector<8x128xf32>
    %cst_111 = arith.constant 1.000000e+00 : f32
    %311 = vector.broadcast %cst_111 : f32 to vector<8x128xf32>
    %312 = arith.addf %311, %310 : vector<8x128xf32>
    %313 = arith.divf %311, %312 : vector<8x128xf32>
    %314 = vector.extract_strided_slice %301 {offsets = [0, 256], sizes = [8, 128], strides = [1, 1]} : vector<8x512xf32> to vector<8x128xf32>
    %315 = math.tanh %314 : vector<8x128xf32>
    %316 = vector.extract_strided_slice %301 {offsets = [0, 384], sizes = [8, 128], strides = [1, 1]} : vector<8x512xf32> to vector<8x128xf32>
    %317 = arith.negf %316 : vector<8x128xf32>
    %318 = math.exp %317 : vector<8x128xf32>
    %cst_112 = arith.constant 1.000000e+00 : f32
    %319 = vector.broadcast %cst_112 : f32 to vector<8x128xf32>
    %320 = arith.addf %319, %318 : vector<8x128xf32>
    %321 = arith.divf %319, %320 : vector<8x128xf32>
    %322 = arith.mulf %313, %260 : vector<8x128xf32>
    %323 = arith.mulf %307, %315 : vector<8x128xf32>
    %324 = arith.addf %322, %323 : vector<8x128xf32>
    %325 = math.tanh %324 : vector<8x128xf32>
    %326 = arith.mulf %321, %325 : vector<8x128xf32>
    %c0_113 = arith.constant 0 : index
    %c128_114 = arith.constant 128 : index
    %327 = vector.load %arg11[%c0_113, %c128_114] : memref<8x256xf32, #tpu.memory_space<vmem>>, vector<8x128xf32>
    tpu.vector_store %arg11[%c0_113, %c128_114], %326 {strides = array<i32>} : memref<8x256xf32, #tpu.memory_space<vmem>>, vector<8x128xf32>,
    %c5_i32 = arith.constant 5 : i32
    %c0_115 = arith.constant 0 : index
    %c0_116 = arith.constant 0 : index
    %328 = vector.load %arg11[%c0_115, %c0_116] : memref<8x256xf32, #tpu.memory_space<vmem>>, vector<8x128xf32>
    %329 = arith.index_cast %c5_i32 : i32 to index
    %c0_117 = arith.constant 0 : index
    %c0_118 = arith.constant 0 : index
    %330 = vector.load %arg2[%329, %c0_117, %c0_118] : memref<8x8x512xbf16, #tpu.memory_space<vmem>>, vector<1x8x512xbf16>
    %331 = vector.shape_cast %330 : vector<1x8x512xbf16> to vector<8x512xbf16>
    %332 = arith.extf %331 : vector<8x512xbf16> to vector<8x512xf32>
    %c0_119 = arith.constant 0 : index
    %c0_120 = arith.constant 0 : index
    %333 = vector.load %arg3[%c0_119, %c0_120] : memref<128x512xf32, #tpu.memory_space<vmem>>, vector<128x512xf32>
    %cst_121 = arith.constant dense<0.000000e+00> : vector<8x512xf32>
    %334 = tpu.matmul %328, %333, %cst_121 {dimension_numbers = #tpu.dot_dimension_numbers<[1], [0], [0], [1], [0, 0, 1, 1], [], []>} : vector<8x128xf32>, vector<128x512xf32>, vector<8x512xf32> -> vector<8x512xf32>
    %335 = arith.addf %332, %334 : vector<8x512xf32>
    %336 = vector.extract_strided_slice %335 {offsets = [0, 0], sizes = [8, 128], strides = [1, 1]} : vector<8x512xf32> to vector<8x128xf32>
    %337 = arith.negf %336 : vector<8x128xf32>
    %338 = math.exp %337 : vector<8x128xf32>
    %cst_122 = arith.constant 1.000000e+00 : f32
    %339 = vector.broadcast %cst_122 : f32 to vector<8x128xf32>
    %340 = arith.addf %339, %338 : vector<8x128xf32>
    %341 = arith.divf %339, %340 : vector<8x128xf32>
    %342 = vector.extract_strided_slice %335 {offsets = [0, 128], sizes = [8, 128], strides = [1, 1]} : vector<8x512xf32> to vector<8x128xf32>
    %343 = arith.negf %342 : vector<8x128xf32>
    %344 = math.exp %343 : vector<8x128xf32>
    %cst_123 = arith.constant 1.000000e+00 : f32
    %345 = vector.broadcast %cst_123 : f32 to vector<8x128xf32>
    %346 = arith.addf %345, %344 : vector<8x128xf32>
    %347 = arith.divf %345, %346 : vector<8x128xf32>
    %348 = vector.extract_strided_slice %335 {offsets = [0, 256], sizes = [8, 128], strides = [1, 1]} : vector<8x512xf32> to vector<8x128xf32>
    %349 = math.tanh %348 : vector<8x128xf32>
    %350 = vector.extract_strided_slice %335 {offsets = [0, 384], sizes = [8, 128], strides = [1, 1]} : vector<8x512xf32> to vector<8x128xf32>
    %351 = arith.negf %350 : vector<8x128xf32>
    %352 = math.exp %351 : vector<8x128xf32>
    %cst_124 = arith.constant 1.000000e+00 : f32
    %353 = vector.broadcast %cst_124 : f32 to vector<8x128xf32>
    %354 = arith.addf %353, %352 : vector<8x128xf32>
    %355 = arith.divf %353, %354 : vector<8x128xf32>
    %356 = arith.mulf %347, %294 : vector<8x128xf32>
    %357 = arith.mulf %341, %349 : vector<8x128xf32>
    %358 = arith.addf %356, %357 : vector<8x128xf32>
    %359 = math.tanh %358 : vector<8x128xf32>
    %360 = arith.mulf %355, %359 : vector<8x128xf32>
    %c0_125 = arith.constant 0 : index
    %c0_126 = arith.constant 0 : index
    %361 = vector.load %arg11[%c0_125, %c0_126] : memref<8x256xf32, #tpu.memory_space<vmem>>, vector<8x128xf32>
    tpu.vector_store %arg11[%c0_125, %c0_126], %360 {strides = array<i32>} : memref<8x256xf32, #tpu.memory_space<vmem>>, vector<8x128xf32>,
    %c0_127 = arith.constant 0 : index
    %c0_128 = arith.constant 0 : index
    %362 = vector.load %arg11[%c0_127, %c0_128] : memref<8x256xf32, #tpu.memory_space<vmem>>, vector<8x256xf32>
    %c0_129 = arith.constant 0 : index
    %c0_130 = arith.constant 0 : index
    %363 = vector.load %arg4[%c0_129, %c0_130] : memref<256x512xf32, #tpu.memory_space<vmem>>, vector<256x512xf32>
    %cst_131 = arith.constant dense<0.000000e+00> : vector<8x512xf32>
    %364 = tpu.matmul %362, %363, %cst_131 {dimension_numbers = #tpu.dot_dimension_numbers<[1], [0], [0], [1], [0, 0, 1, 1], [], []>} : vector<8x256xf32>, vector<256x512xf32>, vector<8x512xf32> -> vector<8x512xf32>
    %365 = arith.addf %364, %5 : vector<8x512xf32>
    %366 = vector.extract_strided_slice %365 {offsets = [0, 0], sizes = [8, 128], strides = [1, 1]} : vector<8x512xf32> to vector<8x128xf32>
    %367 = arith.negf %366 : vector<8x128xf32>
    %368 = math.exp %367 : vector<8x128xf32>
    %cst_132 = arith.constant 1.000000e+00 : f32
    %369 = vector.broadcast %cst_132 : f32 to vector<8x128xf32>
    %370 = arith.addf %369, %368 : vector<8x128xf32>
    %371 = arith.divf %369, %370 : vector<8x128xf32>
    %372 = vector.extract_strided_slice %365 {offsets = [0, 128], sizes = [8, 128], strides = [1, 1]} : vector<8x512xf32> to vector<8x128xf32>
    %373 = arith.negf %372 : vector<8x128xf32>
    %374 = math.exp %373 : vector<8x128xf32>
    %cst_133 = arith.constant 1.000000e+00 : f32
    %375 = vector.broadcast %cst_133 : f32 to vector<8x128xf32>
    %376 = arith.addf %375, %374 : vector<8x128xf32>
    %377 = arith.divf %375, %376 : vector<8x128xf32>
    %378 = vector.extract_strided_slice %365 {offsets = [0, 256], sizes = [8, 128], strides = [1, 1]} : vector<8x512xf32> to vector<8x128xf32>
    %379 = math.tanh %378 : vector<8x128xf32>
    %380 = vector.extract_strided_slice %365 {offsets = [0, 384], sizes = [8, 128], strides = [1, 1]} : vector<8x512xf32> to vector<8x128xf32>
    %381 = arith.negf %380 : vector<8x128xf32>
    %382 = math.exp %381 : vector<8x128xf32>
    %cst_134 = arith.constant 1.000000e+00 : f32
    %383 = vector.broadcast %cst_134 : f32 to vector<8x128xf32>
    %384 = arith.addf %383, %382 : vector<8x128xf32>
    %385 = arith.divf %383, %384 : vector<8x128xf32>
    %386 = arith.mulf %377, %324 : vector<8x128xf32>
    %387 = arith.mulf %371, %379 : vector<8x128xf32>
    %388 = arith.addf %386, %387 : vector<8x128xf32>
    %389 = math.tanh %388 : vector<8x128xf32>
    %390 = arith.mulf %385, %389 : vector<8x128xf32>
    %c0_135 = arith.constant 0 : index
    %c128_136 = arith.constant 128 : index
    %391 = vector.load %arg11[%c0_135, %c128_136] : memref<8x256xf32, #tpu.memory_space<vmem>>, vector<8x128xf32>
    tpu.vector_store %arg11[%c0_135, %c128_136], %390 {strides = array<i32>} : memref<8x256xf32, #tpu.memory_space<vmem>>, vector<8x128xf32>,
    %c6_i32 = arith.constant 6 : i32
    %c0_137 = arith.constant 0 : index
    %c0_138 = arith.constant 0 : index
    %392 = vector.load %arg11[%c0_137, %c0_138] : memref<8x256xf32, #tpu.memory_space<vmem>>, vector<8x128xf32>
    %393 = arith.index_cast %c6_i32 : i32 to index
    %c0_139 = arith.constant 0 : index
    %c0_140 = arith.constant 0 : index
    %394 = vector.load %arg2[%393, %c0_139, %c0_140] : memref<8x8x512xbf16, #tpu.memory_space<vmem>>, vector<1x8x512xbf16>
    %395 = vector.shape_cast %394 : vector<1x8x512xbf16> to vector<8x512xbf16>
    %396 = arith.extf %395 : vector<8x512xbf16> to vector<8x512xf32>
    %c0_141 = arith.constant 0 : index
    %c0_142 = arith.constant 0 : index
    %397 = vector.load %arg3[%c0_141, %c0_142] : memref<128x512xf32, #tpu.memory_space<vmem>>, vector<128x512xf32>
    %cst_143 = arith.constant dense<0.000000e+00> : vector<8x512xf32>
    %398 = tpu.matmul %392, %397, %cst_143 {dimension_numbers = #tpu.dot_dimension_numbers<[1], [0], [0], [1], [0, 0, 1, 1], [], []>} : vector<8x128xf32>, vector<128x512xf32>, vector<8x512xf32> -> vector<8x512xf32>
    %399 = arith.addf %396, %398 : vector<8x512xf32>
    %400 = vector.extract_strided_slice %399 {offsets = [0, 0], sizes = [8, 128], strides = [1, 1]} : vector<8x512xf32> to vector<8x128xf32>
    %401 = arith.negf %400 : vector<8x128xf32>
    %402 = math.exp %401 : vector<8x128xf32>
    %cst_144 = arith.constant 1.000000e+00 : f32
    %403 = vector.broadcast %cst_144 : f32 to vector<8x128xf32>
    %404 = arith.addf %403, %402 : vector<8x128xf32>
    %405 = arith.divf %403, %404 : vector<8x128xf32>
    %406 = vector.extract_strided_slice %399 {offsets = [0, 128], sizes = [8, 128], strides = [1, 1]} : vector<8x512xf32> to vector<8x128xf32>
    %407 = arith.negf %406 : vector<8x128xf32>
    %408 = math.exp %407 : vector<8x128xf32>
    %cst_145 = arith.constant 1.000000e+00 : f32
    %409 = vector.broadcast %cst_145 : f32 to vector<8x128xf32>
    %410 = arith.addf %409, %408 : vector<8x128xf32>
    %411 = arith.divf %409, %410 : vector<8x128xf32>
    %412 = vector.extract_strided_slice %399 {offsets = [0, 256], sizes = [8, 128], strides = [1, 1]} : vector<8x512xf32> to vector<8x128xf32>
    %413 = math.tanh %412 : vector<8x128xf32>
    %414 = vector.extract_strided_slice %399 {offsets = [0, 384], sizes = [8, 128], strides = [1, 1]} : vector<8x512xf32> to vector<8x128xf32>
    %415 = arith.negf %414 : vector<8x128xf32>
    %416 = math.exp %415 : vector<8x128xf32>
    %cst_146 = arith.constant 1.000000e+00 : f32
    %417 = vector.broadcast %cst_146 : f32 to vector<8x128xf32>
    %418 = arith.addf %417, %416 : vector<8x128xf32>
    %419 = arith.divf %417, %418 : vector<8x128xf32>
    %420 = arith.mulf %411, %358 : vector<8x128xf32>
    %421 = arith.mulf %405, %413 : vector<8x128xf32>
    %422 = arith.addf %420, %421 : vector<8x128xf32>
    %423 = math.tanh %422 : vector<8x128xf32>
    %424 = arith.mulf %419, %423 : vector<8x128xf32>
    %c0_147 = arith.constant 0 : index
    %c0_148 = arith.constant 0 : index
    %425 = vector.load %arg11[%c0_147, %c0_148] : memref<8x256xf32, #tpu.memory_space<vmem>>, vector<8x128xf32>
    tpu.vector_store %arg11[%c0_147, %c0_148], %424 {strides = array<i32>} : memref<8x256xf32, #tpu.memory_space<vmem>>, vector<8x128xf32>,
    %c0_149 = arith.constant 0 : index
    %c0_150 = arith.constant 0 : index
    %426 = vector.load %arg11[%c0_149, %c0_150] : memref<8x256xf32, #tpu.memory_space<vmem>>, vector<8x256xf32>
    %c0_151 = arith.constant 0 : index
    %c0_152 = arith.constant 0 : index
    %427 = vector.load %arg4[%c0_151, %c0_152] : memref<256x512xf32, #tpu.memory_space<vmem>>, vector<256x512xf32>
    %cst_153 = arith.constant dense<0.000000e+00> : vector<8x512xf32>
    %428 = tpu.matmul %426, %427, %cst_153 {dimension_numbers = #tpu.dot_dimension_numbers<[1], [0], [0], [1], [0, 0, 1, 1], [], []>} : vector<8x256xf32>, vector<256x512xf32>, vector<8x512xf32> -> vector<8x512xf32>
    %429 = arith.addf %428, %5 : vector<8x512xf32>
    %430 = vector.extract_strided_slice %429 {offsets = [0, 0], sizes = [8, 128], strides = [1, 1]} : vector<8x512xf32> to vector<8x128xf32>
    %431 = arith.negf %430 : vector<8x128xf32>
    %432 = math.exp %431 : vector<8x128xf32>
    %cst_154 = arith.constant 1.000000e+00 : f32
    %433 = vector.broadcast %cst_154 : f32 to vector<8x128xf32>
    %434 = arith.addf %433, %432 : vector<8x128xf32>
    %435 = arith.divf %433, %434 : vector<8x128xf32>
    %436 = vector.extract_strided_slice %429 {offsets = [0, 128], sizes = [8, 128], strides = [1, 1]} : vector<8x512xf32> to vector<8x128xf32>
    %437 = arith.negf %436 : vector<8x128xf32>
    %438 = math.exp %437 : vector<8x128xf32>
    %cst_155 = arith.constant 1.000000e+00 : f32
    %439 = vector.broadcast %cst_155 : f32 to vector<8x128xf32>
    %440 = arith.addf %439, %438 : vector<8x128xf32>
    %441 = arith.divf %439, %440 : vector<8x128xf32>
    %442 = vector.extract_strided_slice %429 {offsets = [0, 256], sizes = [8, 128], strides = [1, 1]} : vector<8x512xf32> to vector<8x128xf32>
    %443 = math.tanh %442 : vector<8x128xf32>
    %444 = vector.extract_strided_slice %429 {offsets = [0, 384], sizes = [8, 128], strides = [1, 1]} : vector<8x512xf32> to vector<8x128xf32>
    %445 = arith.negf %444 : vector<8x128xf32>
    %446 = math.exp %445 : vector<8x128xf32>
    %cst_156 = arith.constant 1.000000e+00 : f32
    %447 = vector.broadcast %cst_156 : f32 to vector<8x128xf32>
    %448 = arith.addf %447, %446 : vector<8x128xf32>
    %449 = arith.divf %447, %448 : vector<8x128xf32>
    %450 = arith.mulf %441, %388 : vector<8x128xf32>
    %451 = arith.mulf %435, %443 : vector<8x128xf32>
    %452 = arith.addf %450, %451 : vector<8x128xf32>
    %453 = math.tanh %452 : vector<8x128xf32>
    %454 = arith.mulf %449, %453 : vector<8x128xf32>
    %c0_157 = arith.constant 0 : index
    %c128_158 = arith.constant 128 : index
    %455 = vector.load %arg11[%c0_157, %c128_158] : memref<8x256xf32, #tpu.memory_space<vmem>>, vector<8x128xf32>
    tpu.vector_store %arg11[%c0_157, %c128_158], %454 {strides = array<i32>} : memref<8x256xf32, #tpu.memory_space<vmem>>, vector<8x128xf32>,
    %c7_i32 = arith.constant 7 : i32
    %c0_159 = arith.constant 0 : index
    %c0_160 = arith.constant 0 : index
    %456 = vector.load %arg11[%c0_159, %c0_160] : memref<8x256xf32, #tpu.memory_space<vmem>>, vector<8x128xf32>
    %457 = arith.index_cast %c7_i32 : i32 to index
    %c0_161 = arith.constant 0 : index
    %c0_162 = arith.constant 0 : index
    %458 = vector.load %arg2[%457, %c0_161, %c0_162] : memref<8x8x512xbf16, #tpu.memory_space<vmem>>, vector<1x8x512xbf16>
    %459 = vector.shape_cast %458 : vector<1x8x512xbf16> to vector<8x512xbf16>
    %460 = arith.extf %459 : vector<8x512xbf16> to vector<8x512xf32>
    %c0_163 = arith.constant 0 : index
    %c0_164 = arith.constant 0 : index
    %461 = vector.load %arg3[%c0_163, %c0_164] : memref<128x512xf32, #tpu.memory_space<vmem>>, vector<128x512xf32>
    %cst_165 = arith.constant dense<0.000000e+00> : vector<8x512xf32>
    %462 = tpu.matmul %456, %461, %cst_165 {dimension_numbers = #tpu.dot_dimension_numbers<[1], [0], [0], [1], [0, 0, 1, 1], [], []>} : vector<8x128xf32>, vector<128x512xf32>, vector<8x512xf32> -> vector<8x512xf32>
    %463 = arith.addf %460, %462 : vector<8x512xf32>
    %464 = vector.extract_strided_slice %463 {offsets = [0, 0], sizes = [8, 128], strides = [1, 1]} : vector<8x512xf32> to vector<8x128xf32>
    %465 = arith.negf %464 : vector<8x128xf32>
    %466 = math.exp %465 : vector<8x128xf32>
    %cst_166 = arith.constant 1.000000e+00 : f32
    %467 = vector.broadcast %cst_166 : f32 to vector<8x128xf32>
    %468 = arith.addf %467, %466 : vector<8x128xf32>
    %469 = arith.divf %467, %468 : vector<8x128xf32>
    %470 = vector.extract_strided_slice %463 {offsets = [0, 128], sizes = [8, 128], strides = [1, 1]} : vector<8x512xf32> to vector<8x128xf32>
    %471 = arith.negf %470 : vector<8x128xf32>
    %472 = math.exp %471 : vector<8x128xf32>
    %cst_167 = arith.constant 1.000000e+00 : f32
    %473 = vector.broadcast %cst_167 : f32 to vector<8x128xf32>
    %474 = arith.addf %473, %472 : vector<8x128xf32>
    %475 = arith.divf %473, %474 : vector<8x128xf32>
    %476 = vector.extract_strided_slice %463 {offsets = [0, 256], sizes = [8, 128], strides = [1, 1]} : vector<8x512xf32> to vector<8x128xf32>
    %477 = math.tanh %476 : vector<8x128xf32>
    %478 = vector.extract_strided_slice %463 {offsets = [0, 384], sizes = [8, 128], strides = [1, 1]} : vector<8x512xf32> to vector<8x128xf32>
    %479 = arith.negf %478 : vector<8x128xf32>
    %480 = math.exp %479 : vector<8x128xf32>
    %cst_168 = arith.constant 1.000000e+00 : f32
    %481 = vector.broadcast %cst_168 : f32 to vector<8x128xf32>
    %482 = arith.addf %481, %480 : vector<8x128xf32>
    %483 = arith.divf %481, %482 : vector<8x128xf32>
    %484 = arith.mulf %475, %422 : vector<8x128xf32>
    %485 = arith.mulf %469, %477 : vector<8x128xf32>
    %486 = arith.addf %484, %485 : vector<8x128xf32>
    %487 = math.tanh %486 : vector<8x128xf32>
    %488 = arith.mulf %483, %487 : vector<8x128xf32>
    %c0_169 = arith.constant 0 : index
    %c0_170 = arith.constant 0 : index
    %489 = vector.load %arg11[%c0_169, %c0_170] : memref<8x256xf32, #tpu.memory_space<vmem>>, vector<8x128xf32>
    tpu.vector_store %arg11[%c0_169, %c0_170], %488 {strides = array<i32>} : memref<8x256xf32, #tpu.memory_space<vmem>>, vector<8x128xf32>,
    %c0_171 = arith.constant 0 : index
    %c0_172 = arith.constant 0 : index
    %490 = vector.load %arg11[%c0_171, %c0_172] : memref<8x256xf32, #tpu.memory_space<vmem>>, vector<8x256xf32>
    %c0_173 = arith.constant 0 : index
    %c0_174 = arith.constant 0 : index
    %491 = vector.load %arg4[%c0_173, %c0_174] : memref<256x512xf32, #tpu.memory_space<vmem>>, vector<256x512xf32>
    %cst_175 = arith.constant dense<0.000000e+00> : vector<8x512xf32>
    %492 = tpu.matmul %490, %491, %cst_175 {dimension_numbers = #tpu.dot_dimension_numbers<[1], [0], [0], [1], [0, 0, 1, 1], [], []>} : vector<8x256xf32>, vector<256x512xf32>, vector<8x512xf32> -> vector<8x512xf32>
    %493 = arith.addf %492, %5 : vector<8x512xf32>
    %494 = vector.extract_strided_slice %493 {offsets = [0, 0], sizes = [8, 128], strides = [1, 1]} : vector<8x512xf32> to vector<8x128xf32>
    %495 = arith.negf %494 : vector<8x128xf32>
    %496 = math.exp %495 : vector<8x128xf32>
    %cst_176 = arith.constant 1.000000e+00 : f32
    %497 = vector.broadcast %cst_176 : f32 to vector<8x128xf32>
    %498 = arith.addf %497, %496 : vector<8x128xf32>
    %499 = arith.divf %497, %498 : vector<8x128xf32>
    %500 = vector.extract_strided_slice %493 {offsets = [0, 128], sizes = [8, 128], strides = [1, 1]} : vector<8x512xf32> to vector<8x128xf32>
    %501 = arith.negf %500 : vector<8x128xf32>
    %502 = math.exp %501 : vector<8x128xf32>
    %cst_177 = arith.constant 1.000000e+00 : f32
    %503 = vector.broadcast %cst_177 : f32 to vector<8x128xf32>
    %504 = arith.addf %503, %502 : vector<8x128xf32>
    %505 = arith.divf %503, %504 : vector<8x128xf32>
    %506 = vector.extract_strided_slice %493 {offsets = [0, 256], sizes = [8, 128], strides = [1, 1]} : vector<8x512xf32> to vector<8x128xf32>
    %507 = math.tanh %506 : vector<8x128xf32>
    %508 = vector.extract_strided_slice %493 {offsets = [0, 384], sizes = [8, 128], strides = [1, 1]} : vector<8x512xf32> to vector<8x128xf32>
    %509 = arith.negf %508 : vector<8x128xf32>
    %510 = math.exp %509 : vector<8x128xf32>
    %cst_178 = arith.constant 1.000000e+00 : f32
    %511 = vector.broadcast %cst_178 : f32 to vector<8x128xf32>
    %512 = arith.addf %511, %510 : vector<8x128xf32>
    %513 = arith.divf %511, %512 : vector<8x128xf32>
    %514 = arith.mulf %505, %452 : vector<8x128xf32>
    %515 = arith.mulf %499, %507 : vector<8x128xf32>
    %516 = arith.addf %514, %515 : vector<8x128xf32>
    %517 = math.tanh %516 : vector<8x128xf32>
    %518 = arith.mulf %513, %517 : vector<8x128xf32>
    %c0_179 = arith.constant 0 : index
    %c128_180 = arith.constant 128 : index
    %519 = vector.load %arg11[%c0_179, %c128_180] : memref<8x256xf32, #tpu.memory_space<vmem>>, vector<8x128xf32>
    tpu.vector_store %arg11[%c0_179, %c128_180], %518 {strides = array<i32>} : memref<8x256xf32, #tpu.memory_space<vmem>>, vector<8x128xf32>,
    %c8_i32 = arith.constant 8 : i32
    %c0_181 = arith.constant 0 : index
    %c0_182 = arith.constant 0 : index
    %520 = vector.load %arg9[%c0_181, %c0_182] : memref<8x128xf32, #tpu.memory_space<vmem>>, vector<8x128xf32>
    tpu.vector_store %arg9[%c0_181, %c0_182], %486 {strides = array<i32>} : memref<8x128xf32, #tpu.memory_space<vmem>>, vector<8x128xf32>,
    %c0_183 = arith.constant 0 : index
    %c0_184 = arith.constant 0 : index
    %521 = vector.load %arg10[%c0_183, %c0_184] : memref<8x128xf32, #tpu.memory_space<vmem>>, vector<8x128xf32>
    tpu.vector_store %arg10[%c0_183, %c0_184], %516 {strides = array<i32>} : memref<8x128xf32, #tpu.memory_space<vmem>>, vector<8x128xf32>,
    %c0_i32_185 = arith.constant 0 : i32
    %522 = arith.cmpi eq, %arg1, %c0_i32_185 : i32
    %523 = arith.extui %522 : i1 to i32
    %c0_i32_186 = arith.constant 0 : i32
    %524 = arith.cmpi ne, %523, %c0_i32_186 : i32
    scf.if %524 {
      %c0_187 = arith.constant 0 : index
      %c128_188 = arith.constant 128 : index
      %525 = vector.load %arg11[%c0_187, %c128_188] : memref<8x256xf32, #tpu.memory_space<vmem>>, vector<8x128xf32>
      %c0_189 = arith.constant 0 : index
      %c0_190 = arith.constant 0 : index
      %526 = vector.load %arg6[%c0_189, %c0_190] : memref<128x128xf32, #tpu.memory_space<vmem>>, vector<128x128xf32>
      %cst_191 = arith.constant dense<0.000000e+00> : vector<8x128xf32>
      %527 = tpu.matmul %525, %526, %cst_191 {dimension_numbers = #tpu.dot_dimension_numbers<[1], [0], [0], [1], [0, 0, 1, 1], [], []>} : vector<8x128xf32>, vector<128x128xf32>, vector<8x128xf32> -> vector<8x128xf32>
      %c0_192 = arith.constant 0 : index
      %c0_193 = arith.constant 0 : index
      %528 = vector.load %arg7[%c0_192, %c0_193] : memref<1x128xf32, #tpu.memory_space<vmem>>, vector<1x128xf32>
      %529 = vector.broadcast %528 : vector<1x128xf32> to vector<8x128xf32>
      %530 = arith.addf %527, %529 : vector<8x128xf32>
      %c0_194 = arith.constant 0 : index
      %c0_195 = arith.constant 0 : index
      %531 = vector.load %arg8[%c0_194, %c0_195] : memref<8x128xf32, #tpu.memory_space<vmem>>, vector<8x128xf32>
      tpu.vector_store %arg8[%c0_194, %c0_195], %530 {strides = array<i32>} : memref<8x128xf32, #tpu.memory_space<vmem>>, vector<8x128xf32>,
    } else {
    }
    return
  }
  func.func @transform_0(%arg0: i32, %arg1: i32) -> (i32, i32, i32) {
    %c0_i32 = arith.constant 0 : i32
    %c0_i32_0 = arith.constant 0 : i32
    return %arg1, %arg0, %c0_i32 : i32, i32, i32
  }
  func.func @transform_1(%arg0: i32, %arg1: i32) -> (i32, i32) {
    %c0_i32 = arith.constant 0 : i32
    %c0_i32_0 = arith.constant 0 : i32
    %c0_i32_1 = arith.constant 0 : i32
    return %c0_i32, %c0_i32_0 : i32, i32
  }
  func.func @transform_2(%arg0: i32, %arg1: i32) -> (i32, i32) {
    %c0_i32 = arith.constant 0 : i32
    %c0_i32_0 = arith.constant 0 : i32
    %c0_i32_1 = arith.constant 0 : i32
    return %c0_i32, %c0_i32_0 : i32, i32
  }
  func.func @transform_3(%arg0: i32, %arg1: i32) -> (i32, i32) {
    %c0_i32 = arith.constant 0 : i32
    %c0_i32_0 = arith.constant 0 : i32
    %c0_i32_1 = arith.constant 0 : i32
    return %c0_i32, %c0_i32_0 : i32, i32
  }
  func.func @transform_4(%arg0: i32, %arg1: i32) -> (i32, i32) {
    %c0_i32 = arith.constant 0 : i32
    %c0_i32_0 = arith.constant 0 : i32
    %c0_i32_1 = arith.constant 0 : i32
    return %c0_i32, %c0_i32_0 : i32, i32
  }
  func.func @transform_5(%arg0: i32, %arg1: i32) -> (i32, i32) {
    %c0_i32 = arith.constant 0 : i32
    %c0_i32_0 = arith.constant 0 : i32
    %c0_i32_1 = arith.constant 0 : i32
    return %c0_i32, %c0_i32_0 : i32, i32
  }
  func.func @transform_6(%arg0: i32, %arg1: i32) -> (i32, i32) {
    %c0_i32 = arith.constant 0 : i32
    %c0_i32_0 = arith.constant 0 : i32
    return %arg0, %c0_i32 : i32, i32
  }
}

</mosaic_0001>

<bundles_post_ra>
// kernel: rnn_model_forward.1
= control target key start
LH: loop header
LB: loop body
LE: loop exit
PB: predicated region body
PF: predicated region fallthrough
CT: control target
= control target key end

     0   :  { %v10664_v61 = vmov 0.0   ;;  %s10657_s1 = inlined_call_operand.vmem [shape: f32[128,512], index: 1, kind: input, shape index: {}]   ;;  %s10658_s2 = inlined_call_operand.vmem [shape: f32[256,512], index: 2, kind: input, shape index: {}]   ;;  %s10659_s0 = inlined_call_operand.vmem [shape: bf16[8,8,512], index: 0, kind: input, shape index: {}]   ;;  %s10660_s3 = inlined_call_operand.vmem [shape: f32[1,512], index: 3, kind: input, shape index: {}]   ;;  %s10661_s5 = inlined_call_operand.vmem [shape: f32[1,128], index: 5, kind: input, shape index: {}]   ;;  %s10662_s4 = inlined_call_operand.vmem [shape: f32[128,128], index: 4, kind: input, shape index: {}]   ;;  %s10663_s6 = inlined_call_operand.vmem [shape: f32[8,128], index: 6, kind: output, shape index: {}]  }
   0x1   :  { %v110_v0 = vld [vmem:[%s10657_s1 + $0x1e0] sm:$0xff]  ;;  %v5063_v1 = vld [vmem:[%s10657_s1 + $0x1e8] sm:$0xff]  ;;  %v5068_v2 = vld [vmem:[%s10657_s1 + $0x1f8] sm:$0xff] }
   0x2   :  { %114 = vmatpush.msra.mxu0 %v110_v0  ;;  %134 = vmatpush.msra.mxu1 %v5063_v1  ;;  %v106_v3 = vld [vmem:[%s10657_s1 + $0x1c0] sm:$0xff]  ;;  %v5077_v4 = vld [vmem:[%s10657_s1 + $0x1c8] sm:$0xff]  ;;  %v5082_v5 = vld [vmem:[%s10657_s1 + $0x1d8] sm:$0xff] }
   0x3   :  { %174 = vmatpush.msra.mxu3 %v5068_v2  ;;  %v102_v6 = vld [vmem:[%s10657_s1 + $0x1a0] sm:$0xff]  ;;  %v5091_v7 = vld [vmem:[%s10657_s1 + $0x1a8] sm:$0xff]  ;;  %v5097_v8 = vld [vmem:[%s10657_s1 + $0x1b8] sm:$0xff] }
   0x4   :  { %115 = vmatpush.msra.mxu0 %v106_v3  ;;  %135 = vmatpush.msra.mxu1 %v5077_v4  ;;  %v98_v9 = vld [vmem:[%s10657_s1 + $0x180] sm:$0xff]  ;;  %v5106_v10 = vld [vmem:[%s10657_s1 + $0x188] sm:$0xff]  ;;  %v5112_v11 = vld [vmem:[%s10657_s1 + $0x198] sm:$0xff] }
   0x5   :  { %175 = vmatpush.msra.mxu3 %v5082_v5  ;;  %v94_v12 = vld [vmem:[%s10657_s1 + $0x160] sm:$0xff]  ;;  %v5121_v13 = vld [vmem:[%s10657_s1 + $0x168] sm:$0xff]  ;;  %v5127_v14 = vld [vmem:[%s10657_s1 + $0x178] sm:$0xff] }
   0x6   :  { %116 = vmatpush.msra.mxu0 %v102_v6  ;;  %136 = vmatpush.msra.mxu1 %v5091_v7  ;;  %v90_v15 = vld [vmem:[%s10657_s1 + $0x140] sm:$0xff]  ;;  %v5136_v16 = vld [vmem:[%s10657_s1 + $0x148] sm:$0xff]  ;;  %v5141_v17 = vld [vmem:[%s10657_s1 + $0x1f0] sm:$0xff] }
   0x7   :  { %176 = vmatpush.msra.mxu3 %v5097_v8  ;;  %v5147_v18 = vld [vmem:[%s10657_s1 + $0x158] sm:$0xff]  ;;  %v5152_v19 = vld [vmem:[%s10657_s1 + $0x1d0] sm:$0xff]  ;;  %v86_v20 = vld [vmem:[%s10657_s1 + $0x120] sm:$0xff]  ;;  %154 = vmatpush.msra.mxu2 %v5141_v17 }
   0x8   :  { %117 = vmatpush.msra.mxu0 %v98_v9  ;;  %137 = vmatpush.msra.mxu1 %v5106_v10  ;;  %v5161_v21 = vld [vmem:[%s10657_s1 + $0x128] sm:$0xff]  ;;  %v5168_v22 = vld [vmem:[%s10657_s1 + $0x138] sm:$0xff]  ;;  %v5173_v23 = vld [vmem:[%s10657_s1 + $0x1b0] sm:$0xff] }
   0x9   :  { %177 = vmatpush.msra.mxu3 %v5112_v11  ;;  %v82_v24 = vld [vmem:[%s10657_s1 + $0x100] sm:$0xff]  ;;  %v5182_v25 = vld [vmem:[%s10657_s1 + $0x108] sm:$0xff]  ;;  %155 = vmatpush.msra.mxu2 %v5152_v19  ;;  %v5189_v26 = vld [vmem:[%s10657_s1 + $0x118] sm:$0xff] }
   0xa   :  { %118 = vmatpush.msra.mxu0 %v94_v12  ;;  %138 = vmatpush.msra.mxu1 %v5121_v13  ;;  %v5194_v27 = vld [vmem:[%s10657_s1 + $0x190] sm:$0xff]  ;;  %v78_v28 = vld [vmem:[%s10657_s1 + $0xe0] sm:$0xff]  ;;  %v5203_v29 = vld [vmem:[%s10657_s1 + $0xe8] sm:$0xff] }
   0xb   :  { %178 = vmatpush.msra.mxu3 %v5127_v14  ;;  %156 = vmatpush.msra.mxu2 %v5173_v23  ;;  %v5210_v30 = vld [vmem:[%s10657_s1 + $0xf8] sm:$0xff]  ;;  %v5215_v31 = vld [vmem:[%s10657_s1 + $0x170] sm:$0xff]  ;;  %v74_v32 = vld [vmem:[%s10657_s1 + $0xc0] sm:$0xff] }
   0xc   :  { %119 = vmatpush.msra.mxu0 %v90_v15  ;;  %139 = vmatpush.msra.mxu1 %v5136_v16  ;;  %10684 = vst [vmem:[#allocation5_spill] sm:$0xff] %v5215_v31  ;;  %v5224_v33 = vld [vmem:[%s10657_s1 + $0xc8] sm:$0xff]  ;;  %v5231_v34 = vld [vmem:[%s10657_s1 + $0xd8] sm:$0xff]  ;;  %v5236_v35 = vld [vmem:[%s10657_s1 + $0x150] sm:$0xff] }
   0xd   :  { %179 = vmatpush.msra.mxu3 %v5147_v18  ;;  %157 = vmatpush.msra.mxu2 %v5194_v27  ;;  %10685 = vst [vmem:[#allocation6_spill] sm:$0xff] %v5236_v35  ;;  %v5242_v36 = vld [vmem:[%s10657_s1 + $0xa0] sm:$0xff]  ;;  %v5247_v37 = vld [vmem:[%s10657_s1 + $0xa8] sm:$0xff]  ;;  %v5254_v38 = vld [vmem:[%s10657_s1 + $0xb8] sm:$0xff] }
   0xe   :  { %120 = vmatpush.msra.mxu0 %v86_v20  ;;  %140 = vmatpush.msra.mxu1 %v5161_v21  ;;  %10686 = vst [vmem:[#allocation7_spill] sm:$0xff] %v5242_v36  ;;  %v5259_v39 = vld [vmem:[%s10657_s1 + $0x130] sm:$0xff]  ;;  %v5265_v40 = vld [vmem:[%s10657_s1 + $0x80] sm:$0xff]  ;;  %v5270_v41 = vld [vmem:[%s10657_s1 + $0x88] sm:$0xff] }
   0xf   :  { %180 = vmatpush.msra.mxu3 %v5168_v22  ;;  %158 = vmatpush.msra.mxu2 %v5215_v31  ;;  %10687 = vst [vmem:[#allocation8_spill] sm:$0xff] %v5259_v39  ;;  %v5278_v42 = vld [vmem:[%s10657_s1 + $0x98] sm:$0xff]  ;;  %v5283_v43 = vld [vmem:[%s10657_s1 + $0x110] sm:$0xff]  ;;  %v5289_v44 = vld [vmem:[%s10657_s1 + $0x60] sm:$0xff] }
  0x10   :  { %121 = vmatpush.msra.mxu0 %v82_v24  ;;  %141 = vmatpush.msra.mxu1 %v5182_v25  ;;  %10688 = vst [vmem:[#allocation9_spill] sm:$0xff] %v5265_v40  ;;  %v5294_v45 = vld [vmem:[%s10657_s1 + $0x68] sm:$0xff]  ;;  %v5302_v46 = vld [vmem:[%s10657_s1 + $0x78] sm:$0xff]  ;;  %v5307_v47 = vld [vmem:[%s10657_s1 + $0xf0] sm:$0xff] }
  0x11   :  { %181 = vmatpush.msra.mxu3 %v5189_v26  ;;  %159 = vmatpush.msra.mxu2 %v5236_v35  ;;  %10689 = vst [vmem:[#allocation10_spill] sm:$0xff] %v5283_v43  ;;  %v5313_v48 = vld [vmem:[%s10657_s1 + $0x40] sm:$0xff]  ;;  %v5318_v49 = vld [vmem:[%s10657_s1 + $0x48] sm:$0xff]  ;;  %v5326_v50 = vld [vmem:[%s10657_s1 + $0x58] sm:$0xff] }
  0x12   :  { %122 = vmatpush.msra.mxu0 %v78_v28  ;;  %142 = vmatpush.msra.mxu1 %v5203_v29  ;;  %10690 = vst [vmem:[#allocation11_spill] sm:$0xff] %v5289_v44  ;;  %v5331_v51 = vld [vmem:[%s10657_s1 + $0xd0] sm:$0xff]  ;;  %v5337_v52 = vld [vmem:[%s10657_s1 + $0x20] sm:$0xff]  ;;  %v5342_v53 = vld [vmem:[%s10657_s1 + $0x28] sm:$0xff] }
  0x13   :  { %182 = vmatpush.msra.mxu3 %v5210_v30  ;;  %160 = vmatpush.msra.mxu2 %v5259_v39  ;;  %10691 = vst [vmem:[#allocation12_spill] sm:$0xff] %v5307_v47  ;;  %v5350_v54 = vld [vmem:[%s10657_s1 + $0x38] sm:$0xff]  ;;  %v5355_v55 = vld [vmem:[%s10657_s1 + $0xb0] sm:$0xff]  ;;  %v5361_v56 = vld [vmem:[%s10657_s1] sm:$0xff] }
  0x14   :  { %123 = vmatpush.msra.mxu0 %v74_v32  ;;  %143 = vmatpush.msra.mxu1 %v5224_v33  ;;  %10692 = vst [vmem:[#allocation13_spill] sm:$0xff] %v5313_v48  ;;  %v5366_v57 = vld [vmem:[%s10657_s1 + $0x8] sm:$0xff]  ;;  %v5374_v58 = vld [vmem:[%s10657_s1 + $0x18] sm:$0xff]  ;;  %v5383_v59 = vld [vmem:[%s10657_s1 + $0x90] sm:$0xff] }
  0x15   :  { %183 = vmatpush.msra.mxu3 %v5231_v34  ;;  %161 = vmatpush.msra.mxu2 %v5283_v43  ;;  %10693 = vst [vmem:[#allocation14_spill] sm:$0xff] %v5331_v51  ;;  %v5388_v60 = vld [vmem:[%s10658_s2 + $0x3e0] sm:$0xff]  ;;  %v5395_v62 = vld [vmem:[%s10658_s2 + $0x3e8] sm:$0xff]  ;;  %v5402_v63 = vld [vmem:[%s10657_s1 + $0x70] sm:$0xff] }
  0x16   :  { %124 = vmatpush.msra.mxu0 %v5242_v36  ;;  %144 = vmatpush.msra.mxu1 %v5247_v37  ;;  %10694 = vst [vmem:[#allocation15_spill] sm:$0xff] %v5337_v52  ;;  %v5407_v0 = vld [vmem:[%s10658_s2 + $0x3c0] sm:$0xff]  ;;  %v5417_v6 = vld [vmem:[%s10658_s2 + $0x3c8] sm:$0xff]  ;;  %v5425_v12 = vld [vmem:[%s10657_s1 + $0x50] sm:$0xff] }
  0x17   :  { %184 = vmatpush.msra.mxu3 %v5254_v38  ;;  %162 = vmatpush.msra.mxu2 %v5307_v47  ;;  %10695 = vst [vmem:[#allocation16_spill] sm:$0xff] %v5355_v55  ;;  %v324_v3 = vld [vmem:[%s10658_s2 + $0x1e0] sm:$0xff]  ;;  %v5438_v20 = vld [vmem:[%s10658_s2 + $0x3a8] sm:$0xff]  ;;  %v5446_v28 = vld [vmem:[%s10657_s1 + $0x30] sm:$0xff] }
  0x18   :  { %125 = vmatpush.msra.mxu0 %v5265_v40  ;;  %145 = vmatpush.msra.mxu1 %v5270_v41  ;;  %10696 = vst [vmem:[#allocation17_spill] sm:$0xff] %v5361_v56  ;;  %v320_v9 = vld [vmem:[%s10658_s2 + $0x1c0] sm:$0xff]  ;;  %v305_v31 = vld [vmem:[%s10658_s2 + $0x148] sm:$0xff] }
  0x19   :  { %185 = vmatpush.msra.mxu3 %v5278_v42  ;;  %163 = vmatpush.msra.mxu2 %v5331_v51  ;;  %10697 = vst [vmem:[#allocation18_spill] sm:$0xff] %v5383_v59  ;;  %v5431_v15 = vld [vmem:[%s10658_s2 + $0x3a0] sm:$0xff] }
  0x1a   :  { %126 = vmatpush.msra.mxu0 %v5289_v44  ;;  %146 = vmatpush.msra.mxu1 %v5294_v45  ;;  %10698 = vst [vmem:[#allocation19_spill] sm:$0xff] %v5402_v63  ;;  %v316_v24 = vld [vmem:[%s10658_s2 + $0x1a0] sm:$0xff]  ;;  %v5515_v44 = vld [vmem:[%s10658_s2 + $0x328] sm:$0xff] }
  0x1b   :  { %186 = vmatpush.msra.mxu3 %v5302_v46  ;;  %164 = vmatpush.msra.mxu2 %v5355_v55  ;;  %10699 = vst [vmem:[#allocation20_spill] sm:$0xff] %v5425_v12  ;;  %v5452_v32 = vld [vmem:[%s10658_s2 + $0x380] sm:$0xff]  ;;  %v317_v55 = vld [vmem:[%s10658_s2 + $0x1a8] sm:$0xff] }
  0x1c   :  { %127 = vmatpush.msra.mxu0 %v5313_v48  ;;  %147 = vmatpush.msra.mxu1 %v5318_v49  ;;  %10700 = vst [vmem:[#allocation21_spill] sm:$0xff] %v5446_v28  ;;  %v308_v48 = vld [vmem:[%s10658_s2 + $0x160] sm:$0xff] }
  0x1d   :  { %187 = vmatpush.msra.mxu3 %v5326_v50  ;;  %165 = vmatpush.msra.mxu2 %v5383_v59  ;;  %v304_v59 = vld [vmem:[%s10658_s2 + $0x140] sm:$0xff] }
  0x1e   :  { %128 = vmatpush.msra.mxu0 %v5337_v52  ;;  %148 = vmatpush.msra.mxu1 %v5342_v53  ;;  %v5480_v52 = vld [vmem:[%s10658_s2 + $0x368] sm:$0xff]  ;;  %v5524_v40 = vld [vmem:[%s10658_s2 + $0x300] sm:$0xff] }
  0x1f   :  { %188 = vmatpush.msra.mxu3 %v5350_v54  ;;  %166 = vmatpush.msra.mxu2 %v5402_v63  ;;  %v10702_v63 = vmov 0.0   ;;  %v300_v36 = vld [vmem:[%s10658_s2 + $0x120] sm:$0xff] }
  0x20   :  { %129 = vmatpush.msra.mxu0 %v5361_v56  ;;  %149 = vmatpush.msra.mxu1 %v5366_v57  ;;  %v5467_v56 = vld [vmem:[%s10657_s1 + $0x10] sm:$0xff]  ;;  %v356_v51 = vld [vmem:[%s10658_s2 + $0x2e0] sm:$0xff] }
  0x21   :  { %189 = vmatpush.msra.mxu3 %v5374_v58  ;;  %130 = vmatmul.f32.vlgmr.msra.gmra.mxu0 %v10664_v61  ;;  %10701 = vst [vmem:[#allocation22_spill] sm:$0xff] %v5467_v56  ;;  %v296_v47 = vld [vmem:[%s10658_s2 + $0x100] sm:$0xff] }
  0x22   :  { %150 = vmatmul.f32.vlgmr.msra.gmra.mxu1 %v10664_v61  ;;  %190 = vmatmul.f32.vlgmr.msra.gmra.mxu3 %v10664_v61  ;;  %v312_v61 = vld [vmem:[%s10658_s2 + $0x180] sm:$0xff] }
  0x23   :  { %412 = vmatpush.msrb.mxu1 %v5388_v60  ;;  %452 = vmatpush.msrb.mxu3 %v5395_v62  ;;  %v352_v43 = vld [vmem:[%s10658_s2 + $0x2c0] sm:$0xff] }
  0x24   :  { %392 = vmatpush.msrb.mxu0 %v324_v3  ;;  %167 = vmatpush.msra.mxu2 %v5425_v12  ;;  %v5459_v3 = vld [vmem:[%s10658_s2 + $0x388] sm:$0xff]  ;;  %v5486_v12 = vld [vmem:[%s10658_s2 + $0x340] sm:$0xff] }
  0x25   :  { %413 = vmatpush.msrb.mxu1 %v5407_v0  ;;  %453 = vmatpush.msrb.mxu3 %v5417_v6  ;;  %v292_v39 = vld [vmem:[%s10658_s2 + $0xe0] sm:$0xff] }
  0x26   :  { %393 = vmatpush.msrb.mxu0 %v320_v9  ;;  %v5473_v9 = vld [vmem:[%s10658_s2 + $0x360] sm:$0xff]  ;;  %168 = vmatpush.msra.mxu2 %v5446_v28  ;;  %v5496_v28 = vld [vmem:[%s10658_s2 + $0x348] sm:$0xff] }
  0x27   :  { %414 = vmatpush.msrb.mxu1 %v5431_v15  ;;  %454 = vmatpush.msrb.mxu3 %v5438_v20  ;;  %v348_v35 = vld [vmem:[%s10658_s2 + $0x2a0] sm:$0xff] }
  0x28   :  { %394 = vmatpush.msrb.mxu0 %v316_v24  ;;  %v325_v24 = vld [vmem:[%s10658_s2 + $0x1e8] sm:$0xff]  ;;  %169 = vmatpush.msra.mxu2 %v5467_v56 }
  0x29   :  { %415 = vmatpush.msrb.mxu1 %v5452_v32  ;;  %455 = vmatpush.msrb.mxu3 %v5459_v3  ;;  %v321_v56 = vld [vmem:[%s10658_s2 + $0x1c8] sm:$0xff] }
  0x2a   :  { %395 = vmatpush.msrb.mxu0 %v312_v61  ;;  %170 = vmatmul.f32.vlgmr.msra.gmra.mxu2 %v10702_v63  ;;  %v5506_v61 = vld [vmem:[%s10658_s2 + $0x320] sm:$0xff] }
  0x2b   :  { %416 = vmatpush.msrb.mxu1 %v5473_v9  ;;  %456 = vmatpush.msrb.mxu3 %v5480_v52 }
  0x2c   :  { %432 = vmatpush.msrb.mxu2 %v325_v24  ;;  %396 = vmatpush.msrb.mxu0 %v308_v48  ;;  %v5533_v24 = vld [vmem:[%s10658_s2 + $0x308] sm:$0xff] }
  0x2d   :  { %417 = vmatpush.msrb.mxu1 %v5486_v12  ;;  %457 = vmatpush.msrb.mxu3 %v5496_v28  ;;  %v313_v48 = vld [vmem:[%s10658_s2 + $0x188] sm:$0xff] }
  0x2e   :  { %433 = vmatpush.msrb.mxu2 %v321_v56  ;;  %397 = vmatpush.msrb.mxu0 %v304_v59  ;;  %v357_v56 = vld [vmem:[%s10658_s2 + $0x2e8] sm:$0xff] }
  0x2f   :  { %418 = vmatpush.msrb.mxu1 %v5506_v61  ;;  %458 = vmatpush.msrb.mxu3 %v5515_v44  ;;  %v309_v59 = vld [vmem:[%s10658_s2 + $0x168] sm:$0xff] }
  0x30   :  { %434 = vmatpush.msrb.mxu2 %v317_v55  ;;  %398 = vmatpush.msrb.mxu0 %v300_v36  ;;  %v353_v55 = vld [vmem:[%s10658_s2 + $0x2c8] sm:$0xff] }
  0x31   :  { %419 = vmatpush.msrb.mxu1 %v5524_v40  ;;  %459 = vmatpush.msrb.mxu3 %v5533_v24  ;;  %v349_v36 = vld [vmem:[%s10658_s2 + $0x2a8] sm:$0xff] }
  0x32   :  { %435 = vmatpush.msrb.mxu2 %v313_v48  ;;  %399 = vmatpush.msrb.mxu0 %v296_v47  ;;  %v301_v48 = vld [vmem:[%s10658_s2 + $0x128] sm:$0xff]  ;;  %v340_v47 = vld [vmem:[%s10658_s2 + $0x260] sm:$0xff] }
  0x33   :  { %420 = vmatpush.msrb.mxu1 %v356_v51  ;;  %460 = vmatpush.msrb.mxu3 %v357_v56  ;;  %v344_v51 = vld [vmem:[%s10658_s2 + $0x280] sm:$0xff]  ;;  %v297_v56 = vld [vmem:[%s10658_s2 + $0x108] sm:$0xff] }
  0x34   :  { %436 = vmatpush.msrb.mxu2 %v309_v59  ;;  %400 = vmatpush.msrb.mxu0 %v292_v39  ;;  %v341_v39 = vld [vmem:[%s10658_s2 + $0x268] sm:$0xff] }
  0x35   :  { %421 = vmatpush.msrb.mxu1 %v352_v43  ;;  %461 = vmatpush.msrb.mxu3 %v353_v55  ;;  %v345_v43 = vld [vmem:[%s10658_s2 + $0x288] sm:$0xff]  ;;  %v332_v55 = vld [vmem:[%s10658_s2 + $0x220] sm:$0xff] }
  0x36   :  { %437 = vmatpush.msrb.mxu2 %v305_v31  ;;  %v336_v31 = vld [vmem:[%s10658_s2 + $0x240] sm:$0xff]  ;;  %v337_v59 = vld [vmem:[%s10658_s2 + $0x248] sm:$0xff] }
  0x37   :  { %422 = vmatpush.msrb.mxu1 %v348_v35  ;;  %462 = vmatpush.msrb.mxu3 %v349_v36  ;;  %v293_v35 = vld [vmem:[%s10658_s2 + $0xe8] sm:$0xff] }
  0x38   :  { %438 = vmatpush.msrb.mxu2 %v301_v48  ;;  %v333_v36 = vld [vmem:[%s10658_s2 + $0x228] sm:$0xff] }
  0x39   :  { %423 = vmatpush.msrb.mxu1 %v344_v51  ;;  %463 = vmatpush.msrb.mxu3 %v345_v43  ;;  %v328_v51 = vld [vmem:[%s10658_s2 + $0x200] sm:$0xff]  ;;  %v329_v48 = vld [vmem:[%s10658_s2 + $0x208] sm:$0xff]  ;;  %v390_v43 = vld [vmem:[%s10658_s2 + $0x3f0] sm:$0xff] }
  0x3a   :  { %439 = vmatpush.msrb.mxu2 %v297_v56  ;;  %v386_v56 = vld [vmem:[%s10658_s2 + $0x3d0] sm:$0xff] }
  0x3b   :  { %424 = vmatpush.msrb.mxu1 %v340_v47  ;;  %464 = vmatpush.msrb.mxu3 %v341_v39  ;;  %v391_v47 = vld [vmem:[%s10658_s2 + $0x3f8] sm:$0xff] }
  0x3c   :  { %440 = vmatpush.msrb.mxu2 %v293_v35  ;;  %v387_v39 = vld [vmem:[%s10658_s2 + $0x3d8] sm:$0xff] }
  0x3d   :  { %425 = vmatpush.msrb.mxu1 %v336_v31  ;;  %465 = vmatpush.msrb.mxu3 %v337_v59  ;;  %v382_v31 = vld [vmem:[%s10658_s2 + $0x3b0] sm:$0xff]  ;;  %v383_v35 = vld [vmem:[%s10658_s2 + $0x3b8] sm:$0xff] }
  0x3e   :  { %v378_v59 = vld [vmem:[%s10658_s2 + $0x390] sm:$0xff] }
  0x3f   :  { %426 = vmatpush.msrb.mxu1 %v332_v55  ;;  %466 = vmatpush.msrb.mxu3 %v333_v36  ;;  %v379_v55 = vld [vmem:[%s10658_s2 + $0x398] sm:$0xff]  ;;  %v374_v36 = vld [vmem:[%s10658_s2 + $0x370] sm:$0xff] }
  0x41   :  { %427 = vmatpush.msrb.mxu1 %v328_v51  ;;  %467 = vmatpush.msrb.mxu3 %v329_v48  ;;  %v375_v51 = vld [vmem:[%s10658_s2 + $0x378] sm:$0xff]  ;;  %v370_v48 = vld [vmem:[%s10658_s2 + $0x350] sm:$0xff] }
  0x42   :  { %428 = vmatmul.f32.vlgmr.msrb.gmra.mxu1 %v10702_v63  ;;  %468 = vmatmul.f32.vlgmr.msrb.gmra.mxu3 %v10702_v63 }
  0x43   :  { %492 = vmatpush.msra.mxu1 %v390_v43  ;;  %532 = vmatpush.msra.mxu3 %v391_v47  ;;  %v371_v43 = vld [vmem:[%s10658_s2 + $0x358] sm:$0xff]  ;;  %v366_v47 = vld [vmem:[%s10658_s2 + $0x330] sm:$0xff] }
  0x45   :  { %493 = vmatpush.msra.mxu1 %v386_v56  ;;  %533 = vmatpush.msra.mxu3 %v387_v39  ;;  %v367_v56 = vld [vmem:[%s10658_s2 + $0x338] sm:$0xff]  ;;  %v362_v39 = vld [vmem:[%s10658_s2 + $0x310] sm:$0xff] }
  0x47   :  { %494 = vmatpush.msra.mxu1 %v382_v31  ;;  %534 = vmatpush.msra.mxu3 %v383_v35  ;;  %v363_v31 = vld [vmem:[%s10658_s2 + $0x318] sm:$0xff]  ;;  %v358_v35 = vld [vmem:[%s10658_s2 + $0x2f0] sm:$0xff] }
  0x49   :  { %495 = vmatpush.msra.mxu1 %v378_v59  ;;  %535 = vmatpush.msra.mxu3 %v379_v55  ;;  %v359_v59 = vld [vmem:[%s10658_s2 + $0x2f8] sm:$0xff]  ;;  %v288_v55 = vld [vmem:[%s10658_s2 + $0xc0] sm:$0xff] }
  0x4a   :  { %401 = vmatpush.msrb.mxu0 %v288_v55  ;;  %v347_v55 = vld [vmem:[%s10658_s2 + $0x298] sm:$0xff] }
  0x4b   :  { %496 = vmatpush.msra.mxu1 %v374_v36  ;;  %536 = vmatpush.msra.mxu3 %v375_v51  ;;  %v289_v36 = vld [vmem:[%s10658_s2 + $0xc8] sm:$0xff]  ;;  %v354_v51 = vld [vmem:[%s10658_s2 + $0x2d0] sm:$0xff] }
  0x4c   :  { %441 = vmatpush.msrb.mxu2 %v289_v36  ;;  %v276_v36 = vld [vmem:[%s10658_s2 + $0x60] sm:$0xff] }
  0x4d   :  { %497 = vmatpush.msra.mxu1 %v370_v48  ;;  %537 = vmatpush.msra.mxu3 %v371_v43  ;;  %v355_v48 = vld [vmem:[%s10658_s2 + $0x2d8] sm:$0xff]  ;;  %v284_v43 = vld [vmem:[%s10658_s2 + $0xa0] sm:$0xff] }
  0x4e   :  { %402 = vmatpush.msrb.mxu0 %v284_v43  ;;  %v343_v43 = vld [vmem:[%s10658_s2 + $0x278] sm:$0xff] }
  0x4f   :  { %498 = vmatpush.msra.mxu1 %v366_v47  ;;  %538 = vmatpush.msra.mxu3 %v367_v56  ;;  %v285_v47 = vld [vmem:[%s10658_s2 + $0xa8] sm:$0xff]  ;;  %v350_v56 = vld [vmem:[%s10658_s2 + $0x2b0] sm:$0xff] }
  0x50   :  { %442 = vmatpush.msrb.mxu2 %v285_v47  ;;  %v272_v47 = vld [vmem:[%s10658_s2 + $0x40] sm:$0xff] }
  0x51   :  { %499 = vmatpush.msra.mxu1 %v362_v39  ;;  %539 = vmatpush.msra.mxu3 %v363_v31  ;;  %v351_v39 = vld [vmem:[%s10658_s2 + $0x2b8] sm:$0xff]  ;;  %v280_v31 = vld [vmem:[%s10658_s2 + $0x80] sm:$0xff] }
  0x52   :  { %403 = vmatpush.msrb.mxu0 %v280_v31  ;;  %v339_v31 = vld [vmem:[%s10658_s2 + $0x258] sm:$0xff] }
  0x53   :  { %500 = vmatpush.msra.mxu1 %v358_v35  ;;  %540 = vmatpush.msra.mxu3 %v359_v59  ;;  %v281_v35 = vld [vmem:[%s10658_s2 + $0x88] sm:$0xff]  ;;  %v346_v59 = vld [vmem:[%s10658_s2 + $0x290] sm:$0xff] }
  0x54   :  { %443 = vmatpush.msrb.mxu2 %v281_v35  ;;  %404 = vmatpush.msrb.mxu0 %v276_v36  ;;  %v268_v35 = vld [vmem:[%s10658_s2 + $0x20] sm:$0xff]  ;;  %v335_v36 = vld [vmem:[%s10658_s2 + $0x238] sm:$0xff] }
  0x55   :  { %501 = vmatpush.msra.mxu1 %v354_v51  ;;  %541 = vmatpush.msra.mxu3 %v355_v48  ;;  %v277_v51 = vld [vmem:[%s10658_s2 + $0x68] sm:$0xff]  ;;  %v342_v48 = vld [vmem:[%s10658_s2 + $0x270] sm:$0xff] }
  0x56   :  { %444 = vmatpush.msrb.mxu2 %v277_v51  ;;  %405 = vmatpush.msrb.mxu0 %v272_v47  ;;  %v264_v51 = vld [vmem:[%s10658_s2] sm:$0xff]  ;;  %v331_v47 = vld [vmem:[%s10658_s2 + $0x218] sm:$0xff] }
  0x57   :  { %502 = vmatpush.msra.mxu1 %v350_v56  ;;  %542 = vmatpush.msra.mxu3 %v351_v39  ;;  %v273_v56 = vld [vmem:[%s10658_s2 + $0x48] sm:$0xff]  ;;  %v338_v39 = vld [vmem:[%s10658_s2 + $0x250] sm:$0xff] }
  0x58   :  { %445 = vmatpush.msrb.mxu2 %v273_v56  ;;  %406 = vmatpush.msrb.mxu0 %v268_v35  ;;  %v326_v56 = vld [vmem:[%s10658_s2 + $0x1f0] sm:$0xff]  ;;  %v323_v35 = vld [vmem:[%s10658_s2 + $0x1d8] sm:$0xff] }
  0x59   :  { %503 = vmatpush.msra.mxu1 %v346_v59  ;;  %543 = vmatpush.msra.mxu3 %v347_v55  ;;  %v269_v59 = vld [vmem:[%s10658_s2 + $0x28] sm:$0xff]  ;;  %v334_v55 = vld [vmem:[%s10658_s2 + $0x230] sm:$0xff] }
  0x5a   :  { %446 = vmatpush.msrb.mxu2 %v269_v59  ;;  %407 = vmatpush.msrb.mxu0 %v264_v51  ;;  %v318_v59 = vld [vmem:[%s10658_s2 + $0x1b0] sm:$0xff] }
  0x5b   :  { %504 = vmatpush.msra.mxu1 %v342_v48  ;;  %544 = vmatpush.msra.mxu3 %v343_v43  ;;  %v265_v48 = vld [vmem:[%s10658_s2 + $0x8] sm:$0xff]  ;;  %v330_v43 = vld [vmem:[%s10658_s2 + $0x210] sm:$0xff] }
  0x5c   :  { %447 = vmatpush.msrb.mxu2 %v265_v48  ;;  %472 = vmatpush.msra.mxu0 %v326_v56  ;;  %v287_v56 = vld [vmem:[%s10658_s2 + $0xb8] sm:$0xff] }
  0x5d   :  { %505 = vmatpush.msra.mxu1 %v338_v39  ;;  %545 = vmatpush.msra.mxu3 %v339_v31  ;;  %v327_v39 = vld [vmem:[%s10658_s2 + $0x1f8] sm:$0xff]  ;;  %v322_v31 = vld [vmem:[%s10658_s2 + $0x1d0] sm:$0xff] }
  0x5e   :  { %512 = vmatpush.msra.mxu2 %v327_v39  ;;  %473 = vmatpush.msra.mxu0 %v322_v31 }
  0x5f   :  { %506 = vmatpush.msra.mxu1 %v334_v55  ;;  %546 = vmatpush.msra.mxu3 %v335_v36  ;;  %v319_v55 = vld [vmem:[%s10658_s2 + $0x1b8] sm:$0xff] }
  0x60   :  { %513 = vmatpush.msra.mxu2 %v323_v35  ;;  %474 = vmatpush.msra.mxu0 %v318_v59 }
  0x61   :  { %507 = vmatpush.msra.mxu1 %v330_v43  ;;  %547 = vmatpush.msra.mxu3 %v331_v47  ;;  %v5837_v47 = vld [vmem:[%s10659_s0 + $0x8] sm:$0xff] }
  0x62   :  { %514 = vmatpush.msra.mxu2 %v319_v55  ;;  %v49_v35 = vunpack.c.h.bf16 %v5837_v47  ;;  %508 = vmatmul.f32.vlgmr.msra.gmra.mxu1 %v10702_v63 }
  0x63   :  { %708 = vmatpush.msrb.mxu1 %v5063_v1  ;;  %748 = vmatpush.msrb.mxu3 %v5068_v2  ;;  %v314_v1 = vld [vmem:[%s10658_s2 + $0x190] sm:$0xff]  ;;  %v315_v2 = vld [vmem:[%s10658_s2 + $0x198] sm:$0xff] }
  0x64   :  { %475 = vmatpush.msra.mxu0 %v314_v1  ;;  %515 = vmatpush.msra.mxu2 %v315_v2  ;;  %v271_v2 = vld [vmem:[%s10658_s2 + $0x38] sm:$0xff] }
  0x65   :  { %709 = vmatpush.msrb.mxu1 %v5077_v4  ;;  %749 = vmatpush.msrb.mxu3 %v5082_v5  ;;  %v310_v4 = vld [vmem:[%s10658_s2 + $0x170] sm:$0xff]  ;;  %v311_v5 = vld [vmem:[%s10658_s2 + $0x178] sm:$0xff] }
  0x66   :  { %476 = vmatpush.msra.mxu0 %v310_v4  ;;  %516 = vmatpush.msra.mxu2 %v311_v5 }
  0x67   :  { %710 = vmatpush.msrb.mxu1 %v5091_v7  ;;  %750 = vmatpush.msrb.mxu3 %v5097_v8  ;;  %v306_v7 = vld [vmem:[%s10658_s2 + $0x150] sm:$0xff]  ;;  %v307_v8 = vld [vmem:[%s10658_s2 + $0x158] sm:$0xff] }
  0x68   :  { %477 = vmatpush.msra.mxu0 %v306_v7  ;;  %517 = vmatpush.msra.mxu2 %v307_v8 }
  0x69   :  { %711 = vmatpush.msrb.mxu1 %v5106_v10  ;;  %751 = vmatpush.msrb.mxu3 %v5112_v11  ;;  %v44_v10 = vld [vmem:[%s10659_s0] sm:$0xff]  ;;  %v302_v11 = vld [vmem:[%s10658_s2 + $0x130] sm:$0xff] }
  0x6a   :  { %478 = vmatpush.msra.mxu0 %v302_v11  ;;  %v47_v36 = vunpack.c.h.bf16 %v44_v10  ;;  %548 = vmatmul.f32.vlgmr.msra.gmra.mxu3 %v10702_v63  ;;  %v270_v63 = vld [vmem:[%s10658_s2 + $0x30] sm:$0xff] }
  0x6b   :  { %712 = vmatpush.msrb.mxu1 %v5121_v13  ;;  %752 = vmatpush.msrb.mxu3 %v5127_v14  ;;  %v303_v13 = vld [vmem:[%s10658_s2 + $0x138] sm:$0xff]  ;;  %v298_v14 = vld [vmem:[%s10658_s2 + $0x110] sm:$0xff] }
  0x6c   :  { %518 = vmatpush.msra.mxu2 %v303_v13  ;;  %479 = vmatpush.msra.mxu0 %v298_v14 }
  0x6d   :  { %713 = vmatpush.msrb.mxu1 %v5136_v16  ;;  %753 = vmatpush.msrb.mxu3 %v5147_v18  ;;  %v299_v16 = vld [vmem:[%s10658_s2 + $0x118] sm:$0xff]  ;;  %v46_v18 = vunpack.c.l.bf16 %v44_v10 }
  0x6e   :  { %519 = vmatpush.msra.mxu2 %v299_v16 }
  0x6f   :  { %714 = vmatpush.msrb.mxu1 %v5161_v21  ;;  %754 = vmatpush.msrb.mxu3 %v5168_v22  ;;  %v294_v21 = vld [vmem:[%s10658_s2 + $0xf0] sm:$0xff]  ;;  %v295_v22 = vld [vmem:[%s10658_s2 + $0xf8] sm:$0xff] }
  0x70   :  { %480 = vmatpush.msra.mxu0 %v294_v21  ;;  %520 = vmatpush.msra.mxu2 %v295_v22 }
  0x71   :  { %715 = vmatpush.msrb.mxu1 %v5182_v25  ;;  %755 = vmatpush.msrb.mxu3 %v5189_v26  ;;  %v290_v25 = vld [vmem:[%s10658_s2 + $0xd0] sm:$0xff]  ;;  %v291_v26 = vld [vmem:[%s10658_s2 + $0xd8] sm:$0xff] }
  0x72   :  { %481 = vmatpush.msra.mxu0 %v290_v25  ;;  %521 = vmatpush.msra.mxu2 %v291_v26 }
  0x73   :  { %716 = vmatpush.msrb.mxu1 %v5203_v29  ;;  %756 = vmatpush.msrb.mxu3 %v5210_v30  ;;  %v286_v30 = vld [vmem:[%s10658_s2 + $0xb0] sm:$0xff] }
  0x74   :  { %482 = vmatpush.msra.mxu0 %v286_v30  ;;  %522 = vmatpush.msra.mxu2 %v287_v56 }
  0x75   :  { %717 = vmatpush.msrb.mxu1 %v5224_v33  ;;  %757 = vmatpush.msrb.mxu3 %v5231_v34  ;;  %v282_v33 = vld [vmem:[%s10658_s2 + $0x90] sm:$0xff]  ;;  %v283_v34 = vld [vmem:[%s10658_s2 + $0x98] sm:$0xff] }
  0x76   :  { %483 = vmatpush.msra.mxu0 %v282_v33  ;;  %523 = vmatpush.msra.mxu2 %v283_v34  ;;  %v676_v33 = vld [vmem:[%s10657_s1 + $0x1a0] sm:$0xff] }
  0x77   :  { %718 = vmatpush.msrb.mxu1 %v5247_v37  ;;  %758 = vmatpush.msrb.mxu3 %v5254_v38  ;;  %v278_v37 = vld [vmem:[%s10658_s2 + $0x70] sm:$0xff]  ;;  %v279_v38 = vld [vmem:[%s10658_s2 + $0x78] sm:$0xff]  ;;  %v672_v34 = vld [vmem:[%s10657_s1 + $0x180] sm:$0xff] }
  0x78   :  { %484 = vmatpush.msra.mxu0 %v278_v37  ;;  %524 = vmatpush.msra.mxu2 %v279_v38  ;;  %v668_v37 = vld [vmem:[%s10657_s1 + $0x160] sm:$0xff]  ;;  %v10704_v38 = vld [vmem:[#allocation6_spill] sm:$0xff] }
  0x79   :  { %719 = vmatpush.msrb.mxu1 %v5270_v41  ;;  %759 = vmatpush.msrb.mxu3 %v5278_v42  ;;  %v274_v41 = vld [vmem:[%s10658_s2 + $0x50] sm:$0xff]  ;;  %v275_v42 = vld [vmem:[%s10658_s2 + $0x58] sm:$0xff] }
  0x7a   :  { %485 = vmatpush.msra.mxu0 %v274_v41  ;;  %525 = vmatpush.msra.mxu2 %v275_v42  ;;  %v10706_v41 = vld [vmem:[#allocation10_spill] sm:$0xff]  ;;  %v648_v42 = vld [vmem:[%s10657_s1 + $0xc0] sm:$0xff] }
  0x7b   :  { %720 = vmatpush.msrb.mxu1 %v5294_v45  ;;  %760 = vmatpush.msrb.mxu3 %v5302_v46  ;;  %v266_v45 = vld [vmem:[%s10658_s2 + $0x10] sm:$0xff]  ;;  %v267_v46 = vld [vmem:[%s10658_s2 + $0x18] sm:$0xff] }
  0x7c   :  { %486 = vmatpush.msra.mxu0 %v270_v63  ;;  %526 = vmatpush.msra.mxu2 %v271_v2  ;;  %v10708_v63 = vld [vmem:[#allocation14_spill] sm:$0xff]  ;;  %v10709_v2 = vld [vmem:[#allocation7_spill] sm:$0xff] }
  0x7d   :  { %721 = vmatpush.msrb.mxu1 %v5318_v49  ;;  %761 = vmatpush.msrb.mxu3 %v5326_v50  ;;  %v48_v49 = vunpack.c.l.bf16 %v5837_v47 }
  0x7e   :  { %487 = vmatpush.msra.mxu0 %v266_v45  ;;  %527 = vmatpush.msra.mxu2 %v267_v46  ;;  %v10711_v45 = vld [vmem:[#allocation9_spill] sm:$0xff]  ;;  %v10712_v46 = vld [vmem:[#allocation18_spill] sm:$0xff] }
  0x7f   :  { %722 = vmatpush.msrb.mxu1 %v5342_v53  ;;  %762 = vmatpush.msrb.mxu3 %v5350_v54 }
  0x81   :  { %723 = vmatpush.msrb.mxu1 %v5366_v57  ;;  %763 = vmatpush.msrb.mxu3 %v5374_v58 }
  0x83   :  { %986 = vmatpush.msra.mxu1 %v5388_v60  ;;  %1026 = vmatpush.msra.mxu3 %v5395_v62 }
  0x85   :  { %987 = vmatpush.msra.mxu1 %v5407_v0  ;;  %1027 = vmatpush.msra.mxu3 %v5417_v6 }
  0x87   :  { %988 = vmatpush.msra.mxu1 %v5431_v15  ;;  %1028 = vmatpush.msra.mxu3 %v5438_v20 }
  0x89   :  { %989 = vmatpush.msra.mxu1 %v5452_v32  ;;  %1029 = vmatpush.msra.mxu3 %v5459_v3 }
  0x8b   :  { %990 = vmatpush.msra.mxu1 %v5473_v9  ;;  %1030 = vmatpush.msra.mxu3 %v5480_v52 }
  0x8d   :  { %991 = vmatpush.msra.mxu1 %v5486_v12  ;;  %1031 = vmatpush.msra.mxu3 %v5496_v28 }
  0x8f   :  { %992 = vmatpush.msra.mxu1 %v5506_v61  ;;  %1032 = vmatpush.msra.mxu3 %v5515_v44 }
  0x91   :  { %993 = vmatpush.msra.mxu1 %v5524_v40  ;;  %1033 = vmatpush.msra.mxu3 %v5533_v24 }
  0x9e   :  { %v131_v51 = vpop.f32.mrf.mxu0 }
  0x9f   :  { %v194_v48 = vadd.f32 %v131_v51, %v46_v18  ;;  %v151_v43 = vpop.f32.mrf.mxu1 }
  0xa0   :  { %v195_v29 = vadd.f32 %v151_v43, %v47_v36 }
  0xa1   :  { %v4685_v39 = vmul.f32 -1.442695, %v194_v48 }
  0xa2   :  { %v4686_v31 = vmul.f32 -1.442695, %v195_v29 }
  0xa3   :  { %4749 = vpow2.f32 %v4685_v39 }
  0xa4   :  { %4751 = vpow2.f32 %v4686_v31  ;;  %v684_v31 = vld [vmem:[%s10657_s1 + $0x1e0] sm:$0xff] }
  0xa5   :  { %v191_v59 = vpop.f32.mrf.mxu3 }
  0xa6   :  { %v197_v55 = vadd.f32 %v191_v59, %v49_v35  ;;  %v680_v35 = vld [vmem:[%s10657_s1 + $0x1c0] sm:$0xff]  ;;  %v10705_v59 = vld [vmem:[#allocation8_spill] sm:$0xff] }
  0xa8   :  { %v4687_v1 = vmul.f32 -1.442695, %v197_v55  ;;  %v652_v55 = vld [vmem:[%s10657_s1 + $0xe0] sm:$0xff] }
  0xa9   :  { %v4750_v4 = vpop.eup %4749 }
  0xaa   :  { %v4752_v5 = vpop.eup %4751  ;;  %v201_v7 = vadd.f32 1.0, %v4750_v4  ;;  %4753 = vpow2.f32 %v4687_v1  ;;  %v10707_v1 = vld [vmem:[#allocation12_spill] sm:$0xff] }
  0xab   :  { %v220_v8 = vadd.f32 1.0, %v4752_v5  ;;  %v10710_v4 = vld [vmem:[#allocation16_spill] sm:$0xff]  ;;  %v10713_v5 = vld [vmem:[#allocation11_spill] sm:$0xff] }
  0xac   :  { %4755 = vrcp.f32 %v201_v7  ;;  %v213_v0 = vand.u32 2147483648, %v201_v7  ;;  %v211_v20 = vand.u32 2147483647, %v201_v7  ;;  %vm207_vm2 = vweird.f32 %v201_v7 }
  0xad   :  { %4757 = vrcp.f32 %v220_v8  ;;  %v171_v50 = vpop.f32.mrf.mxu2  ;;  %v232_v6 = vand.u32 2147483648, %v220_v8  ;;  %v230_v16 = vand.u32 2147483647, %v220_v8  ;;  %vm226_vm3 = vweird.f32 %v220_v8 }
  0xae   :  { %v196_v11 = vadd.f32 %v171_v50, %v48_v49  ;;  %v214_v9 = vor.u32 1.1754944e-38, %v213_v0  ;;  %vm212_vm5 = vcmp.eq.f32.partialorder %v211_v20, 8.507059e+37  ;;  %v10716_v49 = vld [vmem:[#allocation20_spill] sm:$0xff]  ;;  %v10717_v50 = vld [vmem:[#allocation15_spill] sm:$0xff]  ;;  %v918_v0 = vld [vmem:[%s10658_s2 + $0x280] sm:$0xff] }
  0xaf   :  { %v233_v21 = vor.u32 1.1754944e-38, %v232_v6  ;;  %vm231_vm7 = vcmp.eq.f32.partialorder %v230_v16, 8.507059e+37  ;;  %v919_v6 = vld [vmem:[%s10658_s2 + $0x288] sm:$0xff] }
  0xb0   :  { %v4754_v10 = vpop.eup %4753  ;;  %v899_v20 = vld [vmem:[%s10658_s2 + $0x1e8] sm:$0xff] }
  0xb1   :  { %v240_v53 = vadd.f32 1.0, %v4754_v10  ;;  %v10718_v10 = vld [vmem:[#allocation21_spill] sm:$0xff]  ;;  %v915_v16 = vld [vmem:[%s10658_s2 + $0x268] sm:$0xff] }
  0xb2   :  { %v4756_v54 = vpop.eup %4755 }
  0xb3   :  { %v4758_v57 = vpop.eup %4757  ;;  %v203_v13 = vmul.f32 %v4756_v54, %v201_v7  ;;  %4759 = vrcp.f32 %v240_v53  ;;  %vm208_vm0 = vweird.f32 %v4756_v54  ;;  %v252_v47 = vand.u32 2147483648, %v240_v53  ;;  %v10714_v7 = vld [vmem:[#allocation19_spill] sm:$0xff] }
  0xb4   :  { %v222_v58 = vmul.f32 %v4758_v57, %v220_v8  ;;  %4761 = vtanh.f32 %v196_v11  ;;  %vm227_vm1 = vweird.f32 %v4758_v57  ;;  %vm209_vm4 = vmor %vm207_vm2, %vm208_vm0  ;;  %vm246_vm9 = vweird.f32 %v240_v53  ;;  %v10715_v8 = vld [vmem:[#allocation13_spill] sm:$0xff] }
  0xb5   :  { %v204_v60 = vsub.f32 1.0, %v203_v13  ;;  %vm228_vm6 = vmor %vm226_vm3, %vm227_vm1  ;;  %v250_v29 = vand.u32 2147483647, %v240_v53  ;;  %v253_v56 = vor.u32 1.1754944e-38, %v252_v47  ;;  %v10719_v11 = vld [vmem:[#allocation17_spill] sm:$0xff] }
  0xb6   :  { %v223_v62 = vsub.f32 1.0, %v222_v58  ;;  %v926_v13 = vld [vmem:[%s10658_s2 + $0x2c0] sm:$0xff]  ;;  %v927_v58 = vld [vmem:[%s10658_s2 + $0x2c8] sm:$0xff] }
  0xb7   :  { %v205_v15 = vmul.f32 %v4756_v54, %v204_v60  ;;  %vm251_vm11 = vcmp.eq.f32.partialorder %v250_v29, 8.507059e+37  ;;  %v922_v60 = vld [vmem:[%s10658_s2 + $0x2a0] sm:$0xff]  ;;  %v965_v29 = vld [vmem:[%s10658_s2 + $0x3f8] sm:$0xff] }
  0xb8   :  { %v224_v14 = vmul.f32 %v4758_v57, %v223_v62  ;;  %v923_v62 = vld [vmem:[%s10658_s2 + $0x2a8] sm:$0xff]  ;;  %v6051_v47 = vld [vmem:[%s10660_s3] sm:$0xf] }
  0xb9   :  { %v4760_v32 = vpop.eup %4759  ;;  %v206_v3 = vadd.f32 %v4756_v54, %v205_v15  ;;  %v898_v15 = vld [vmem:[%s10658_s2 + $0x1e0] sm:$0xff] }
  0xba   :  { %v4762_v18 = vpop.eup %4761  ;;  %v242_v36 = vmul.f32 %v4760_v32, %v240_v53  ;;  %v225_v52 = vadd.f32 %v4758_v57, %v224_v14  ;;  %vm247_vm8 = vweird.f32 %v4760_v32  ;;  %v10720_v53 = vld [vmem:[#allocation22_spill] sm:$0xff]  ;;  %v914_v14 = vld [vmem:[%s10658_s2 + $0x260] sm:$0xff] }
  0xbb   :  { %v210_v22 = vsel %vm209_vm4, %v4756_v54, %v206_v3  ;;  %vm248_vm10 = vmor %vm246_vm9, %vm247_vm8  ;;  %v930_v54 = vld [vmem:[%s10658_s2 + $0x2e0] sm:$0xff]  ;;  %v895_v3 = vld [vmem:[%s10658_s2 + $0x1c8] sm:$0xff] }
  0xbc   :  { %v243_v12 = vsub.f32 1.0, %v242_v36  ;;  %v215_v28 = vsel %vm212_vm5, %v214_v9, %v210_v22  ;;  %v229_v51 = vsel %vm228_vm6, %v4758_v57, %v225_v52  ;;  %v931_v57 = vld [vmem:[%s10658_s2 + $0x2e8] sm:$0xff]  ;;  %994 = vmatpush.msra.mxu1 %v930_v54  ;;  %v910_v36 = vld [vmem:[%s10658_s2 + $0x240] sm:$0xff] }
  0xbd   :  { %v234_v25 = vsel %vm231_vm7, %v233_v21, %v229_v51  ;;  %v257_v26 = vmul.f32 %v4762_v18, %v215_v28  ;;  %1034 = vmatpush.msra.mxu3 %v931_v57  ;;  %v911_v9 = vld [vmem:[%s10658_s2 + $0x248] sm:$0xff]  ;;  %v890_v52 = vld [vmem:[%s10658_s2 + $0x1a0] sm:$0xff] }
  0xbe   :  { %v244_v48 = vmul.f32 %v4760_v32, %v243_v12  ;;  %v256_v43 = vmul.f32 0.0, %v234_v25  ;;  %995 = vmatpush.msra.mxu1 %v926_v13  ;;  %v891_v21 = vld [vmem:[%s10658_s2 + $0x1a8] sm:$0xff]  ;;  %v906_v22 = vld [vmem:[%s10658_s2 + $0x220] sm:$0xff] }
  0xbf   :  { %1035 = vmatpush.msra.mxu3 %v927_v58  ;;  %v6007_v18 = vpop.f32.mrf.mxu1  ;;  %v907_v12 = vld [vmem:[%s10658_s2 + $0x228] sm:$0xff]  ;;  %v886_v28 = vld [vmem:[%s10658_s2 + $0x180] sm:$0xff] }
  0xc0   :  { %v5910_v61 = vadd.f32 %v257_v26, %v256_v43  ;;  %v245_v44 = vadd.f32 %v4760_v32, %v244_v48  ;;  %996 = vmatpush.msra.mxu1 %v922_v60  ;;  %v887_v51 = vld [vmem:[%s10658_s2 + $0x188] sm:$0xff]  ;;  %v902_v25 = vld [vmem:[%s10658_s2 + $0x200] sm:$0xff]  ;;  %v936_v60 = vld [vmem:[%s10658_s2 + $0x310] sm:$0xff] }
  0xc1   :  { %1036 = vmatpush.msra.mxu3 %v923_v62  ;;  %v903_v26 = vld [vmem:[%s10658_s2 + $0x208] sm:$0xff]  ;;  %v882_v48 = vld [vmem:[%s10658_s2 + $0x160] sm:$0xff] }
  0xc2   :  { %4763 = vtanh.f32 %v5910_v61  ;;  %v249_v30 = vsel %vm248_vm10, %v4760_v32, %v245_v44  ;;  %997 = vmatpush.msra.mxu1 %v918_v0  ;;  %v894_v32 = vld [vmem:[%s10658_s2 + $0x1c0] sm:$0xff]  ;;  %v883_v43 = vld [vmem:[%s10658_s2 + $0x168] sm:$0xff]  ;;  %v964_v44 = vld [vmem:[%s10658_s2 + $0x3f0] sm:$0xff] }
  0xc3   :  { %v254_v39 = vsel %vm251_vm11, %v253_v56, %v249_v30  ;;  %1037 = vmatpush.msra.mxu3 %v919_v6  ;;  %v878_v30 = vld [vmem:[%s10658_s2 + $0x140] sm:$0xff]  ;;  %v879_v56 = vld [vmem:[%s10658_s2 + $0x148] sm:$0xff]  ;;  %v937_v6 = vld [vmem:[%s10658_s2 + $0x318] sm:$0xff] }
  0xc4   :  { %998 = vmatpush.msra.mxu1 %v914_v14  ;;  %v854_v13 = vld [vmem:[%s10658_s2 + $0x80] sm:$0xff]  ;;  %v855_v58 = vld [vmem:[%s10658_s2 + $0x88] sm:$0xff]  ;;  %v932_v14 = vld [vmem:[%s10658_s2 + $0x2f0] sm:$0xff] }
  0xc5   :  { %1038 = vmatpush.msra.mxu3 %v915_v16 }
  0xc6   :  { %999 = vmatpush.msra.mxu1 %v910_v36  ;;  %v846_v36 = vld [vmem:[%s10658_s2 + $0x40] sm:$0xff] }
  0xc7   :  { %1039 = vmatpush.msra.mxu3 %v911_v9  ;;  %v847_v9 = vld [vmem:[%s10658_s2 + $0x48] sm:$0xff] }
  0xc8   :  { %v4764_v40 = vpop.eup %4763  ;;  %1000 = vmatpush.msra.mxu1 %v906_v22  ;;  %v929_v22 = vld [vmem:[%s10658_s2 + $0x2d8] sm:$0xff] }
  0xc9   :  { %v260_v24 = vmul.f32 %v4764_v40, %v254_v39  ;;  %1040 = vmatpush.msra.mxu3 %v907_v12  ;;  %v960_v40 = vld [vmem:[%s10658_s2 + $0x3d0] sm:$0xff]  ;;  %v961_v39 = vld [vmem:[%s10658_s2 + $0x3d8] sm:$0xff]  ;;  %v842_v12 = vld [vmem:[%s10658_s2 + $0x20] sm:$0xff] }
  0xca   :  { %1001 = vmatpush.msra.mxu1 %v902_v25 }
  0xcb   :  { %408 = vmatmul.f32.vlgmr.msrb.gmra.mxu0 %v260_v24  ;;  %448 = vmatmul.f32.vlgmr.msrb.gmra.mxu2 %v260_v24 }
  0xcc   :  { %688 = vmatpush.msrb.mxu0 %v684_v31  ;;  %724 = vmatmul.f32.vlgmr.msrb.gmra.mxu1 %v260_v24  ;;  %v875_v31 = vld [vmem:[%s10658_s2 + $0x128] sm:$0xff] }
  0xcd   :  { %728 = vmatpush.msrb.mxu2 %v5141_v17  ;;  %764 = vmatmul.f32.vlgmr.msrb.gmra.mxu3 %v260_v24  ;;  %v664_v17 = vld [vmem:[%s10657_s1 + $0x140] sm:$0xff] }
  0xce   :  { %689 = vmatpush.msrb.mxu0 %v680_v35  ;;  %1041 = vmatpush.msra.mxu3 %v903_v26  ;;  %v956_v35 = vld [vmem:[%s10658_s2 + $0x3b0] sm:$0xff]  ;;  %v6193_v26 = vld [vmem:[%s10659_s0 + $0x18] sm:$0xff] }
  0xcf   :  { %729 = vmatpush.msrb.mxu2 %v5152_v19  ;;  %v10703_v19 = vld [vmem:[#allocation5_spill] sm:$0xff]  ;;  %1066 = vmatpush.msrb.mxu1 %v964_v44 }
  0xd0   :  { %690 = vmatpush.msrb.mxu0 %v676_v33  ;;  %1106 = vmatpush.msrb.mxu3 %v965_v29 }
  0xd1   :  { %730 = vmatpush.msrb.mxu2 %v5173_v23  ;;  %v660_v23 = vld [vmem:[%s10657_s1 + $0x120] sm:$0xff]  ;;  %1067 = vmatpush.msrb.mxu1 %v960_v40  ;;  %v920_v40 = vld [vmem:[%s10658_s2 + $0x290] sm:$0xff] }
  0xd2   :  { %691 = vmatpush.msrb.mxu0 %v672_v34  ;;  %1107 = vmatpush.msrb.mxu3 %v961_v39  ;;  %v6080_v34 = vperm.slane %v6051_v47, 0 }
  0xd3   :  { %731 = vmatpush.msrb.mxu2 %v5194_v27  ;;  %488 = vmatmul.f32.vlgmr.msra.gmra.mxu0 %v260_v24  ;;  %v656_v27 = vld [vmem:[%s10657_s1 + $0x100] sm:$0xff] }
  0xd4   :  { %528 = vmatmul.f32.vlgmr.msra.gmra.mxu2 %v260_v24  ;;  %692 = vmatpush.msrb.mxu0 %v668_v37  ;;  %v957_v37 = vld [vmem:[%s10658_s2 + $0x3b8] sm:$0xff] }
  0xd5   :  { %732 = vmatpush.msrb.mxu2 %v10703_v19  ;;  %1068 = vmatpush.msrb.mxu1 %v956_v35  ;;  %v871_v19 = vld [vmem:[%s10658_s2 + $0x108] sm:$0xff]  ;;  %v901_v35 = vld [vmem:[%s10658_s2 + $0x1f8] sm:$0xff] }
  0xd6   :  { %693 = vmatpush.msrb.mxu0 %v664_v17  ;;  %1108 = vmatpush.msrb.mxu3 %v957_v37  ;;  %v870_v17 = vld [vmem:[%s10658_s2 + $0x100] sm:$0xff]  ;;  %v916_v37 = vld [vmem:[%s10658_s2 + $0x270] sm:$0xff] }
  0xd7   :  { %733 = vmatpush.msrb.mxu2 %v10704_v38  ;;  %v469_v38 = vpop.f32.mrf.mxu3 }
  0xd8   :  { %694 = vmatpush.msrb.mxu0 %v660_v23  ;;  %v952_v23 = vld [vmem:[%s10658_s2 + $0x390] sm:$0xff] }
  0xd9   :  { %734 = vmatpush.msrb.mxu2 %v10705_v59  ;;  %1069 = vmatpush.msrb.mxu1 %v952_v23  ;;  %v896_v23 = vld [vmem:[%s10658_s2 + $0x1d0] sm:$0xff] }
  0xda   :  { %695 = vmatpush.msrb.mxu0 %v656_v27  ;;  %v953_v27 = vld [vmem:[%s10658_s2 + $0x398] sm:$0xff] }
  0xdb   :  { %735 = vmatpush.msrb.mxu2 %v10706_v41  ;;  %1109 = vmatpush.msrb.mxu3 %v953_v27  ;;  %v867_v41 = vld [vmem:[%s10658_s2 + $0xe8] sm:$0xff]  ;;  %v623_v27 = vunpack.c.h.bf16 %v6193_v26 }
  0xdc   :  { %696 = vmatpush.msrb.mxu0 %v652_v55  ;;  %v866_v55 = vld [vmem:[%s10658_s2 + $0xe0] sm:$0xff] }
  0xdd   :  { %736 = vmatpush.msrb.mxu2 %v10707_v1 }
  0xde   :  { %697 = vmatpush.msrb.mxu0 %v648_v42  ;;  %v948_v42 = vld [vmem:[%s10658_s2 + $0x370] sm:$0xff] }
  0xdf   :  { %737 = vmatpush.msrb.mxu2 %v10708_v63  ;;  %v6077_v33 = vpop.f32.mrf.mxu1  ;;  %v949_v63 = vld [vmem:[%s10658_s2 + $0x378] sm:$0xff]  ;;  %1070 = vmatpush.msrb.mxu1 %v948_v42 }
  0xe0   :  { %698 = vmatpush.msrb.mxu0 %v10709_v2  ;;  %1110 = vmatpush.msrb.mxu3 %v949_v63  ;;  %v862_v2 = vld [vmem:[%s10658_s2 + $0xc0] sm:$0xff]  ;;  %v892_v63 = vld [vmem:[%s10658_s2 + $0x1b0] sm:$0xff] }
  0xe1   :  { %738 = vmatpush.msrb.mxu2 %v10710_v4  ;;  %v863_v4 = vld [vmem:[%s10658_s2 + $0xc8] sm:$0xff] }
  0xe2   :  { %699 = vmatpush.msrb.mxu0 %v10711_v45  ;;  %v944_v45 = vld [vmem:[%s10658_s2 + $0x350] sm:$0xff] }
  0xe3   :  { %739 = vmatpush.msrb.mxu2 %v10712_v46  ;;  %1071 = vmatpush.msrb.mxu1 %v944_v45  ;;  %v6251_v45 = vperm.slane %v6051_v47, 2 }
  0xe4   :  { %700 = vmatpush.msrb.mxu0 %v10713_v5  ;;  %v6123_v5 = vld [vmem:[%s10659_s0 + $0x10] sm:$0xff] }
  0xe5   :  { %740 = vmatpush.msrb.mxu2 %v10714_v7  ;;  %v6126_v7 = vperm.slane %v6051_v47, 1  ;;  %v621_v54 = vunpack.c.h.bf16 %v6123_v5 }
  0xe6   :  { %701 = vmatpush.msrb.mxu0 %v10715_v8  ;;  %v945_v8 = vld [vmem:[%s10658_s2 + $0x358] sm:$0xff] }
  0xe7   :  { %741 = vmatpush.msrb.mxu2 %v10716_v49  ;;  %1111 = vmatpush.msrb.mxu3 %v945_v8  ;;  %v858_v49 = vld [vmem:[%s10658_s2 + $0xa0] sm:$0xff]  ;;  %v909_v8 = vld [vmem:[%s10658_s2 + $0x238] sm:$0xff] }
  0xe8   :  { %702 = vmatpush.msrb.mxu0 %v10717_v50  ;;  %v859_v50 = vld [vmem:[%s10658_s2 + $0xa8] sm:$0xff] }
  0xe9   :  { %742 = vmatpush.msrb.mxu2 %v10718_v10  ;;  %v940_v10 = vld [vmem:[%s10658_s2 + $0x330] sm:$0xff] }
  0xea   :  { %703 = vmatpush.msrb.mxu0 %v10719_v11  ;;  %1072 = vmatpush.msrb.mxu1 %v940_v10  ;;  %v888_v10 = vld [vmem:[%s10658_s2 + $0x190] sm:$0xff] }
  0xeb   :  { %743 = vmatpush.msrb.mxu2 %v10720_v53  ;;  %704 = vmatmul.f32.vlgmr.msrb.gmra.mxu0 %v260_v24  ;;  %v941_v53 = vld [vmem:[%s10658_s2 + $0x338] sm:$0xff] }
  0xec   :  { %744 = vmatmul.f32.vlgmr.msrb.gmra.mxu2 %v260_v24  ;;  %966 = vmatpush.msra.mxu0 %v898_v15  ;;  %v874_v24 = vld [vmem:[%s10658_s2 + $0x120] sm:$0xff] }
  0xed   :  { %1006 = vmatpush.msra.mxu2 %v899_v20  ;;  %1112 = vmatpush.msrb.mxu3 %v941_v53  ;;  %v850_v15 = vld [vmem:[%s10658_s2 + $0x60] sm:$0xff]  ;;  %v851_v20 = vld [vmem:[%s10658_s2 + $0x68] sm:$0xff]  ;;  %v549_v16 = vpop.f32.mrf.mxu3 }
  0xee   :  { %967 = vmatpush.msra.mxu0 %v894_v32  ;;  %1073 = vmatpush.msrb.mxu1 %v936_v60 }
  0xef   :  { %1007 = vmatpush.msra.mxu2 %v895_v3  ;;  %1113 = vmatpush.msrb.mxu3 %v937_v6  ;;  %v933_v3 = vld [vmem:[%s10658_s2 + $0x2f8] sm:$0xff] }
  0xf0   :  { %968 = vmatpush.msra.mxu0 %v890_v52  ;;  %1074 = vmatpush.msrb.mxu1 %v932_v14  ;;  %v928_v52 = vld [vmem:[%s10658_s2 + $0x2d0] sm:$0xff]  ;;  %v881_v14 = vld [vmem:[%s10658_s2 + $0x158] sm:$0xff] }
  0xf1   :  { %1008 = vmatpush.msra.mxu2 %v891_v21  ;;  %1114 = vmatpush.msrb.mxu3 %v933_v3 }
  0xf2   :  { %969 = vmatpush.msra.mxu0 %v886_v28  ;;  %1075 = vmatpush.msrb.mxu1 %v928_v52  ;;  %v843_v28 = vld [vmem:[%s10658_s2 + $0x28] sm:$0xff] }
  0xf3   :  { %1009 = vmatpush.msra.mxu2 %v887_v51  ;;  %1115 = vmatpush.msrb.mxu3 %v929_v22  ;;  %v924_v51 = vld [vmem:[%s10658_s2 + $0x2b0] sm:$0xff]  ;;  %v620_v22 = vunpack.c.l.bf16 %v6123_v5 }
  0xf4   :  { %970 = vmatpush.msra.mxu0 %v882_v48  ;;  %v6196_v48 = vperm.slane %v6051_v47, 3  ;;  %1076 = vmatpush.msrb.mxu1 %v924_v51  ;;  %v889_v47 = vld [vmem:[%s10658_s2 + $0x198] sm:$0xff] }
  0xf5   :  { %1010 = vmatpush.msra.mxu2 %v883_v43  ;;  %v925_v43 = vld [vmem:[%s10658_s2 + $0x2b8] sm:$0xff] }
  0xf6   :  { %971 = vmatpush.msra.mxu0 %v878_v30  ;;  %1116 = vmatpush.msrb.mxu3 %v925_v43  ;;  %v838_v30 = vld [vmem:[%s10658_s2] sm:$0xff] }
  0xf7   :  { %1011 = vmatpush.msra.mxu2 %v879_v56  ;;  %v839_v56 = vld [vmem:[%s10658_s2 + $0x8] sm:$0xff]  ;;  %1077 = vmatpush.msrb.mxu1 %v920_v40 }
  0xf8   :  { %972 = vmatpush.msra.mxu0 %v874_v24  ;;  %v921_v24 = vld [vmem:[%s10658_s2 + $0x298] sm:$0xff] }
  0xf9   :  { %1012 = vmatpush.msra.mxu2 %v875_v31  ;;  %v900_v31 = vld [vmem:[%s10658_s2 + $0x1f0] sm:$0xff]  ;;  %1117 = vmatpush.msrb.mxu3 %v921_v24 }
  0xfa   :  { %973 = vmatpush.msra.mxu0 %v870_v17  ;;  %v917_v17 = vld [vmem:[%s10658_s2 + $0x278] sm:$0xff]  ;;  %1078 = vmatpush.msrb.mxu1 %v916_v37 }
  0xfb   :  { %1013 = vmatpush.msra.mxu2 %v871_v19  ;;  %1118 = vmatpush.msrb.mxu3 %v917_v17  ;;  %v864_v17 = vld [vmem:[%s10658_s2 + $0xd0] sm:$0xff] }
  0xfc   :  { %974 = vmatpush.msra.mxu0 %v866_v55  ;;  %v913_v55 = vld [vmem:[%s10658_s2 + $0x258] sm:$0xff] }
  0xfd   :  { %1014 = vmatpush.msra.mxu2 %v867_v41  ;;  %1119 = vmatpush.msrb.mxu3 %v913_v55 }
  0xfe   :  { %975 = vmatpush.msra.mxu0 %v862_v2  ;;  %v893_v2 = vld [vmem:[%s10658_s2 + $0x1b8] sm:$0xff] }
  0xff   :  { %1015 = vmatpush.msra.mxu2 %v863_v4  ;;  %1120 = vmatpush.msrb.mxu3 %v909_v8  ;;  %v857_v8 = vld [vmem:[%s10658_s2 + $0x98] sm:$0xff] }
 0x100   :  { %976 = vmatpush.msra.mxu0 %v858_v49 }
 0x101   :  { %1016 = vmatpush.msra.mxu2 %v859_v50 }
 0x102   :  { %977 = vmatpush.msra.mxu0 %v854_v13 }
 0x103   :  { %1017 = vmatpush.msra.mxu2 %v855_v58 }
 0x104   :  { %978 = vmatpush.msra.mxu0 %v850_v15 }
 0x105   :  { %1018 = vmatpush.msra.mxu2 %v851_v20  ;;  %v880_v20 = vld [vmem:[%s10658_s2 + $0x150] sm:$0xff] }
 0x106   :  { %979 = vmatpush.msra.mxu0 %v846_v36  ;;  %v876_v36 = vld [vmem:[%s10658_s2 + $0x130] sm:$0xff] }
 0x107   :  { %1019 = vmatpush.msra.mxu2 %v847_v9  ;;  %v877_v9 = vld [vmem:[%s10658_s2 + $0x138] sm:$0xff] }
 0x108   :  { %980 = vmatpush.msra.mxu0 %v842_v12  ;;  %v872_v12 = vld [vmem:[%s10658_s2 + $0x110] sm:$0xff] }
 0x109   :  { %1020 = vmatpush.msra.mxu2 %v843_v28  ;;  %v873_v28 = vld [vmem:[%s10658_s2 + $0x118] sm:$0xff] }
 0x10a   :  { %981 = vmatpush.msra.mxu0 %v838_v30 }
 0x10b   :  { %1021 = vmatpush.msra.mxu2 %v839_v56 }
 0x10c   :  { %1046 = vmatpush.msrb.mxu0 %v900_v31 }
 0x10d   :  { %1086 = vmatpush.msrb.mxu2 %v901_v35 }
 0x10e   :  { %1047 = vmatpush.msrb.mxu0 %v896_v23 }
 0x110   :  { %1048 = vmatpush.msrb.mxu0 %v892_v63 }
 0x112   :  { %1049 = vmatpush.msrb.mxu0 %v888_v10 }
 0x148   :  { %v409_v59 = vpop.f32.mrf.mxu0 }
 0x149   :  { %v410_v1 = vadd.f32 %v409_v59, %v6080_v34  ;;  %v725_v62 = vpop.f32.mrf.mxu1  ;;  %v912_v59 = vld [vmem:[%s10658_s2 + $0x250] sm:$0xff] }
 0x14a   :  { %1079 = vmatpush.msrb.mxu1 %v912_v59 }
 0x14b   :  { %v430_v46 = vadd.f32 %v6007_v18, %v410_v1  ;;  %v769_v18 = vadd.f32 %v725_v62, %v621_v54  ;;  %v904_v54 = vld [vmem:[%s10658_s2 + $0x210] sm:$0xff] }
 0x14c   :  { %v884_v62 = vld [vmem:[%s10658_s2 + $0x170] sm:$0xff] }
 0x14d   :  { %v4688_v11 = vmul.f32 -1.442695, %v430_v46  ;;  %v4694_v29 = vmul.f32 -1.442695, %v769_v18  ;;  %v908_v46 = vld [vmem:[%s10658_s2 + $0x230] sm:$0xff]  ;;  %1050 = vmatpush.msrb.mxu0 %v884_v62 }
 0x14e   :  { %v449_v57 = vpop.f32.mrf.mxu2  ;;  %1080 = vmatpush.msrb.mxu1 %v908_v46  ;;  %v856_v46 = vld [vmem:[%s10658_s2 + $0x90] sm:$0xff] }
 0x14f   :  { %4765 = vpow2.f32 %v4688_v11  ;;  %v450_v0 = vadd.f32 %v449_v57, %v6126_v7  ;;  %v905_v57 = vld [vmem:[%s10658_s2 + $0x218] sm:$0xff]  ;;  %1051 = vmatpush.msrb.mxu0 %v880_v20 }
 0x150   :  { %v765_v42 = vpop.f32.mrf.mxu3  ;;  %v489_v49 = vpop.f32.mrf.mxu0  ;;  %1081 = vmatpush.msrb.mxu1 %v904_v54  ;;  %1121 = vmatpush.msrb.mxu3 %v905_v57 }
 0x151   :  { %v470_v32 = vadd.f32 %v469_v38, %v450_v0  ;;  %v897_v38 = vld [vmem:[%s10658_s2 + $0x1d8] sm:$0xff]  ;;  %v771_v53 = vadd.f32 %v765_v42, %v623_v27  ;;  %v490_v60 = vadd.f32 %v489_v49, %v6251_v45  ;;  %1052 = vmatpush.msrb.mxu0 %v876_v36  ;;  %v840_v36 = vld [vmem:[%s10658_s2 + $0x10] sm:$0xff] }
 0x152   :  { %1087 = vmatpush.msrb.mxu2 %v897_v38  ;;  %v885_v0 = vld [vmem:[%s10658_s2 + $0x178] sm:$0xff] }
 0x153   :  { %v4689_v21 = vmul.f32 -1.442695, %v470_v32  ;;  %v4695_v15 = vmul.f32 -1.442695, %v771_v53  ;;  %v510_v18 = vadd.f32 %v6077_v33, %v490_v60  ;;  %1053 = vmatpush.msrb.mxu0 %v872_v12  ;;  %v861_v42 = vld [vmem:[%s10658_s2 + $0xb8] sm:$0xff] }
 0x154   :  { %1088 = vmatpush.msrb.mxu2 %v893_v2  ;;  %v853_v53 = vld [vmem:[%s10658_s2 + $0x78] sm:$0xff] }
 0x155   :  { %v4766_v25 = vpop.eup %4765  ;;  %4767 = vpow2.f32 %v4689_v21  ;;  %v849_v60 = vld [vmem:[%s10658_s2 + $0x58] sm:$0xff] }
 0x156   :  { %v6201_v44 = vadd.f32 1.0, %v4766_v25  ;;  %1089 = vmatpush.msrb.mxu2 %v889_v47 }
 0x157   :  { %v529_v39 = vpop.f32.mrf.mxu2 }
 0x158   :  { %4769 = vrcp.f32 %v6201_v44  ;;  %v530_v19 = vadd.f32 %v529_v39, %v6196_v48  ;;  %1090 = vmatpush.msrb.mxu2 %v885_v0  ;;  %v567_v33 = vand.u32 2147483648, %v6201_v44  ;;  %vm561_vm13 = vweird.f32 %v6201_v44  ;;  %v869_v39 = vld [vmem:[%s10658_s2 + $0xf8] sm:$0xff] }
 0x159   :  { %4771 = vpow2.f32 %v4694_v29  ;;  %v565_v5 = vand.u32 2147483647, %v6201_v44  ;;  %v1259_v29 = vld [vmem:[%s10657_s1 + $0x1e8] sm:$0xff] }
 0x15a   :  { %v550_v1 = vadd.f32 %v549_v16, %v530_v19  ;;  %1091 = vmatpush.msrb.mxu2 %v881_v14  ;;  %v568_v37 = vor.u32 1.1754944e-38, %v567_v33  ;;  %v865_v19 = vld [vmem:[%s10658_s2 + $0xd8] sm:$0xff] }
 0x15b   :  { %v4768_v41 = vpop.eup %4767  ;;  %vm566_vm1 = vcmp.eq.f32.partialorder %v565_v5, 8.507059e+37  ;;  %v845_v14 = vld [vmem:[%s10658_s2 + $0x38] sm:$0xff] }
 0x15c   :  { %v6248_v4 = vadd.f32 1.0, %v4768_v41  ;;  %v4690_v50 = vmul.f32 -1.442695, %v550_v1  ;;  %1092 = vmatpush.msrb.mxu2 %v877_v9  ;;  %v860_v41 = vld [vmem:[%s10658_s2 + $0xb0] sm:$0xff]  ;;  %v841_v9 = vld [vmem:[%s10658_s2 + $0x18] sm:$0xff] }
 0x15e   :  { %v6265_v11 = vpop.eup %4769  ;;  %4773 = vrcp.f32 %v6248_v4  ;;  %1093 = vmatpush.msrb.mxu2 %v873_v28  ;;  %v586_v43 = vand.u32 2147483648, %v6248_v4  ;;  %v584_v30 = vand.u32 2147483647, %v6248_v4  ;;  %vm580_vm0 = vweird.f32 %v6248_v4 }
 0x15f   :  { %v557_v13 = vmul.f32 %v6265_v11, %v6201_v44  ;;  %v4772_v58 = vpop.eup %4771  ;;  %4775 = vpow2.f32 %v4690_v50  ;;  %vm562_vm12 = vweird.f32 %v6265_v11  ;;  %v868_v44 = vld [vmem:[%s10658_s2 + $0xf0] sm:$0xff] }
 0x160   :  { %v6289_v16 = vadd.f32 1.0, %v4772_v58  ;;  %4777 = vpow2.f32 %v4695_v15  ;;  %vm6316_vm14 = vmor %vm561_vm13, %vm562_vm12  ;;  %1054 = vmatpush.msrb.mxu0 %v868_v44  ;;  %1094 = vmatpush.msrb.mxu2 %v869_v39  ;;  %v587_v59 = vor.u32 1.1754944e-38, %v586_v43  ;;  %vm585_vm3 = vcmp.eq.f32.partialorder %v584_v30, 8.507059e+37  ;;  %v848_v58 = vld [vmem:[%s10658_s2 + $0x50] sm:$0xff]  ;;  %v1255_v39 = vld [vmem:[%s10657_s1 + $0x1c8] sm:$0xff] }
 0x161   :  { %v558_v6 = vsub.f32 1.0, %v557_v13 }
 0x162   :  { %4779 = vrcp.f32 %v6289_v16  ;;  %1055 = vmatpush.msrb.mxu0 %v864_v17  ;;  %1095 = vmatpush.msrb.mxu2 %v865_v19  ;;  %vm800_vm9 = vweird.f32 %v6289_v16  ;;  %v804_v17 = vand.u32 2147483647, %v6289_v16  ;;  %v1251_v19 = vld [vmem:[%s10657_s1 + $0x1a8] sm:$0xff] }
 0x163   :  { %v559_v32 = vmul.f32 %v6265_v11, %v558_v6  ;;  %4781 = vtanh.f32 %v510_v18  ;;  %v844_v6 = vld [vmem:[%s10658_s2 + $0x30] sm:$0xff] }
 0x164   :  { %v4774_v3 = vpop.eup %4773  ;;  %1056 = vmatpush.msrb.mxu0 %v860_v41  ;;  %1096 = vmatpush.msrb.mxu2 %v861_v42  ;;  %v1247_v41 = vld [vmem:[%s10657_s1 + $0x188] sm:$0xff]  ;;  %v1249_v42 = vld [vmem:[%s10657_s1 + $0x198] sm:$0xff]  ;;  %vm805_vm13 = vcmp.eq.f32.partialorder %v804_v17, 8.507059e+37  ;;  %v1248_v17 = vld [vmem:[%s10657_s1 + $0x190] sm:$0xff] }
 0x165   :  { %v576_v52 = vmul.f32 %v4774_v3, %v6248_v4  ;;  %v560_v21 = vadd.f32 %v6265_v11, %v559_v32  ;;  %v4776_v51 = vpop.eup %4775  ;;  %vm581_vm15 = vweird.f32 %v4774_v3 }
 0x166   :  { %v6321_v56 = vadd.f32 1.0, %v4776_v51  ;;  %v4778_v27 = vpop.eup %4777  ;;  %vm582_vm2 = vmor %vm580_vm0, %vm581_vm15  ;;  %1057 = vmatpush.msrb.mxu0 %v856_v46  ;;  %1097 = vmatpush.msrb.mxu2 %v857_v8  ;;  %v1245_v46 = vld [vmem:[%s10657_s1 + $0x178] sm:$0xff] }
 0x167   :  { %v577_v25 = vsub.f32 1.0, %v576_v52  ;;  %v564_v31 = vsel %vm6316_vm14, %v6265_v11, %v560_v21  ;;  %v6355_v47 = vadd.f32 1.0, %v4778_v27  ;;  %v852_v11 = vld [vmem:[%s10658_s2 + $0x70] sm:$0xff]  ;;  %v622_v21 = vunpack.c.l.bf16 %v6193_v26  ;;  %v1261_v26 = vld [vmem:[%s10657_s1 + $0x1f8] sm:$0xff] }
 0x168   :  { %v705_v40 = vpop.f32.mrf.mxu0  ;;  %4783 = vrcp.f32 %v6321_v56  ;;  %v569_v55 = vsel %vm566_vm1, %v568_v37, %v564_v31  ;;  %v6347_v1 = vpop.eup %4779  ;;  %1058 = vmatpush.msrb.mxu0 %v852_v11  ;;  %1098 = vmatpush.msrb.mxu2 %v853_v53  ;;  %v606_v20 = vand.u32 2147483648, %v6321_v56  ;;  %v604_v18 = vand.u32 2147483647, %v6321_v56  ;;  %v1241_v11 = vld [vmem:[%s10657_s1 + $0x158] sm:$0xff] }
 0x169   :  { %v578_v24 = vmul.f32 %v4774_v3, %v577_v25  ;;  %v768_v35 = vadd.f32 %v705_v40, %v620_v22  ;;  %v4782_v2 = vpop.eup %4781  ;;  %v796_v54 = vmul.f32 %v6347_v1, %v6289_v16  ;;  %vm600_vm5 = vweird.f32 %v6321_v56 }
 0x16a   :  { %v611_v50 = vmul.f32 %v4782_v2, %v569_v55  ;;  %1059 = vmatpush.msrb.mxu0 %v848_v58  ;;  %1099 = vmatpush.msrb.mxu2 %v849_v60  ;;  %v607_v22 = vor.u32 1.1754944e-38, %v606_v20  ;;  %vm605_vm7 = vcmp.eq.f32.partialorder %v604_v18, 8.507059e+37  ;;  %vm801_vm8 = vweird.f32 %v6347_v1 }
 0x16b   :  { %v579_v23 = vadd.f32 %v4774_v3, %v578_v24  ;;  %v4693_v38 = vmul.f32 -1.442695, %v768_v35  ;;  %v797_v32 = vsub.f32 1.0, %v796_v54  ;;  %v1257_v24 = vld [vmem:[%s10657_s1 + $0x1d8] sm:$0xff]  ;;  %v806_v31 = vand.u32 2147483648, %v6289_v16  ;;  %vm6426_vm10 = vmor %vm800_vm9, %vm801_vm8 }
 0x16c   :  { %1060 = vmatpush.msrb.mxu0 %v844_v6  ;;  %1100 = vmatpush.msrb.mxu2 %v845_v14  ;;  %v826_v14 = vand.u32 2147483648, %v6355_v47  ;;  %vm820_vm1 = vweird.f32 %v6355_v47  ;;  %v824_v18 = vand.u32 2147483647, %v6355_v47 }
 0x16d   :  { %v583_v63 = vsel %vm582_vm2, %v4774_v3, %v579_v23  ;;  %4785 = vpow2.f32 %v4693_v38  ;;  %v798_v12 = vmul.f32 %v6347_v1, %v797_v32  ;;  %v1253_v23 = vld [vmem:[%s10657_s1 + $0x1b8] sm:$0xff]  ;;  %v1227_v32 = vld [vmem:[%s10657_s1 + $0xe8] sm:$0xff]  ;;  %v1242_v38 = vld [vmem:[%s10657_s1 + $0x160] sm:$0xff] }
 0x16e   :  { %v588_v4 = vsel %vm585_vm3, %v587_v59, %v583_v63  ;;  %v4784_v10 = vpop.eup %4783  ;;  %1061 = vmatpush.msrb.mxu0 %v840_v36  ;;  %1101 = vmatpush.msrb.mxu2 %v841_v9  ;;  %v807_v63 = vor.u32 1.1754944e-38, %v806_v31  ;;  %v1223_v36 = vld [vmem:[%s10657_s1 + $0xc8] sm:$0xff]  ;;  %v1225_v9 = vld [vmem:[%s10657_s1 + $0xd8] sm:$0xff]  ;;  %vm825_vm3 = vcmp.eq.f32.partialorder %v824_v18, 8.507059e+37  ;;  %v1524_v18 = vld [vmem:[%s10658_s2 + $0x380] sm:$0xff] }
 0x16f   :  { %v610_v49 = vmul.f32 0.0, %v588_v4  ;;  %v596_v13 = vmul.f32 %v4784_v10, %v6321_v56  ;;  %vm601_vm4 = vweird.f32 %v4784_v10  ;;  %v745_v28 = vpop.f32.mrf.mxu2  ;;  %v799_v44 = vadd.f32 %v6347_v1, %v798_v12  ;;  %v1203_v31 = vld [vmem:[%s10657_s1 + $0x28] sm:$0xff] }
 0x170   :  { %vm602_vm6 = vmor %vm600_vm5, %vm601_vm4  ;;  %v770_v56 = vadd.f32 %v745_v28, %v622_v21  ;;  %v827_v21 = vor.u32 1.1754944e-38, %v826_v14  ;;  %v1215_v28 = vld [vmem:[%s10657_s1 + $0x88] sm:$0xff] }
 0x171   :  { %v6365_v57 = vadd.f32 %v611_v50, %v610_v49  ;;  %v597_v0 = vsub.f32 1.0, %v596_v13  ;;  %v803_v55 = vsel %vm6426_vm10, %v6347_v1, %v799_v44  ;;  %v1243_v1 = vld [vmem:[%s10657_s1 + $0x168] sm:$0xff]  ;;  %v1209_v44 = vld [vmem:[%s10657_s1 + $0x58] sm:$0xff] }
 0x172   :  { %v808_v49 = vsel %vm805_vm13, %v807_v63, %v803_v55  ;;  %v1234_v55 = vld [vmem:[%s10657_s1 + $0x120] sm:$0xff]  ;;  %v1232_v63 = vld [vmem:[%s10657_s1 + $0x110] sm:$0xff]  ;;  %v1533_v14 = vld [vmem:[%s10658_s2 + $0x3c8] sm:$0xff] }
 0x173   :  { %v4786_v62 = vpop.eup %4785  ;;  %4787 = vtanh.f32 %v6365_v57  ;;  %v598_v3 = vmul.f32 %v4784_v10, %v597_v0  ;;  %v830_v58 = vmul.f32 %v808_v49, %v5910_v61  ;;  %v1237_v0 = vld [vmem:[%s10657_s1 + $0x138] sm:$0xff]  ;;  %v1220_v49 = vld [vmem:[%s10657_s1 + $0xb0] sm:$0xff] }
 0x174   :  { %4789 = vrcp.f32 %v6355_v47  ;;  %v6379_v15 = vadd.f32 1.0, %v4786_v62  ;;  %v1235_v62 = vld [vmem:[%s10657_s1 + $0x128] sm:$0xff]  ;;  %v1233_v61 = vld [vmem:[%s10657_s1 + $0x118] sm:$0xff] }
 0x175   :  { %v599_v52 = vadd.f32 %v4784_v10, %v598_v3  ;;  %v1229_v3 = vld [vmem:[%s10657_s1 + $0xf8] sm:$0xff] }
 0x176   :  { %4791 = vrcp.f32 %v6379_v15  ;;  %v787_v27 = vand.u32 2147483648, %v6379_v15  ;;  %v785_v59 = vand.u32 2147483647, %v6379_v15  ;;  %vm781_vm12 = vweird.f32 %v6379_v15 }
 0x177   :  { %v603_v51 = vsel %vm602_vm6, %v4784_v10, %v599_v52  ;;  %4793 = vtanh.f32 %v770_v56  ;;  %v1239_v10 = vld [vmem:[%s10657_s1 + $0x148] sm:$0xff]  ;;  %v1256_v56 = vld [vmem:[%s10657_s1 + $0x1d0] sm:$0xff] }
 0x178   :  { %v608_v5 = vsel %vm605_vm7, %v607_v22, %v603_v51  ;;  %v788_v8 = vor.u32 1.1754944e-38, %v787_v27  ;;  %vm786_vm15 = vcmp.eq.f32.partialorder %v785_v59, 8.507059e+37  ;;  %v1221_v22 = vld [vmem:[%s10657_s1 + $0xb8] sm:$0xff]  ;;  %v1244_v27 = vld [vmem:[%s10657_s1 + $0x170] sm:$0xff] }
 0x179   :  { %v4788_v33 = vpop.eup %4787  ;;  %v1217_v51 = vld [vmem:[%s10657_s1 + $0x98] sm:$0xff]  ;;  %v1240_v59 = vld [vmem:[%s10657_s1 + $0x150] sm:$0xff] }
 0x17a   :  { %v6396_v25 = vpop.eup %4789  ;;  %v614_v43 = vmul.f32 %v4788_v33, %v608_v5  ;;  %v1258_v5 = vld [vmem:[%s10657_s1 + $0x1e0] sm:$0xff] }
 0x17b   :  { %v816_v35 = vmul.f32 %v6396_v25, %v6355_v47  ;;  %vm821_vm0 = vweird.f32 %v6396_v25  ;;  %v1219_v47 = vld [vmem:[%s10657_s1 + $0xa8] sm:$0xff] }
 0x17c   :  { %v4792_v30 = vpop.eup %4791  ;;  %1002 = vmatmul.f32.vlgmr.msra.gmra.mxu1 %v614_v43  ;;  %1042 = vmatmul.f32.vlgmr.msra.gmra.mxu3 %v614_v43  ;;  %vm822_vm2 = vmor %vm820_vm1, %vm821_vm0 }
 0x17d   :  { %v777_v40 = vmul.f32 %v4792_v30, %v6379_v15  ;;  %1282 = vmatpush.msra.mxu1 %v1259_v29  ;;  %1322 = vmatpush.msra.mxu3 %v1261_v26  ;;  %vm782_vm11 = vweird.f32 %v4792_v30  ;;  %v817_v2 = vsub.f32 1.0, %v816_v35  ;;  %v4794_v53 = vpop.eup %4793  ;;  %v1231_v15 = vld [vmem:[%s10657_s1 + $0x108] sm:$0xff]  ;;  %v1213_v26 = vld [vmem:[%s10657_s1 + $0x78] sm:$0xff] }
 0x17e   :  { %vm783_vm14 = vmor %vm781_vm12, %vm782_vm11  ;;  %v1211_v29 = vld [vmem:[%s10657_s1 + $0x68] sm:$0xff]  ;;  %v1205_v35 = vld [vmem:[%s10657_s1 + $0x38] sm:$0xff] }
 0x17f   :  { %v778_v37 = vsub.f32 1.0, %v777_v40  ;;  %1283 = vmatpush.msra.mxu1 %v1255_v39  ;;  %1323 = vmatpush.msra.mxu3 %v1257_v24  ;;  %v818_v54 = vmul.f32 %v6396_v25, %v817_v2  ;;  %v1207_v40 = vld [vmem:[%s10657_s1 + $0x48] sm:$0xff]  ;;  %v1250_v39 = vld [vmem:[%s10657_s1 + $0x1a0] sm:$0xff]  ;;  %v1252_v24 = vld [vmem:[%s10657_s1 + $0x1b0] sm:$0xff] }
 0x180   :  { %v1226_v2 = vld [vmem:[%s10657_s1 + $0xe0] sm:$0xff] }
 0x181   :  { %v779_v16 = vmul.f32 %v4792_v30, %v778_v37  ;;  %1284 = vmatpush.msra.mxu1 %v1251_v19  ;;  %1324 = vmatpush.msra.mxu3 %v1253_v23  ;;  %v819_v20 = vadd.f32 %v6396_v25, %v818_v54  ;;  %v1246_v37 = vld [vmem:[%s10657_s1 + $0x180] sm:$0xff]  ;;  %v1199_v19 = vld [vmem:[%s10657_s1 + $0x8] sm:$0xff]  ;;  %v1201_v23 = vld [vmem:[%s10657_s1 + $0x18] sm:$0xff] }
 0x182   :  { %v1206_v54 = vld [vmem:[%s10657_s1 + $0x40] sm:$0xff] }
 0x183   :  { %v780_v4 = vadd.f32 %v4792_v30, %v779_v16  ;;  %1285 = vmatpush.msra.mxu1 %v1247_v41  ;;  %1325 = vmatpush.msra.mxu3 %v1249_v42  ;;  %v823_v52 = vsel %vm822_vm2, %v6396_v25, %v819_v20  ;;  %v1238_v16 = vld [vmem:[%s10657_s1 + $0x140] sm:$0xff]  ;;  %v1236_v41 = vld [vmem:[%s10657_s1 + $0x130] sm:$0xff] }
 0x184   :  { %1082 = vmatmul.f32.vlgmr.msrb.gmra.mxu1 %v614_v43  ;;  %1122 = vmatmul.f32.vlgmr.msrb.gmra.mxu3 %v614_v43  ;;  %v828_v12 = vsel %vm825_vm3, %v827_v21, %v823_v52  ;;  %v1260_v43 = vld [vmem:[%s10657_s1 + $0x1f0] sm:$0xff]  ;;  %v1230_v42 = vld [vmem:[%s10657_s1 + $0x100] sm:$0xff]  ;;  %v1521_v52 = vld [vmem:[%s10658_s2 + $0x368] sm:$0xff] }
 0x185   :  { %v784_v50 = vsel %vm783_vm14, %v4792_v30, %v780_v4  ;;  %1286 = vmatpush.msra.mxu1 %v1243_v1  ;;  %1326 = vmatpush.msra.mxu3 %v1245_v46  ;;  %v1254_v30 = vld [vmem:[%s10657_s1 + $0x1c0] sm:$0xff]  ;;  %v1228_v4 = vld [vmem:[%s10657_s1 + $0xf0] sm:$0xff] }
 0x186   :  { %v789_v13 = vsel %vm786_vm15, %v788_v8, %v784_v50  ;;  %v1222_v1 = vld [vmem:[%s10657_s1 + $0xc0] sm:$0xff]  ;;  %v1224_v46 = vld [vmem:[%s10657_s1 + $0xd0] sm:$0xff] }
 0x187   :  { %v831_v60 = vmul.f32 %v4794_v53, %v789_v13  ;;  %1287 = vmatpush.msra.mxu1 %v1239_v10  ;;  %1327 = vmatpush.msra.mxu3 %v1241_v11  ;;  %v1218_v8 = vld [vmem:[%s10657_s1 + $0xa0] sm:$0xff]  ;;  %v1216_v10 = vld [vmem:[%s10657_s1 + $0x90] sm:$0xff] }
 0x188   :  { %v1214_v50 = vld [vmem:[%s10657_s1 + $0x80] sm:$0xff]  ;;  %v1212_v53 = vld [vmem:[%s10657_s1 + $0x70] sm:$0xff] }
 0x189   :  { %v6462_v6 = vadd.f32 %v831_v60, %v830_v58  ;;  %1288 = vmatpush.msra.mxu1 %v1235_v62  ;;  %1328 = vmatpush.msra.mxu3 %v1237_v0  ;;  %v1210_v11 = vld [vmem:[%s10657_s1 + $0x60] sm:$0xff]  ;;  %v1208_v13 = vld [vmem:[%s10657_s1 + $0x50] sm:$0xff] }
 0x18a   :  { %v1202_v58 = vld [vmem:[%s10657_s1 + $0x20] sm:$0xff]  ;;  %v1204_v60 = vld [vmem:[%s10657_s1 + $0x30] sm:$0xff] }
 0x18b   :  { %4795 = vtanh.f32 %v6462_v6  ;;  %1289 = vmatpush.msra.mxu1 %v1231_v15  ;;  %1329 = vmatpush.msra.mxu3 %v1233_v61  ;;  %v1198_v62 = vld [vmem:[%s10657_s1] sm:$0xff]  ;;  %v1200_v0 = vld [vmem:[%s10657_s1 + $0x10] sm:$0xff]  ;;  %v1537_v61 = vld [vmem:[%s10658_s2 + $0x3e8] sm:$0xff] }
 0x18c   :  { %v1536_v15 = vld [vmem:[%s10658_s2 + $0x3e0] sm:$0xff] }
 0x18d   :  { %1290 = vmatpush.msra.mxu1 %v1227_v32  ;;  %1330 = vmatpush.msra.mxu3 %v1229_v3  ;;  %v1532_v20 = vld [vmem:[%s10658_s2 + $0x3c0] sm:$0xff]  ;;  %v1529_v3 = vld [vmem:[%s10658_s2 + $0x3a8] sm:$0xff] }
 0x18e   :  { %v1528_v32 = vld [vmem:[%s10658_s2 + $0x3a0] sm:$0xff] }
 0x18f   :  { %1291 = vmatpush.msra.mxu1 %v1223_v36  ;;  %1331 = vmatpush.msra.mxu3 %v1225_v9  ;;  %v1525_v36 = vld [vmem:[%s10658_s2 + $0x388] sm:$0xff]  ;;  %v1520_v9 = vld [vmem:[%s10658_s2 + $0x360] sm:$0xff] }
 0x190   :  { %v1516_v21 = vld [vmem:[%s10658_s2 + $0x340] sm:$0xff] }
 0x191   :  { %v4796_v33 = vpop.eup %4795  ;;  %1292 = vmatpush.msra.mxu1 %v1219_v47  ;;  %1332 = vmatpush.msra.mxu3 %v1221_v22  ;;  %v1517_v47 = vld [vmem:[%s10658_s2 + $0x348] sm:$0xff]  ;;  %v1512_v22 = vld [vmem:[%s10658_s2 + $0x320] sm:$0xff] }
 0x192   :  { %v6501_v25 = vmul.f32 %v4796_v33, %v828_v12  ;;  %v1513_v33 = vld [vmem:[%s10658_s2 + $0x328] sm:$0xff]  ;;  %v1508_v12 = vld [vmem:[%s10658_s2 + $0x300] sm:$0xff] }
 0x193   :  { %1293 = vmatpush.msra.mxu1 %v1215_v28  ;;  %1333 = vmatpush.msra.mxu3 %v1217_v51  ;;  %v1509_v28 = vld [vmem:[%s10658_s2 + $0x308] sm:$0xff]  ;;  %v5005_v51 = vld [vmem:[%s10658_s2 + $0x2e0] sm:$0xff] }
 0x194   :  { %982 = vmatmul.f32.vlgmr.msra.gmra.mxu0 %v6501_v25  ;;  %1022 = vmatmul.f32.vlgmr.msra.gmra.mxu2 %v6501_v25 }
 0x195   :  { %1262 = vmatpush.msra.mxu0 %v1258_v5  ;;  %1302 = vmatpush.msra.mxu2 %v1260_v43  ;;  %v1500_v5 = vld [vmem:[%s10658_s2 + $0x2c0] sm:$0xff]  ;;  %v1501_v43 = vld [vmem:[%s10658_s2 + $0x2c8] sm:$0xff] }
 0x196   :  { %1294 = vmatpush.msra.mxu1 %v1211_v29  ;;  %1334 = vmatpush.msra.mxu3 %v1213_v26  ;;  %v1496_v29 = vld [vmem:[%s10658_s2 + $0x2a0] sm:$0xff]  ;;  %v1497_v26 = vld [vmem:[%s10658_s2 + $0x2a8] sm:$0xff] }
 0x197   :  { %1263 = vmatpush.msra.mxu0 %v1254_v30  ;;  %1303 = vmatpush.msra.mxu2 %v1256_v56  ;;  %v1492_v30 = vld [vmem:[%s10658_s2 + $0x280] sm:$0xff]  ;;  %v1493_v56 = vld [vmem:[%s10658_s2 + $0x288] sm:$0xff] }
 0x198   :  { %1295 = vmatpush.msra.mxu1 %v1207_v40  ;;  %1335 = vmatpush.msra.mxu3 %v1209_v44  ;;  %v1472_v40 = vld [vmem:[%s10658_s2 + $0x1e0] sm:$0xff]  ;;  %v1473_v44 = vld [vmem:[%s10658_s2 + $0x1e8] sm:$0xff] }
 0x199   :  { %1264 = vmatpush.msra.mxu0 %v1250_v39  ;;  %1304 = vmatpush.msra.mxu2 %v1252_v24  ;;  %v1488_v39 = vld [vmem:[%s10658_s2 + $0x260] sm:$0xff]  ;;  %v1489_v24 = vld [vmem:[%s10658_s2 + $0x268] sm:$0xff] }
 0x19a   :  { %1296 = vmatpush.msra.mxu1 %v1203_v31  ;;  %1336 = vmatpush.msra.mxu3 %v1205_v35  ;;  %v1468_v31 = vld [vmem:[%s10658_s2 + $0x1c0] sm:$0xff]  ;;  %v1469_v35 = vld [vmem:[%s10658_s2 + $0x1c8] sm:$0xff] }
 0x19b   :  { %1265 = vmatpush.msra.mxu0 %v1246_v37  ;;  %1305 = vmatpush.msra.mxu2 %v1248_v17  ;;  %v1484_v37 = vld [vmem:[%s10658_s2 + $0x240] sm:$0xff]  ;;  %v1485_v17 = vld [vmem:[%s10658_s2 + $0x248] sm:$0xff] }
 0x19c   :  { %1297 = vmatpush.msra.mxu1 %v1199_v19  ;;  %1337 = vmatpush.msra.mxu3 %v1201_v23  ;;  %v1464_v19 = vld [vmem:[%s10658_s2 + $0x1a0] sm:$0xff]  ;;  %v1465_v23 = vld [vmem:[%s10658_s2 + $0x1a8] sm:$0xff] }
 0x19d   :  { %1062 = vmatmul.f32.vlgmr.msrb.gmra.mxu0 %v6501_v25  ;;  %1102 = vmatmul.f32.vlgmr.msrb.gmra.mxu2 %v6501_v25 }
 0x19e   :  { %1266 = vmatpush.msra.mxu0 %v1242_v38  ;;  %1298 = vmatmul.f32.vlgmr.msra.gmra.mxu1 %v6501_v25  ;;  %v1480_v38 = vld [vmem:[%s10658_s2 + $0x220] sm:$0xff] }
 0x19f   :  { %1306 = vmatpush.msra.mxu2 %v1244_v27  ;;  %1338 = vmatmul.f32.vlgmr.msra.gmra.mxu3 %v6501_v25  ;;  %v1481_v27 = vld [vmem:[%s10658_s2 + $0x228] sm:$0xff] }
 0x1a0   :  { %1267 = vmatpush.msra.mxu0 %v1238_v16  ;;  %1560 = vmatpush.msrb.mxu1 %v1536_v15  ;;  %v1527_v15 = vld [vmem:[%s10658_s2 + $0x398] sm:$0xff] }
 0x1a1   :  { %1307 = vmatpush.msra.mxu2 %v1240_v59  ;;  %1600 = vmatpush.msrb.mxu3 %v1537_v61  ;;  %v1460_v59 = vld [vmem:[%s10658_s2 + $0x180] sm:$0xff] }
 0x1a2   :  { %1268 = vmatpush.msra.mxu0 %v1234_v55  ;;  %1561 = vmatpush.msrb.mxu1 %v1532_v20  ;;  %v1461_v55 = vld [vmem:[%s10658_s2 + $0x188] sm:$0xff] }
 0x1a3   :  { %1308 = vmatpush.msra.mxu2 %v1236_v41  ;;  %1601 = vmatpush.msrb.mxu3 %v1533_v14  ;;  %v1476_v41 = vld [vmem:[%s10658_s2 + $0x200] sm:$0xff] }
 0x1a4   :  { %1269 = vmatpush.msra.mxu0 %v1230_v42  ;;  %1562 = vmatpush.msrb.mxu1 %v1528_v32  ;;  %v1477_v42 = vld [vmem:[%s10658_s2 + $0x208] sm:$0xff]  ;;  %v1440_v14 = vld [vmem:[%s10658_s2 + $0xe0] sm:$0xff] }
 0x1a5   :  { %1309 = vmatpush.msra.mxu2 %v1232_v63  ;;  %1602 = vmatpush.msrb.mxu3 %v1529_v3  ;;  %v1456_v63 = vld [vmem:[%s10658_s2 + $0x160] sm:$0xff]  ;;  %v1441_v32 = vld [vmem:[%s10658_s2 + $0xe8] sm:$0xff]  ;;  %v1522_v3 = vld [vmem:[%s10658_s2 + $0x370] sm:$0xff] }
 0x1a6   :  { %1270 = vmatpush.msra.mxu0 %v1226_v2  ;;  %1563 = vmatpush.msrb.mxu1 %v1524_v18  ;;  %v1457_v2 = vld [vmem:[%s10658_s2 + $0x168] sm:$0xff] }
 0x1a7   :  { %1310 = vmatpush.msra.mxu2 %v1228_v4  ;;  %1603 = vmatpush.msrb.mxu3 %v1525_v36  ;;  %v1538_v4 = vld [vmem:[%s10658_s2 + $0x3f0] sm:$0xff]  ;;  %v1523_v36 = vld [vmem:[%s10658_s2 + $0x378] sm:$0xff] }
 0x1a8   :  { %1271 = vmatpush.msra.mxu0 %v1222_v1  ;;  %1564 = vmatpush.msrb.mxu1 %v1520_v9  ;;  %v1539_v1 = vld [vmem:[%s10658_s2 + $0x3f8] sm:$0xff]  ;;  %v1436_v9 = vld [vmem:[%s10658_s2 + $0xc0] sm:$0xff] }
 0x1a9   :  { %1311 = vmatpush.msra.mxu2 %v1224_v46  ;;  %1604 = vmatpush.msrb.mxu3 %v1521_v52  ;;  %v1452_v46 = vld [vmem:[%s10658_s2 + $0x140] sm:$0xff]  ;;  %v1437_v52 = vld [vmem:[%s10658_s2 + $0xc8] sm:$0xff] }
 0x1aa   :  { %1272 = vmatpush.msra.mxu0 %v1218_v8  ;;  %1565 = vmatpush.msrb.mxu1 %v1516_v21  ;;  %v1453_v8 = vld [vmem:[%s10658_s2 + $0x148] sm:$0xff]  ;;  %v1518_v21 = vld [vmem:[%s10658_s2 + $0x350] sm:$0xff] }
 0x1ab   :  { %1312 = vmatpush.msra.mxu2 %v1220_v49  ;;  %1605 = vmatpush.msrb.mxu3 %v1517_v47  ;;  %v1534_v49 = vld [vmem:[%s10658_s2 + $0x3d0] sm:$0xff] }
 0x1ac   :  { %1273 = vmatpush.msra.mxu0 %v1214_v50  ;;  %1566 = vmatpush.msrb.mxu1 %v1512_v22  ;;  %v1535_v50 = vld [vmem:[%s10658_s2 + $0x3d8] sm:$0xff]  ;;  %v6826_v22 = vld [vmem:[%s10659_s0 + $0x20] sm:$0xff] }
 0x1ad   :  { %1313 = vmatpush.msra.mxu2 %v1216_v10  ;;  %1606 = vmatpush.msrb.mxu3 %v1513_v33  ;;  %v1448_v10 = vld [vmem:[%s10658_s2 + $0x120] sm:$0xff]  ;;  %v1519_v33 = vld [vmem:[%s10658_s2 + $0x358] sm:$0xff] }
 0x1ae   :  { %1274 = vmatpush.msra.mxu0 %v1210_v11  ;;  %1567 = vmatpush.msrb.mxu1 %v1508_v12  ;;  %v1449_v11 = vld [vmem:[%s10658_s2 + $0x128] sm:$0xff] }
 0x1af   :  { %1314 = vmatpush.msra.mxu2 %v1212_v53  ;;  %1607 = vmatpush.msrb.mxu3 %v1509_v28  ;;  %v1530_v53 = vld [vmem:[%s10658_s2 + $0x3b0] sm:$0xff]  ;;  %v1432_v28 = vld [vmem:[%s10658_s2 + $0xa0] sm:$0xff] }
 0x1b0   :  { %1275 = vmatpush.msra.mxu0 %v1206_v54  ;;  %1568 = vmatpush.msrb.mxu1 %v5005_v51  ;;  %v1531_v54 = vld [vmem:[%s10658_s2 + $0x3b8] sm:$0xff]  ;;  %v1433_v51 = vld [vmem:[%s10658_s2 + $0xa8] sm:$0xff] }
 0x1b1   :  { %1315 = vmatpush.msra.mxu2 %v1208_v13 }
 0x1b2   :  { %1276 = vmatpush.msra.mxu0 %v1202_v58  ;;  %1569 = vmatpush.msrb.mxu1 %v1500_v5  ;;  %v1444_v58 = vld [vmem:[%s10658_s2 + $0x100] sm:$0xff] }
 0x1b3   :  { %1316 = vmatpush.msra.mxu2 %v1204_v60  ;;  %v1445_v60 = vld [vmem:[%s10658_s2 + $0x108] sm:$0xff] }
 0x1b4   :  { %1277 = vmatpush.msra.mxu0 %v1198_v62  ;;  %1570 = vmatpush.msrb.mxu1 %v1496_v29  ;;  %v1526_v62 = vld [vmem:[%s10658_s2 + $0x390] sm:$0xff]  ;;  %v1195_v29 = vunpack.c.h.bf16 %v6826_v22 }
 0x1b5   :  { %1317 = vmatpush.msra.mxu2 %v1200_v0  ;;  %1278 = vmatmul.f32.vlgmr.msra.gmra.mxu0 %v6501_v25 }
 0x1b6   :  { %1318 = vmatmul.f32.vlgmr.msra.gmra.mxu2 %v6501_v25  ;;  %v5006_v25 = vld [vmem:[%s10658_s2 + $0x2e8] sm:$0xff]  ;;  %1571 = vmatpush.msrb.mxu1 %v1492_v30 }
 0x1b7   :  { %1608 = vmatpush.msrb.mxu3 %v5006_v25  ;;  %1540 = vmatpush.msrb.mxu0 %v1472_v40  ;;  %v1514_v25 = vld [vmem:[%s10658_s2 + $0x330] sm:$0xff]  ;;  %v1429_v30 = vld [vmem:[%s10658_s2 + $0x88] sm:$0xff] }
 0x1b8   :  { %1580 = vmatpush.msrb.mxu2 %v1473_v44  ;;  %1572 = vmatpush.msrb.mxu1 %v1488_v39  ;;  %v1511_v44 = vld [vmem:[%s10658_s2 + $0x318] sm:$0xff] }
 0x1b9   :  { %1609 = vmatpush.msrb.mxu3 %v1501_v43  ;;  %1541 = vmatpush.msrb.mxu0 %v1468_v31  ;;  %v1515_v43 = vld [vmem:[%s10658_s2 + $0x338] sm:$0xff]  ;;  %v1425_v31 = vld [vmem:[%s10658_s2 + $0x68] sm:$0xff] }
 0x1ba   :  { %1581 = vmatpush.msrb.mxu2 %v1469_v35  ;;  %1573 = vmatpush.msrb.mxu1 %v1484_v37  ;;  %v1506_v35 = vld [vmem:[%s10658_s2 + $0x2f0] sm:$0xff] }
 0x1bb   :  { %1610 = vmatpush.msrb.mxu3 %v1497_v26  ;;  %1542 = vmatpush.msrb.mxu0 %v1464_v19  ;;  %v1428_v26 = vld [vmem:[%s10658_s2 + $0x80] sm:$0xff] }
 0x1bc   :  { %1582 = vmatpush.msrb.mxu2 %v1465_v23  ;;  %1574 = vmatpush.msrb.mxu1 %v1480_v38  ;;  %v1420_v38 = vld [vmem:[%s10658_s2 + $0x40] sm:$0xff] }
 0x1bd   :  { %1611 = vmatpush.msrb.mxu3 %v1493_v56  ;;  %1543 = vmatpush.msrb.mxu0 %v1460_v59  ;;  %v1510_v56 = vld [vmem:[%s10658_s2 + $0x310] sm:$0xff] }
 0x1be   :  { %1583 = vmatpush.msrb.mxu2 %v1461_v55  ;;  %1575 = vmatpush.msrb.mxu1 %v1476_v41  ;;  %v1503_v55 = vld [vmem:[%s10658_s2 + $0x2d8] sm:$0xff] }
 0x1bf   :  { %1612 = vmatpush.msrb.mxu3 %v1489_v24  ;;  %1544 = vmatpush.msrb.mxu0 %v1456_v63  ;;  %v1424_v24 = vld [vmem:[%s10658_s2 + $0x60] sm:$0xff]  ;;  %v1417_v63 = vld [vmem:[%s10658_s2 + $0x28] sm:$0xff] }
 0x1c0   :  { %1584 = vmatpush.msrb.mxu2 %v1457_v2  ;;  %1640 = vmatpush.msra.mxu1 %v1538_v4  ;;  %v1498_v2 = vld [vmem:[%s10658_s2 + $0x2b0] sm:$0xff] }
 0x1c1   :  { %1613 = vmatpush.msrb.mxu3 %v1485_v17  ;;  %1545 = vmatpush.msrb.mxu0 %v1452_v46  ;;  %v1507_v17 = vld [vmem:[%s10658_s2 + $0x2f8] sm:$0xff] }
 0x1c2   :  { %1585 = vmatpush.msrb.mxu2 %v1453_v8  ;;  %1641 = vmatpush.msra.mxu1 %v1534_v49  ;;  %v1499_v46 = vld [vmem:[%s10658_s2 + $0x2b8] sm:$0xff]  ;;  %v1412_v49 = vld [vmem:[%s10658_s2] sm:$0xff] }
 0x1c3   :  { %1614 = vmatpush.msrb.mxu3 %v1481_v27  ;;  %1546 = vmatpush.msrb.mxu0 %v1448_v10  ;;  %v1421_v27 = vld [vmem:[%s10658_s2 + $0x48] sm:$0xff]  ;;  %v1494_v10 = vld [vmem:[%s10658_s2 + $0x290] sm:$0xff] }
 0x1c4   :  { %1586 = vmatpush.msrb.mxu2 %v1449_v11  ;;  %1642 = vmatpush.msra.mxu1 %v1530_v53  ;;  %v1495_v53 = vld [vmem:[%s10658_s2 + $0x298] sm:$0xff] }
 0x1c5   :  { %1615 = vmatpush.msrb.mxu3 %v1477_v42  ;;  %1547 = vmatpush.msrb.mxu0 %v1444_v58  ;;  %v1416_v42 = vld [vmem:[%s10658_s2 + $0x20] sm:$0xff]  ;;  %v1490_v58 = vld [vmem:[%s10658_s2 + $0x270] sm:$0xff] }
 0x1c6   :  { %1587 = vmatpush.msrb.mxu2 %v1445_v60  ;;  %1643 = vmatpush.msra.mxu1 %v1526_v62  ;;  %v1491_v60 = vld [vmem:[%s10658_s2 + $0x278] sm:$0xff] }
 0x1c7   :  { %1680 = vmatpush.msra.mxu3 %v1539_v1  ;;  %1548 = vmatpush.msrb.mxu0 %v1440_v14  ;;  %v6895_v1 = vld [vmem:[%s10659_s0 + $0x28] sm:$0xff]  ;;  %v1470_v14 = vld [vmem:[%s10658_s2 + $0x1d0] sm:$0xff] }
 0x1c8   :  { %1588 = vmatpush.msrb.mxu2 %v1441_v32  ;;  %1644 = vmatpush.msra.mxu1 %v1522_v3  ;;  %v1471_v32 = vld [vmem:[%s10658_s2 + $0x1d8] sm:$0xff] }
 0x1c9   :  { %1681 = vmatpush.msra.mxu3 %v1535_v50  ;;  %1549 = vmatpush.msrb.mxu0 %v1436_v9  ;;  %v1413_v50 = vld [vmem:[%s10658_s2 + $0x8] sm:$0xff]  ;;  %v1487_v9 = vld [vmem:[%s10658_s2 + $0x258] sm:$0xff] }
 0x1ca   :  { %1589 = vmatpush.msrb.mxu2 %v1437_v52  ;;  %1645 = vmatpush.msra.mxu1 %v1518_v21  ;;  %v1466_v21 = vld [vmem:[%s10658_s2 + $0x1b0] sm:$0xff] }
 0x1cb   :  { %1682 = vmatpush.msra.mxu3 %v1531_v54  ;;  %1550 = vmatpush.msrb.mxu0 %v1432_v28  ;;  %v1474_v54 = vld [vmem:[%s10658_s2 + $0x1f0] sm:$0xff] }
 0x1cc   :  { %1590 = vmatpush.msrb.mxu2 %v1433_v51  ;;  %1646 = vmatpush.msra.mxu1 %v1514_v25  ;;  %v1482_v28 = vld [vmem:[%s10658_s2 + $0x230] sm:$0xff]  ;;  %v1483_v51 = vld [vmem:[%s10658_s2 + $0x238] sm:$0xff] }
 0x1cd   :  { %1683 = vmatpush.msra.mxu3 %v1527_v15  ;;  %1551 = vmatpush.msrb.mxu0 %v1428_v26  ;;  %v1478_v26 = vld [vmem:[%s10658_s2 + $0x210] sm:$0xff] }
 0x1ce   :  { %1591 = vmatpush.msrb.mxu2 %v1429_v30  ;;  %1647 = vmatpush.msra.mxu1 %v1510_v56  ;;  %v1479_v30 = vld [vmem:[%s10658_s2 + $0x218] sm:$0xff] }
 0x1cf   :  { %1684 = vmatpush.msra.mxu3 %v1523_v36  ;;  %1552 = vmatpush.msrb.mxu0 %v1424_v24  ;;  %v1486_v36 = vld [vmem:[%s10658_s2 + $0x250] sm:$0xff] }
 0x1d0   :  { %1592 = vmatpush.msrb.mxu2 %v1425_v31  ;;  %1648 = vmatpush.msra.mxu1 %v1506_v35 }
 0x1d1   :  { %1685 = vmatpush.msra.mxu3 %v1519_v33  ;;  %1553 = vmatpush.msrb.mxu0 %v1420_v38 }
 0x1d2   :  { %1593 = vmatpush.msrb.mxu2 %v1421_v27 }
 0x1d3   :  { %1686 = vmatpush.msra.mxu3 %v1515_v43  ;;  %1554 = vmatpush.msrb.mxu0 %v1416_v42  ;;  %v1462_v43 = vld [vmem:[%s10658_s2 + $0x190] sm:$0xff] }
 0x1d4   :  { %1594 = vmatpush.msrb.mxu2 %v1417_v63  ;;  %v1194_v63 = vunpack.c.l.bf16 %v6826_v22 }
 0x1d5   :  { %1687 = vmatpush.msra.mxu3 %v1511_v44  ;;  %1555 = vmatpush.msrb.mxu0 %v1412_v49  ;;  %v1459_v44 = vld [vmem:[%s10658_s2 + $0x178] sm:$0xff] }
 0x1d6   :  { %1595 = vmatpush.msrb.mxu2 %v1413_v50 }
 0x1d7   :  { %1688 = vmatpush.msra.mxu3 %v1507_v17  ;;  %1620 = vmatpush.msra.mxu0 %v1474_v54  ;;  %v1455_v17 = vld [vmem:[%s10658_s2 + $0x158] sm:$0xff] }
 0x1d8   :  { %v1443_v54 = vld [vmem:[%s10658_s2 + $0xf8] sm:$0xff] }
 0x1d9   :  { %1689 = vmatpush.msra.mxu3 %v1503_v55  ;;  %1621 = vmatpush.msra.mxu0 %v1470_v14 }
 0x1db   :  { %1690 = vmatpush.msra.mxu3 %v1499_v46  ;;  %1622 = vmatpush.msra.mxu0 %v1466_v21  ;;  %v1446_v46 = vld [vmem:[%s10658_s2 + $0x110] sm:$0xff] }
 0x1dd   :  { %1691 = vmatpush.msra.mxu3 %v1495_v53  ;;  %1623 = vmatpush.msra.mxu0 %v1462_v43  ;;  %v1442_v53 = vld [vmem:[%s10658_s2 + $0xf0] sm:$0xff] }
 0x1df   :  { %1692 = vmatpush.msra.mxu3 %v1491_v60 }
 0x1e1   :  { %1693 = vmatpush.msra.mxu3 %v1487_v9  ;;  %v1435_v9 = vld [vmem:[%s10658_s2 + $0xb8] sm:$0xff] }
 0x1e3   :  { %1694 = vmatpush.msra.mxu3 %v1483_v51  ;;  %v1430_v51 = vld [vmem:[%s10658_s2 + $0x90] sm:$0xff] }
 0x1e5   :  { %1695 = vmatpush.msra.mxu3 %v1479_v30 }
 0x1f9   :  { %v1003_v16 = vpop.f32.mrf.mxu1 }
 0x1ff   :  { %v1043_v61 = vpop.f32.mrf.mxu3 }
 0x201   :  { %v6800_v20 = vpop.f32.mrf.mxu1 }
 0x207   :  { %v1123_v19 = vpop.f32.mrf.mxu3 }
 0x211   :  { %v983_v13 = vpop.f32.mrf.mxu0 }
 0x212   :  { %v984_v0 = vadd.f32 %v983_v13, %v6080_v34  ;;  %v1475_v13 = vld [vmem:[%s10658_s2 + $0x1f8] sm:$0xff] }
 0x213   :  { %1660 = vmatpush.msra.mxu2 %v1475_v13 }
 0x214   :  { %v1004_v18 = vadd.f32 %v1003_v16, %v984_v0  ;;  %v1502_v16 = vld [vmem:[%s10658_s2 + $0x2d0] sm:$0xff] }
 0x215   :  { %1649 = vmatpush.msra.mxu1 %v1502_v16  ;;  %1661 = vmatpush.msra.mxu2 %v1471_v32  ;;  %v1450_v16 = vld [vmem:[%s10658_s2 + $0x130] sm:$0xff] }
 0x216   :  { %v4696_v47 = vmul.f32 -1.442695, %v1004_v18 }
 0x217   :  { %v1023_v12 = vpop.f32.mrf.mxu2  ;;  %1650 = vmatpush.msra.mxu1 %v1498_v2 }
 0x218   :  { %4797 = vpow2.f32 %v4696_v47  ;;  %v1024_v5 = vadd.f32 %v1023_v12, %v6126_v7  ;;  %v1467_v47 = vld [vmem:[%s10658_s2 + $0x1b8] sm:$0xff] }
 0x219   :  { %1651 = vmatpush.msra.mxu1 %v1494_v10  ;;  %1662 = vmatpush.msra.mxu2 %v1467_v47 }
 0x21a   :  { %v1044_v40 = vadd.f32 %v1043_v61, %v1024_v5  ;;  %v1063_v0 = vpop.f32.mrf.mxu0  ;;  %v1197_v61 = vunpack.c.h.bf16 %v6895_v1 }
 0x21b   :  { %v1299_v39 = vpop.f32.mrf.mxu1  ;;  %1652 = vmatpush.msra.mxu1 %v1490_v58  ;;  %v1064_v12 = vadd.f32 %v1063_v0, %v6251_v45  ;;  %v1439_v0 = vld [vmem:[%s10658_s2 + $0xd8] sm:$0xff] }
 0x21c   :  { %v4697_v37 = vmul.f32 -1.442695, %v1044_v40  ;;  %v1343_v23 = vadd.f32 %v1299_v39, %v1195_v29  ;;  %v1463_v29 = vld [vmem:[%s10658_s2 + $0x198] sm:$0xff]  ;;  %v1458_v40 = vld [vmem:[%s10658_s2 + $0x170] sm:$0xff] }
 0x21d   :  { %1653 = vmatpush.msra.mxu1 %v1486_v36  ;;  %1663 = vmatpush.msra.mxu2 %v1463_v29  ;;  %v1084_v24 = vadd.f32 %v6800_v20, %v1064_v12  ;;  %v1434_v36 = vld [vmem:[%s10658_s2 + $0xb0] sm:$0xff]  ;;  %v1427_v29 = vld [vmem:[%s10658_s2 + $0x78] sm:$0xff] }
 0x21e   :  { %v4798_v59 = vpop.eup %4797  ;;  %4799 = vpow2.f32 %v4697_v37  ;;  %v4702_v8 = vmul.f32 -1.442695, %v1343_v23  ;;  %1624 = vmatpush.msra.mxu0 %v1458_v40  ;;  %v1454_v37 = vld [vmem:[%s10658_s2 + $0x150] sm:$0xff] }
 0x21f   :  { %v6881_v41 = vadd.f32 1.0, %v4798_v59  ;;  %1654 = vmatpush.msra.mxu1 %v1482_v28  ;;  %1664 = vmatpush.msra.mxu2 %v1459_v44  ;;  %v1451_v59 = vld [vmem:[%s10658_s2 + $0x138] sm:$0xff]  ;;  %v1422_v44 = vld [vmem:[%s10658_s2 + $0x50] sm:$0xff] }
 0x220   :  { %v1103_v4 = vpop.f32.mrf.mxu2  ;;  %1625 = vmatpush.msra.mxu0 %v1454_v37  ;;  %v1419_v37 = vld [vmem:[%s10658_s2 + $0x38] sm:$0xff] }
 0x221   :  { %4801 = vrcp.f32 %v6881_v41  ;;  %v1104_v11 = vadd.f32 %v1103_v4, %v6196_v48  ;;  %1655 = vmatpush.msra.mxu1 %v1478_v26  ;;  %1665 = vmatpush.msra.mxu2 %v1455_v17  ;;  %v1141_v55 = vand.u32 2147483648, %v6881_v41  ;;  %vm1135_vm5 = vweird.f32 %v6881_v41 }
 0x222   :  { %4803 = vpow2.f32 %v4702_v8  ;;  %v1339_v18 = vpop.f32.mrf.mxu3  ;;  %v1139_v4 = vand.u32 2147483647, %v6881_v41  ;;  %1626 = vmatpush.msra.mxu0 %v1450_v16  ;;  %v1447_v8 = vld [vmem:[%s10658_s2 + $0x118] sm:$0xff] }
 0x223   :  { %v1124_v15 = vadd.f32 %v1123_v19, %v1104_v11  ;;  %v1345_v5 = vadd.f32 %v1339_v18, %v1197_v61  ;;  %1666 = vmatpush.msra.mxu2 %v1451_v59  ;;  %v1142_v13 = vor.u32 1.1754944e-38, %v1141_v55 }
 0x224   :  { %v4800_v62 = vpop.eup %4799  ;;  %1627 = vmatpush.msra.mxu0 %v1446_v46  ;;  %vm1140_vm9 = vcmp.eq.f32.partialorder %v1139_v4, 8.507059e+37 }
 0x225   :  { %v6933_v3 = vadd.f32 1.0, %v4800_v62  ;;  %v4698_v52 = vmul.f32 -1.442695, %v1124_v15  ;;  %v4703_v35 = vmul.f32 -1.442695, %v1345_v5  ;;  %1667 = vmatpush.msra.mxu2 %v1447_v8  ;;  %v1438_v62 = vld [vmem:[%s10658_s2 + $0xd0] sm:$0xff] }
 0x226   :  { %1628 = vmatpush.msra.mxu0 %v1442_v53  ;;  %v1833_v8 = vld [vmem:[%s10657_s1 + $0x1e8] sm:$0xff] }
 0x227   :  { %v6947_v33 = vpop.eup %4801  ;;  %4805 = vrcp.f32 %v6933_v3  ;;  %v1160_v49 = vand.u32 2147483648, %v6933_v3  ;;  %vm1154_vm8 = vweird.f32 %v6933_v3  ;;  %1668 = vmatpush.msra.mxu2 %v1443_v54  ;;  %v1825_v54 = vld [vmem:[%s10657_s1 + $0x1a8] sm:$0xff] }
 0x228   :  { %v1131_v25 = vmul.f32 %v6947_v33, %v6881_v41  ;;  %4807 = vpow2.f32 %v4698_v52  ;;  %v4804_v39 = vpop.eup %4803  ;;  %vm1136_vm4 = vweird.f32 %v6947_v33  ;;  %v1158_v41 = vand.u32 2147483647, %v6933_v3  ;;  %1629 = vmatpush.msra.mxu0 %v1438_v62 }
 0x229   :  { %v6988_v27 = vadd.f32 1.0, %v4804_v39  ;;  %4809 = vtanh.f32 %v1084_v24  ;;  %vm7011_vm6 = vmor %vm1135_vm5, %vm1136_vm4  ;;  %v1161_v61 = vor.u32 1.1754944e-38, %v1160_v49  ;;  %1669 = vmatpush.msra.mxu2 %v1439_v0  ;;  %v1423_v39 = vld [vmem:[%s10658_s2 + $0x58] sm:$0xff] }
 0x22a   :  { %v1132_v56 = vsub.f32 1.0, %v1131_v25  ;;  %4811 = vpow2.f32 %v4703_v35  ;;  %vm1159_vm11 = vcmp.eq.f32.partialorder %v1158_v41, 8.507059e+37  ;;  %1630 = vmatpush.msra.mxu0 %v1434_v36  ;;  %v1431_v25 = vld [vmem:[%s10658_s2 + $0x98] sm:$0xff]  ;;  %v1418_v35 = vld [vmem:[%s10658_s2 + $0x30] sm:$0xff]  ;;  %v1817_v36 = vld [vmem:[%s10657_s1 + $0x168] sm:$0xff] }
 0x22b   :  { %1670 = vmatpush.msra.mxu2 %v1435_v9  ;;  %v1835_v49 = vld [vmem:[%s10657_s1 + $0x1f8] sm:$0xff]  ;;  %vm1374_vm1 = vweird.f32 %v6988_v27  ;;  %v1378_v0 = vand.u32 2147483647, %v6988_v27 }
 0x22c   :  { %v1133_v31 = vmul.f32 %v6947_v33, %v1132_v56  ;;  %1631 = vmatpush.msra.mxu0 %v1430_v51  ;;  %v1831_v41 = vld [vmem:[%s10657_s1 + $0x1d8] sm:$0xff] }
 0x22d   :  { %v4806_v19 = vpop.eup %4805  ;;  %1671 = vmatpush.msra.mxu2 %v1431_v25  ;;  %v1819_v9 = vld [vmem:[%s10657_s1 + $0x178] sm:$0xff]  ;;  %vm1379_vm5 = vcmp.eq.f32.partialorder %v1378_v0, 8.507059e+37 }
 0x22e   :  { %v4808_v23 = vpop.eup %4807  ;;  %v1150_v38 = vmul.f32 %v4806_v19, %v6933_v3  ;;  %v1134_v20 = vadd.f32 %v6947_v33, %v1133_v31  ;;  %vm1155_vm7 = vweird.f32 %v4806_v19  ;;  %v1775_v0 = vld [vmem:[%s10657_s1 + $0x18] sm:$0xff] }
 0x22f   :  { %v6997_v42 = vadd.f32 1.0, %v4808_v23  ;;  %v4810_v15 = vpop.eup %4809  ;;  %vm1156_vm10 = vmor %vm1154_vm8, %vm1155_vm7  ;;  %1672 = vmatpush.msra.mxu2 %v1427_v29 }
 0x230   :  { %v1151_v2 = vsub.f32 1.0, %v1150_v38  ;;  %v1138_v10 = vsel %vm7011_vm6, %v6947_v33, %v1134_v20  ;;  %v4812_v18 = vpop.eup %4811  ;;  %v1414_v38 = vld [vmem:[%s10658_s2 + $0x10] sm:$0xff]  ;;  %v1415_v20 = vld [vmem:[%s10658_s2 + $0x18] sm:$0xff] }
 0x231   :  { %4813 = vrcp.f32 %v6997_v42  ;;  %v1143_v14 = vsel %vm1140_vm9, %v1142_v13, %v1138_v10  ;;  %v7061_v30 = vadd.f32 1.0, %v4812_v18  ;;  %v1180_v40 = vand.u32 2147483648, %v6997_v42  ;;  %1673 = vmatpush.msra.mxu2 %v1423_v39  ;;  %v1827_v13 = vld [vmem:[%s10657_s1 + $0x1b8] sm:$0xff]  ;;  %v1805_v39 = vld [vmem:[%s10657_s1 + $0x108] sm:$0xff] }
 0x232   :  { %v1152_v50 = vmul.f32 %v4806_v19, %v1151_v2  ;;  %4815 = vrcp.f32 %v6988_v27  ;;  %v1279_v11 = vpop.f32.mrf.mxu0  ;;  %v1185_v12 = vmul.f32 %v4810_v15, %v1143_v14  ;;  %v1178_v31 = vand.u32 2147483647, %v6997_v42  ;;  %v1821_v15 = vld [vmem:[%s10657_s1 + $0x188] sm:$0xff]  ;;  %v1812_v14 = vld [vmem:[%s10657_s1 + $0x140] sm:$0xff] }
 0x233   :  { %v1342_v58 = vadd.f32 %v1279_v11, %v1194_v63  ;;  %vm1174_vm13 = vweird.f32 %v6997_v42  ;;  %v1181_v16 = vor.u32 1.1754944e-38, %v1180_v40  ;;  %1674 = vmatpush.msra.mxu2 %v1419_v37  ;;  %v1196_v63 = vunpack.c.l.bf16 %v6895_v1  ;;  %v1829_v1 = vld [vmem:[%s10657_s1 + $0x1c8] sm:$0xff] }
 0x234   :  { %v1153_v60 = vadd.f32 %v4806_v19, %v1152_v50  ;;  %vm1179_vm15 = vcmp.eq.f32.partialorder %v1178_v31, 8.507059e+37  ;;  %vm1394_vm9 = vweird.f32 %v7061_v30 }
 0x235   :  { %v4701_v32 = vmul.f32 -1.442695, %v1342_v58  ;;  %1675 = vmatpush.msra.mxu2 %v1415_v20  ;;  %v1380_v58 = vand.u32 2147483648, %v6988_v27  ;;  %v1793_v20 = vld [vmem:[%s10657_s1 + $0xa8] sm:$0xff] }
 0x236   :  { %v1157_v3 = vsel %vm1156_vm10, %v4806_v19, %v1153_v60 }
 0x237   :  { %v4814_v52 = vpop.eup %4813  ;;  %v1162_v21 = vsel %vm1159_vm11, %v1161_v61, %v1157_v3  ;;  %4817 = vpow2.f32 %v4701_v32  ;;  %v1823_v61 = vld [vmem:[%s10657_s1 + $0x198] sm:$0xff] }
 0x238   :  { %v7041_v47 = vpop.eup %4815  ;;  %v1184_v33 = vmul.f32 %v1162_v21, %v6365_v57  ;;  %v1170_v28 = vmul.f32 %v4814_v52, %v6997_v42  ;;  %v1426_v57 = vld [vmem:[%s10658_s2 + $0x70] sm:$0xff]  ;;  %vm1175_vm12 = vweird.f32 %v4814_v52 }
 0x239   :  { %v1370_v26 = vmul.f32 %v7041_v47, %v6988_v27  ;;  %1632 = vmatpush.msra.mxu0 %v1426_v57  ;;  %vm1176_vm14 = vmor %vm1174_vm13, %vm1175_vm12  ;;  %v1319_v4 = vpop.f32.mrf.mxu2  ;;  %vm1375_vm0 = vweird.f32 %v7041_v47  ;;  %v1811_v57 = vld [vmem:[%s10657_s1 + $0x138] sm:$0xff] }
 0x23a   :  { %v7051_v5 = vadd.f32 %v1185_v12, %v1184_v33  ;;  %v1171_v43 = vsub.f32 1.0, %v1170_v28  ;;  %v1344_v10 = vadd.f32 %v1319_v4, %v1196_v63  ;;  %vm7125_vm2 = vmor %vm1374_vm1, %vm1375_vm0  ;;  %v1815_v12 = vld [vmem:[%s10657_s1 + $0x158] sm:$0xff] }
 0x23b   :  { %1633 = vmatpush.msra.mxu0 %v1422_v44  ;;  %v1371_v23 = vsub.f32 1.0, %v1370_v26  ;;  %v1791_v63 = vld [vmem:[%s10657_s1 + $0x98] sm:$0xff] }
 0x23c   :  { %4819 = vtanh.f32 %v7051_v5  ;;  %v1172_v56 = vmul.f32 %v4814_v52, %v1171_v43  ;;  %v1809_v43 = vld [vmem:[%s10657_s1 + $0x128] sm:$0xff] }
 0x23d   :  { %v4818_v24 = vpop.eup %4817  ;;  %4821 = vrcp.f32 %v7061_v30  ;;  %1634 = vmatpush.msra.mxu0 %v1418_v35  ;;  %v1372_v2 = vmul.f32 %v7041_v47, %v1371_v23  ;;  %v1801_v35 = vld [vmem:[%s10657_s1 + $0xe8] sm:$0xff]  ;;  %v1799_v23 = vld [vmem:[%s10657_s1 + $0xd8] sm:$0xff] }
 0x23e   :  { %v7078_v17 = vadd.f32 1.0, %v4818_v24  ;;  %v1173_v19 = vadd.f32 %v4814_v52, %v1172_v56  ;;  %v1807_v24 = vld [vmem:[%s10657_s1 + $0x118] sm:$0xff] }
 0x23f   :  { %1635 = vmatpush.msra.mxu0 %v1414_v38  ;;  %v1373_v53 = vadd.f32 %v7041_v47, %v1372_v2  ;;  %v1398_v38 = vand.u32 2147483647, %v7061_v30 }
 0x240   :  { %4823 = vrcp.f32 %v7078_v17  ;;  %v1177_v59 = vsel %vm1176_vm14, %v4814_v52, %v1173_v19  ;;  %v1361_v32 = vand.u32 2147483648, %v7078_v17  ;;  %v1359_v27 = vand.u32 2147483647, %v7078_v17  ;;  %v1797_v19 = vld [vmem:[%s10657_s1 + $0xc8] sm:$0xff] }
 0x241   :  { %v1182_v42 = vsel %vm1179_vm15, %v1181_v16, %v1177_v59  ;;  %4825 = vtanh.f32 %v1344_v10  ;;  %v1377_v3 = vsel %vm7125_vm2, %v7041_v47, %v1373_v53  ;;  %v1381_v52 = vor.u32 1.1754944e-38, %v1380_v58  ;;  %v1813_v47 = vld [vmem:[%s10657_s1 + $0x148] sm:$0xff]  ;;  %v1795_v16 = vld [vmem:[%s10657_s1 + $0xb8] sm:$0xff]  ;;  %v1826_v53 = vld [vmem:[%s10657_s1 + $0x1b0] sm:$0xff] }
 0x242   :  { %v4820_v55 = vpop.eup %4819  ;;  %vm1355_vm4 = vweird.f32 %v7078_v17  ;;  %v1362_v28 = vor.u32 1.1754944e-38, %v1361_v32  ;;  %vm1360_vm7 = vcmp.eq.f32.partialorder %v1359_v27, 8.507059e+37  ;;  %vm1399_vm11 = vcmp.eq.f32.partialorder %v1398_v38, 8.507059e+37  ;;  %v1783_v10 = vld [vmem:[%s10657_s1 + $0x58] sm:$0xff]  ;;  %v1820_v58 = vld [vmem:[%s10657_s1 + $0x180] sm:$0xff]  ;;  %v1814_v32 = vld [vmem:[%s10657_s1 + $0x150] sm:$0xff] }
 0x243   :  { %v1188_v46 = vmul.f32 %v4820_v55, %v1182_v42  ;;  %v7097_v22 = vpop.eup %4821  ;;  %v1382_v51 = vsel %vm1379_vm5, %v1381_v52, %v1377_v3  ;;  %v1810_v27 = vld [vmem:[%s10657_s1 + $0x130] sm:$0xff]  ;;  %v1804_v3 = vld [vmem:[%s10657_s1 + $0x100] sm:$0xff] }
 0x244   :  { %v1390_v60 = vmul.f32 %v7097_v22, %v7061_v30  ;;  %v1404_v40 = vmul.f32 %v1382_v51, %v6462_v6  ;;  %v1803_v6 = vld [vmem:[%s10657_s1 + $0xf8] sm:$0xff]  ;;  %vm1395_vm8 = vweird.f32 %v7097_v22  ;;  %v1802_v52 = vld [vmem:[%s10657_s1 + $0xf0] sm:$0xff]  ;;  %v2094_v38 = vld [vmem:[%s10658_s2 + $0x360] sm:$0xff] }
 0x245   :  { %1576 = vmatmul.f32.vlgmr.msrb.gmra.mxu1 %v1188_v46  ;;  %1616 = vmatmul.f32.vlgmr.msrb.gmra.mxu3 %v1188_v46  ;;  %vm1396_vm10 = vmor %vm1394_vm9, %vm1395_vm8  ;;  %v1790_v51 = vld [vmem:[%s10657_s1 + $0x90] sm:$0xff] }
 0x246   :  { %v4824_v50 = vpop.eup %4823  ;;  %1856 = vmatpush.msrb.mxu1 %v1833_v8  ;;  %1896 = vmatpush.msrb.mxu3 %v1835_v49  ;;  %v1391_v21 = vsub.f32 1.0, %v1390_v60  ;;  %v1834_v8 = vld [vmem:[%s10657_s1 + $0x1f0] sm:$0xff]  ;;  %v1785_v49 = vld [vmem:[%s10657_s1 + $0x68] sm:$0xff] }
 0x247   :  { %v1351_v11 = vmul.f32 %v4824_v50, %v7078_v17  ;;  %vm1356_vm3 = vweird.f32 %v4824_v50  ;;  %v4826_v29 = vpop.eup %4825  ;;  %v1400_v17 = vand.u32 2147483648, %v7061_v30  ;;  %v1789_v30 = vld [vmem:[%s10657_s1 + $0x88] sm:$0xff]  ;;  %v1822_v60 = vld [vmem:[%s10657_s1 + $0x190] sm:$0xff] }
 0x248   :  { %1857 = vmatpush.msrb.mxu1 %v1829_v1  ;;  %1897 = vmatpush.msrb.mxu3 %v1831_v41  ;;  %vm1357_vm6 = vmor %vm1355_vm4, %vm1356_vm3  ;;  %v1392_v26 = vmul.f32 %v7097_v22, %v1391_v21  ;;  %v1828_v1 = vld [vmem:[%s10657_s1 + $0x1c0] sm:$0xff]  ;;  %v1830_v41 = vld [vmem:[%s10657_s1 + $0x1d0] sm:$0xff] }
 0x249   :  { %v1352_v62 = vsub.f32 1.0, %v1351_v11  ;;  %v1401_v55 = vor.u32 1.1754944e-38, %v1400_v17  ;;  %v1824_v11 = vld [vmem:[%s10657_s1 + $0x1a0] sm:$0xff]  ;;  %v2103_v17 = vld [vmem:[%s10658_s2 + $0x3a8] sm:$0xff] }
 0x24a   :  { %1858 = vmatpush.msrb.mxu1 %v1825_v54  ;;  %1898 = vmatpush.msrb.mxu3 %v1827_v13  ;;  %v1393_v37 = vadd.f32 %v7097_v22, %v1392_v26  ;;  %v1777_v54 = vld [vmem:[%s10657_s1 + $0x28] sm:$0xff]  ;;  %v1779_v13 = vld [vmem:[%s10657_s1 + $0x38] sm:$0xff]  ;;  %v1796_v21 = vld [vmem:[%s10657_s1 + $0xc0] sm:$0xff] }
 0x24b   :  { %v1353_v18 = vmul.f32 %v4824_v50, %v1352_v62  ;;  %v1773_v62 = vld [vmem:[%s10657_s1 + $0x8] sm:$0xff]  ;;  %v1776_v26 = vld [vmem:[%s10657_s1 + $0x20] sm:$0xff] }
 0x24c   :  { %1859 = vmatpush.msrb.mxu1 %v1821_v15  ;;  %1899 = vmatpush.msrb.mxu3 %v1823_v61  ;;  %v1397_v59 = vsel %vm1396_vm10, %v7097_v22, %v1393_v37  ;;  %v1787_v22 = vld [vmem:[%s10657_s1 + $0x78] sm:$0xff]  ;;  %v1816_v15 = vld [vmem:[%s10657_s1 + $0x160] sm:$0xff]  ;;  %v1818_v61 = vld [vmem:[%s10657_s1 + $0x170] sm:$0xff] }
 0x24d   :  { %v1354_v33 = vadd.f32 %v4824_v50, %v1353_v18  ;;  %1656 = vmatmul.f32.vlgmr.msra.gmra.mxu1 %v1188_v46  ;;  %1696 = vmatmul.f32.vlgmr.msra.gmra.mxu3 %v1188_v46  ;;  %v1402_v2 = vsel %vm1399_vm11, %v1401_v55, %v1397_v59  ;;  %v1832_v46 = vld [vmem:[%s10657_s1 + $0x1e0] sm:$0xff]  ;;  %v2091_v59 = vld [vmem:[%s10658_s2 + $0x348] sm:$0xff] }
 0x24e   :  { %1860 = vmatpush.msrb.mxu1 %v1817_v36  ;;  %1900 = vmatpush.msrb.mxu3 %v1819_v9  ;;  %v1808_v18 = vld [vmem:[%s10657_s1 + $0x120] sm:$0xff]  ;;  %v1806_v36 = vld [vmem:[%s10657_s1 + $0x110] sm:$0xff] }
 0x24f   :  { %v1358_v25 = vsel %vm1357_vm6, %v4824_v50, %v1354_v33  ;;  %v1781_v50 = vld [vmem:[%s10657_s1 + $0x48] sm:$0xff]  ;;  %v1800_v9 = vld [vmem:[%s10657_s1 + $0xe0] sm:$0xff]  ;;  %v1798_v33 = vld [vmem:[%s10657_s1 + $0xd0] sm:$0xff] }
 0x250   :  { %v1363_v56 = vsel %vm1360_vm7, %v1362_v28, %v1358_v25  ;;  %1861 = vmatpush.msrb.mxu1 %v1813_v47  ;;  %1901 = vmatpush.msrb.mxu3 %v1815_v12  ;;  %v1792_v47 = vld [vmem:[%s10657_s1 + $0xa0] sm:$0xff]  ;;  %v1794_v12 = vld [vmem:[%s10657_s1 + $0xb0] sm:$0xff] }
 0x251   :  { %v1405_v44 = vmul.f32 %v4826_v29, %v1363_v56  ;;  %v1788_v28 = vld [vmem:[%s10657_s1 + $0x80] sm:$0xff]  ;;  %v1782_v29 = vld [vmem:[%s10657_s1 + $0x50] sm:$0xff] }
 0x252   :  { %1862 = vmatpush.msrb.mxu1 %v1809_v43  ;;  %1902 = vmatpush.msrb.mxu3 %v1811_v57  ;;  %v1784_v25 = vld [vmem:[%s10657_s1 + $0x60] sm:$0xff]  ;;  %v1786_v43 = vld [vmem:[%s10657_s1 + $0x70] sm:$0xff] }
 0x253   :  { %v7162_v31 = vadd.f32 %v1405_v44, %v1404_v40  ;;  %v1780_v57 = vld [vmem:[%s10657_s1 + $0x40] sm:$0xff]  ;;  %v1778_v56 = vld [vmem:[%s10657_s1 + $0x30] sm:$0xff] }
 0x254   :  { %1863 = vmatpush.msrb.mxu1 %v1805_v39  ;;  %1903 = vmatpush.msrb.mxu3 %v1807_v24  ;;  %v1772_v40 = vld [vmem:[%s10657_s1] sm:$0xff]  ;;  %v1774_v44 = vld [vmem:[%s10657_s1 + $0x10] sm:$0xff]  ;;  %v2111_v24 = vld [vmem:[%s10658_s2 + $0x3e8] sm:$0xff] }
 0x255   :  { %4827 = vtanh.f32 %v7162_v31  ;;  %v2110_v39 = vld [vmem:[%s10658_s2 + $0x3e0] sm:$0xff] }
 0x256   :  { %1864 = vmatpush.msrb.mxu1 %v1801_v35  ;;  %1904 = vmatpush.msrb.mxu3 %v1803_v6  ;;  %v2106_v35 = vld [vmem:[%s10658_s2 + $0x3c0] sm:$0xff]  ;;  %v2107_v6 = vld [vmem:[%s10658_s2 + $0x3c8] sm:$0xff] }
 0x257   :  { %v2102_v37 = vld [vmem:[%s10658_s2 + $0x3a0] sm:$0xff] }
 0x258   :  { %1865 = vmatpush.msrb.mxu1 %v1797_v19  ;;  %1905 = vmatpush.msrb.mxu3 %v1799_v23  ;;  %v2098_v19 = vld [vmem:[%s10658_s2 + $0x380] sm:$0xff]  ;;  %v2099_v23 = vld [vmem:[%s10658_s2 + $0x388] sm:$0xff] }
 0x259   :  { %v2086_v55 = vld [vmem:[%s10658_s2 + $0x320] sm:$0xff] }
 0x25a   :  { %1866 = vmatpush.msrb.mxu1 %v1793_v20  ;;  %1906 = vmatpush.msrb.mxu3 %v1795_v16  ;;  %v2095_v20 = vld [vmem:[%s10658_s2 + $0x368] sm:$0xff]  ;;  %v2090_v16 = vld [vmem:[%s10658_s2 + $0x340] sm:$0xff] }
 0x25b   :  { %v4828_v42 = vpop.eup %4827 }
 0x25c   :  { %v7195_v4 = vmul.f32 %v4828_v42, %v1402_v2  ;;  %1867 = vmatpush.msrb.mxu1 %v1789_v30  ;;  %1907 = vmatpush.msrb.mxu3 %v1791_v63  ;;  %v2087_v30 = vld [vmem:[%s10658_s2 + $0x328] sm:$0xff]  ;;  %v2082_v63 = vld [vmem:[%s10658_s2 + $0x300] sm:$0xff] }
 0x25d   :  { %v2083_v42 = vld [vmem:[%s10658_s2 + $0x308] sm:$0xff]  ;;  %v2078_v2 = vld [vmem:[%s10658_s2 + $0x2e0] sm:$0xff] }
 0x25e   :  { %1556 = vmatmul.f32.vlgmr.msrb.gmra.mxu0 %v7195_v4  ;;  %1596 = vmatmul.f32.vlgmr.msrb.gmra.mxu2 %v7195_v4 }
 0x25f   :  { %1836 = vmatpush.msrb.mxu0 %v1832_v46  ;;  %1876 = vmatpush.msrb.mxu2 %v1834_v8  ;;  %v2074_v46 = vld [vmem:[%s10658_s2 + $0x2c0] sm:$0xff]  ;;  %v2075_v8 = vld [vmem:[%s10658_s2 + $0x2c8] sm:$0xff] }
 0x260   :  { %1868 = vmatpush.msrb.mxu1 %v1785_v49  ;;  %1908 = vmatpush.msrb.mxu3 %v1787_v22  ;;  %v2070_v49 = vld [vmem:[%s10658_s2 + $0x2a0] sm:$0xff]  ;;  %v2071_v22 = vld [vmem:[%s10658_s2 + $0x2a8] sm:$0xff] }
 0x261   :  { %1837 = vmatpush.msrb.mxu0 %v1828_v1  ;;  %1877 = vmatpush.msrb.mxu2 %v1830_v41  ;;  %v2066_v1 = vld [vmem:[%s10658_s2 + $0x280] sm:$0xff]  ;;  %v2067_v41 = vld [vmem:[%s10658_s2 + $0x288] sm:$0xff] }
 0x262   :  { %1869 = vmatpush.msrb.mxu1 %v1781_v50  ;;  %1909 = vmatpush.msrb.mxu3 %v1783_v10  ;;  %v2046_v50 = vld [vmem:[%s10658_s2 + $0x1e0] sm:$0xff]  ;;  %v2047_v10 = vld [vmem:[%s10658_s2 + $0x1e8] sm:$0xff] }
 0x263   :  { %1838 = vmatpush.msrb.mxu0 %v1824_v11  ;;  %1878 = vmatpush.msrb.mxu2 %v1826_v53  ;;  %v2062_v11 = vld [vmem:[%s10658_s2 + $0x260] sm:$0xff]  ;;  %v2063_v53 = vld [vmem:[%s10658_s2 + $0x268] sm:$0xff] }
 0x264   :  { %1870 = vmatpush.msrb.mxu1 %v1777_v54  ;;  %1910 = vmatpush.msrb.mxu3 %v1779_v13  ;;  %v2042_v54 = vld [vmem:[%s10658_s2 + $0x1c0] sm:$0xff]  ;;  %v2043_v13 = vld [vmem:[%s10658_s2 + $0x1c8] sm:$0xff] }
 0x265   :  { %1839 = vmatpush.msrb.mxu0 %v1820_v58  ;;  %1879 = vmatpush.msrb.mxu2 %v1822_v60  ;;  %v2058_v58 = vld [vmem:[%s10658_s2 + $0x240] sm:$0xff]  ;;  %v2059_v60 = vld [vmem:[%s10658_s2 + $0x248] sm:$0xff] }
 0x266   :  { %1871 = vmatpush.msrb.mxu1 %v1773_v62  ;;  %1911 = vmatpush.msrb.mxu3 %v1775_v0  ;;  %v2038_v62 = vld [vmem:[%s10658_s2 + $0x1a0] sm:$0xff]  ;;  %v2039_v0 = vld [vmem:[%s10658_s2 + $0x1a8] sm:$0xff] }
 0x267   :  { %1636 = vmatmul.f32.vlgmr.msra.gmra.mxu0 %v7195_v4  ;;  %1676 = vmatmul.f32.vlgmr.msra.gmra.mxu2 %v7195_v4 }
 0x268   :  { %1840 = vmatpush.msrb.mxu0 %v1816_v15  ;;  %1872 = vmatmul.f32.vlgmr.msrb.gmra.mxu1 %v7195_v4  ;;  %v2054_v15 = vld [vmem:[%s10658_s2 + $0x220] sm:$0xff] }
 0x269   :  { %1880 = vmatpush.msrb.mxu2 %v1818_v61  ;;  %1912 = vmatmul.f32.vlgmr.msrb.gmra.mxu3 %v7195_v4  ;;  %v2055_v61 = vld [vmem:[%s10658_s2 + $0x228] sm:$0xff] }
 0x26a   :  { %1841 = vmatpush.msrb.mxu0 %v1812_v14  ;;  %2134 = vmatpush.msra.mxu1 %v2110_v39  ;;  %v2101_v39 = vld [vmem:[%s10658_s2 + $0x398] sm:$0xff] }
 0x26b   :  { %1881 = vmatpush.msrb.mxu2 %v1814_v32  ;;  %2174 = vmatpush.msra.mxu3 %v2111_v24  ;;  %v2034_v32 = vld [vmem:[%s10658_s2 + $0x180] sm:$0xff] }
 0x26c   :  { %1842 = vmatpush.msrb.mxu0 %v1808_v18  ;;  %2135 = vmatpush.msra.mxu1 %v2106_v35  ;;  %v2035_v18 = vld [vmem:[%s10658_s2 + $0x188] sm:$0xff] }
 0x26d   :  { %1882 = vmatpush.msrb.mxu2 %v1810_v27  ;;  %2175 = vmatpush.msra.mxu3 %v2107_v6  ;;  %v2050_v27 = vld [vmem:[%s10658_s2 + $0x200] sm:$0xff] }
 0x26e   :  { %1843 = vmatpush.msrb.mxu0 %v1804_v3  ;;  %2136 = vmatpush.msra.mxu1 %v2102_v37  ;;  %v2051_v3 = vld [vmem:[%s10658_s2 + $0x208] sm:$0xff]  ;;  %v2014_v6 = vld [vmem:[%s10658_s2 + $0xe0] sm:$0xff] }
 0x26f   :  { %1883 = vmatpush.msrb.mxu2 %v1806_v36  ;;  %2176 = vmatpush.msra.mxu3 %v2103_v17  ;;  %v2030_v36 = vld [vmem:[%s10658_s2 + $0x160] sm:$0xff]  ;;  %v2015_v37 = vld [vmem:[%s10658_s2 + $0xe8] sm:$0xff]  ;;  %v2096_v17 = vld [vmem:[%s10658_s2 + $0x370] sm:$0xff] }
 0x270   :  { %1844 = vmatpush.msrb.mxu0 %v1800_v9  ;;  %2137 = vmatpush.msra.mxu1 %v2098_v19  ;;  %v2031_v9 = vld [vmem:[%s10658_s2 + $0x168] sm:$0xff] }
 0x271   :  { %1884 = vmatpush.msrb.mxu2 %v1802_v52  ;;  %2177 = vmatpush.msra.mxu3 %v2099_v23  ;;  %v2112_v52 = vld [vmem:[%s10658_s2 + $0x3f0] sm:$0xff]  ;;  %v2097_v23 = vld [vmem:[%s10658_s2 + $0x378] sm:$0xff] }
 0x272   :  { %1845 = vmatpush.msrb.mxu0 %v1796_v21  ;;  %2138 = vmatpush.msra.mxu1 %v2094_v38  ;;  %v2113_v21 = vld [vmem:[%s10658_s2 + $0x3f8] sm:$0xff]  ;;  %v2010_v38 = vld [vmem:[%s10658_s2 + $0xc0] sm:$0xff] }
 0x273   :  { %1885 = vmatpush.msrb.mxu2 %v1798_v33  ;;  %2178 = vmatpush.msra.mxu3 %v2095_v20  ;;  %v2026_v33 = vld [vmem:[%s10658_s2 + $0x140] sm:$0xff]  ;;  %v2011_v20 = vld [vmem:[%s10658_s2 + $0xc8] sm:$0xff] }
 0x274   :  { %1846 = vmatpush.msrb.mxu0 %v1792_v47  ;;  %2139 = vmatpush.msra.mxu1 %v2090_v16  ;;  %v2027_v47 = vld [vmem:[%s10658_s2 + $0x148] sm:$0xff]  ;;  %v2092_v16 = vld [vmem:[%s10658_s2 + $0x350] sm:$0xff] }
 0x275   :  { %1886 = vmatpush.msrb.mxu2 %v1794_v12  ;;  %2179 = vmatpush.msra.mxu3 %v2091_v59  ;;  %v2108_v12 = vld [vmem:[%s10658_s2 + $0x3d0] sm:$0xff] }
 0x276   :  { %1847 = vmatpush.msrb.mxu0 %v1788_v28  ;;  %2140 = vmatpush.msra.mxu1 %v2086_v55  ;;  %v2109_v28 = vld [vmem:[%s10658_s2 + $0x3d8] sm:$0xff]  ;;  %v7520_v55 = vld [vmem:[%s10659_s0 + $0x30] sm:$0xff] }
 0x277   :  { %1887 = vmatpush.msrb.mxu2 %v1790_v51  ;;  %2180 = vmatpush.msra.mxu3 %v2087_v30  ;;  %v2022_v51 = vld [vmem:[%s10658_s2 + $0x120] sm:$0xff]  ;;  %v2093_v30 = vld [vmem:[%s10658_s2 + $0x358] sm:$0xff] }
 0x278   :  { %1848 = vmatpush.msrb.mxu0 %v1784_v25  ;;  %2141 = vmatpush.msra.mxu1 %v2082_v63  ;;  %v2023_v25 = vld [vmem:[%s10658_s2 + $0x128] sm:$0xff] }
 0x279   :  { %1888 = vmatpush.msrb.mxu2 %v1786_v43  ;;  %2181 = vmatpush.msra.mxu3 %v2083_v42  ;;  %v2104_v43 = vld [vmem:[%s10658_s2 + $0x3b0] sm:$0xff]  ;;  %v2006_v42 = vld [vmem:[%s10658_s2 + $0xa0] sm:$0xff] }
 0x27a   :  { %1849 = vmatpush.msrb.mxu0 %v1780_v57  ;;  %2142 = vmatpush.msra.mxu1 %v2078_v2  ;;  %v2105_v57 = vld [vmem:[%s10658_s2 + $0x3b8] sm:$0xff]  ;;  %v2007_v2 = vld [vmem:[%s10658_s2 + $0xa8] sm:$0xff] }
 0x27b   :  { %1889 = vmatpush.msrb.mxu2 %v1782_v29 }
 0x27c   :  { %1850 = vmatpush.msrb.mxu0 %v1776_v26  ;;  %2143 = vmatpush.msra.mxu1 %v2074_v46  ;;  %v2018_v26 = vld [vmem:[%s10658_s2 + $0x100] sm:$0xff] }
 0x27d   :  { %1890 = vmatpush.msrb.mxu2 %v1778_v56  ;;  %v2019_v56 = vld [vmem:[%s10658_s2 + $0x108] sm:$0xff] }
 0x27e   :  { %1851 = vmatpush.msrb.mxu0 %v1772_v40  ;;  %2144 = vmatpush.msra.mxu1 %v2070_v49  ;;  %v2100_v40 = vld [vmem:[%s10658_s2 + $0x390] sm:$0xff]  ;;  %v1769_v49 = vunpack.c.h.bf16 %v7520_v55 }
 0x27f   :  { %1891 = vmatpush.msrb.mxu2 %v1774_v44  ;;  %1852 = vmatmul.f32.vlgmr.msrb.gmra.mxu0 %v7195_v4 }
 0x280   :  { %1892 = vmatmul.f32.vlgmr.msrb.gmra.mxu2 %v7195_v4  ;;  %v2079_v4 = vld [vmem:[%s10658_s2 + $0x2e8] sm:$0xff]  ;;  %2145 = vmatpush.msra.mxu1 %v2066_v1 }
 0x281   :  { %2182 = vmatpush.msra.mxu3 %v2079_v4  ;;  %2114 = vmatpush.msra.mxu0 %v2046_v50  ;;  %v2088_v4 = vld [vmem:[%s10658_s2 + $0x330] sm:$0xff]  ;;  %v2003_v1 = vld [vmem:[%s10658_s2 + $0x88] sm:$0xff] }
 0x282   :  { %2154 = vmatpush.msra.mxu2 %v2047_v10  ;;  %2146 = vmatpush.msra.mxu1 %v2062_v11  ;;  %v2085_v10 = vld [vmem:[%s10658_s2 + $0x318] sm:$0xff] }
 0x283   :  { %2183 = vmatpush.msra.mxu3 %v2075_v8  ;;  %2115 = vmatpush.msra.mxu0 %v2042_v54  ;;  %v2089_v8 = vld [vmem:[%s10658_s2 + $0x338] sm:$0xff]  ;;  %v1999_v54 = vld [vmem:[%s10658_s2 + $0x68] sm:$0xff] }
 0x284   :  { %2155 = vmatpush.msra.mxu2 %v2043_v13  ;;  %2147 = vmatpush.msra.mxu1 %v2058_v58  ;;  %v2080_v13 = vld [vmem:[%s10658_s2 + $0x2f0] sm:$0xff] }
 0x285   :  { %2184 = vmatpush.msra.mxu3 %v2071_v22  ;;  %2116 = vmatpush.msra.mxu0 %v2038_v62  ;;  %v2002_v22 = vld [vmem:[%s10658_s2 + $0x80] sm:$0xff] }
 0x286   :  { %2156 = vmatpush.msra.mxu2 %v2039_v0  ;;  %2148 = vmatpush.msra.mxu1 %v2054_v15  ;;  %v1994_v15 = vld [vmem:[%s10658_s2 + $0x40] sm:$0xff] }
 0x287   :  { %2185 = vmatpush.msra.mxu3 %v2067_v41  ;;  %2117 = vmatpush.msra.mxu0 %v2034_v32  ;;  %v2084_v41 = vld [vmem:[%s10658_s2 + $0x310] sm:$0xff] }
 0x288   :  { %2157 = vmatpush.msra.mxu2 %v2035_v18  ;;  %2149 = vmatpush.msra.mxu1 %v2050_v27  ;;  %v2077_v18 = vld [vmem:[%s10658_s2 + $0x2d8] sm:$0xff] }
 0x289   :  { %2186 = vmatpush.msra.mxu3 %v2063_v53  ;;  %2118 = vmatpush.msra.mxu0 %v2030_v36  ;;  %v1998_v53 = vld [vmem:[%s10658_s2 + $0x60] sm:$0xff]  ;;  %v1991_v36 = vld [vmem:[%s10658_s2 + $0x28] sm:$0xff] }
 0x28a   :  { %2158 = vmatpush.msra.mxu2 %v2031_v9  ;;  %2214 = vmatpush.msrb.mxu1 %v2112_v52  ;;  %v2072_v9 = vld [vmem:[%s10658_s2 + $0x2b0] sm:$0xff] }
 0x28b   :  { %2187 = vmatpush.msra.mxu3 %v2059_v60  ;;  %2119 = vmatpush.msra.mxu0 %v2026_v33  ;;  %v2081_v60 = vld [vmem:[%s10658_s2 + $0x2f8] sm:$0xff] }
 0x28c   :  { %2159 = vmatpush.msra.mxu2 %v2027_v47  ;;  %2215 = vmatpush.msrb.mxu1 %v2108_v12  ;;  %v2073_v33 = vld [vmem:[%s10658_s2 + $0x2b8] sm:$0xff]  ;;  %v1986_v12 = vld [vmem:[%s10658_s2] sm:$0xff] }
 0x28d   :  { %2188 = vmatpush.msra.mxu3 %v2055_v61  ;;  %2120 = vmatpush.msra.mxu0 %v2022_v51  ;;  %v1995_v61 = vld [vmem:[%s10658_s2 + $0x48] sm:$0xff]  ;;  %v2068_v51 = vld [vmem:[%s10658_s2 + $0x290] sm:$0xff] }
 0x28e   :  { %2160 = vmatpush.msra.mxu2 %v2023_v25  ;;  %2216 = vmatpush.msrb.mxu1 %v2104_v43  ;;  %v2069_v43 = vld [vmem:[%s10658_s2 + $0x298] sm:$0xff] }
 0x28f   :  { %2189 = vmatpush.msra.mxu3 %v2051_v3  ;;  %2121 = vmatpush.msra.mxu0 %v2018_v26  ;;  %v1990_v3 = vld [vmem:[%s10658_s2 + $0x20] sm:$0xff]  ;;  %v2064_v26 = vld [vmem:[%s10658_s2 + $0x270] sm:$0xff] }
 0x290   :  { %2161 = vmatpush.msra.mxu2 %v2019_v56  ;;  %2217 = vmatpush.msrb.mxu1 %v2100_v40  ;;  %v2065_v56 = vld [vmem:[%s10658_s2 + $0x278] sm:$0xff] }
 0x291   :  { %2254 = vmatpush.msrb.mxu3 %v2113_v21  ;;  %2122 = vmatpush.msra.mxu0 %v2014_v6  ;;  %v7589_v21 = vld [vmem:[%s10659_s0 + $0x38] sm:$0xff]  ;;  %v2044_v6 = vld [vmem:[%s10658_s2 + $0x1d0] sm:$0xff] }
 0x292   :  { %2162 = vmatpush.msra.mxu2 %v2015_v37  ;;  %2218 = vmatpush.msrb.mxu1 %v2096_v17  ;;  %v2045_v37 = vld [vmem:[%s10658_s2 + $0x1d8] sm:$0xff] }
 0x293   :  { %2255 = vmatpush.msrb.mxu3 %v2109_v28  ;;  %2123 = vmatpush.msra.mxu0 %v2010_v38  ;;  %v1987_v28 = vld [vmem:[%s10658_s2 + $0x8] sm:$0xff]  ;;  %v2061_v38 = vld [vmem:[%s10658_s2 + $0x258] sm:$0xff] }
 0x294   :  { %2163 = vmatpush.msra.mxu2 %v2011_v20  ;;  %2219 = vmatpush.msrb.mxu1 %v2092_v16  ;;  %v2040_v16 = vld [vmem:[%s10658_s2 + $0x1b0] sm:$0xff] }
 0x295   :  { %2256 = vmatpush.msrb.mxu3 %v2105_v57  ;;  %2124 = vmatpush.msra.mxu0 %v2006_v42  ;;  %v2048_v57 = vld [vmem:[%s10658_s2 + $0x1f0] sm:$0xff] }
 0x296   :  { %2164 = vmatpush.msra.mxu2 %v2007_v2  ;;  %2220 = vmatpush.msrb.mxu1 %v2088_v4  ;;  %v2056_v42 = vld [vmem:[%s10658_s2 + $0x230] sm:$0xff]  ;;  %v2057_v2 = vld [vmem:[%s10658_s2 + $0x238] sm:$0xff] }
 0x297   :  { %2257 = vmatpush.msrb.mxu3 %v2101_v39  ;;  %2125 = vmatpush.msra.mxu0 %v2002_v22  ;;  %v2052_v22 = vld [vmem:[%s10658_s2 + $0x210] sm:$0xff] }
 0x298   :  { %2165 = vmatpush.msra.mxu2 %v2003_v1  ;;  %2221 = vmatpush.msrb.mxu1 %v2084_v41  ;;  %v2053_v1 = vld [vmem:[%s10658_s2 + $0x218] sm:$0xff] }
 0x299   :  { %2258 = vmatpush.msrb.mxu3 %v2097_v23  ;;  %2126 = vmatpush.msra.mxu0 %v1998_v53  ;;  %v2060_v23 = vld [vmem:[%s10658_s2 + $0x250] sm:$0xff] }
 0x29a   :  { %2166 = vmatpush.msra.mxu2 %v1999_v54  ;;  %2222 = vmatpush.msrb.mxu1 %v2080_v13 }
 0x29b   :  { %2259 = vmatpush.msrb.mxu3 %v2093_v30  ;;  %2127 = vmatpush.msra.mxu0 %v1994_v15 }
 0x29c   :  { %2167 = vmatpush.msra.mxu2 %v1995_v61 }
 0x29d   :  { %2260 = vmatpush.msrb.mxu3 %v2089_v8  ;;  %2128 = vmatpush.msra.mxu0 %v1990_v3  ;;  %v2036_v8 = vld [vmem:[%s10658_s2 + $0x190] sm:$0xff] }
 0x29e   :  { %2168 = vmatpush.msra.mxu2 %v1991_v36  ;;  %v1768_v36 = vunpack.c.l.bf16 %v7520_v55 }
 0x29f   :  { %2261 = vmatpush.msrb.mxu3 %v2085_v10  ;;  %2129 = vmatpush.msra.mxu0 %v1986_v12  ;;  %v2033_v10 = vld [vmem:[%s10658_s2 + $0x178] sm:$0xff] }
 0x2a0   :  { %2169 = vmatpush.msra.mxu2 %v1987_v28 }
 0x2a1   :  { %2262 = vmatpush.msrb.mxu3 %v2081_v60  ;;  %2194 = vmatpush.msrb.mxu0 %v2048_v57  ;;  %v2029_v60 = vld [vmem:[%s10658_s2 + $0x158] sm:$0xff] }
 0x2a2   :  { %v2017_v57 = vld [vmem:[%s10658_s2 + $0xf8] sm:$0xff] }
 0x2a3   :  { %2263 = vmatpush.msrb.mxu3 %v2077_v18  ;;  %2195 = vmatpush.msrb.mxu0 %v2044_v6 }
 0x2a5   :  { %2264 = vmatpush.msrb.mxu3 %v2073_v33  ;;  %2196 = vmatpush.msrb.mxu0 %v2040_v16  ;;  %v2020_v33 = vld [vmem:[%s10658_s2 + $0x110] sm:$0xff] }
 0x2a7   :  { %2265 = vmatpush.msrb.mxu3 %v2069_v43  ;;  %2197 = vmatpush.msrb.mxu0 %v2036_v8  ;;  %v2016_v43 = vld [vmem:[%s10658_s2 + $0xf0] sm:$0xff] }
 0x2a9   :  { %2266 = vmatpush.msrb.mxu3 %v2065_v56 }
 0x2ab   :  { %2267 = vmatpush.msrb.mxu3 %v2061_v38  ;;  %v2009_v38 = vld [vmem:[%s10658_s2 + $0xb8] sm:$0xff] }
 0x2ad   :  { %2268 = vmatpush.msrb.mxu3 %v2057_v2  ;;  %v2004_v2 = vld [vmem:[%s10658_s2 + $0x90] sm:$0xff] }
 0x2af   :  { %2269 = vmatpush.msrb.mxu3 %v2053_v1 }
 0x2c2   :  { %v1577_v14 = vpop.f32.mrf.mxu1 }
 0x2c8   :  { %v1617_v24 = vpop.f32.mrf.mxu3 }
 0x2ca   :  { %v7494_v35 = vpop.f32.mrf.mxu1 }
 0x2d0   :  { %v1697_v62 = vpop.f32.mrf.mxu3 }
 0x2db   :  { %v1557_v29 = vpop.f32.mrf.mxu0 }
 0x2dc   :  { %v1558_v44 = vadd.f32 %v1557_v29, %v6080_v34  ;;  %v2049_v29 = vld [vmem:[%s10658_s2 + $0x1f8] sm:$0xff] }
 0x2dd   :  { %2234 = vmatpush.msrb.mxu2 %v2049_v29 }
 0x2de   :  { %v1578_v19 = vadd.f32 %v1577_v14, %v1558_v44  ;;  %v2076_v14 = vld [vmem:[%s10658_s2 + $0x2d0] sm:$0xff] }
 0x2df   :  { %2223 = vmatpush.msrb.mxu1 %v2076_v14  ;;  %2235 = vmatpush.msrb.mxu2 %v2045_v37  ;;  %v2024_v14 = vld [vmem:[%s10658_s2 + $0x130] sm:$0xff] }
 0x2e0   :  { %v4704_v59 = vmul.f32 -1.442695, %v1578_v19 }
 0x2e1   :  { %v1597_v63 = vpop.f32.mrf.mxu2  ;;  %2224 = vmatpush.msrb.mxu1 %v2072_v9 }
 0x2e2   :  { %4829 = vpow2.f32 %v4704_v59  ;;  %v1598_v46 = vadd.f32 %v1597_v63, %v6126_v7  ;;  %v2041_v59 = vld [vmem:[%s10658_s2 + $0x1b8] sm:$0xff] }
 0x2e3   :  { %2225 = vmatpush.msrb.mxu1 %v2068_v51  ;;  %2236 = vmatpush.msrb.mxu2 %v2041_v59 }
 0x2e4   :  { %v1618_v50 = vadd.f32 %v1617_v24, %v1598_v46  ;;  %v1637_v44 = vpop.f32.mrf.mxu0  ;;  %v1771_v24 = vunpack.c.h.bf16 %v7589_v21 }
 0x2e5   :  { %v1873_v11 = vpop.f32.mrf.mxu1  ;;  %2226 = vmatpush.msrb.mxu1 %v2064_v26  ;;  %v1638_v63 = vadd.f32 %v1637_v44, %v6251_v45  ;;  %v2013_v44 = vld [vmem:[%s10658_s2 + $0xd8] sm:$0xff] }
 0x2e6   :  { %v4705_v58 = vmul.f32 -1.442695, %v1618_v50  ;;  %v1917_v0 = vadd.f32 %v1873_v11, %v1769_v49  ;;  %v2037_v49 = vld [vmem:[%s10658_s2 + $0x198] sm:$0xff]  ;;  %v2032_v50 = vld [vmem:[%s10658_s2 + $0x170] sm:$0xff] }
 0x2e7   :  { %2227 = vmatpush.msrb.mxu1 %v2060_v23  ;;  %2237 = vmatpush.msrb.mxu2 %v2037_v49  ;;  %v1658_v53 = vadd.f32 %v7494_v35, %v1638_v63  ;;  %v2008_v23 = vld [vmem:[%s10658_s2 + $0xb0] sm:$0xff]  ;;  %v2001_v49 = vld [vmem:[%s10658_s2 + $0x78] sm:$0xff] }
 0x2e8   :  { %v4830_v32 = vpop.eup %4829  ;;  %4831 = vpow2.f32 %v4705_v58  ;;  %v4710_v47 = vmul.f32 -1.442695, %v1917_v0  ;;  %2198 = vmatpush.msrb.mxu0 %v2032_v50  ;;  %v2028_v58 = vld [vmem:[%s10658_s2 + $0x150] sm:$0xff] }
 0x2e9   :  { %v7575_v27 = vadd.f32 1.0, %v4830_v32  ;;  %2228 = vmatpush.msrb.mxu1 %v2056_v42  ;;  %2238 = vmatpush.msrb.mxu2 %v2033_v10  ;;  %v2025_v32 = vld [vmem:[%s10658_s2 + $0x138] sm:$0xff]  ;;  %v1996_v10 = vld [vmem:[%s10658_s2 + $0x50] sm:$0xff] }
 0x2ea   :  { %v1677_v52 = vpop.f32.mrf.mxu2  ;;  %2199 = vmatpush.msrb.mxu0 %v2028_v58  ;;  %v1993_v58 = vld [vmem:[%s10658_s2 + $0x38] sm:$0xff] }
 0x2eb   :  { %4833 = vrcp.f32 %v7575_v27  ;;  %v1678_v25 = vadd.f32 %v1677_v52, %v6196_v48  ;;  %2229 = vmatpush.msrb.mxu1 %v2052_v22  ;;  %2239 = vmatpush.msrb.mxu2 %v2029_v60  ;;  %v1715_v18 = vand.u32 2147483648, %v7575_v27  ;;  %vm1709_vm13 = vweird.f32 %v7575_v27 }
 0x2ec   :  { %4835 = vpow2.f32 %v4710_v47  ;;  %v1913_v19 = vpop.f32.mrf.mxu3  ;;  %v1713_v52 = vand.u32 2147483647, %v7575_v27  ;;  %2200 = vmatpush.msrb.mxu0 %v2024_v14  ;;  %v2021_v47 = vld [vmem:[%s10658_s2 + $0x118] sm:$0xff] }
 0x2ed   :  { %v1698_v39 = vadd.f32 %v1697_v62, %v1678_v25  ;;  %v1919_v46 = vadd.f32 %v1913_v19, %v1771_v24  ;;  %2240 = vmatpush.msrb.mxu2 %v2025_v32  ;;  %v1716_v29 = vor.u32 1.1754944e-38, %v1715_v18 }
 0x2ee   :  { %v4832_v40 = vpop.eup %4831  ;;  %2201 = vmatpush.msrb.mxu0 %v2020_v33  ;;  %vm1714_vm1 = vcmp.eq.f32.partialorder %v1713_v52, 8.507059e+37 }
 0x2ef   :  { %v7627_v17 = vadd.f32 1.0, %v4832_v40  ;;  %v4706_v20 = vmul.f32 -1.442695, %v1698_v39  ;;  %v4711_v13 = vmul.f32 -1.442695, %v1919_v46  ;;  %2241 = vmatpush.msrb.mxu2 %v2021_v47  ;;  %v2012_v40 = vld [vmem:[%s10658_s2 + $0xd0] sm:$0xff] }
 0x2f0   :  { %2202 = vmatpush.msrb.mxu0 %v2016_v43  ;;  %v2407_v47 = vld [vmem:[%s10657_s1 + $0x1e8] sm:$0xff] }
 0x2f1   :  { %v7641_v30 = vpop.eup %4833  ;;  %4837 = vrcp.f32 %v7627_v17  ;;  %v1734_v12 = vand.u32 2147483648, %v7627_v17  ;;  %vm1728_vm0 = vweird.f32 %v7627_v17  ;;  %2242 = vmatpush.msrb.mxu2 %v2017_v57  ;;  %v2399_v57 = vld [vmem:[%s10657_s1 + $0x1a8] sm:$0xff] }
 0x2f2   :  { %v1705_v4 = vmul.f32 %v7641_v30, %v7575_v27  ;;  %4839 = vpow2.f32 %v4706_v20  ;;  %v4836_v11 = vpop.eup %4835  ;;  %vm1710_vm12 = vweird.f32 %v7641_v30  ;;  %v1732_v27 = vand.u32 2147483647, %v7627_v17  ;;  %2203 = vmatpush.msrb.mxu0 %v2012_v40 }
 0x2f3   :  { %v7682_v61 = vadd.f32 1.0, %v4836_v11  ;;  %4841 = vtanh.f32 %v1658_v53  ;;  %vm7705_vm14 = vmor %vm1709_vm13, %vm1710_vm12  ;;  %v1735_v24 = vor.u32 1.1754944e-38, %v1734_v12  ;;  %2243 = vmatpush.msrb.mxu2 %v2013_v44  ;;  %v1997_v11 = vld [vmem:[%s10658_s2 + $0x58] sm:$0xff] }
 0x2f4   :  { %v1706_v41 = vsub.f32 1.0, %v1705_v4  ;;  %4843 = vpow2.f32 %v4711_v13  ;;  %vm1733_vm3 = vcmp.eq.f32.partialorder %v1732_v27, 8.507059e+37  ;;  %2204 = vmatpush.msrb.mxu0 %v2008_v23  ;;  %v2005_v4 = vld [vmem:[%s10658_s2 + $0x98] sm:$0xff]  ;;  %v1992_v13 = vld [vmem:[%s10658_s2 + $0x30] sm:$0xff]  ;;  %v2391_v23 = vld [vmem:[%s10657_s1 + $0x168] sm:$0xff] }
 0x2f5   :  { %2244 = vmatpush.msrb.mxu2 %v2009_v38  ;;  %v2409_v12 = vld [vmem:[%s10657_s1 + $0x1f8] sm:$0xff]  ;;  %vm1948_vm9 = vweird.f32 %v7682_v61  ;;  %v1952_v44 = vand.u32 2147483647, %v7682_v61 }
 0x2f6   :  { %v1707_v54 = vmul.f32 %v7641_v30, %v1706_v41  ;;  %2205 = vmatpush.msrb.mxu0 %v2004_v2  ;;  %v2405_v27 = vld [vmem:[%s10657_s1 + $0x1d8] sm:$0xff] }
 0x2f7   :  { %v4838_v62 = vpop.eup %4837  ;;  %2245 = vmatpush.msrb.mxu2 %v2005_v4  ;;  %v2393_v38 = vld [vmem:[%s10657_s1 + $0x178] sm:$0xff]  ;;  %vm1953_vm13 = vcmp.eq.f32.partialorder %v1952_v44, 8.507059e+37 }
 0x2f8   :  { %v4840_v0 = vpop.eup %4839  ;;  %v1724_v15 = vmul.f32 %v4838_v62, %v7627_v17  ;;  %v1708_v35 = vadd.f32 %v7641_v30, %v1707_v54  ;;  %vm1729_vm15 = vweird.f32 %v4838_v62  ;;  %v2349_v44 = vld [vmem:[%s10657_s1 + $0x18] sm:$0xff] }
 0x2f9   :  { %v7691_v3 = vadd.f32 1.0, %v4840_v0  ;;  %v4842_v39 = vpop.eup %4841  ;;  %vm1730_vm2 = vmor %vm1728_vm0, %vm1729_vm15  ;;  %2246 = vmatpush.msrb.mxu2 %v2001_v49 }
 0x2fa   :  { %v1725_v9 = vsub.f32 1.0, %v1724_v15  ;;  %v1712_v51 = vsel %vm7705_vm14, %v7641_v30, %v1708_v35  ;;  %v4844_v19 = vpop.eup %4843  ;;  %v1988_v15 = vld [vmem:[%s10658_s2 + $0x10] sm:$0xff]  ;;  %v1989_v35 = vld [vmem:[%s10658_s2 + $0x18] sm:$0xff] }
 0x2fb   :  { %4845 = vrcp.f32 %v7691_v3  ;;  %v1717_v6 = vsel %vm1714_vm1, %v1716_v29, %v1712_v51  ;;  %v7755_v1 = vadd.f32 1.0, %v4844_v19  ;;  %v1754_v50 = vand.u32 2147483648, %v7691_v3  ;;  %2247 = vmatpush.msrb.mxu2 %v1997_v11  ;;  %v2401_v29 = vld [vmem:[%s10657_s1 + $0x1b8] sm:$0xff]  ;;  %v2379_v11 = vld [vmem:[%s10657_s1 + $0x108] sm:$0xff] }
 0x2fc   :  { %v1726_v28 = vmul.f32 %v4838_v62, %v1725_v9  ;;  %4847 = vrcp.f32 %v7682_v61  ;;  %v1853_v25 = vpop.f32.mrf.mxu0  ;;  %v1759_v63 = vmul.f32 %v4842_v39, %v1717_v6  ;;  %v1752_v54 = vand.u32 2147483647, %v7691_v3  ;;  %v2395_v39 = vld [vmem:[%s10657_s1 + $0x188] sm:$0xff]  ;;  %v2386_v6 = vld [vmem:[%s10657_s1 + $0x140] sm:$0xff] }
 0x2fd   :  { %v1916_v26 = vadd.f32 %v1853_v25, %v1768_v36  ;;  %vm1748_vm5 = vweird.f32 %v7691_v3  ;;  %v1755_v14 = vor.u32 1.1754944e-38, %v1754_v50  ;;  %2248 = vmatpush.msrb.mxu2 %v1993_v58  ;;  %v1770_v36 = vunpack.c.l.bf16 %v7589_v21  ;;  %v2403_v21 = vld [vmem:[%s10657_s1 + $0x1c8] sm:$0xff] }
 0x2fe   :  { %v1727_v56 = vadd.f32 %v4838_v62, %v1726_v28  ;;  %vm1753_vm7 = vcmp.eq.f32.partialorder %v1752_v54, 8.507059e+37  ;;  %vm1968_vm1 = vweird.f32 %v7755_v1 }
 0x2ff   :  { %v4709_v37 = vmul.f32 -1.442695, %v1916_v26  ;;  %2249 = vmatpush.msrb.mxu2 %v1989_v35  ;;  %v1954_v26 = vand.u32 2147483648, %v7682_v61  ;;  %v2367_v35 = vld [vmem:[%s10657_s1 + $0xa8] sm:$0xff] }
 0x300   :  { %v1731_v17 = vsel %vm1730_vm2, %v4838_v62, %v1727_v56 }
 0x301   :  { %v4846_v20 = vpop.eup %4845  ;;  %v1736_v16 = vsel %vm1733_vm3, %v1735_v24, %v1731_v17  ;;  %4849 = vpow2.f32 %v4709_v37  ;;  %v2397_v24 = vld [vmem:[%s10657_s1 + $0x198] sm:$0xff] }
 0x302   :  { %v7735_v59 = vpop.eup %4847  ;;  %v1758_v30 = vmul.f32 %v1736_v16, %v7051_v5  ;;  %v1744_v42 = vmul.f32 %v4846_v20, %v7691_v3  ;;  %v2000_v5 = vld [vmem:[%s10658_s2 + $0x70] sm:$0xff]  ;;  %vm1749_vm4 = vweird.f32 %v4846_v20 }
 0x303   :  { %v1944_v22 = vmul.f32 %v7735_v59, %v7682_v61  ;;  %2206 = vmatpush.msrb.mxu0 %v2000_v5  ;;  %vm1750_vm6 = vmor %vm1748_vm5, %vm1749_vm4  ;;  %v1893_v52 = vpop.f32.mrf.mxu2  ;;  %vm1949_vm8 = vweird.f32 %v7735_v59  ;;  %v2385_v5 = vld [vmem:[%s10657_s1 + $0x138] sm:$0xff] }
 0x304   :  { %v7745_v46 = vadd.f32 %v1759_v63, %v1758_v30  ;;  %v1745_v8 = vsub.f32 1.0, %v1744_v42  ;;  %v1918_v51 = vadd.f32 %v1893_v52, %v1770_v36  ;;  %vm7819_vm10 = vmor %vm1948_vm9, %vm1949_vm8  ;;  %v2389_v63 = vld [vmem:[%s10657_s1 + $0x158] sm:$0xff] }
 0x305   :  { %2207 = vmatpush.msrb.mxu0 %v1996_v10  ;;  %v1945_v0 = vsub.f32 1.0, %v1944_v22  ;;  %v2365_v36 = vld [vmem:[%s10657_s1 + $0x98] sm:$0xff] }
 0x306   :  { %4851 = vtanh.f32 %v7745_v46  ;;  %v1746_v41 = vmul.f32 %v4846_v20, %v1745_v8  ;;  %v2383_v8 = vld [vmem:[%s10657_s1 + $0x128] sm:$0xff] }
 0x307   :  { %v4850_v53 = vpop.eup %4849  ;;  %4853 = vrcp.f32 %v7755_v1  ;;  %2208 = vmatpush.msrb.mxu0 %v1992_v13  ;;  %v1946_v9 = vmul.f32 %v7735_v59, %v1945_v0  ;;  %v2375_v13 = vld [vmem:[%s10657_s1 + $0xe8] sm:$0xff]  ;;  %v2373_v0 = vld [vmem:[%s10657_s1 + $0xd8] sm:$0xff] }
 0x308   :  { %v7772_v60 = vadd.f32 1.0, %v4850_v53  ;;  %v1747_v62 = vadd.f32 %v4846_v20, %v1746_v41  ;;  %v2381_v53 = vld [vmem:[%s10657_s1 + $0x118] sm:$0xff] }
 0x309   :  { %2209 = vmatpush.msrb.mxu0 %v1988_v15  ;;  %v1947_v43 = vadd.f32 %v7735_v59, %v1946_v9  ;;  %v1972_v15 = vand.u32 2147483647, %v7755_v1 }
 0x30a   :  { %4855 = vrcp.f32 %v7772_v60  ;;  %v1751_v32 = vsel %vm1750_vm6, %v4846_v20, %v1747_v62  ;;  %v1935_v37 = vand.u32 2147483648, %v7772_v60  ;;  %v1933_v61 = vand.u32 2147483647, %v7772_v60  ;;  %v2371_v62 = vld [vmem:[%s10657_s1 + $0xc8] sm:$0xff] }
 0x30b   :  { %v1756_v3 = vsel %vm1753_vm7, %v1755_v14, %v1751_v32  ;;  %4857 = vtanh.f32 %v1918_v51  ;;  %v1951_v17 = vsel %vm7819_vm10, %v7735_v59, %v1947_v43  ;;  %v1955_v20 = vor.u32 1.1754944e-38, %v1954_v26  ;;  %v2387_v59 = vld [vmem:[%s10657_s1 + $0x148] sm:$0xff]  ;;  %v2369_v14 = vld [vmem:[%s10657_s1 + $0xb8] sm:$0xff]  ;;  %v2400_v43 = vld [vmem:[%s10657_s1 + $0x1b0] sm:$0xff] }
 0x30c   :  { %v4852_v18 = vpop.eup %4851  ;;  %vm1929_vm12 = vweird.f32 %v7772_v60  ;;  %v1936_v42 = vor.u32 1.1754944e-38, %v1935_v37  ;;  %vm1934_vm15 = vcmp.eq.f32.partialorder %v1933_v61, 8.507059e+37  ;;  %vm1973_vm3 = vcmp.eq.f32.partialorder %v1972_v15, 8.507059e+37  ;;  %v2357_v51 = vld [vmem:[%s10657_s1 + $0x58] sm:$0xff]  ;;  %v2394_v26 = vld [vmem:[%s10657_s1 + $0x180] sm:$0xff]  ;;  %v2388_v37 = vld [vmem:[%s10657_s1 + $0x150] sm:$0xff] }
 0x30d   :  { %v1762_v33 = vmul.f32 %v4852_v18, %v1756_v3  ;;  %v7791_v55 = vpop.eup %4853  ;;  %v1956_v2 = vsel %vm1953_vm13, %v1955_v20, %v1951_v17  ;;  %v2384_v61 = vld [vmem:[%s10657_s1 + $0x130] sm:$0xff]  ;;  %v2378_v17 = vld [vmem:[%s10657_s1 + $0x100] sm:$0xff] }
 0x30e   :  { %v1964_v56 = vmul.f32 %v7791_v55, %v7755_v1  ;;  %v1978_v50 = vmul.f32 %v1956_v2, %v7162_v31  ;;  %v2377_v31 = vld [vmem:[%s10657_s1 + $0xf8] sm:$0xff]  ;;  %vm1969_vm0 = vweird.f32 %v7791_v55  ;;  %v2376_v20 = vld [vmem:[%s10657_s1 + $0xf0] sm:$0xff]  ;;  %v2668_v15 = vld [vmem:[%s10658_s2 + $0x360] sm:$0xff] }
 0x30f   :  { %2150 = vmatmul.f32.vlgmr.msra.gmra.mxu1 %v1762_v33  ;;  %2190 = vmatmul.f32.vlgmr.msra.gmra.mxu3 %v1762_v33  ;;  %vm1970_vm2 = vmor %vm1968_vm1, %vm1969_vm0  ;;  %v2364_v2 = vld [vmem:[%s10657_s1 + $0x90] sm:$0xff] }
 0x310   :  { %v4856_v28 = vpop.eup %4855  ;;  %2430 = vmatpush.msra.mxu1 %v2407_v47  ;;  %2470 = vmatpush.msra.mxu3 %v2409_v12  ;;  %v1965_v16 = vsub.f32 1.0, %v1964_v56  ;;  %v2408_v47 = vld [vmem:[%s10657_s1 + $0x1f0] sm:$0xff]  ;;  %v2359_v12 = vld [vmem:[%s10657_s1 + $0x68] sm:$0xff] }
 0x311   :  { %v1925_v25 = vmul.f32 %v4856_v28, %v7772_v60  ;;  %vm1930_vm11 = vweird.f32 %v4856_v28  ;;  %v4858_v49 = vpop.eup %4857  ;;  %v1974_v60 = vand.u32 2147483648, %v7755_v1  ;;  %v2363_v1 = vld [vmem:[%s10657_s1 + $0x88] sm:$0xff]  ;;  %v2396_v56 = vld [vmem:[%s10657_s1 + $0x190] sm:$0xff] }
 0x312   :  { %2431 = vmatpush.msra.mxu1 %v2403_v21  ;;  %2471 = vmatpush.msra.mxu3 %v2405_v27  ;;  %vm1931_vm14 = vmor %vm1929_vm12, %vm1930_vm11  ;;  %v1966_v22 = vmul.f32 %v7791_v55, %v1965_v16  ;;  %v2402_v21 = vld [vmem:[%s10657_s1 + $0x1c0] sm:$0xff]  ;;  %v2404_v27 = vld [vmem:[%s10657_s1 + $0x1d0] sm:$0xff] }
 0x313   :  { %v1926_v40 = vsub.f32 1.0, %v1925_v25  ;;  %v1975_v18 = vor.u32 1.1754944e-38, %v1974_v60  ;;  %v2398_v25 = vld [vmem:[%s10657_s1 + $0x1a0] sm:$0xff]  ;;  %v2677_v60 = vld [vmem:[%s10658_s2 + $0x3a8] sm:$0xff] }
 0x314   :  { %2432 = vmatpush.msra.mxu1 %v2399_v57  ;;  %2472 = vmatpush.msra.mxu3 %v2401_v29  ;;  %v1967_v58 = vadd.f32 %v7791_v55, %v1966_v22  ;;  %v2351_v57 = vld [vmem:[%s10657_s1 + $0x28] sm:$0xff]  ;;  %v2353_v29 = vld [vmem:[%s10657_s1 + $0x38] sm:$0xff]  ;;  %v2370_v16 = vld [vmem:[%s10657_s1 + $0xc0] sm:$0xff] }
 0x315   :  { %v1927_v19 = vmul.f32 %v4856_v28, %v1926_v40  ;;  %v2347_v40 = vld [vmem:[%s10657_s1 + $0x8] sm:$0xff]  ;;  %v2350_v22 = vld [vmem:[%s10657_s1 + $0x20] sm:$0xff] }
 0x316   :  { %2433 = vmatpush.msra.mxu1 %v2395_v39  ;;  %2473 = vmatpush.msra.mxu3 %v2397_v24  ;;  %v1971_v32 = vsel %vm1970_vm2, %v7791_v55, %v1967_v58  ;;  %v2361_v55 = vld [vmem:[%s10657_s1 + $0x78] sm:$0xff]  ;;  %v2390_v39 = vld [vmem:[%s10657_s1 + $0x160] sm:$0xff]  ;;  %v2392_v24 = vld [vmem:[%s10657_s1 + $0x170] sm:$0xff] }
 0x317   :  { %v1928_v30 = vadd.f32 %v4856_v28, %v1927_v19  ;;  %2230 = vmatmul.f32.vlgmr.msrb.gmra.mxu1 %v1762_v33  ;;  %2270 = vmatmul.f32.vlgmr.msrb.gmra.mxu3 %v1762_v33  ;;  %v1976_v9 = vsel %vm1973_vm3, %v1975_v18, %v1971_v32  ;;  %v2406_v33 = vld [vmem:[%s10657_s1 + $0x1e0] sm:$0xff]  ;;  %v2665_v32 = vld [vmem:[%s10658_s2 + $0x348] sm:$0xff] }
 0x318   :  { %2434 = vmatpush.msra.mxu1 %v2391_v23  ;;  %2474 = vmatpush.msra.mxu3 %v2393_v38  ;;  %v2382_v19 = vld [vmem:[%s10657_s1 + $0x120] sm:$0xff]  ;;  %v2380_v23 = vld [vmem:[%s10657_s1 + $0x110] sm:$0xff] }
 0x319   :  { %v1932_v4 = vsel %vm1931_vm14, %v4856_v28, %v1928_v30  ;;  %v2355_v28 = vld [vmem:[%s10657_s1 + $0x48] sm:$0xff]  ;;  %v2374_v38 = vld [vmem:[%s10657_s1 + $0xe0] sm:$0xff]  ;;  %v2372_v30 = vld [vmem:[%s10657_s1 + $0xd0] sm:$0xff] }
 0x31a   :  { %v1937_v41 = vsel %vm1934_vm15, %v1936_v42, %v1932_v4  ;;  %2435 = vmatpush.msra.mxu1 %v2387_v59  ;;  %2475 = vmatpush.msra.mxu3 %v2389_v63  ;;  %v2366_v59 = vld [vmem:[%s10657_s1 + $0xa0] sm:$0xff]  ;;  %v2368_v63 = vld [vmem:[%s10657_s1 + $0xb0] sm:$0xff] }
 0x31b   :  { %v1979_v10 = vmul.f32 %v4858_v49, %v1937_v41  ;;  %v2362_v42 = vld [vmem:[%s10657_s1 + $0x80] sm:$0xff]  ;;  %v2356_v49 = vld [vmem:[%s10657_s1 + $0x50] sm:$0xff] }
 0x31c   :  { %2436 = vmatpush.msra.mxu1 %v2383_v8  ;;  %2476 = vmatpush.msra.mxu3 %v2385_v5  ;;  %v2358_v4 = vld [vmem:[%s10657_s1 + $0x60] sm:$0xff]  ;;  %v2360_v8 = vld [vmem:[%s10657_s1 + $0x70] sm:$0xff] }
 0x31d   :  { %v7856_v54 = vadd.f32 %v1979_v10, %v1978_v50  ;;  %v2354_v5 = vld [vmem:[%s10657_s1 + $0x40] sm:$0xff]  ;;  %v2352_v41 = vld [vmem:[%s10657_s1 + $0x30] sm:$0xff] }
 0x31e   :  { %2437 = vmatpush.msra.mxu1 %v2379_v11  ;;  %2477 = vmatpush.msra.mxu3 %v2381_v53  ;;  %v2346_v50 = vld [vmem:[%s10657_s1] sm:$0xff]  ;;  %v2348_v10 = vld [vmem:[%s10657_s1 + $0x10] sm:$0xff]  ;;  %v2685_v53 = vld [vmem:[%s10658_s2 + $0x3e8] sm:$0xff] }
 0x31f   :  { %4859 = vtanh.f32 %v7856_v54  ;;  %v2684_v11 = vld [vmem:[%s10658_s2 + $0x3e0] sm:$0xff] }
 0x320   :  { %2438 = vmatpush.msra.mxu1 %v2375_v13  ;;  %2478 = vmatpush.msra.mxu3 %v2377_v31  ;;  %v2680_v13 = vld [vmem:[%s10658_s2 + $0x3c0] sm:$0xff]  ;;  %v2681_v31 = vld [vmem:[%s10658_s2 + $0x3c8] sm:$0xff] }
 0x321   :  { %v2676_v58 = vld [vmem:[%s10658_s2 + $0x3a0] sm:$0xff] }
 0x322   :  { %2439 = vmatpush.msra.mxu1 %v2371_v62  ;;  %2479 = vmatpush.msra.mxu3 %v2373_v0  ;;  %v2672_v62 = vld [vmem:[%s10658_s2 + $0x380] sm:$0xff]  ;;  %v2673_v0 = vld [vmem:[%s10658_s2 + $0x388] sm:$0xff] }
 0x323   :  { %v2660_v18 = vld [vmem:[%s10658_s2 + $0x320] sm:$0xff] }
 0x324   :  { %2440 = vmatpush.msra.mxu1 %v2367_v35  ;;  %2480 = vmatpush.msra.mxu3 %v2369_v14  ;;  %v2669_v35 = vld [vmem:[%s10658_s2 + $0x368] sm:$0xff]  ;;  %v2664_v14 = vld [vmem:[%s10658_s2 + $0x340] sm:$0xff] }
 0x325   :  { %v4860_v3 = vpop.eup %4859 }
 0x326   :  { %v7889_v52 = vmul.f32 %v4860_v3, %v1976_v9  ;;  %2441 = vmatpush.msra.mxu1 %v2363_v1  ;;  %2481 = vmatpush.msra.mxu3 %v2365_v36  ;;  %v2661_v1 = vld [vmem:[%s10658_s2 + $0x328] sm:$0xff]  ;;  %v2656_v36 = vld [vmem:[%s10658_s2 + $0x300] sm:$0xff] }
 0x327   :  { %v2657_v3 = vld [vmem:[%s10658_s2 + $0x308] sm:$0xff]  ;;  %v2652_v9 = vld [vmem:[%s10658_s2 + $0x2e0] sm:$0xff] }
 0x328   :  { %2130 = vmatmul.f32.vlgmr.msra.gmra.mxu0 %v7889_v52  ;;  %2170 = vmatmul.f32.vlgmr.msra.gmra.mxu2 %v7889_v52 }
 0x329   :  { %2410 = vmatpush.msra.mxu0 %v2406_v33  ;;  %2450 = vmatpush.msra.mxu2 %v2408_v47  ;;  %v2648_v33 = vld [vmem:[%s10658_s2 + $0x2c0] sm:$0xff]  ;;  %v2649_v47 = vld [vmem:[%s10658_s2 + $0x2c8] sm:$0xff] }
 0x32a   :  { %2442 = vmatpush.msra.mxu1 %v2359_v12  ;;  %2482 = vmatpush.msra.mxu3 %v2361_v55  ;;  %v2644_v12 = vld [vmem:[%s10658_s2 + $0x2a0] sm:$0xff]  ;;  %v2645_v55 = vld [vmem:[%s10658_s2 + $0x2a8] sm:$0xff] }
 0x32b   :  { %2411 = vmatpush.msra.mxu0 %v2402_v21  ;;  %2451 = vmatpush.msra.mxu2 %v2404_v27  ;;  %v2640_v21 = vld [vmem:[%s10658_s2 + $0x280] sm:$0xff]  ;;  %v2641_v27 = vld [vmem:[%s10658_s2 + $0x288] sm:$0xff] }
 0x32c   :  { %2443 = vmatpush.msra.mxu1 %v2355_v28  ;;  %2483 = vmatpush.msra.mxu3 %v2357_v51  ;;  %v2620_v28 = vld [vmem:[%s10658_s2 + $0x1e0] sm:$0xff]  ;;  %v2621_v51 = vld [vmem:[%s10658_s2 + $0x1e8] sm:$0xff] }
 0x32d   :  { %2412 = vmatpush.msra.mxu0 %v2398_v25  ;;  %2452 = vmatpush.msra.mxu2 %v2400_v43  ;;  %v2636_v25 = vld [vmem:[%s10658_s2 + $0x260] sm:$0xff]  ;;  %v2637_v43 = vld [vmem:[%s10658_s2 + $0x268] sm:$0xff] }
 0x32e   :  { %2444 = vmatpush.msra.mxu1 %v2351_v57  ;;  %2484 = vmatpush.msra.mxu3 %v2353_v29  ;;  %v2616_v57 = vld [vmem:[%s10658_s2 + $0x1c0] sm:$0xff]  ;;  %v2617_v29 = vld [vmem:[%s10658_s2 + $0x1c8] sm:$0xff] }
 0x32f   :  { %2413 = vmatpush.msra.mxu0 %v2394_v26  ;;  %2453 = vmatpush.msra.mxu2 %v2396_v56  ;;  %v2632_v26 = vld [vmem:[%s10658_s2 + $0x240] sm:$0xff]  ;;  %v2633_v56 = vld [vmem:[%s10658_s2 + $0x248] sm:$0xff] }
 0x330   :  { %2445 = vmatpush.msra.mxu1 %v2347_v40  ;;  %2485 = vmatpush.msra.mxu3 %v2349_v44  ;;  %v2612_v40 = vld [vmem:[%s10658_s2 + $0x1a0] sm:$0xff]  ;;  %v2613_v44 = vld [vmem:[%s10658_s2 + $0x1a8] sm:$0xff] }
 0x331   :  { %2210 = vmatmul.f32.vlgmr.msrb.gmra.mxu0 %v7889_v52  ;;  %2250 = vmatmul.f32.vlgmr.msrb.gmra.mxu2 %v7889_v52 }
 0x332   :  { %2414 = vmatpush.msra.mxu0 %v2390_v39  ;;  %2446 = vmatmul.f32.vlgmr.msra.gmra.mxu1 %v7889_v52  ;;  %v2628_v39 = vld [vmem:[%s10658_s2 + $0x220] sm:$0xff] }
 0x333   :  { %2454 = vmatpush.msra.mxu2 %v2392_v24  ;;  %2486 = vmatmul.f32.vlgmr.msra.gmra.mxu3 %v7889_v52  ;;  %v2629_v24 = vld [vmem:[%s10658_s2 + $0x228] sm:$0xff] }
 0x334   :  { %2415 = vmatpush.msra.mxu0 %v2386_v6  ;;  %2708 = vmatpush.msrb.mxu1 %v2684_v11  ;;  %v2675_v11 = vld [vmem:[%s10658_s2 + $0x398] sm:$0xff] }
 0x335   :  { %2455 = vmatpush.msra.mxu2 %v2388_v37  ;;  %2748 = vmatpush.msrb.mxu3 %v2685_v53  ;;  %v2608_v37 = vld [vmem:[%s10658_s2 + $0x180] sm:$0xff] }
 0x336   :  { %2416 = vmatpush.msra.mxu0 %v2382_v19  ;;  %2709 = vmatpush.msrb.mxu1 %v2680_v13  ;;  %v2609_v19 = vld [vmem:[%s10658_s2 + $0x188] sm:$0xff] }
 0x337   :  { %2456 = vmatpush.msra.mxu2 %v2384_v61  ;;  %2749 = vmatpush.msrb.mxu3 %v2681_v31  ;;  %v2624_v61 = vld [vmem:[%s10658_s2 + $0x200] sm:$0xff] }
 0x338   :  { %2417 = vmatpush.msra.mxu0 %v2378_v17  ;;  %2710 = vmatpush.msrb.mxu1 %v2676_v58  ;;  %v2625_v17 = vld [vmem:[%s10658_s2 + $0x208] sm:$0xff]  ;;  %v2588_v31 = vld [vmem:[%s10658_s2 + $0xe0] sm:$0xff] }
 0x339   :  { %2457 = vmatpush.msra.mxu2 %v2380_v23  ;;  %2750 = vmatpush.msrb.mxu3 %v2677_v60  ;;  %v2604_v23 = vld [vmem:[%s10658_s2 + $0x160] sm:$0xff]  ;;  %v2589_v58 = vld [vmem:[%s10658_s2 + $0xe8] sm:$0xff]  ;;  %v2670_v60 = vld [vmem:[%s10658_s2 + $0x370] sm:$0xff] }
 0x33a   :  { %2418 = vmatpush.msra.mxu0 %v2374_v38  ;;  %2711 = vmatpush.msrb.mxu1 %v2672_v62  ;;  %v2605_v38 = vld [vmem:[%s10658_s2 + $0x168] sm:$0xff] }
 0x33b   :  { %2458 = vmatpush.msra.mxu2 %v2376_v20  ;;  %2751 = vmatpush.msrb.mxu3 %v2673_v0  ;;  %v2686_v20 = vld [vmem:[%s10658_s2 + $0x3f0] sm:$0xff]  ;;  %v2671_v0 = vld [vmem:[%s10658_s2 + $0x378] sm:$0xff] }
 0x33c   :  { %2419 = vmatpush.msra.mxu0 %v2370_v16  ;;  %2712 = vmatpush.msrb.mxu1 %v2668_v15  ;;  %v2687_v16 = vld [vmem:[%s10658_s2 + $0x3f8] sm:$0xff]  ;;  %v2584_v15 = vld [vmem:[%s10658_s2 + $0xc0] sm:$0xff] }
 0x33d   :  { %2459 = vmatpush.msra.mxu2 %v2372_v30  ;;  %2752 = vmatpush.msrb.mxu3 %v2669_v35  ;;  %v2600_v30 = vld [vmem:[%s10658_s2 + $0x140] sm:$0xff]  ;;  %v2585_v35 = vld [vmem:[%s10658_s2 + $0xc8] sm:$0xff] }
 0x33e   :  { %2420 = vmatpush.msra.mxu0 %v2366_v59  ;;  %2713 = vmatpush.msrb.mxu1 %v2664_v14  ;;  %v2601_v59 = vld [vmem:[%s10658_s2 + $0x148] sm:$0xff]  ;;  %v2666_v14 = vld [vmem:[%s10658_s2 + $0x350] sm:$0xff] }
 0x33f   :  { %2460 = vmatpush.msra.mxu2 %v2368_v63  ;;  %2753 = vmatpush.msrb.mxu3 %v2665_v32  ;;  %v2682_v63 = vld [vmem:[%s10658_s2 + $0x3d0] sm:$0xff] }
 0x340   :  { %2421 = vmatpush.msra.mxu0 %v2362_v42  ;;  %2714 = vmatpush.msrb.mxu1 %v2660_v18  ;;  %v2683_v42 = vld [vmem:[%s10658_s2 + $0x3d8] sm:$0xff]  ;;  %v8214_v18 = vld [vmem:[%s10659_s0 + $0x40] sm:$0xff] }
 0x341   :  { %2461 = vmatpush.msra.mxu2 %v2364_v2  ;;  %2754 = vmatpush.msrb.mxu3 %v2661_v1  ;;  %v2596_v2 = vld [vmem:[%s10658_s2 + $0x120] sm:$0xff]  ;;  %v2667_v1 = vld [vmem:[%s10658_s2 + $0x358] sm:$0xff] }
 0x342   :  { %2422 = vmatpush.msra.mxu0 %v2358_v4  ;;  %2715 = vmatpush.msrb.mxu1 %v2656_v36  ;;  %v2597_v4 = vld [vmem:[%s10658_s2 + $0x128] sm:$0xff] }
 0x343   :  { %2462 = vmatpush.msra.mxu2 %v2360_v8  ;;  %2755 = vmatpush.msrb.mxu3 %v2657_v3  ;;  %v2678_v8 = vld [vmem:[%s10658_s2 + $0x3b0] sm:$0xff]  ;;  %v2580_v3 = vld [vmem:[%s10658_s2 + $0xa0] sm:$0xff] }
 0x344   :  { %2423 = vmatpush.msra.mxu0 %v2354_v5  ;;  %2716 = vmatpush.msrb.mxu1 %v2652_v9  ;;  %v2679_v5 = vld [vmem:[%s10658_s2 + $0x3b8] sm:$0xff]  ;;  %v2581_v9 = vld [vmem:[%s10658_s2 + $0xa8] sm:$0xff] }
 0x345   :  { %2463 = vmatpush.msra.mxu2 %v2356_v49 }
 0x346   :  { %2424 = vmatpush.msra.mxu0 %v2350_v22  ;;  %2717 = vmatpush.msrb.mxu1 %v2648_v33  ;;  %v2592_v22 = vld [vmem:[%s10658_s2 + $0x100] sm:$0xff] }
 0x347   :  { %2464 = vmatpush.msra.mxu2 %v2352_v41  ;;  %v2593_v41 = vld [vmem:[%s10658_s2 + $0x108] sm:$0xff] }
 0x348   :  { %2425 = vmatpush.msra.mxu0 %v2346_v50  ;;  %2718 = vmatpush.msrb.mxu1 %v2644_v12  ;;  %v2674_v50 = vld [vmem:[%s10658_s2 + $0x390] sm:$0xff]  ;;  %v2343_v12 = vunpack.c.h.bf16 %v8214_v18 }
 0x349   :  { %2465 = vmatpush.msra.mxu2 %v2348_v10  ;;  %2426 = vmatmul.f32.vlgmr.msra.gmra.mxu0 %v7889_v52 }
 0x34a   :  { %2466 = vmatmul.f32.vlgmr.msra.gmra.mxu2 %v7889_v52  ;;  %v2653_v52 = vld [vmem:[%s10658_s2 + $0x2e8] sm:$0xff]  ;;  %2719 = vmatpush.msrb.mxu1 %v2640_v21 }
 0x34b   :  { %2756 = vmatpush.msrb.mxu3 %v2653_v52  ;;  %2688 = vmatpush.msrb.mxu0 %v2620_v28  ;;  %v2662_v52 = vld [vmem:[%s10658_s2 + $0x330] sm:$0xff]  ;;  %v2577_v21 = vld [vmem:[%s10658_s2 + $0x88] sm:$0xff] }
 0x34c   :  { %2728 = vmatpush.msrb.mxu2 %v2621_v51  ;;  %2720 = vmatpush.msrb.mxu1 %v2636_v25  ;;  %v2659_v51 = vld [vmem:[%s10658_s2 + $0x318] sm:$0xff] }
 0x34d   :  { %2757 = vmatpush.msrb.mxu3 %v2649_v47  ;;  %2689 = vmatpush.msrb.mxu0 %v2616_v57  ;;  %v2663_v47 = vld [vmem:[%s10658_s2 + $0x338] sm:$0xff]  ;;  %v2573_v57 = vld [vmem:[%s10658_s2 + $0x68] sm:$0xff] }
 0x34e   :  { %2729 = vmatpush.msrb.mxu2 %v2617_v29  ;;  %2721 = vmatpush.msrb.mxu1 %v2632_v26  ;;  %v2654_v29 = vld [vmem:[%s10658_s2 + $0x2f0] sm:$0xff] }
 0x34f   :  { %2758 = vmatpush.msrb.mxu3 %v2645_v55  ;;  %2690 = vmatpush.msrb.mxu0 %v2612_v40  ;;  %v2576_v55 = vld [vmem:[%s10658_s2 + $0x80] sm:$0xff] }
 0x350   :  { %2730 = vmatpush.msrb.mxu2 %v2613_v44  ;;  %2722 = vmatpush.msrb.mxu1 %v2628_v39  ;;  %v2568_v39 = vld [vmem:[%s10658_s2 + $0x40] sm:$0xff] }
 0x351   :  { %2759 = vmatpush.msrb.mxu3 %v2641_v27  ;;  %2691 = vmatpush.msrb.mxu0 %v2608_v37  ;;  %v2658_v27 = vld [vmem:[%s10658_s2 + $0x310] sm:$0xff] }
 0x352   :  { %2731 = vmatpush.msrb.mxu2 %v2609_v19  ;;  %2723 = vmatpush.msrb.mxu1 %v2624_v61  ;;  %v2651_v19 = vld [vmem:[%s10658_s2 + $0x2d8] sm:$0xff] }
 0x353   :  { %2760 = vmatpush.msrb.mxu3 %v2637_v43  ;;  %2692 = vmatpush.msrb.mxu0 %v2604_v23  ;;  %v2572_v43 = vld [vmem:[%s10658_s2 + $0x60] sm:$0xff]  ;;  %v2565_v23 = vld [vmem:[%s10658_s2 + $0x28] sm:$0xff] }
 0x354   :  { %2732 = vmatpush.msrb.mxu2 %v2605_v38  ;;  %2788 = vmatpush.msra.mxu1 %v2686_v20  ;;  %v2646_v38 = vld [vmem:[%s10658_s2 + $0x2b0] sm:$0xff] }
 0x355   :  { %2761 = vmatpush.msrb.mxu3 %v2633_v56  ;;  %2693 = vmatpush.msrb.mxu0 %v2600_v30  ;;  %v2655_v56 = vld [vmem:[%s10658_s2 + $0x2f8] sm:$0xff] }
 0x356   :  { %2733 = vmatpush.msrb.mxu2 %v2601_v59  ;;  %2789 = vmatpush.msra.mxu1 %v2682_v63  ;;  %v2647_v30 = vld [vmem:[%s10658_s2 + $0x2b8] sm:$0xff]  ;;  %v2560_v63 = vld [vmem:[%s10658_s2] sm:$0xff] }
 0x357   :  { %2762 = vmatpush.msrb.mxu3 %v2629_v24  ;;  %2694 = vmatpush.msrb.mxu0 %v2596_v2  ;;  %v2569_v24 = vld [vmem:[%s10658_s2 + $0x48] sm:$0xff]  ;;  %v2642_v2 = vld [vmem:[%s10658_s2 + $0x290] sm:$0xff] }
 0x358   :  { %2734 = vmatpush.msrb.mxu2 %v2597_v4  ;;  %2790 = vmatpush.msra.mxu1 %v2678_v8  ;;  %v2643_v8 = vld [vmem:[%s10658_s2 + $0x298] sm:$0xff] }
 0x359   :  { %2763 = vmatpush.msrb.mxu3 %v2625_v17  ;;  %2695 = vmatpush.msrb.mxu0 %v2592_v22  ;;  %v2564_v17 = vld [vmem:[%s10658_s2 + $0x20] sm:$0xff]  ;;  %v2638_v22 = vld [vmem:[%s10658_s2 + $0x270] sm:$0xff] }
 0x35a   :  { %2735 = vmatpush.msrb.mxu2 %v2593_v41  ;;  %2791 = vmatpush.msra.mxu1 %v2674_v50  ;;  %v2639_v41 = vld [vmem:[%s10658_s2 + $0x278] sm:$0xff] }
 0x35b   :  { %2828 = vmatpush.msra.mxu3 %v2687_v16  ;;  %2696 = vmatpush.msrb.mxu0 %v2588_v31  ;;  %v8283_v16 = vld [vmem:[%s10659_s0 + $0x48] sm:$0xff]  ;;  %v2618_v31 = vld [vmem:[%s10658_s2 + $0x1d0] sm:$0xff] }
 0x35c   :  { %2736 = vmatpush.msrb.mxu2 %v2589_v58  ;;  %2792 = vmatpush.msra.mxu1 %v2670_v60  ;;  %v2619_v58 = vld [vmem:[%s10658_s2 + $0x1d8] sm:$0xff] }
 0x35d   :  { %2829 = vmatpush.msra.mxu3 %v2683_v42  ;;  %2697 = vmatpush.msrb.mxu0 %v2584_v15  ;;  %v2561_v42 = vld [vmem:[%s10658_s2 + $0x8] sm:$0xff]  ;;  %v2635_v15 = vld [vmem:[%s10658_s2 + $0x258] sm:$0xff] }
 0x35e   :  { %2737 = vmatpush.msrb.mxu2 %v2585_v35  ;;  %2793 = vmatpush.msra.mxu1 %v2666_v14  ;;  %v2614_v14 = vld [vmem:[%s10658_s2 + $0x1b0] sm:$0xff] }
 0x35f   :  { %2830 = vmatpush.msra.mxu3 %v2679_v5  ;;  %2698 = vmatpush.msrb.mxu0 %v2580_v3  ;;  %v2622_v5 = vld [vmem:[%s10658_s2 + $0x1f0] sm:$0xff] }
 0x360   :  { %2738 = vmatpush.msrb.mxu2 %v2581_v9  ;;  %2794 = vmatpush.msra.mxu1 %v2662_v52  ;;  %v2630_v3 = vld [vmem:[%s10658_s2 + $0x230] sm:$0xff]  ;;  %v2631_v9 = vld [vmem:[%s10658_s2 + $0x238] sm:$0xff] }
 0x361   :  { %2831 = vmatpush.msra.mxu3 %v2675_v11  ;;  %2699 = vmatpush.msrb.mxu0 %v2576_v55  ;;  %v2626_v55 = vld [vmem:[%s10658_s2 + $0x210] sm:$0xff] }
 0x362   :  { %2739 = vmatpush.msrb.mxu2 %v2577_v21  ;;  %2795 = vmatpush.msra.mxu1 %v2658_v27  ;;  %v2627_v21 = vld [vmem:[%s10658_s2 + $0x218] sm:$0xff] }
 0x363   :  { %2832 = vmatpush.msra.mxu3 %v2671_v0  ;;  %2700 = vmatpush.msrb.mxu0 %v2572_v43  ;;  %v2634_v0 = vld [vmem:[%s10658_s2 + $0x250] sm:$0xff] }
 0x364   :  { %2740 = vmatpush.msrb.mxu2 %v2573_v57  ;;  %2796 = vmatpush.msra.mxu1 %v2654_v29 }
 0x365   :  { %2833 = vmatpush.msra.mxu3 %v2667_v1  ;;  %2701 = vmatpush.msrb.mxu0 %v2568_v39 }
 0x366   :  { %2741 = vmatpush.msrb.mxu2 %v2569_v24 }
 0x367   :  { %2834 = vmatpush.msra.mxu3 %v2663_v47  ;;  %2702 = vmatpush.msrb.mxu0 %v2564_v17  ;;  %v2610_v47 = vld [vmem:[%s10658_s2 + $0x190] sm:$0xff] }
 0x368   :  { %2742 = vmatpush.msrb.mxu2 %v2565_v23  ;;  %v2342_v23 = vunpack.c.l.bf16 %v8214_v18 }
 0x369   :  { %2835 = vmatpush.msra.mxu3 %v2659_v51  ;;  %2703 = vmatpush.msrb.mxu0 %v2560_v63  ;;  %v2607_v51 = vld [vmem:[%s10658_s2 + $0x178] sm:$0xff] }
 0x36a   :  { %2743 = vmatpush.msrb.mxu2 %v2561_v42 }
 0x36b   :  { %2836 = vmatpush.msra.mxu3 %v2655_v56  ;;  %2768 = vmatpush.msra.mxu0 %v2622_v5  ;;  %v2603_v56 = vld [vmem:[%s10658_s2 + $0x158] sm:$0xff] }
 0x36c   :  { %v2591_v5 = vld [vmem:[%s10658_s2 + $0xf8] sm:$0xff] }
 0x36d   :  { %2837 = vmatpush.msra.mxu3 %v2651_v19  ;;  %2769 = vmatpush.msra.mxu0 %v2618_v31 }
 0x36f   :  { %2838 = vmatpush.msra.mxu3 %v2647_v30  ;;  %2770 = vmatpush.msra.mxu0 %v2614_v14  ;;  %v2594_v30 = vld [vmem:[%s10658_s2 + $0x110] sm:$0xff] }
 0x371   :  { %2839 = vmatpush.msra.mxu3 %v2643_v8  ;;  %2771 = vmatpush.msra.mxu0 %v2610_v47  ;;  %v2590_v8 = vld [vmem:[%s10658_s2 + $0xf0] sm:$0xff] }
 0x373   :  { %2840 = vmatpush.msra.mxu3 %v2639_v41 }
 0x375   :  { %2841 = vmatpush.msra.mxu3 %v2635_v15  ;;  %v2583_v15 = vld [vmem:[%s10658_s2 + $0xb8] sm:$0xff] }
 0x377   :  { %2842 = vmatpush.msra.mxu3 %v2631_v9  ;;  %v2578_v9 = vld [vmem:[%s10658_s2 + $0x90] sm:$0xff] }
 0x379   :  { %2843 = vmatpush.msra.mxu3 %v2627_v21 }
 0x38c   :  { %v2151_v6 = vpop.f32.mrf.mxu1 }
 0x392   :  { %v2191_v53 = vpop.f32.mrf.mxu3 }
 0x394   :  { %v8188_v13 = vpop.f32.mrf.mxu1 }
 0x39a   :  { %v2271_v40 = vpop.f32.mrf.mxu3 }
 0x3a5   :  { %v2131_v49 = vpop.f32.mrf.mxu0 }
 0x3a6   :  { %v2132_v10 = vadd.f32 %v2131_v49, %v6080_v34  ;;  %v2623_v49 = vld [vmem:[%s10658_s2 + $0x1f8] sm:$0xff] }
 0x3a7   :  { %2808 = vmatpush.msra.mxu2 %v2623_v49 }
 0x3a8   :  { %v2152_v62 = vadd.f32 %v2151_v6, %v2132_v10  ;;  %v2650_v6 = vld [vmem:[%s10658_s2 + $0x2d0] sm:$0xff] }
 0x3a9   :  { %2797 = vmatpush.msra.mxu1 %v2650_v6  ;;  %2809 = vmatpush.msra.mxu2 %v2619_v58  ;;  %v2598_v6 = vld [vmem:[%s10658_s2 + $0x130] sm:$0xff] }
 0x3aa   :  { %v4712_v32 = vmul.f32 -1.442695, %v2152_v62 }
 0x3ab   :  { %v2171_v36 = vpop.f32.mrf.mxu2  ;;  %2798 = vmatpush.msra.mxu1 %v2646_v38 }
 0x3ac   :  { %4861 = vpow2.f32 %v4712_v32  ;;  %v2172_v33 = vadd.f32 %v2171_v36, %v6126_v7  ;;  %v2615_v32 = vld [vmem:[%s10658_s2 + $0x1b8] sm:$0xff] }
 0x3ad   :  { %2799 = vmatpush.msra.mxu1 %v2642_v2  ;;  %2810 = vmatpush.msra.mxu2 %v2615_v32 }
 0x3ae   :  { %v2192_v28 = vadd.f32 %v2191_v53, %v2172_v33  ;;  %v2211_v10 = vpop.f32.mrf.mxu0  ;;  %v2345_v53 = vunpack.c.h.bf16 %v8283_v16 }
 0x3af   :  { %v2447_v25 = vpop.f32.mrf.mxu1  ;;  %2800 = vmatpush.msra.mxu1 %v2638_v22  ;;  %v2212_v36 = vadd.f32 %v2211_v10, %v6251_v45  ;;  %v2587_v10 = vld [vmem:[%s10658_s2 + $0xd8] sm:$0xff] }
 0x3b0   :  { %v4713_v26 = vmul.f32 -1.442695, %v2192_v28  ;;  %v2491_v44 = vadd.f32 %v2447_v25, %v2343_v12  ;;  %v2611_v12 = vld [vmem:[%s10658_s2 + $0x198] sm:$0xff]  ;;  %v2606_v28 = vld [vmem:[%s10658_s2 + $0x170] sm:$0xff] }
 0x3b1   :  { %2801 = vmatpush.msra.mxu1 %v2634_v0  ;;  %2811 = vmatpush.msra.mxu2 %v2611_v12  ;;  %v2232_v43 = vadd.f32 %v8188_v13, %v2212_v36  ;;  %v2582_v0 = vld [vmem:[%s10658_s2 + $0xb0] sm:$0xff]  ;;  %v2575_v12 = vld [vmem:[%s10658_s2 + $0x78] sm:$0xff] }
 0x3b2   :  { %v4862_v37 = vpop.eup %4861  ;;  %4863 = vpow2.f32 %v4713_v26  ;;  %v4718_v59 = vmul.f32 -1.442695, %v2491_v44  ;;  %2772 = vmatpush.msra.mxu0 %v2606_v28  ;;  %v2602_v26 = vld [vmem:[%s10658_s2 + $0x150] sm:$0xff] }
 0x3b3   :  { %v8269_v61 = vadd.f32 1.0, %v4862_v37  ;;  %2802 = vmatpush.msra.mxu1 %v2630_v3  ;;  %2812 = vmatpush.msra.mxu2 %v2607_v51  ;;  %v2599_v37 = vld [vmem:[%s10658_s2 + $0x138] sm:$0xff]  ;;  %v2570_v51 = vld [vmem:[%s10658_s2 + $0x50] sm:$0xff] }
 0x3b4   :  { %v2251_v20 = vpop.f32.mrf.mxu2  ;;  %2773 = vmatpush.msra.mxu0 %v2602_v26  ;;  %v2567_v26 = vld [vmem:[%s10658_s2 + $0x38] sm:$0xff] }
 0x3b5   :  { %4865 = vrcp.f32 %v8269_v61  ;;  %v2252_v4 = vadd.f32 %v2251_v20, %v6196_v48  ;;  %2803 = vmatpush.msra.mxu1 %v2626_v55  ;;  %2813 = vmatpush.msra.mxu2 %v2603_v56  ;;  %v2289_v19 = vand.u32 2147483648, %v8269_v61  ;;  %vm2283_vm5 = vweird.f32 %v8269_v61 }
 0x3b6   :  { %4867 = vpow2.f32 %v4718_v59  ;;  %v2487_v62 = vpop.f32.mrf.mxu3  ;;  %v2287_v20 = vand.u32 2147483647, %v8269_v61  ;;  %2774 = vmatpush.msra.mxu0 %v2598_v6  ;;  %v2595_v59 = vld [vmem:[%s10658_s2 + $0x118] sm:$0xff] }
 0x3b7   :  { %v2272_v11 = vadd.f32 %v2271_v40, %v2252_v4  ;;  %v2493_v33 = vadd.f32 %v2487_v62, %v2345_v53  ;;  %2814 = vmatpush.msra.mxu2 %v2599_v37  ;;  %v2290_v49 = vor.u32 1.1754944e-38, %v2289_v19 }
 0x3b8   :  { %v4864_v50 = vpop.eup %4863  ;;  %2775 = vmatpush.msra.mxu0 %v2594_v30  ;;  %vm2288_vm9 = vcmp.eq.f32.partialorder %v2287_v20, 8.507059e+37 }
 0x3b9   :  { %v8321_v60 = vadd.f32 1.0, %v4864_v50  ;;  %v4714_v35 = vmul.f32 -1.442695, %v2272_v11  ;;  %v4719_v29 = vmul.f32 -1.442695, %v2493_v33  ;;  %2815 = vmatpush.msra.mxu2 %v2595_v59  ;;  %v2586_v50 = vld [vmem:[%s10658_s2 + $0xd0] sm:$0xff] }
 0x3ba   :  { %2776 = vmatpush.msra.mxu0 %v2590_v8  ;;  %v2981_v59 = vld [vmem:[%s10657_s1 + $0x1e8] sm:$0xff] }
 0x3bb   :  { %v8335_v1 = vpop.eup %4865  ;;  %4869 = vrcp.f32 %v8321_v60  ;;  %v2308_v63 = vand.u32 2147483648, %v8321_v60  ;;  %vm2302_vm8 = vweird.f32 %v8321_v60  ;;  %2816 = vmatpush.msra.mxu2 %v2591_v5  ;;  %v2973_v5 = vld [vmem:[%s10657_s1 + $0x1a8] sm:$0xff] }
 0x3bc   :  { %v2279_v52 = vmul.f32 %v8335_v1, %v8269_v61  ;;  %4871 = vpow2.f32 %v4714_v35  ;;  %v4868_v25 = vpop.eup %4867  ;;  %vm2284_vm4 = vweird.f32 %v8335_v1  ;;  %v2306_v61 = vand.u32 2147483647, %v8321_v60  ;;  %2777 = vmatpush.msra.mxu0 %v2586_v50 }
 0x3bd   :  { %v8376_v24 = vadd.f32 1.0, %v4868_v25  ;;  %4873 = vtanh.f32 %v2232_v43  ;;  %vm8399_vm6 = vmor %vm2283_vm5, %vm2284_vm4  ;;  %v2309_v53 = vor.u32 1.1754944e-38, %v2308_v63  ;;  %2817 = vmatpush.msra.mxu2 %v2587_v10  ;;  %v2571_v25 = vld [vmem:[%s10658_s2 + $0x58] sm:$0xff] }
 0x3be   :  { %v2280_v27 = vsub.f32 1.0, %v2279_v52  ;;  %4875 = vpow2.f32 %v4719_v29  ;;  %vm2307_vm11 = vcmp.eq.f32.partialorder %v2306_v61, 8.507059e+37  ;;  %2778 = vmatpush.msra.mxu0 %v2582_v0  ;;  %v2579_v52 = vld [vmem:[%s10658_s2 + $0x98] sm:$0xff]  ;;  %v2566_v29 = vld [vmem:[%s10658_s2 + $0x30] sm:$0xff]  ;;  %v2965_v0 = vld [vmem:[%s10657_s1 + $0x168] sm:$0xff] }
 0x3bf   :  { %2818 = vmatpush.msra.mxu2 %v2583_v15  ;;  %v2983_v63 = vld [vmem:[%s10657_s1 + $0x1f8] sm:$0xff]  ;;  %vm2522_vm1 = vweird.f32 %v8376_v24  ;;  %v2526_v10 = vand.u32 2147483647, %v8376_v24 }
 0x3c0   :  { %v2281_v57 = vmul.f32 %v8335_v1, %v2280_v27  ;;  %2779 = vmatpush.msra.mxu0 %v2578_v9  ;;  %v2979_v61 = vld [vmem:[%s10657_s1 + $0x1d8] sm:$0xff] }
 0x3c1   :  { %v4870_v40 = vpop.eup %4869  ;;  %2819 = vmatpush.msra.mxu2 %v2579_v52  ;;  %v2967_v15 = vld [vmem:[%s10657_s1 + $0x178] sm:$0xff]  ;;  %vm2527_vm5 = vcmp.eq.f32.partialorder %v2526_v10, 8.507059e+37 }
 0x3c2   :  { %v4872_v44 = vpop.eup %4871  ;;  %v2298_v39 = vmul.f32 %v4870_v40, %v8321_v60  ;;  %v2282_v13 = vadd.f32 %v8335_v1, %v2281_v57  ;;  %vm2303_vm7 = vweird.f32 %v4870_v40  ;;  %v2923_v10 = vld [vmem:[%s10657_s1 + $0x18] sm:$0xff] }
 0x3c3   :  { %v8385_v17 = vadd.f32 1.0, %v4872_v44  ;;  %v4874_v11 = vpop.eup %4873  ;;  %vm2304_vm10 = vmor %vm2302_vm8, %vm2303_vm7  ;;  %2820 = vmatpush.msra.mxu2 %v2575_v12 }
 0x3c4   :  { %v2299_v38 = vsub.f32 1.0, %v2298_v39  ;;  %v2286_v2 = vsel %vm8399_vm6, %v8335_v1, %v2282_v13  ;;  %v4876_v62 = vpop.eup %4875  ;;  %v2562_v39 = vld [vmem:[%s10658_s2 + $0x10] sm:$0xff]  ;;  %v2563_v13 = vld [vmem:[%s10658_s2 + $0x18] sm:$0xff] }
 0x3c5   :  { %4877 = vrcp.f32 %v8385_v17  ;;  %v2291_v31 = vsel %vm2288_vm9, %v2290_v49, %v2286_v2  ;;  %v8449_v21 = vadd.f32 1.0, %v4876_v62  ;;  %v2328_v28 = vand.u32 2147483648, %v8385_v17  ;;  %2821 = vmatpush.msra.mxu2 %v2571_v25  ;;  %v2975_v49 = vld [vmem:[%s10657_s1 + $0x1b8] sm:$0xff]  ;;  %v2953_v25 = vld [vmem:[%s10657_s1 + $0x108] sm:$0xff] }
 0x3c6   :  { %v2300_v42 = vmul.f32 %v4870_v40, %v2299_v38  ;;  %4879 = vrcp.f32 %v8376_v24  ;;  %v2427_v4 = vpop.f32.mrf.mxu0  ;;  %v2333_v36 = vmul.f32 %v4874_v11, %v2291_v31  ;;  %v2326_v57 = vand.u32 2147483647, %v8385_v17  ;;  %v2969_v11 = vld [vmem:[%s10657_s1 + $0x188] sm:$0xff]  ;;  %v2960_v31 = vld [vmem:[%s10657_s1 + $0x140] sm:$0xff] }
 0x3c7   :  { %v2490_v22 = vadd.f32 %v2427_v4, %v2342_v23  ;;  %vm2322_vm13 = vweird.f32 %v8385_v17  ;;  %v2329_v6 = vor.u32 1.1754944e-38, %v2328_v28  ;;  %2822 = vmatpush.msra.mxu2 %v2567_v26  ;;  %v2344_v23 = vunpack.c.l.bf16 %v8283_v16  ;;  %v2977_v16 = vld [vmem:[%s10657_s1 + $0x1c8] sm:$0xff] }
 0x3c8   :  { %v2301_v41 = vadd.f32 %v4870_v40, %v2300_v42  ;;  %vm2327_vm15 = vcmp.eq.f32.partialorder %v2326_v57, 8.507059e+37  ;;  %vm2542_vm9 = vweird.f32 %v8449_v21 }
 0x3c9   :  { %v4717_v58 = vmul.f32 -1.442695, %v2490_v22  ;;  %2823 = vmatpush.msra.mxu2 %v2563_v13  ;;  %v2528_v22 = vand.u32 2147483648, %v8376_v24  ;;  %v2941_v13 = vld [vmem:[%s10657_s1 + $0xa8] sm:$0xff] }
 0x3ca   :  { %v2305_v60 = vsel %vm2304_vm10, %v4870_v40, %v2301_v41 }
 0x3cb   :  { %v4878_v35 = vpop.eup %4877  ;;  %v2310_v14 = vsel %vm2307_vm11, %v2309_v53, %v2305_v60  ;;  %4881 = vpow2.f32 %v4717_v58  ;;  %v2971_v53 = vld [vmem:[%s10657_s1 + $0x198] sm:$0xff] }
 0x3cc   :  { %v8429_v32 = vpop.eup %4879  ;;  %v2332_v1 = vmul.f32 %v2310_v14, %v7745_v46  ;;  %v2318_v3 = vmul.f32 %v4878_v35, %v8385_v17  ;;  %v2574_v46 = vld [vmem:[%s10658_s2 + $0x70] sm:$0xff]  ;;  %vm2323_vm12 = vweird.f32 %v4878_v35 }
 0x3cd   :  { %v2518_v55 = vmul.f32 %v8429_v32, %v8376_v24  ;;  %2780 = vmatpush.msra.mxu0 %v2574_v46  ;;  %vm2324_vm14 = vmor %vm2322_vm13, %vm2323_vm12  ;;  %v2467_v20 = vpop.f32.mrf.mxu2  ;;  %vm2523_vm0 = vweird.f32 %v8429_v32  ;;  %v2959_v46 = vld [vmem:[%s10657_s1 + $0x138] sm:$0xff] }
 0x3ce   :  { %v8439_v33 = vadd.f32 %v2333_v36, %v2332_v1  ;;  %v2319_v47 = vsub.f32 1.0, %v2318_v3  ;;  %v2492_v2 = vadd.f32 %v2467_v20, %v2344_v23  ;;  %vm8513_vm2 = vmor %vm2522_vm1, %vm2523_vm0  ;;  %v2963_v36 = vld [vmem:[%s10657_s1 + $0x158] sm:$0xff] }
 0x3cf   :  { %2781 = vmatpush.msra.mxu0 %v2570_v51  ;;  %v2519_v44 = vsub.f32 1.0, %v2518_v55  ;;  %v2939_v23 = vld [vmem:[%s10657_s1 + $0x98] sm:$0xff] }
 0x3d0   :  { %4883 = vtanh.f32 %v8439_v33  ;;  %v2320_v27 = vmul.f32 %v4878_v35, %v2319_v47  ;;  %v2957_v47 = vld [vmem:[%s10657_s1 + $0x128] sm:$0xff] }
 0x3d1   :  { %v4882_v43 = vpop.eup %4881  ;;  %4885 = vrcp.f32 %v8449_v21  ;;  %2782 = vmatpush.msra.mxu0 %v2566_v29  ;;  %v2520_v38 = vmul.f32 %v8429_v32, %v2519_v44  ;;  %v2949_v29 = vld [vmem:[%s10657_s1 + $0xe8] sm:$0xff]  ;;  %v2947_v44 = vld [vmem:[%s10657_s1 + $0xd8] sm:$0xff] }
 0x3d2   :  { %v8466_v56 = vadd.f32 1.0, %v4882_v43  ;;  %v2321_v40 = vadd.f32 %v4878_v35, %v2320_v27  ;;  %v2955_v43 = vld [vmem:[%s10657_s1 + $0x118] sm:$0xff] }
 0x3d3   :  { %2783 = vmatpush.msra.mxu0 %v2562_v39  ;;  %v2521_v8 = vadd.f32 %v8429_v32, %v2520_v38  ;;  %v2546_v39 = vand.u32 2147483647, %v8449_v21 }
 0x3d4   :  { %4887 = vrcp.f32 %v8466_v56  ;;  %v2325_v37 = vsel %vm2324_vm14, %v4878_v35, %v2321_v40  ;;  %v2509_v58 = vand.u32 2147483648, %v8466_v56  ;;  %v2507_v24 = vand.u32 2147483647, %v8466_v56  ;;  %v2945_v40 = vld [vmem:[%s10657_s1 + $0xc8] sm:$0xff] }
 0x3d5   :  { %v2330_v17 = vsel %vm2327_vm15, %v2329_v6, %v2325_v37  ;;  %4889 = vtanh.f32 %v2492_v2  ;;  %v2525_v60 = vsel %vm8513_vm2, %v8429_v32, %v2521_v8  ;;  %v2529_v35 = vor.u32 1.1754944e-38, %v2528_v22  ;;  %v2961_v32 = vld [vmem:[%s10657_s1 + $0x148] sm:$0xff]  ;;  %v2943_v6 = vld [vmem:[%s10657_s1 + $0xb8] sm:$0xff]  ;;  %v2974_v8 = vld [vmem:[%s10657_s1 + $0x1b0] sm:$0xff] }
 0x3d6   :  { %v4884_v19 = vpop.eup %4883  ;;  %vm2503_vm4 = vweird.f32 %v8466_v56  ;;  %v2510_v3 = vor.u32 1.1754944e-38, %v2509_v58  ;;  %vm2508_vm7 = vcmp.eq.f32.partialorder %v2507_v24, 8.507059e+37  ;;  %vm2547_vm11 = vcmp.eq.f32.partialorder %v2546_v39, 8.507059e+37  ;;  %v2931_v2 = vld [vmem:[%s10657_s1 + $0x58] sm:$0xff]  ;;  %v2968_v22 = vld [vmem:[%s10657_s1 + $0x180] sm:$0xff]  ;;  %v2962_v58 = vld [vmem:[%s10657_s1 + $0x150] sm:$0xff] }
 0x3d7   :  { %v2336_v30 = vmul.f32 %v4884_v19, %v2330_v17  ;;  %v8485_v18 = vpop.eup %4885  ;;  %v2530_v9 = vsel %vm2527_vm5, %v2529_v35, %v2525_v60  ;;  %v2958_v24 = vld [vmem:[%s10657_s1 + $0x130] sm:$0xff]  ;;  %v2952_v60 = vld [vmem:[%s10657_s1 + $0x100] sm:$0xff] }
 0x3d8   :  { %v2538_v41 = vmul.f32 %v8485_v18, %v8449_v21  ;;  %v2552_v28 = vmul.f32 %v2530_v9, %v7856_v54  ;;  %v2951_v54 = vld [vmem:[%s10657_s1 + $0xf8] sm:$0xff]  ;;  %vm2543_vm8 = vweird.f32 %v8485_v18  ;;  %v2950_v35 = vld [vmem:[%s10657_s1 + $0xf0] sm:$0xff]  ;;  %v3242_v39 = vld [vmem:[%s10658_s2 + $0x360] sm:$0xff] }
 0x3d9   :  { %2724 = vmatmul.f32.vlgmr.msrb.gmra.mxu1 %v2336_v30  ;;  %2764 = vmatmul.f32.vlgmr.msrb.gmra.mxu3 %v2336_v30  ;;  %vm2544_vm10 = vmor %vm2542_vm9, %vm2543_vm8  ;;  %v2938_v9 = vld [vmem:[%s10657_s1 + $0x90] sm:$0xff] }
 0x3da   :  { %v4888_v42 = vpop.eup %4887  ;;  %3004 = vmatpush.msrb.mxu1 %v2981_v59  ;;  %3044 = vmatpush.msrb.mxu3 %v2983_v63  ;;  %v2539_v14 = vsub.f32 1.0, %v2538_v41  ;;  %v2982_v59 = vld [vmem:[%s10657_s1 + $0x1f0] sm:$0xff]  ;;  %v2933_v63 = vld [vmem:[%s10657_s1 + $0x68] sm:$0xff] }
 0x3db   :  { %v2499_v4 = vmul.f32 %v4888_v42, %v8466_v56  ;;  %vm2504_vm3 = vweird.f32 %v4888_v42  ;;  %v4890_v12 = vpop.eup %4889  ;;  %v2548_v56 = vand.u32 2147483648, %v8449_v21  ;;  %v2937_v21 = vld [vmem:[%s10657_s1 + $0x88] sm:$0xff]  ;;  %v2970_v41 = vld [vmem:[%s10657_s1 + $0x190] sm:$0xff] }
 0x3dc   :  { %3005 = vmatpush.msrb.mxu1 %v2977_v16  ;;  %3045 = vmatpush.msrb.mxu3 %v2979_v61  ;;  %vm2505_vm6 = vmor %vm2503_vm4, %vm2504_vm3  ;;  %v2540_v55 = vmul.f32 %v8485_v18, %v2539_v14  ;;  %v2976_v16 = vld [vmem:[%s10657_s1 + $0x1c0] sm:$0xff]  ;;  %v2978_v61 = vld [vmem:[%s10657_s1 + $0x1d0] sm:$0xff] }
 0x3dd   :  { %v2500_v50 = vsub.f32 1.0, %v2499_v4  ;;  %v2549_v19 = vor.u32 1.1754944e-38, %v2548_v56  ;;  %v2972_v4 = vld [vmem:[%s10657_s1 + $0x1a0] sm:$0xff]  ;;  %v3251_v56 = vld [vmem:[%s10658_s2 + $0x3a8] sm:$0xff] }
 0x3de   :  { %3006 = vmatpush.msrb.mxu1 %v2973_v5  ;;  %3046 = vmatpush.msrb.mxu3 %v2975_v49  ;;  %v2541_v26 = vadd.f32 %v8485_v18, %v2540_v55  ;;  %v2925_v5 = vld [vmem:[%s10657_s1 + $0x28] sm:$0xff]  ;;  %v2927_v49 = vld [vmem:[%s10657_s1 + $0x38] sm:$0xff]  ;;  %v2944_v14 = vld [vmem:[%s10657_s1 + $0xc0] sm:$0xff] }
 0x3df   :  { %v2501_v62 = vmul.f32 %v4888_v42, %v2500_v50  ;;  %v2921_v50 = vld [vmem:[%s10657_s1 + $0x8] sm:$0xff]  ;;  %v2924_v55 = vld [vmem:[%s10657_s1 + $0x20] sm:$0xff] }
 0x3e0   :  { %3007 = vmatpush.msrb.mxu1 %v2969_v11  ;;  %3047 = vmatpush.msrb.mxu3 %v2971_v53  ;;  %v2545_v37 = vsel %vm2544_vm10, %v8485_v18, %v2541_v26  ;;  %v2935_v18 = vld [vmem:[%s10657_s1 + $0x78] sm:$0xff]  ;;  %v2964_v11 = vld [vmem:[%s10657_s1 + $0x160] sm:$0xff]  ;;  %v2966_v53 = vld [vmem:[%s10657_s1 + $0x170] sm:$0xff] }
 0x3e1   :  { %v2502_v1 = vadd.f32 %v4888_v42, %v2501_v62  ;;  %2804 = vmatmul.f32.vlgmr.msra.gmra.mxu1 %v2336_v30  ;;  %2844 = vmatmul.f32.vlgmr.msra.gmra.mxu3 %v2336_v30  ;;  %v2550_v38 = vsel %vm2547_vm11, %v2549_v19, %v2545_v37  ;;  %v2980_v30 = vld [vmem:[%s10657_s1 + $0x1e0] sm:$0xff]  ;;  %v3239_v37 = vld [vmem:[%s10658_s2 + $0x348] sm:$0xff] }
 0x3e2   :  { %3008 = vmatpush.msrb.mxu1 %v2965_v0  ;;  %3048 = vmatpush.msrb.mxu3 %v2967_v15  ;;  %v2956_v62 = vld [vmem:[%s10657_s1 + $0x120] sm:$0xff]  ;;  %v2954_v0 = vld [vmem:[%s10657_s1 + $0x110] sm:$0xff] }
 0x3e3   :  { %v2506_v52 = vsel %vm2505_vm6, %v4888_v42, %v2502_v1  ;;  %v2929_v42 = vld [vmem:[%s10657_s1 + $0x48] sm:$0xff]  ;;  %v2948_v15 = vld [vmem:[%s10657_s1 + $0xe0] sm:$0xff]  ;;  %v2946_v1 = vld [vmem:[%s10657_s1 + $0xd0] sm:$0xff] }
 0x3e4   :  { %v2511_v27 = vsel %vm2508_vm7, %v2510_v3, %v2506_v52  ;;  %3009 = vmatpush.msrb.mxu1 %v2961_v32  ;;  %3049 = vmatpush.msrb.mxu3 %v2963_v36  ;;  %v2940_v32 = vld [vmem:[%s10657_s1 + $0xa0] sm:$0xff]  ;;  %v2942_v36 = vld [vmem:[%s10657_s1 + $0xb0] sm:$0xff] }
 0x3e5   :  { %v2553_v51 = vmul.f32 %v4890_v12, %v2511_v27  ;;  %v2936_v3 = vld [vmem:[%s10657_s1 + $0x80] sm:$0xff]  ;;  %v2930_v12 = vld [vmem:[%s10657_s1 + $0x50] sm:$0xff] }
 0x3e6   :  { %3010 = vmatpush.msrb.mxu1 %v2957_v47  ;;  %3050 = vmatpush.msrb.mxu3 %v2959_v46  ;;  %v2932_v52 = vld [vmem:[%s10657_s1 + $0x60] sm:$0xff]  ;;  %v2934_v47 = vld [vmem:[%s10657_s1 + $0x70] sm:$0xff] }
 0x3e7   :  { %v8550_v57 = vadd.f32 %v2553_v51, %v2552_v28  ;;  %v2928_v46 = vld [vmem:[%s10657_s1 + $0x40] sm:$0xff]  ;;  %v2926_v27 = vld [vmem:[%s10657_s1 + $0x30] sm:$0xff] }
 0x3e8   :  { %3011 = vmatpush.msrb.mxu1 %v2953_v25  ;;  %3051 = vmatpush.msrb.mxu3 %v2955_v43  ;;  %v2920_v28 = vld [vmem:[%s10657_s1] sm:$0xff]  ;;  %v2922_v51 = vld [vmem:[%s10657_s1 + $0x10] sm:$0xff]  ;;  %v3259_v43 = vld [vmem:[%s10658_s2 + $0x3e8] sm:$0xff] }
 0x3e9   :  { %4891 = vtanh.f32 %v8550_v57  ;;  %v3258_v25 = vld [vmem:[%s10658_s2 + $0x3e0] sm:$0xff] }
 0x3ea   :  { %3012 = vmatpush.msrb.mxu1 %v2949_v29  ;;  %3052 = vmatpush.msrb.mxu3 %v2951_v54  ;;  %v3254_v29 = vld [vmem:[%s10658_s2 + $0x3c0] sm:$0xff]  ;;  %v3255_v54 = vld [vmem:[%s10658_s2 + $0x3c8] sm:$0xff] }
 0x3eb   :  { %v3250_v26 = vld [vmem:[%s10658_s2 + $0x3a0] sm:$0xff] }
 0x3ec   :  { %3013 = vmatpush.msrb.mxu1 %v2945_v40  ;;  %3053 = vmatpush.msrb.mxu3 %v2947_v44  ;;  %v3246_v40 = vld [vmem:[%s10658_s2 + $0x380] sm:$0xff]  ;;  %v3247_v44 = vld [vmem:[%s10658_s2 + $0x388] sm:$0xff] }
 0x3ed   :  { %v3234_v19 = vld [vmem:[%s10658_s2 + $0x320] sm:$0xff] }
 0x3ee   :  { %3014 = vmatpush.msrb.mxu1 %v2941_v13  ;;  %3054 = vmatpush.msrb.mxu3 %v2943_v6  ;;  %v3243_v13 = vld [vmem:[%s10658_s2 + $0x368] sm:$0xff]  ;;  %v3238_v6 = vld [vmem:[%s10658_s2 + $0x340] sm:$0xff] }
 0x3ef   :  { %v4892_v17 = vpop.eup %4891 }
 0x3f0   :  { %v8583_v20 = vmul.f32 %v4892_v17, %v2550_v38  ;;  %3015 = vmatpush.msrb.mxu1 %v2937_v21  ;;  %3055 = vmatpush.msrb.mxu3 %v2939_v23  ;;  %v3235_v21 = vld [vmem:[%s10658_s2 + $0x328] sm:$0xff]  ;;  %v3230_v23 = vld [vmem:[%s10658_s2 + $0x300] sm:$0xff] }
 0x3f1   :  { %v3231_v17 = vld [vmem:[%s10658_s2 + $0x308] sm:$0xff]  ;;  %v3226_v38 = vld [vmem:[%s10658_s2 + $0x2e0] sm:$0xff] }
 0x3f2   :  { %2704 = vmatmul.f32.vlgmr.msrb.gmra.mxu0 %v8583_v20  ;;  %2744 = vmatmul.f32.vlgmr.msrb.gmra.mxu2 %v8583_v20 }
 0x3f3   :  { %2984 = vmatpush.msrb.mxu0 %v2980_v30  ;;  %3024 = vmatpush.msrb.mxu2 %v2982_v59  ;;  %v3222_v30 = vld [vmem:[%s10658_s2 + $0x2c0] sm:$0xff]  ;;  %v3223_v59 = vld [vmem:[%s10658_s2 + $0x2c8] sm:$0xff] }
 0x3f4   :  { %3016 = vmatpush.msrb.mxu1 %v2933_v63  ;;  %3056 = vmatpush.msrb.mxu3 %v2935_v18  ;;  %v3218_v63 = vld [vmem:[%s10658_s2 + $0x2a0] sm:$0xff]  ;;  %v3219_v18 = vld [vmem:[%s10658_s2 + $0x2a8] sm:$0xff] }
 0x3f5   :  { %2985 = vmatpush.msrb.mxu0 %v2976_v16  ;;  %3025 = vmatpush.msrb.mxu2 %v2978_v61  ;;  %v3214_v16 = vld [vmem:[%s10658_s2 + $0x280] sm:$0xff]  ;;  %v3215_v61 = vld [vmem:[%s10658_s2 + $0x288] sm:$0xff] }
 0x3f6   :  { %3017 = vmatpush.msrb.mxu1 %v2929_v42  ;;  %3057 = vmatpush.msrb.mxu3 %v2931_v2  ;;  %v3194_v42 = vld [vmem:[%s10658_s2 + $0x1e0] sm:$0xff]  ;;  %v3195_v2 = vld [vmem:[%s10658_s2 + $0x1e8] sm:$0xff] }
 0x3f7   :  { %2986 = vmatpush.msrb.mxu0 %v2972_v4  ;;  %3026 = vmatpush.msrb.mxu2 %v2974_v8  ;;  %v3210_v4 = vld [vmem:[%s10658_s2 + $0x260] sm:$0xff]  ;;  %v3211_v8 = vld [vmem:[%s10658_s2 + $0x268] sm:$0xff] }
 0x3f8   :  { %3018 = vmatpush.msrb.mxu1 %v2925_v5  ;;  %3058 = vmatpush.msrb.mxu3 %v2927_v49  ;;  %v3190_v5 = vld [vmem:[%s10658_s2 + $0x1c0] sm:$0xff]  ;;  %v3191_v49 = vld [vmem:[%s10658_s2 + $0x1c8] sm:$0xff] }
 0x3f9   :  { %2987 = vmatpush.msrb.mxu0 %v2968_v22  ;;  %3027 = vmatpush.msrb.mxu2 %v2970_v41  ;;  %v3206_v22 = vld [vmem:[%s10658_s2 + $0x240] sm:$0xff]  ;;  %v3207_v41 = vld [vmem:[%s10658_s2 + $0x248] sm:$0xff] }
 0x3fa   :  { %3019 = vmatpush.msrb.mxu1 %v2921_v50  ;;  %3059 = vmatpush.msrb.mxu3 %v2923_v10  ;;  %v3186_v50 = vld [vmem:[%s10658_s2 + $0x1a0] sm:$0xff]  ;;  %v3187_v10 = vld [vmem:[%s10658_s2 + $0x1a8] sm:$0xff] }
 0x3fb   :  { %2784 = vmatmul.f32.vlgmr.msra.gmra.mxu0 %v8583_v20  ;;  %2824 = vmatmul.f32.vlgmr.msra.gmra.mxu2 %v8583_v20 }
 0x3fc   :  { %2988 = vmatpush.msrb.mxu0 %v2964_v11  ;;  %3020 = vmatmul.f32.vlgmr.msrb.gmra.mxu1 %v8583_v20  ;;  %v3202_v11 = vld [vmem:[%s10658_s2 + $0x220] sm:$0xff] }
 0x3fd   :  { %3028 = vmatpush.msrb.mxu2 %v2966_v53  ;;  %3060 = vmatmul.f32.vlgmr.msrb.gmra.mxu3 %v8583_v20  ;;  %v3203_v53 = vld [vmem:[%s10658_s2 + $0x228] sm:$0xff] }
 0x3fe   :  { %2989 = vmatpush.msrb.mxu0 %v2960_v31  ;;  %3282 = vmatpush.msra.mxu1 %v3258_v25  ;;  %v3249_v25 = vld [vmem:[%s10658_s2 + $0x398] sm:$0xff] }
 0x3ff   :  { %3029 = vmatpush.msrb.mxu2 %v2962_v58  ;;  %3322 = vmatpush.msra.mxu3 %v3259_v43  ;;  %v3182_v58 = vld [vmem:[%s10658_s2 + $0x180] sm:$0xff] }
 0x400   :  { %2990 = vmatpush.msrb.mxu0 %v2956_v62  ;;  %3283 = vmatpush.msra.mxu1 %v3254_v29  ;;  %v3183_v62 = vld [vmem:[%s10658_s2 + $0x188] sm:$0xff] }
 0x401   :  { %3030 = vmatpush.msrb.mxu2 %v2958_v24  ;;  %3323 = vmatpush.msra.mxu3 %v3255_v54  ;;  %v3198_v24 = vld [vmem:[%s10658_s2 + $0x200] sm:$0xff] }
 0x402   :  { %2991 = vmatpush.msrb.mxu0 %v2952_v60  ;;  %3284 = vmatpush.msra.mxu1 %v3250_v26  ;;  %v3199_v60 = vld [vmem:[%s10658_s2 + $0x208] sm:$0xff]  ;;  %v3162_v54 = vld [vmem:[%s10658_s2 + $0xe0] sm:$0xff] }
 0x403   :  { %3031 = vmatpush.msrb.mxu2 %v2954_v0  ;;  %3324 = vmatpush.msra.mxu3 %v3251_v56  ;;  %v3178_v0 = vld [vmem:[%s10658_s2 + $0x160] sm:$0xff]  ;;  %v3163_v26 = vld [vmem:[%s10658_s2 + $0xe8] sm:$0xff]  ;;  %v3244_v56 = vld [vmem:[%s10658_s2 + $0x370] sm:$0xff] }
 0x404   :  { %2992 = vmatpush.msrb.mxu0 %v2948_v15  ;;  %3285 = vmatpush.msra.mxu1 %v3246_v40  ;;  %v3179_v15 = vld [vmem:[%s10658_s2 + $0x168] sm:$0xff] }
 0x405   :  { %3032 = vmatpush.msrb.mxu2 %v2950_v35  ;;  %3325 = vmatpush.msra.mxu3 %v3247_v44  ;;  %v3260_v35 = vld [vmem:[%s10658_s2 + $0x3f0] sm:$0xff]  ;;  %v3245_v44 = vld [vmem:[%s10658_s2 + $0x378] sm:$0xff] }
 0x406   :  { %2993 = vmatpush.msrb.mxu0 %v2944_v14  ;;  %3286 = vmatpush.msra.mxu1 %v3242_v39  ;;  %v3261_v14 = vld [vmem:[%s10658_s2 + $0x3f8] sm:$0xff]  ;;  %v3158_v39 = vld [vmem:[%s10658_s2 + $0xc0] sm:$0xff] }
 0x407   :  { %3033 = vmatpush.msrb.mxu2 %v2946_v1  ;;  %3326 = vmatpush.msra.mxu3 %v3243_v13  ;;  %v3174_v1 = vld [vmem:[%s10658_s2 + $0x140] sm:$0xff]  ;;  %v3159_v13 = vld [vmem:[%s10658_s2 + $0xc8] sm:$0xff] }
 0x408   :  { %2994 = vmatpush.msrb.mxu0 %v2940_v32  ;;  %3287 = vmatpush.msra.mxu1 %v3238_v6  ;;  %v3175_v32 = vld [vmem:[%s10658_s2 + $0x148] sm:$0xff]  ;;  %v3240_v6 = vld [vmem:[%s10658_s2 + $0x350] sm:$0xff] }
 0x409   :  { %3034 = vmatpush.msrb.mxu2 %v2942_v36  ;;  %3327 = vmatpush.msra.mxu3 %v3239_v37  ;;  %v3256_v36 = vld [vmem:[%s10658_s2 + $0x3d0] sm:$0xff] }
 0x40a   :  { %2995 = vmatpush.msrb.mxu0 %v2936_v3  ;;  %3288 = vmatpush.msra.mxu1 %v3234_v19  ;;  %v3257_v3 = vld [vmem:[%s10658_s2 + $0x3d8] sm:$0xff]  ;;  %v8908_v19 = vld [vmem:[%s10659_s0 + $0x50] sm:$0xff] }
 0x40b   :  { %3035 = vmatpush.msrb.mxu2 %v2938_v9  ;;  %3328 = vmatpush.msra.mxu3 %v3235_v21  ;;  %v3170_v9 = vld [vmem:[%s10658_s2 + $0x120] sm:$0xff]  ;;  %v3241_v21 = vld [vmem:[%s10658_s2 + $0x358] sm:$0xff] }
 0x40c   :  { %2996 = vmatpush.msrb.mxu0 %v2932_v52  ;;  %3289 = vmatpush.msra.mxu1 %v3230_v23  ;;  %v3171_v52 = vld [vmem:[%s10658_s2 + $0x128] sm:$0xff] }
 0x40d   :  { %3036 = vmatpush.msrb.mxu2 %v2934_v47  ;;  %3329 = vmatpush.msra.mxu3 %v3231_v17  ;;  %v3252_v47 = vld [vmem:[%s10658_s2 + $0x3b0] sm:$0xff]  ;;  %v3154_v17 = vld [vmem:[%s10658_s2 + $0xa0] sm:$0xff] }
 0x40e   :  { %2997 = vmatpush.msrb.mxu0 %v2928_v46  ;;  %3290 = vmatpush.msra.mxu1 %v3226_v38  ;;  %v3253_v46 = vld [vmem:[%s10658_s2 + $0x3b8] sm:$0xff]  ;;  %v3155_v38 = vld [vmem:[%s10658_s2 + $0xa8] sm:$0xff] }
 0x40f   :  { %3037 = vmatpush.msrb.mxu2 %v2930_v12 }
 0x410   :  { %2998 = vmatpush.msrb.mxu0 %v2924_v55  ;;  %3291 = vmatpush.msra.mxu1 %v3222_v30  ;;  %v3166_v55 = vld [vmem:[%s10658_s2 + $0x100] sm:$0xff] }
 0x411   :  { %3038 = vmatpush.msrb.mxu2 %v2926_v27  ;;  %v3167_v27 = vld [vmem:[%s10658_s2 + $0x108] sm:$0xff] }
 0x412   :  { %2999 = vmatpush.msrb.mxu0 %v2920_v28  ;;  %3292 = vmatpush.msra.mxu1 %v3218_v63  ;;  %v3248_v28 = vld [vmem:[%s10658_s2 + $0x390] sm:$0xff]  ;;  %v2917_v63 = vunpack.c.h.bf16 %v8908_v19 }
 0x413   :  { %3039 = vmatpush.msrb.mxu2 %v2922_v51  ;;  %3000 = vmatmul.f32.vlgmr.msrb.gmra.mxu0 %v8583_v20 }
 0x414   :  { %3040 = vmatmul.f32.vlgmr.msrb.gmra.mxu2 %v8583_v20  ;;  %v3227_v20 = vld [vmem:[%s10658_s2 + $0x2e8] sm:$0xff]  ;;  %3293 = vmatpush.msra.mxu1 %v3214_v16 }
 0x415   :  { %3330 = vmatpush.msra.mxu3 %v3227_v20  ;;  %3262 = vmatpush.msra.mxu0 %v3194_v42  ;;  %v3236_v20 = vld [vmem:[%s10658_s2 + $0x330] sm:$0xff]  ;;  %v3151_v16 = vld [vmem:[%s10658_s2 + $0x88] sm:$0xff] }
 0x416   :  { %3302 = vmatpush.msra.mxu2 %v3195_v2  ;;  %3294 = vmatpush.msra.mxu1 %v3210_v4  ;;  %v3233_v2 = vld [vmem:[%s10658_s2 + $0x318] sm:$0xff] }
 0x417   :  { %3331 = vmatpush.msra.mxu3 %v3223_v59  ;;  %3263 = vmatpush.msra.mxu0 %v3190_v5  ;;  %v3237_v59 = vld [vmem:[%s10658_s2 + $0x338] sm:$0xff]  ;;  %v3147_v5 = vld [vmem:[%s10658_s2 + $0x68] sm:$0xff] }
 0x418   :  { %3303 = vmatpush.msra.mxu2 %v3191_v49  ;;  %3295 = vmatpush.msra.mxu1 %v3206_v22  ;;  %v3228_v49 = vld [vmem:[%s10658_s2 + $0x2f0] sm:$0xff] }
 0x419   :  { %3332 = vmatpush.msra.mxu3 %v3219_v18  ;;  %3264 = vmatpush.msra.mxu0 %v3186_v50  ;;  %v3150_v18 = vld [vmem:[%s10658_s2 + $0x80] sm:$0xff] }
 0x41a   :  { %3304 = vmatpush.msra.mxu2 %v3187_v10  ;;  %3296 = vmatpush.msra.mxu1 %v3202_v11  ;;  %v3142_v11 = vld [vmem:[%s10658_s2 + $0x40] sm:$0xff] }
 0x41b   :  { %3333 = vmatpush.msra.mxu3 %v3215_v61  ;;  %3265 = vmatpush.msra.mxu0 %v3182_v58  ;;  %v3232_v61 = vld [vmem:[%s10658_s2 + $0x310] sm:$0xff] }
 0x41c   :  { %3305 = vmatpush.msra.mxu2 %v3183_v62  ;;  %3297 = vmatpush.msra.mxu1 %v3198_v24  ;;  %v3225_v62 = vld [vmem:[%s10658_s2 + $0x2d8] sm:$0xff] }
 0x41d   :  { %3334 = vmatpush.msra.mxu3 %v3211_v8  ;;  %3266 = vmatpush.msra.mxu0 %v3178_v0  ;;  %v3146_v8 = vld [vmem:[%s10658_s2 + $0x60] sm:$0xff]  ;;  %v3139_v0 = vld [vmem:[%s10658_s2 + $0x28] sm:$0xff] }
 0x41e   :  { %3306 = vmatpush.msra.mxu2 %v3179_v15  ;;  %3362 = vmatpush.msrb.mxu1 %v3260_v35  ;;  %v3220_v15 = vld [vmem:[%s10658_s2 + $0x2b0] sm:$0xff] }
 0x41f   :  { %3335 = vmatpush.msra.mxu3 %v3207_v41  ;;  %3267 = vmatpush.msra.mxu0 %v3174_v1  ;;  %v3229_v41 = vld [vmem:[%s10658_s2 + $0x2f8] sm:$0xff] }
 0x420   :  { %3307 = vmatpush.msra.mxu2 %v3175_v32  ;;  %3363 = vmatpush.msrb.mxu1 %v3256_v36  ;;  %v3221_v1 = vld [vmem:[%s10658_s2 + $0x2b8] sm:$0xff]  ;;  %v3134_v36 = vld [vmem:[%s10658_s2] sm:$0xff] }
 0x421   :  { %3336 = vmatpush.msra.mxu3 %v3203_v53  ;;  %3268 = vmatpush.msra.mxu0 %v3170_v9  ;;  %v3143_v53 = vld [vmem:[%s10658_s2 + $0x48] sm:$0xff]  ;;  %v3216_v9 = vld [vmem:[%s10658_s2 + $0x290] sm:$0xff] }
 0x422   :  { %3308 = vmatpush.msra.mxu2 %v3171_v52  ;;  %3364 = vmatpush.msrb.mxu1 %v3252_v47  ;;  %v3217_v47 = vld [vmem:[%s10658_s2 + $0x298] sm:$0xff] }
 0x423   :  { %3337 = vmatpush.msra.mxu3 %v3199_v60  ;;  %3269 = vmatpush.msra.mxu0 %v3166_v55  ;;  %v3138_v60 = vld [vmem:[%s10658_s2 + $0x20] sm:$0xff]  ;;  %v3212_v55 = vld [vmem:[%s10658_s2 + $0x270] sm:$0xff] }
 0x424   :  { %3309 = vmatpush.msra.mxu2 %v3167_v27  ;;  %3365 = vmatpush.msrb.mxu1 %v3248_v28  ;;  %v3213_v27 = vld [vmem:[%s10658_s2 + $0x278] sm:$0xff] }
 0x425   :  { %3402 = vmatpush.msrb.mxu3 %v3261_v14  ;;  %3270 = vmatpush.msra.mxu0 %v3162_v54  ;;  %v8977_v14 = vld [vmem:[%s10659_s0 + $0x58] sm:$0xff]  ;;  %v3192_v54 = vld [vmem:[%s10658_s2 + $0x1d0] sm:$0xff] }
 0x426   :  { %3310 = vmatpush.msra.mxu2 %v3163_v26  ;;  %3366 = vmatpush.msrb.mxu1 %v3244_v56  ;;  %v3193_v26 = vld [vmem:[%s10658_s2 + $0x1d8] sm:$0xff] }
 0x427   :  { %3403 = vmatpush.msrb.mxu3 %v3257_v3  ;;  %3271 = vmatpush.msra.mxu0 %v3158_v39  ;;  %v3135_v3 = vld [vmem:[%s10658_s2 + $0x8] sm:$0xff]  ;;  %v3209_v39 = vld [vmem:[%s10658_s2 + $0x258] sm:$0xff] }
 0x428   :  { %3311 = vmatpush.msra.mxu2 %v3159_v13  ;;  %3367 = vmatpush.msrb.mxu1 %v3240_v6  ;;  %v3188_v6 = vld [vmem:[%s10658_s2 + $0x1b0] sm:$0xff] }
 0x429   :  { %3404 = vmatpush.msrb.mxu3 %v3253_v46  ;;  %3272 = vmatpush.msra.mxu0 %v3154_v17  ;;  %v3196_v46 = vld [vmem:[%s10658_s2 + $0x1f0] sm:$0xff] }
 0x42a   :  { %3312 = vmatpush.msra.mxu2 %v3155_v38  ;;  %3368 = vmatpush.msrb.mxu1 %v3236_v20  ;;  %v3204_v17 = vld [vmem:[%s10658_s2 + $0x230] sm:$0xff]  ;;  %v3205_v38 = vld [vmem:[%s10658_s2 + $0x238] sm:$0xff] }
 0x42b   :  { %3405 = vmatpush.msrb.mxu3 %v3249_v25  ;;  %3273 = vmatpush.msra.mxu0 %v3150_v18  ;;  %v3200_v18 = vld [vmem:[%s10658_s2 + $0x210] sm:$0xff] }
 0x42c   :  { %3313 = vmatpush.msra.mxu2 %v3151_v16  ;;  %3369 = vmatpush.msrb.mxu1 %v3232_v61  ;;  %v3201_v16 = vld [vmem:[%s10658_s2 + $0x218] sm:$0xff] }
 0x42d   :  { %3406 = vmatpush.msrb.mxu3 %v3245_v44  ;;  %3274 = vmatpush.msra.mxu0 %v3146_v8  ;;  %v3208_v44 = vld [vmem:[%s10658_s2 + $0x250] sm:$0xff] }
 0x42e   :  { %3314 = vmatpush.msra.mxu2 %v3147_v5  ;;  %3370 = vmatpush.msrb.mxu1 %v3228_v49 }
 0x42f   :  { %3407 = vmatpush.msrb.mxu3 %v3241_v21  ;;  %3275 = vmatpush.msra.mxu0 %v3142_v11 }
 0x430   :  { %3315 = vmatpush.msra.mxu2 %v3143_v53 }
 0x431   :  { %3408 = vmatpush.msrb.mxu3 %v3237_v59  ;;  %3276 = vmatpush.msra.mxu0 %v3138_v60  ;;  %v3184_v59 = vld [vmem:[%s10658_s2 + $0x190] sm:$0xff] }
 0x432   :  { %3316 = vmatpush.msra.mxu2 %v3139_v0  ;;  %v2916_v0 = vunpack.c.l.bf16 %v8908_v19 }
 0x433   :  { %3409 = vmatpush.msrb.mxu3 %v3233_v2  ;;  %3277 = vmatpush.msra.mxu0 %v3134_v36  ;;  %v3181_v2 = vld [vmem:[%s10658_s2 + $0x178] sm:$0xff] }
 0x434   :  { %3317 = vmatpush.msra.mxu2 %v3135_v3 }
 0x435   :  { %3410 = vmatpush.msrb.mxu3 %v3229_v41  ;;  %3342 = vmatpush.msrb.mxu0 %v3196_v46  ;;  %v3177_v41 = vld [vmem:[%s10658_s2 + $0x158] sm:$0xff] }
 0x436   :  { %v3165_v46 = vld [vmem:[%s10658_s2 + $0xf8] sm:$0xff] }
 0x437   :  { %3411 = vmatpush.msrb.mxu3 %v3225_v62  ;;  %3343 = vmatpush.msrb.mxu0 %v3192_v54 }
 0x439   :  { %3412 = vmatpush.msrb.mxu3 %v3221_v1  ;;  %3344 = vmatpush.msrb.mxu0 %v3188_v6  ;;  %v3168_v1 = vld [vmem:[%s10658_s2 + $0x110] sm:$0xff] }
 0x43b   :  { %3413 = vmatpush.msrb.mxu3 %v3217_v47  ;;  %3345 = vmatpush.msrb.mxu0 %v3184_v59  ;;  %v3164_v47 = vld [vmem:[%s10658_s2 + $0xf0] sm:$0xff] }
 0x43d   :  { %3414 = vmatpush.msrb.mxu3 %v3213_v27 }
 0x43f   :  { %3415 = vmatpush.msrb.mxu3 %v3209_v39  ;;  %v3157_v39 = vld [vmem:[%s10658_s2 + $0xb8] sm:$0xff] }
 0x441   :  { %3416 = vmatpush.msrb.mxu3 %v3205_v38  ;;  %v3152_v38 = vld [vmem:[%s10658_s2 + $0x90] sm:$0xff] }
 0x443   :  { %3417 = vmatpush.msrb.mxu3 %v3201_v16 }
 0x456   :  { %v2725_v31 = vpop.f32.mrf.mxu1 }
 0x45c   :  { %v2765_v43 = vpop.f32.mrf.mxu3 }
 0x45e   :  { %v8882_v29 = vpop.f32.mrf.mxu1 }
 0x464   :  { %v2845_v50 = vpop.f32.mrf.mxu3 }
 0x46f   :  { %v2705_v12 = vpop.f32.mrf.mxu0 }
 0x470   :  { %v2706_v51 = vadd.f32 %v2705_v12, %v6080_v34  ;;  %v3197_v12 = vld [vmem:[%s10658_s2 + $0x1f8] sm:$0xff] }
 0x471   :  { %3382 = vmatpush.msrb.mxu2 %v3197_v12 }
 0x472   :  { %v2726_v40 = vadd.f32 %v2725_v31, %v2706_v51  ;;  %v3224_v31 = vld [vmem:[%s10658_s2 + $0x2d0] sm:$0xff] }
 0x473   :  { %3371 = vmatpush.msrb.mxu1 %v3224_v31  ;;  %3383 = vmatpush.msrb.mxu2 %v3193_v26  ;;  %v3172_v31 = vld [vmem:[%s10658_s2 + $0x130] sm:$0xff] }
 0x474   :  { %v4720_v37 = vmul.f32 -1.442695, %v2726_v40 }
 0x475   :  { %v2745_v23 = vpop.f32.mrf.mxu2  ;;  %3372 = vmatpush.msrb.mxu1 %v3220_v15 }
 0x476   :  { %4893 = vpow2.f32 %v4720_v37  ;;  %v2746_v30 = vadd.f32 %v2745_v23, %v6126_v7  ;;  %v3189_v37 = vld [vmem:[%s10658_s2 + $0x1b8] sm:$0xff] }
 0x477   :  { %3373 = vmatpush.msrb.mxu1 %v3216_v9  ;;  %3384 = vmatpush.msrb.mxu2 %v3189_v37 }
 0x478   :  { %v2766_v42 = vadd.f32 %v2765_v43, %v2746_v30  ;;  %v2785_v51 = vpop.f32.mrf.mxu0  ;;  %v2919_v43 = vunpack.c.h.bf16 %v8977_v14 }
 0x479   :  { %v3021_v4 = vpop.f32.mrf.mxu1  ;;  %3374 = vmatpush.msrb.mxu1 %v3212_v55  ;;  %v2786_v23 = vadd.f32 %v2785_v51, %v6251_v45  ;;  %v3161_v51 = vld [vmem:[%s10658_s2 + $0xd8] sm:$0xff] }
 0x47a   :  { %v4721_v22 = vmul.f32 -1.442695, %v2766_v42  ;;  %v3065_v10 = vadd.f32 %v3021_v4, %v2917_v63  ;;  %v3185_v63 = vld [vmem:[%s10658_s2 + $0x198] sm:$0xff]  ;;  %v3180_v42 = vld [vmem:[%s10658_s2 + $0x170] sm:$0xff] }
 0x47b   :  { %3375 = vmatpush.msrb.mxu1 %v3208_v44  ;;  %3385 = vmatpush.msrb.mxu2 %v3185_v63  ;;  %v2806_v8 = vadd.f32 %v8882_v29, %v2786_v23  ;;  %v3156_v44 = vld [vmem:[%s10658_s2 + $0xb0] sm:$0xff]  ;;  %v3149_v63 = vld [vmem:[%s10658_s2 + $0x78] sm:$0xff] }
 0x47c   :  { %v4894_v58 = vpop.eup %4893  ;;  %4895 = vpow2.f32 %v4721_v22  ;;  %v4726_v32 = vmul.f32 -1.442695, %v3065_v10  ;;  %3346 = vmatpush.msrb.mxu0 %v3180_v42  ;;  %v3176_v22 = vld [vmem:[%s10658_s2 + $0x150] sm:$0xff] }
 0x47d   :  { %v8963_v24 = vadd.f32 1.0, %v4894_v58  ;;  %3376 = vmatpush.msrb.mxu1 %v3204_v17  ;;  %3386 = vmatpush.msrb.mxu2 %v3181_v2  ;;  %v3173_v58 = vld [vmem:[%s10658_s2 + $0x138] sm:$0xff]  ;;  %v3144_v2 = vld [vmem:[%s10658_s2 + $0x50] sm:$0xff] }
 0x47e   :  { %v2825_v35 = vpop.f32.mrf.mxu2  ;;  %3347 = vmatpush.msrb.mxu0 %v3176_v22  ;;  %v3141_v22 = vld [vmem:[%s10658_s2 + $0x38] sm:$0xff] }
 0x47f   :  { %4897 = vrcp.f32 %v8963_v24  ;;  %v2826_v52 = vadd.f32 %v2825_v35, %v6196_v48  ;;  %3377 = vmatpush.msrb.mxu1 %v3200_v18  ;;  %3387 = vmatpush.msrb.mxu2 %v3177_v41  ;;  %v2863_v62 = vand.u32 2147483648, %v8963_v24  ;;  %vm2857_vm13 = vweird.f32 %v8963_v24 }
 0x480   :  { %4899 = vpow2.f32 %v4726_v32  ;;  %v3061_v40 = vpop.f32.mrf.mxu3  ;;  %v2861_v35 = vand.u32 2147483647, %v8963_v24  ;;  %3348 = vmatpush.msrb.mxu0 %v3172_v31  ;;  %v3169_v32 = vld [vmem:[%s10658_s2 + $0x118] sm:$0xff] }
 0x481   :  { %v2846_v25 = vadd.f32 %v2845_v50, %v2826_v52  ;;  %v3067_v30 = vadd.f32 %v3061_v40, %v2919_v43  ;;  %3388 = vmatpush.msrb.mxu2 %v3173_v58  ;;  %v2864_v12 = vor.u32 1.1754944e-38, %v2863_v62 }
 0x482   :  { %v4896_v28 = vpop.eup %4895  ;;  %3349 = vmatpush.msrb.mxu0 %v3168_v1  ;;  %vm2862_vm1 = vcmp.eq.f32.partialorder %v2861_v35, 8.507059e+37 }
 0x483   :  { %v9015_v56 = vadd.f32 1.0, %v4896_v28  ;;  %v4722_v13 = vmul.f32 -1.442695, %v2846_v25  ;;  %v4727_v49 = vmul.f32 -1.442695, %v3067_v30  ;;  %3389 = vmatpush.msrb.mxu2 %v3169_v32  ;;  %v3160_v28 = vld [vmem:[%s10658_s2 + $0xd0] sm:$0xff] }
 0x484   :  { %3350 = vmatpush.msrb.mxu0 %v3164_v47  ;;  %v3555_v32 = vld [vmem:[%s10657_s1 + $0x1e8] sm:$0xff] }
 0x485   :  { %v9029_v21 = vpop.eup %4897  ;;  %4901 = vrcp.f32 %v9015_v56  ;;  %v2882_v36 = vand.u32 2147483648, %v9015_v56  ;;  %vm2876_vm0 = vweird.f32 %v9015_v56  ;;  %3390 = vmatpush.msrb.mxu2 %v3165_v46  ;;  %v3547_v46 = vld [vmem:[%s10657_s1 + $0x1a8] sm:$0xff] }
 0x486   :  { %v2853_v20 = vmul.f32 %v9029_v21, %v8963_v24  ;;  %4903 = vpow2.f32 %v4722_v13  ;;  %v4900_v4 = vpop.eup %4899  ;;  %vm2858_vm12 = vweird.f32 %v9029_v21  ;;  %v2880_v24 = vand.u32 2147483647, %v9015_v56  ;;  %3351 = vmatpush.msrb.mxu0 %v3160_v28 }
 0x487   :  { %v9070_v53 = vadd.f32 1.0, %v4900_v4  ;;  %4905 = vtanh.f32 %v2806_v8  ;;  %vm9093_vm14 = vmor %vm2857_vm13, %vm2858_vm12  ;;  %v2883_v43 = vor.u32 1.1754944e-38, %v2882_v36  ;;  %3391 = vmatpush.msrb.mxu2 %v3161_v51  ;;  %v3145_v4 = vld [vmem:[%s10658_s2 + $0x58] sm:$0xff] }
 0x488   :  { %v2854_v61 = vsub.f32 1.0, %v2853_v20  ;;  %4907 = vpow2.f32 %v4727_v49  ;;  %vm2881_vm3 = vcmp.eq.f32.partialorder %v2880_v24, 8.507059e+37  ;;  %3352 = vmatpush.msrb.mxu0 %v3156_v44  ;;  %v3153_v20 = vld [vmem:[%s10658_s2 + $0x98] sm:$0xff]  ;;  %v3140_v49 = vld [vmem:[%s10658_s2 + $0x30] sm:$0xff]  ;;  %v3539_v44 = vld [vmem:[%s10657_s1 + $0x168] sm:$0xff] }
 0x489   :  { %3392 = vmatpush.msrb.mxu2 %v3157_v39  ;;  %v3557_v36 = vld [vmem:[%s10657_s1 + $0x1f8] sm:$0xff]  ;;  %vm3096_vm9 = vweird.f32 %v9070_v53  ;;  %v3100_v51 = vand.u32 2147483647, %v9070_v53 }
 0x48a   :  { %v2855_v5 = vmul.f32 %v9029_v21, %v2854_v61  ;;  %3353 = vmatpush.msrb.mxu0 %v3152_v38  ;;  %v3553_v24 = vld [vmem:[%s10657_s1 + $0x1d8] sm:$0xff] }
 0x48b   :  { %v4902_v50 = vpop.eup %4901  ;;  %3393 = vmatpush.msrb.mxu2 %v3153_v20  ;;  %v3541_v39 = vld [vmem:[%s10657_s1 + $0x178] sm:$0xff]  ;;  %vm3101_vm13 = vcmp.eq.f32.partialorder %v3100_v51, 8.507059e+37 }
 0x48c   :  { %v4904_v10 = vpop.eup %4903  ;;  %v2872_v11 = vmul.f32 %v4902_v50, %v9015_v56  ;;  %v2856_v29 = vadd.f32 %v9029_v21, %v2855_v5  ;;  %vm2877_vm15 = vweird.f32 %v4902_v50  ;;  %v3497_v51 = vld [vmem:[%s10657_s1 + $0x18] sm:$0xff] }
 0x48d   :  { %v9079_v60 = vadd.f32 1.0, %v4904_v10  ;;  %v4906_v25 = vpop.eup %4905  ;;  %vm2878_vm2 = vmor %vm2876_vm0, %vm2877_vm15  ;;  %3394 = vmatpush.msrb.mxu2 %v3149_v63 }
 0x48e   :  { %v2873_v15 = vsub.f32 1.0, %v2872_v11  ;;  %v2860_v9 = vsel %vm9093_vm14, %v9029_v21, %v2856_v29  ;;  %v4908_v40 = vpop.eup %4907  ;;  %v3136_v11 = vld [vmem:[%s10658_s2 + $0x10] sm:$0xff]  ;;  %v3137_v29 = vld [vmem:[%s10658_s2 + $0x18] sm:$0xff] }
 0x48f   :  { %4909 = vrcp.f32 %v9079_v60  ;;  %v2865_v54 = vsel %vm2862_vm1, %v2864_v12, %v2860_v9  ;;  %v9143_v16 = vadd.f32 1.0, %v4908_v40  ;;  %v2902_v42 = vand.u32 2147483648, %v9079_v60  ;;  %3395 = vmatpush.msrb.mxu2 %v3145_v4  ;;  %v3549_v12 = vld [vmem:[%s10657_s1 + $0x1b8] sm:$0xff]  ;;  %v3527_v4 = vld [vmem:[%s10657_s1 + $0x108] sm:$0xff] }
 0x490   :  { %v2874_v3 = vmul.f32 %v4902_v50, %v2873_v15  ;;  %4911 = vrcp.f32 %v9070_v53  ;;  %v3001_v52 = vpop.f32.mrf.mxu0  ;;  %v2907_v23 = vmul.f32 %v4906_v25, %v2865_v54  ;;  %v2900_v5 = vand.u32 2147483647, %v9079_v60  ;;  %v3543_v25 = vld [vmem:[%s10657_s1 + $0x188] sm:$0xff]  ;;  %v3534_v54 = vld [vmem:[%s10657_s1 + $0x140] sm:$0xff] }
 0x491   :  { %v3064_v55 = vadd.f32 %v3001_v52, %v2916_v0  ;;  %vm2896_vm5 = vweird.f32 %v9079_v60  ;;  %v2903_v31 = vor.u32 1.1754944e-38, %v2902_v42  ;;  %3396 = vmatpush.msrb.mxu2 %v3141_v22  ;;  %v2918_v0 = vunpack.c.l.bf16 %v8977_v14  ;;  %v3551_v14 = vld [vmem:[%s10657_s1 + $0x1c8] sm:$0xff] }
 0x492   :  { %v2875_v27 = vadd.f32 %v4902_v50, %v2874_v3  ;;  %vm2901_vm7 = vcmp.eq.f32.partialorder %v2900_v5, 8.507059e+37  ;;  %vm3116_vm1 = vweird.f32 %v9143_v16 }
 0x493   :  { %v4725_v26 = vmul.f32 -1.442695, %v3064_v55  ;;  %3397 = vmatpush.msrb.mxu2 %v3137_v29  ;;  %v3102_v55 = vand.u32 2147483648, %v9070_v53  ;;  %v3515_v29 = vld [vmem:[%s10657_s1 + $0xa8] sm:$0xff] }
 0x494   :  { %v2879_v56 = vsel %vm2878_vm2, %v4902_v50, %v2875_v27 }
 0x495   :  { %v4910_v13 = vpop.eup %4909  ;;  %v2884_v6 = vsel %vm2881_vm3, %v2883_v43, %v2879_v56  ;;  %4913 = vpow2.f32 %v4725_v26  ;;  %v3545_v43 = vld [vmem:[%s10657_s1 + $0x198] sm:$0xff] }
 0x496   :  { %v9123_v37 = vpop.eup %4911  ;;  %v2906_v21 = vmul.f32 %v2884_v6, %v8439_v33  ;;  %v2892_v17 = vmul.f32 %v4910_v13, %v9079_v60  ;;  %v3148_v33 = vld [vmem:[%s10658_s2 + $0x70] sm:$0xff]  ;;  %vm2897_vm4 = vweird.f32 %v4910_v13 }
 0x497   :  { %v3092_v18 = vmul.f32 %v9123_v37, %v9070_v53  ;;  %3354 = vmatpush.msrb.mxu0 %v3148_v33  ;;  %vm2898_vm6 = vmor %vm2896_vm5, %vm2897_vm4  ;;  %v3041_v35 = vpop.f32.mrf.mxu2  ;;  %vm3097_vm8 = vweird.f32 %v9123_v37  ;;  %v3533_v33 = vld [vmem:[%s10657_s1 + $0x138] sm:$0xff] }
 0x498   :  { %v9133_v30 = vadd.f32 %v2907_v23, %v2906_v21  ;;  %v2893_v59 = vsub.f32 1.0, %v2892_v17  ;;  %v3066_v9 = vadd.f32 %v3041_v35, %v2918_v0  ;;  %vm9207_vm10 = vmor %vm3096_vm9, %vm3097_vm8  ;;  %v3537_v23 = vld [vmem:[%s10657_s1 + $0x158] sm:$0xff] }
 0x499   :  { %3355 = vmatpush.msrb.mxu0 %v3144_v2  ;;  %v3093_v10 = vsub.f32 1.0, %v3092_v18  ;;  %v3513_v0 = vld [vmem:[%s10657_s1 + $0x98] sm:$0xff] }
 0x49a   :  { %4915 = vtanh.f32 %v9133_v30  ;;  %v2894_v61 = vmul.f32 %v4910_v13, %v2893_v59  ;;  %v3531_v59 = vld [vmem:[%s10657_s1 + $0x128] sm:$0xff] }
 0x49b   :  { %v4914_v8 = vpop.eup %4913  ;;  %4917 = vrcp.f32 %v9143_v16  ;;  %3356 = vmatpush.msrb.mxu0 %v3140_v49  ;;  %v3094_v15 = vmul.f32 %v9123_v37, %v3093_v10  ;;  %v3523_v49 = vld [vmem:[%s10657_s1 + $0xe8] sm:$0xff]  ;;  %v3521_v10 = vld [vmem:[%s10657_s1 + $0xd8] sm:$0xff] }
 0x49c   :  { %v9160_v41 = vadd.f32 1.0, %v4914_v8  ;;  %v2895_v50 = vadd.f32 %v4910_v13, %v2894_v61  ;;  %v3529_v8 = vld [vmem:[%s10657_s1 + $0x118] sm:$0xff] }
 0x49d   :  { %3357 = vmatpush.msrb.mxu0 %v3136_v11  ;;  %v3095_v47 = vadd.f32 %v9123_v37, %v3094_v15  ;;  %v3120_v11 = vand.u32 2147483647, %v9143_v16 }
 0x49e   :  { %4919 = vrcp.f32 %v9160_v41  ;;  %v2899_v58 = vsel %vm2898_vm6, %v4910_v13, %v2895_v50  ;;  %v3083_v26 = vand.u32 2147483648, %v9160_v41  ;;  %v3081_v53 = vand.u32 2147483647, %v9160_v41  ;;  %v3519_v50 = vld [vmem:[%s10657_s1 + $0xc8] sm:$0xff] }
 0x49f   :  { %v2904_v60 = vsel %vm2901_vm7, %v2903_v31, %v2899_v58  ;;  %4921 = vtanh.f32 %v3066_v9  ;;  %v3099_v56 = vsel %vm9207_vm10, %v9123_v37, %v3095_v47  ;;  %v3103_v13 = vor.u32 1.1754944e-38, %v3102_v55  ;;  %v3535_v37 = vld [vmem:[%s10657_s1 + $0x148] sm:$0xff]  ;;  %v3517_v31 = vld [vmem:[%s10657_s1 + $0xb8] sm:$0xff]  ;;  %v3548_v47 = vld [vmem:[%s10657_s1 + $0x1b0] sm:$0xff] }
 0x4a0   :  { %v4916_v62 = vpop.eup %4915  ;;  %vm3077_vm12 = vweird.f32 %v9160_v41  ;;  %v3084_v17 = vor.u32 1.1754944e-38, %v3083_v26  ;;  %vm3082_vm15 = vcmp.eq.f32.partialorder %v3081_v53, 8.507059e+37  ;;  %vm3121_vm3 = vcmp.eq.f32.partialorder %v3120_v11, 8.507059e+37  ;;  %v3505_v9 = vld [vmem:[%s10657_s1 + $0x58] sm:$0xff]  ;;  %v3542_v55 = vld [vmem:[%s10657_s1 + $0x180] sm:$0xff]  ;;  %v3536_v26 = vld [vmem:[%s10657_s1 + $0x150] sm:$0xff] }
 0x4a1   :  { %v2910_v1 = vmul.f32 %v4916_v62, %v2904_v60  ;;  %v9179_v19 = vpop.eup %4917  ;;  %v3104_v38 = vsel %vm3101_vm13, %v3103_v13, %v3099_v56  ;;  %v3532_v53 = vld [vmem:[%s10657_s1 + $0x130] sm:$0xff]  ;;  %v3526_v56 = vld [vmem:[%s10657_s1 + $0x100] sm:$0xff] }
 0x4a2   :  { %v3112_v27 = vmul.f32 %v9179_v19, %v9143_v16  ;;  %v3126_v42 = vmul.f32 %v3104_v38, %v8550_v57  ;;  %v3525_v57 = vld [vmem:[%s10657_s1 + $0xf8] sm:$0xff]  ;;  %vm3117_vm0 = vweird.f32 %v9179_v19  ;;  %v3524_v13 = vld [vmem:[%s10657_s1 + $0xf0] sm:$0xff]  ;;  %v3816_v11 = vld [vmem:[%s10658_s2 + $0x360] sm:$0xff] }
 0x4a3   :  { %3298 = vmatmul.f32.vlgmr.msra.gmra.mxu1 %v2910_v1  ;;  %3338 = vmatmul.f32.vlgmr.msra.gmra.mxu3 %v2910_v1  ;;  %vm3118_vm2 = vmor %vm3116_vm1, %vm3117_vm0  ;;  %v3512_v38 = vld [vmem:[%s10657_s1 + $0x90] sm:$0xff] }
 0x4a4   :  { %v4920_v3 = vpop.eup %4919  ;;  %3578 = vmatpush.msra.mxu1 %v3555_v32  ;;  %3618 = vmatpush.msra.mxu3 %v3557_v36  ;;  %v3113_v6 = vsub.f32 1.0, %v3112_v27  ;;  %v3556_v32 = vld [vmem:[%s10657_s1 + $0x1f0] sm:$0xff]  ;;  %v3507_v36 = vld [vmem:[%s10657_s1 + $0x68] sm:$0xff] }
 0x4a5   :  { %v3073_v52 = vmul.f32 %v4920_v3, %v9160_v41  ;;  %vm3078_vm11 = vweird.f32 %v4920_v3  ;;  %v4922_v63 = vpop.eup %4921  ;;  %v3122_v41 = vand.u32 2147483648, %v9143_v16  ;;  %v3511_v16 = vld [vmem:[%s10657_s1 + $0x88] sm:$0xff]  ;;  %v3544_v27 = vld [vmem:[%s10657_s1 + $0x190] sm:$0xff] }
 0x4a6   :  { %3579 = vmatpush.msra.mxu1 %v3551_v14  ;;  %3619 = vmatpush.msra.mxu3 %v3553_v24  ;;  %vm3079_vm14 = vmor %vm3077_vm12, %vm3078_vm11  ;;  %v3114_v18 = vmul.f32 %v9179_v19, %v3113_v6  ;;  %v3550_v14 = vld [vmem:[%s10657_s1 + $0x1c0] sm:$0xff]  ;;  %v3552_v24 = vld [vmem:[%s10657_s1 + $0x1d0] sm:$0xff] }
 0x4a7   :  { %v3074_v28 = vsub.f32 1.0, %v3073_v52  ;;  %v3123_v62 = vor.u32 1.1754944e-38, %v3122_v41  ;;  %v3546_v52 = vld [vmem:[%s10657_s1 + $0x1a0] sm:$0xff]  ;;  %v3825_v41 = vld [vmem:[%s10658_s2 + $0x3a8] sm:$0xff] }
 0x4a8   :  { %3580 = vmatpush.msra.mxu1 %v3547_v46  ;;  %3620 = vmatpush.msra.mxu3 %v3549_v12  ;;  %v3115_v22 = vadd.f32 %v9179_v19, %v3114_v18  ;;  %v3499_v46 = vld [vmem:[%s10657_s1 + $0x28] sm:$0xff]  ;;  %v3501_v12 = vld [vmem:[%s10657_s1 + $0x38] sm:$0xff]  ;;  %v3518_v6 = vld [vmem:[%s10657_s1 + $0xc0] sm:$0xff] }
 0x4a9   :  { %v3075_v40 = vmul.f32 %v4920_v3, %v3074_v28  ;;  %v3495_v28 = vld [vmem:[%s10657_s1 + $0x8] sm:$0xff]  ;;  %v3498_v18 = vld [vmem:[%s10657_s1 + $0x20] sm:$0xff] }
 0x4aa   :  { %3581 = vmatpush.msra.mxu1 %v3543_v25  ;;  %3621 = vmatpush.msra.mxu3 %v3545_v43  ;;  %v3119_v58 = vsel %vm3118_vm2, %v9179_v19, %v3115_v22  ;;  %v3509_v19 = vld [vmem:[%s10657_s1 + $0x78] sm:$0xff]  ;;  %v3538_v25 = vld [vmem:[%s10657_s1 + $0x160] sm:$0xff]  ;;  %v3540_v43 = vld [vmem:[%s10657_s1 + $0x170] sm:$0xff] }
 0x4ab   :  { %v3076_v21 = vadd.f32 %v4920_v3, %v3075_v40  ;;  %3378 = vmatmul.f32.vlgmr.msrb.gmra.mxu1 %v2910_v1  ;;  %3418 = vmatmul.f32.vlgmr.msrb.gmra.mxu3 %v2910_v1  ;;  %v3124_v15 = vsel %vm3121_vm3, %v3123_v62, %v3119_v58  ;;  %v3554_v1 = vld [vmem:[%s10657_s1 + $0x1e0] sm:$0xff]  ;;  %v3813_v58 = vld [vmem:[%s10658_s2 + $0x348] sm:$0xff] }
 0x4ac   :  { %3582 = vmatpush.msra.mxu1 %v3539_v44  ;;  %3622 = vmatpush.msra.mxu3 %v3541_v39  ;;  %v3530_v40 = vld [vmem:[%s10657_s1 + $0x120] sm:$0xff]  ;;  %v3528_v44 = vld [vmem:[%s10657_s1 + $0x110] sm:$0xff] }
 0x4ad   :  { %v3080_v20 = vsel %vm3079_vm14, %v4920_v3, %v3076_v21  ;;  %v3503_v3 = vld [vmem:[%s10657_s1 + $0x48] sm:$0xff]  ;;  %v3522_v39 = vld [vmem:[%s10657_s1 + $0xe0] sm:$0xff]  ;;  %v3520_v21 = vld [vmem:[%s10657_s1 + $0xd0] sm:$0xff] }
 0x4ae   :  { %v3085_v61 = vsel %vm3082_vm15, %v3084_v17, %v3080_v20  ;;  %3583 = vmatpush.msra.mxu1 %v3535_v37  ;;  %3623 = vmatpush.msra.mxu3 %v3537_v23  ;;  %v3514_v37 = vld [vmem:[%s10657_s1 + $0xa0] sm:$0xff]  ;;  %v3516_v23 = vld [vmem:[%s10657_s1 + $0xb0] sm:$0xff] }
 0x4af   :  { %v3127_v2 = vmul.f32 %v4922_v63, %v3085_v61  ;;  %v3510_v17 = vld [vmem:[%s10657_s1 + $0x80] sm:$0xff]  ;;  %v3504_v63 = vld [vmem:[%s10657_s1 + $0x50] sm:$0xff] }
 0x4b0   :  { %3584 = vmatpush.msra.mxu1 %v3531_v59  ;;  %3624 = vmatpush.msra.mxu3 %v3533_v33  ;;  %v3506_v20 = vld [vmem:[%s10657_s1 + $0x60] sm:$0xff]  ;;  %v3508_v59 = vld [vmem:[%s10657_s1 + $0x70] sm:$0xff] }
 0x4b1   :  { %v9244_v5 = vadd.f32 %v3127_v2, %v3126_v42  ;;  %v3502_v33 = vld [vmem:[%s10657_s1 + $0x40] sm:$0xff]  ;;  %v3500_v61 = vld [vmem:[%s10657_s1 + $0x30] sm:$0xff] }
 0x4b2   :  { %3585 = vmatpush.msra.mxu1 %v3527_v4  ;;  %3625 = vmatpush.msra.mxu3 %v3529_v8  ;;  %v3494_v42 = vld [vmem:[%s10657_s1] sm:$0xff]  ;;  %v3496_v2 = vld [vmem:[%s10657_s1 + $0x10] sm:$0xff]  ;;  %v3833_v8 = vld [vmem:[%s10658_s2 + $0x3e8] sm:$0xff] }
 0x4b3   :  { %4923 = vtanh.f32 %v9244_v5  ;;  %v3832_v4 = vld [vmem:[%s10658_s2 + $0x3e0] sm:$0xff] }
 0x4b4   :  { %3586 = vmatpush.msra.mxu1 %v3523_v49  ;;  %3626 = vmatpush.msra.mxu3 %v3525_v57  ;;  %v3828_v49 = vld [vmem:[%s10658_s2 + $0x3c0] sm:$0xff]  ;;  %v3829_v57 = vld [vmem:[%s10658_s2 + $0x3c8] sm:$0xff] }
 0x4b5   :  { %v3824_v22 = vld [vmem:[%s10658_s2 + $0x3a0] sm:$0xff] }
 0x4b6   :  { %3587 = vmatpush.msra.mxu1 %v3519_v50  ;;  %3627 = vmatpush.msra.mxu3 %v3521_v10  ;;  %v3820_v50 = vld [vmem:[%s10658_s2 + $0x380] sm:$0xff]  ;;  %v3821_v10 = vld [vmem:[%s10658_s2 + $0x388] sm:$0xff] }
 0x4b7   :  { %v3808_v62 = vld [vmem:[%s10658_s2 + $0x320] sm:$0xff] }
 0x4b8   :  { %3588 = vmatpush.msra.mxu1 %v3515_v29  ;;  %3628 = vmatpush.msra.mxu3 %v3517_v31  ;;  %v3817_v29 = vld [vmem:[%s10658_s2 + $0x368] sm:$0xff]  ;;  %v3812_v31 = vld [vmem:[%s10658_s2 + $0x340] sm:$0xff] }
 0x4b9   :  { %v4924_v60 = vpop.eup %4923 }
 0x4ba   :  { %v9277_v35 = vmul.f32 %v4924_v60, %v3124_v15  ;;  %3589 = vmatpush.msra.mxu1 %v3511_v16  ;;  %3629 = vmatpush.msra.mxu3 %v3513_v0  ;;  %v3809_v16 = vld [vmem:[%s10658_s2 + $0x328] sm:$0xff]  ;;  %v3804_v0 = vld [vmem:[%s10658_s2 + $0x300] sm:$0xff] }
 0x4bb   :  { %v3805_v60 = vld [vmem:[%s10658_s2 + $0x308] sm:$0xff]  ;;  %v3800_v15 = vld [vmem:[%s10658_s2 + $0x2e0] sm:$0xff] }
 0x4bc   :  { %3278 = vmatmul.f32.vlgmr.msra.gmra.mxu0 %v9277_v35  ;;  %3318 = vmatmul.f32.vlgmr.msra.gmra.mxu2 %v9277_v35 }
 0x4bd   :  { %3558 = vmatpush.msra.mxu0 %v3554_v1  ;;  %3598 = vmatpush.msra.mxu2 %v3556_v32  ;;  %v3796_v1 = vld [vmem:[%s10658_s2 + $0x2c0] sm:$0xff]  ;;  %v3797_v32 = vld [vmem:[%s10658_s2 + $0x2c8] sm:$0xff] }
 0x4be   :  { %3590 = vmatpush.msra.mxu1 %v3507_v36  ;;  %3630 = vmatpush.msra.mxu3 %v3509_v19  ;;  %v3792_v36 = vld [vmem:[%s10658_s2 + $0x2a0] sm:$0xff]  ;;  %v3793_v19 = vld [vmem:[%s10658_s2 + $0x2a8] sm:$0xff] }
 0x4bf   :  { %3559 = vmatpush.msra.mxu0 %v3550_v14  ;;  %3599 = vmatpush.msra.mxu2 %v3552_v24  ;;  %v3788_v14 = vld [vmem:[%s10658_s2 + $0x280] sm:$0xff]  ;;  %v3789_v24 = vld [vmem:[%s10658_s2 + $0x288] sm:$0xff] }
 0x4c0   :  { %3591 = vmatpush.msra.mxu1 %v3503_v3  ;;  %3631 = vmatpush.msra.mxu3 %v3505_v9  ;;  %v3768_v3 = vld [vmem:[%s10658_s2 + $0x1e0] sm:$0xff]  ;;  %v3769_v9 = vld [vmem:[%s10658_s2 + $0x1e8] sm:$0xff] }
 0x4c1   :  { %3560 = vmatpush.msra.mxu0 %v3546_v52  ;;  %3600 = vmatpush.msra.mxu2 %v3548_v47  ;;  %v3784_v52 = vld [vmem:[%s10658_s2 + $0x260] sm:$0xff]  ;;  %v3785_v47 = vld [vmem:[%s10658_s2 + $0x268] sm:$0xff] }
 0x4c2   :  { %3592 = vmatpush.msra.mxu1 %v3499_v46  ;;  %3632 = vmatpush.msra.mxu3 %v3501_v12  ;;  %v3764_v46 = vld [vmem:[%s10658_s2 + $0x1c0] sm:$0xff]  ;;  %v3765_v12 = vld [vmem:[%s10658_s2 + $0x1c8] sm:$0xff] }
 0x4c3   :  { %3561 = vmatpush.msra.mxu0 %v3542_v55  ;;  %3601 = vmatpush.msra.mxu2 %v3544_v27  ;;  %v3780_v55 = vld [vmem:[%s10658_s2 + $0x240] sm:$0xff]  ;;  %v3781_v27 = vld [vmem:[%s10658_s2 + $0x248] sm:$0xff] }
 0x4c4   :  { %3593 = vmatpush.msra.mxu1 %v3495_v28  ;;  %3633 = vmatpush.msra.mxu3 %v3497_v51  ;;  %v3760_v28 = vld [vmem:[%s10658_s2 + $0x1a0] sm:$0xff]  ;;  %v3761_v51 = vld [vmem:[%s10658_s2 + $0x1a8] sm:$0xff] }
 0x4c5   :  { %3358 = vmatmul.f32.vlgmr.msrb.gmra.mxu0 %v9277_v35  ;;  %3398 = vmatmul.f32.vlgmr.msrb.gmra.mxu2 %v9277_v35 }
 0x4c6   :  { %3562 = vmatpush.msra.mxu0 %v3538_v25  ;;  %3594 = vmatmul.f32.vlgmr.msra.gmra.mxu1 %v9277_v35  ;;  %v3776_v25 = vld [vmem:[%s10658_s2 + $0x220] sm:$0xff] }
 0x4c7   :  { %3602 = vmatpush.msra.mxu2 %v3540_v43  ;;  %3634 = vmatmul.f32.vlgmr.msra.gmra.mxu3 %v9277_v35  ;;  %v3777_v43 = vld [vmem:[%s10658_s2 + $0x228] sm:$0xff] }
 0x4c8   :  { %3563 = vmatpush.msra.mxu0 %v3534_v54  ;;  %3856 = vmatpush.msrb.mxu1 %v3832_v4  ;;  %v3823_v4 = vld [vmem:[%s10658_s2 + $0x398] sm:$0xff] }
 0x4c9   :  { %3603 = vmatpush.msra.mxu2 %v3536_v26  ;;  %3896 = vmatpush.msrb.mxu3 %v3833_v8  ;;  %v3756_v26 = vld [vmem:[%s10658_s2 + $0x180] sm:$0xff] }
 0x4ca   :  { %3564 = vmatpush.msra.mxu0 %v3530_v40  ;;  %3857 = vmatpush.msrb.mxu1 %v3828_v49  ;;  %v3757_v40 = vld [vmem:[%s10658_s2 + $0x188] sm:$0xff] }
 0x4cb   :  { %3604 = vmatpush.msra.mxu2 %v3532_v53  ;;  %3897 = vmatpush.msrb.mxu3 %v3829_v57  ;;  %v3772_v53 = vld [vmem:[%s10658_s2 + $0x200] sm:$0xff] }
 0x4cc   :  { %3565 = vmatpush.msra.mxu0 %v3526_v56  ;;  %3858 = vmatpush.msrb.mxu1 %v3824_v22  ;;  %v3773_v56 = vld [vmem:[%s10658_s2 + $0x208] sm:$0xff]  ;;  %v3736_v57 = vld [vmem:[%s10658_s2 + $0xe0] sm:$0xff] }
 0x4cd   :  { %3605 = vmatpush.msra.mxu2 %v3528_v44  ;;  %3898 = vmatpush.msrb.mxu3 %v3825_v41  ;;  %v3752_v44 = vld [vmem:[%s10658_s2 + $0x160] sm:$0xff]  ;;  %v3737_v22 = vld [vmem:[%s10658_s2 + $0xe8] sm:$0xff]  ;;  %v3818_v41 = vld [vmem:[%s10658_s2 + $0x370] sm:$0xff] }
 0x4ce   :  { %3566 = vmatpush.msra.mxu0 %v3522_v39  ;;  %3859 = vmatpush.msrb.mxu1 %v3820_v50  ;;  %v3753_v39 = vld [vmem:[%s10658_s2 + $0x168] sm:$0xff] }
 0x4cf   :  { %3606 = vmatpush.msra.mxu2 %v3524_v13  ;;  %3899 = vmatpush.msrb.mxu3 %v3821_v10  ;;  %v3834_v13 = vld [vmem:[%s10658_s2 + $0x3f0] sm:$0xff]  ;;  %v3819_v10 = vld [vmem:[%s10658_s2 + $0x378] sm:$0xff] }
 0x4d0   :  { %3567 = vmatpush.msra.mxu0 %v3518_v6  ;;  %3860 = vmatpush.msrb.mxu1 %v3816_v11  ;;  %v3835_v6 = vld [vmem:[%s10658_s2 + $0x3f8] sm:$0xff]  ;;  %v3732_v11 = vld [vmem:[%s10658_s2 + $0xc0] sm:$0xff] }
 0x4d1   :  { %3607 = vmatpush.msra.mxu2 %v3520_v21  ;;  %3900 = vmatpush.msrb.mxu3 %v3817_v29  ;;  %v3748_v21 = vld [vmem:[%s10658_s2 + $0x140] sm:$0xff]  ;;  %v3733_v29 = vld [vmem:[%s10658_s2 + $0xc8] sm:$0xff] }
 0x4d2   :  { %3568 = vmatpush.msra.mxu0 %v3514_v37  ;;  %3861 = vmatpush.msrb.mxu1 %v3812_v31  ;;  %v3749_v37 = vld [vmem:[%s10658_s2 + $0x148] sm:$0xff]  ;;  %v3814_v31 = vld [vmem:[%s10658_s2 + $0x350] sm:$0xff] }
 0x4d3   :  { %3608 = vmatpush.msra.mxu2 %v3516_v23  ;;  %3901 = vmatpush.msrb.mxu3 %v3813_v58  ;;  %v3830_v23 = vld [vmem:[%s10658_s2 + $0x3d0] sm:$0xff] }
 0x4d4   :  { %3569 = vmatpush.msra.mxu0 %v3510_v17  ;;  %3862 = vmatpush.msrb.mxu1 %v3808_v62  ;;  %v3831_v17 = vld [vmem:[%s10658_s2 + $0x3d8] sm:$0xff]  ;;  %v9602_v62 = vld [vmem:[%s10659_s0 + $0x60] sm:$0xff] }
 0x4d5   :  { %3609 = vmatpush.msra.mxu2 %v3512_v38  ;;  %3902 = vmatpush.msrb.mxu3 %v3809_v16  ;;  %v3744_v38 = vld [vmem:[%s10658_s2 + $0x120] sm:$0xff]  ;;  %v3815_v16 = vld [vmem:[%s10658_s2 + $0x358] sm:$0xff] }
 0x4d6   :  { %3570 = vmatpush.msra.mxu0 %v3506_v20  ;;  %3863 = vmatpush.msrb.mxu1 %v3804_v0  ;;  %v3745_v20 = vld [vmem:[%s10658_s2 + $0x128] sm:$0xff] }
 0x4d7   :  { %3610 = vmatpush.msra.mxu2 %v3508_v59  ;;  %3903 = vmatpush.msrb.mxu3 %v3805_v60  ;;  %v3826_v59 = vld [vmem:[%s10658_s2 + $0x3b0] sm:$0xff]  ;;  %v3728_v60 = vld [vmem:[%s10658_s2 + $0xa0] sm:$0xff] }
 0x4d8   :  { %3571 = vmatpush.msra.mxu0 %v3502_v33  ;;  %3864 = vmatpush.msrb.mxu1 %v3800_v15  ;;  %v3827_v33 = vld [vmem:[%s10658_s2 + $0x3b8] sm:$0xff]  ;;  %v3729_v15 = vld [vmem:[%s10658_s2 + $0xa8] sm:$0xff] }
 0x4d9   :  { %3611 = vmatpush.msra.mxu2 %v3504_v63 }
 0x4da   :  { %3572 = vmatpush.msra.mxu0 %v3498_v18  ;;  %3865 = vmatpush.msrb.mxu1 %v3796_v1  ;;  %v3740_v18 = vld [vmem:[%s10658_s2 + $0x100] sm:$0xff] }
 0x4db   :  { %3612 = vmatpush.msra.mxu2 %v3500_v61  ;;  %v3741_v61 = vld [vmem:[%s10658_s2 + $0x108] sm:$0xff] }
 0x4dc   :  { %3573 = vmatpush.msra.mxu0 %v3494_v42  ;;  %3866 = vmatpush.msrb.mxu1 %v3792_v36  ;;  %v3822_v42 = vld [vmem:[%s10658_s2 + $0x390] sm:$0xff]  ;;  %v3491_v36 = vunpack.c.h.bf16 %v9602_v62 }
 0x4dd   :  { %3613 = vmatpush.msra.mxu2 %v3496_v2  ;;  %3574 = vmatmul.f32.vlgmr.msra.gmra.mxu0 %v9277_v35 }
 0x4de   :  { %3614 = vmatmul.f32.vlgmr.msra.gmra.mxu2 %v9277_v35  ;;  %v3801_v35 = vld [vmem:[%s10658_s2 + $0x2e8] sm:$0xff]  ;;  %3867 = vmatpush.msrb.mxu1 %v3788_v14 }
 0x4df   :  { %3904 = vmatpush.msrb.mxu3 %v3801_v35  ;;  %3836 = vmatpush.msrb.mxu0 %v3768_v3  ;;  %v3810_v35 = vld [vmem:[%s10658_s2 + $0x330] sm:$0xff]  ;;  %v3725_v14 = vld [vmem:[%s10658_s2 + $0x88] sm:$0xff] }
 0x4e0   :  { %3876 = vmatpush.msrb.mxu2 %v3769_v9  ;;  %3868 = vmatpush.msrb.mxu1 %v3784_v52  ;;  %v3807_v9 = vld [vmem:[%s10658_s2 + $0x318] sm:$0xff] }
 0x4e1   :  { %3905 = vmatpush.msrb.mxu3 %v3797_v32  ;;  %3837 = vmatpush.msrb.mxu0 %v3764_v46  ;;  %v3811_v32 = vld [vmem:[%s10658_s2 + $0x338] sm:$0xff]  ;;  %v3721_v46 = vld [vmem:[%s10658_s2 + $0x68] sm:$0xff] }
 0x4e2   :  { %3877 = vmatpush.msrb.mxu2 %v3765_v12  ;;  %3869 = vmatpush.msrb.mxu1 %v3780_v55  ;;  %v3802_v12 = vld [vmem:[%s10658_s2 + $0x2f0] sm:$0xff] }
 0x4e3   :  { %3906 = vmatpush.msrb.mxu3 %v3793_v19  ;;  %3838 = vmatpush.msrb.mxu0 %v3760_v28  ;;  %v3724_v19 = vld [vmem:[%s10658_s2 + $0x80] sm:$0xff] }
 0x4e4   :  { %3878 = vmatpush.msrb.mxu2 %v3761_v51  ;;  %3870 = vmatpush.msrb.mxu1 %v3776_v25  ;;  %v3716_v25 = vld [vmem:[%s10658_s2 + $0x40] sm:$0xff] }
 0x4e5   :  { %3907 = vmatpush.msrb.mxu3 %v3789_v24  ;;  %3839 = vmatpush.msrb.mxu0 %v3756_v26  ;;  %v3806_v24 = vld [vmem:[%s10658_s2 + $0x310] sm:$0xff] }
 0x4e6   :  { %3879 = vmatpush.msrb.mxu2 %v3757_v40  ;;  %3871 = vmatpush.msrb.mxu1 %v3772_v53  ;;  %v3799_v40 = vld [vmem:[%s10658_s2 + $0x2d8] sm:$0xff] }
 0x4e7   :  { %3908 = vmatpush.msrb.mxu3 %v3785_v47  ;;  %3840 = vmatpush.msrb.mxu0 %v3752_v44  ;;  %v3720_v47 = vld [vmem:[%s10658_s2 + $0x60] sm:$0xff]  ;;  %v3713_v44 = vld [vmem:[%s10658_s2 + $0x28] sm:$0xff] }
 0x4e8   :  { %3880 = vmatpush.msrb.mxu2 %v3753_v39  ;;  %3936 = vmatpush.msra.mxu1 %v3834_v13  ;;  %v3794_v39 = vld [vmem:[%s10658_s2 + $0x2b0] sm:$0xff] }
 0x4e9   :  { %3909 = vmatpush.msrb.mxu3 %v3781_v27  ;;  %3841 = vmatpush.msrb.mxu0 %v3748_v21  ;;  %v3803_v27 = vld [vmem:[%s10658_s2 + $0x2f8] sm:$0xff] }
 0x4ea   :  { %3881 = vmatpush.msrb.mxu2 %v3749_v37  ;;  %3937 = vmatpush.msra.mxu1 %v3830_v23  ;;  %v3795_v21 = vld [vmem:[%s10658_s2 + $0x2b8] sm:$0xff]  ;;  %v3708_v23 = vld [vmem:[%s10658_s2] sm:$0xff] }
 0x4eb   :  { %3910 = vmatpush.msrb.mxu3 %v3777_v43  ;;  %3842 = vmatpush.msrb.mxu0 %v3744_v38  ;;  %v3717_v43 = vld [vmem:[%s10658_s2 + $0x48] sm:$0xff]  ;;  %v3790_v38 = vld [vmem:[%s10658_s2 + $0x290] sm:$0xff] }
 0x4ec   :  { %3882 = vmatpush.msrb.mxu2 %v3745_v20  ;;  %3938 = vmatpush.msra.mxu1 %v3826_v59  ;;  %v3791_v59 = vld [vmem:[%s10658_s2 + $0x298] sm:$0xff] }
 0x4ed   :  { %3911 = vmatpush.msrb.mxu3 %v3773_v56  ;;  %3843 = vmatpush.msrb.mxu0 %v3740_v18  ;;  %v3712_v56 = vld [vmem:[%s10658_s2 + $0x20] sm:$0xff]  ;;  %v3786_v18 = vld [vmem:[%s10658_s2 + $0x270] sm:$0xff] }
 0x4ee   :  { %3883 = vmatpush.msrb.mxu2 %v3741_v61  ;;  %3939 = vmatpush.msra.mxu1 %v3822_v42  ;;  %v3787_v61 = vld [vmem:[%s10658_s2 + $0x278] sm:$0xff] }
 0x4ef   :  { %3976 = vmatpush.msra.mxu3 %v3835_v6  ;;  %3844 = vmatpush.msrb.mxu0 %v3736_v57  ;;  %v9671_v6 = vld [vmem:[%s10659_s0 + $0x68] sm:$0xff]  ;;  %v3766_v57 = vld [vmem:[%s10658_s2 + $0x1d0] sm:$0xff] }
 0x4f0   :  { %3884 = vmatpush.msrb.mxu2 %v3737_v22  ;;  %3940 = vmatpush.msra.mxu1 %v3818_v41  ;;  %v3767_v22 = vld [vmem:[%s10658_s2 + $0x1d8] sm:$0xff] }
 0x4f1   :  { %3977 = vmatpush.msra.mxu3 %v3831_v17  ;;  %3845 = vmatpush.msrb.mxu0 %v3732_v11  ;;  %v3709_v17 = vld [vmem:[%s10658_s2 + $0x8] sm:$0xff]  ;;  %v3783_v11 = vld [vmem:[%s10658_s2 + $0x258] sm:$0xff] }
 0x4f2   :  { %3885 = vmatpush.msrb.mxu2 %v3733_v29  ;;  %3941 = vmatpush.msra.mxu1 %v3814_v31  ;;  %v3762_v31 = vld [vmem:[%s10658_s2 + $0x1b0] sm:$0xff] }
 0x4f3   :  { %3978 = vmatpush.msra.mxu3 %v3827_v33  ;;  %3846 = vmatpush.msrb.mxu0 %v3728_v60  ;;  %v3770_v33 = vld [vmem:[%s10658_s2 + $0x1f0] sm:$0xff] }
 0x4f4   :  { %3886 = vmatpush.msrb.mxu2 %v3729_v15  ;;  %3942 = vmatpush.msra.mxu1 %v3810_v35  ;;  %v3778_v60 = vld [vmem:[%s10658_s2 + $0x230] sm:$0xff]  ;;  %v3779_v15 = vld [vmem:[%s10658_s2 + $0x238] sm:$0xff] }
 0x4f5   :  { %3979 = vmatpush.msra.mxu3 %v3823_v4  ;;  %3847 = vmatpush.msrb.mxu0 %v3724_v19  ;;  %v3774_v19 = vld [vmem:[%s10658_s2 + $0x210] sm:$0xff] }
 0x4f6   :  { %3887 = vmatpush.msrb.mxu2 %v3725_v14  ;;  %3943 = vmatpush.msra.mxu1 %v3806_v24  ;;  %v3775_v14 = vld [vmem:[%s10658_s2 + $0x218] sm:$0xff] }
 0x4f7   :  { %3980 = vmatpush.msra.mxu3 %v3819_v10  ;;  %3848 = vmatpush.msrb.mxu0 %v3720_v47  ;;  %v3782_v10 = vld [vmem:[%s10658_s2 + $0x250] sm:$0xff] }
 0x4f8   :  { %3888 = vmatpush.msrb.mxu2 %v3721_v46  ;;  %3944 = vmatpush.msra.mxu1 %v3802_v12 }
 0x4f9   :  { %3981 = vmatpush.msra.mxu3 %v3815_v16  ;;  %3849 = vmatpush.msrb.mxu0 %v3716_v25 }
 0x4fa   :  { %3889 = vmatpush.msrb.mxu2 %v3717_v43 }
 0x4fb   :  { %3982 = vmatpush.msra.mxu3 %v3811_v32  ;;  %3850 = vmatpush.msrb.mxu0 %v3712_v56  ;;  %v3758_v32 = vld [vmem:[%s10658_s2 + $0x190] sm:$0xff] }
 0x4fc   :  { %3890 = vmatpush.msrb.mxu2 %v3713_v44  ;;  %v3490_v44 = vunpack.c.l.bf16 %v9602_v62 }
 0x4fd   :  { %3983 = vmatpush.msra.mxu3 %v3807_v9  ;;  %3851 = vmatpush.msrb.mxu0 %v3708_v23  ;;  %v3755_v9 = vld [vmem:[%s10658_s2 + $0x178] sm:$0xff] }
 0x4fe   :  { %3891 = vmatpush.msrb.mxu2 %v3709_v17 }
 0x4ff   :  { %3984 = vmatpush.msra.mxu3 %v3803_v27  ;;  %3916 = vmatpush.msra.mxu0 %v3770_v33  ;;  %v3751_v27 = vld [vmem:[%s10658_s2 + $0x158] sm:$0xff] }
 0x500   :  { %v3739_v33 = vld [vmem:[%s10658_s2 + $0xf8] sm:$0xff] }
 0x501   :  { %3985 = vmatpush.msra.mxu3 %v3799_v40  ;;  %3917 = vmatpush.msra.mxu0 %v3766_v57 }
 0x503   :  { %3986 = vmatpush.msra.mxu3 %v3795_v21  ;;  %3918 = vmatpush.msra.mxu0 %v3762_v31  ;;  %v3742_v21 = vld [vmem:[%s10658_s2 + $0x110] sm:$0xff] }
 0x505   :  { %3987 = vmatpush.msra.mxu3 %v3791_v59  ;;  %3919 = vmatpush.msra.mxu0 %v3758_v32  ;;  %v3738_v59 = vld [vmem:[%s10658_s2 + $0xf0] sm:$0xff] }
 0x507   :  { %3988 = vmatpush.msra.mxu3 %v3787_v61 }
 0x509   :  { %3989 = vmatpush.msra.mxu3 %v3783_v11  ;;  %v3731_v11 = vld [vmem:[%s10658_s2 + $0xb8] sm:$0xff] }
 0x50b   :  { %3990 = vmatpush.msra.mxu3 %v3779_v15  ;;  %v3726_v15 = vld [vmem:[%s10658_s2 + $0x90] sm:$0xff] }
 0x50d   :  { %3991 = vmatpush.msra.mxu3 %v3775_v14 }
 0x520   :  { %v3299_v54 = vpop.f32.mrf.mxu1 }
 0x526   :  { %v3339_v8 = vpop.f32.mrf.mxu3 }
 0x528   :  { %v9576_v49 = vpop.f32.mrf.mxu1 }
 0x52e   :  { %v3419_v28 = vpop.f32.mrf.mxu3 }
 0x539   :  { %v3279_v63 = vpop.f32.mrf.mxu0 }
 0x53a   :  { %v3280_v2 = vadd.f32 %v3279_v63, %v6080_v34  ;;  %v3771_v63 = vld [vmem:[%s10658_s2 + $0x1f8] sm:$0xff] }
 0x53b   :  { %3956 = vmatpush.msra.mxu2 %v3771_v63 }
 0x53c   :  { %v3300_v50 = vadd.f32 %v3299_v54, %v3280_v2  ;;  %v3798_v54 = vld [vmem:[%s10658_s2 + $0x2d0] sm:$0xff] }
 0x53d   :  { %3945 = vmatpush.msra.mxu1 %v3798_v54  ;;  %3957 = vmatpush.msra.mxu2 %v3767_v22  ;;  %v3746_v54 = vld [vmem:[%s10658_s2 + $0x130] sm:$0xff] }
 0x53e   :  { %v4728_v58 = vmul.f32 -1.442695, %v3300_v50 }
 0x53f   :  { %v3319_v0 = vpop.f32.mrf.mxu2  ;;  %3946 = vmatpush.msra.mxu1 %v3794_v39 }
 0x540   :  { %4925 = vpow2.f32 %v4728_v58  ;;  %v3320_v1 = vadd.f32 %v3319_v0, %v6126_v7  ;;  %v3763_v58 = vld [vmem:[%s10658_s2 + $0x1b8] sm:$0xff] }
 0x541   :  { %3947 = vmatpush.msra.mxu1 %v3790_v38  ;;  %3958 = vmatpush.msra.mxu2 %v3763_v58 }
 0x542   :  { %v3340_v3 = vadd.f32 %v3339_v8, %v3320_v1  ;;  %v3359_v2 = vpop.f32.mrf.mxu0  ;;  %v3493_v8 = vunpack.c.h.bf16 %v9671_v6 }
 0x543   :  { %v3595_v52 = vpop.f32.mrf.mxu1  ;;  %3948 = vmatpush.msra.mxu1 %v3786_v18  ;;  %v3360_v0 = vadd.f32 %v3359_v2, %v6251_v45  ;;  %v3735_v2 = vld [vmem:[%s10658_s2 + $0xd8] sm:$0xff] }
 0x544   :  { %v4729_v55 = vmul.f32 -1.442695, %v3340_v3  ;;  %v3639_v51 = vadd.f32 %v3595_v52, %v3491_v36  ;;  %v3759_v36 = vld [vmem:[%s10658_s2 + $0x198] sm:$0xff]  ;;  %v3754_v3 = vld [vmem:[%s10658_s2 + $0x170] sm:$0xff] }
 0x545   :  { %3949 = vmatpush.msra.mxu1 %v3782_v10  ;;  %3959 = vmatpush.msra.mxu2 %v3759_v36  ;;  %v3380_v47 = vadd.f32 %v9576_v49, %v3360_v0  ;;  %v3730_v10 = vld [vmem:[%s10658_s2 + $0xb0] sm:$0xff]  ;;  %v3723_v36 = vld [vmem:[%s10658_s2 + $0x78] sm:$0xff] }
 0x546   :  { %v4926_v26 = vpop.eup %4925  ;;  %4927 = vpow2.f32 %v4729_v55  ;;  %v4734_v37 = vmul.f32 -1.442695, %v3639_v51  ;;  %3920 = vmatpush.msra.mxu0 %v3754_v3  ;;  %v3750_v55 = vld [vmem:[%s10658_s2 + $0x150] sm:$0xff] }
 0x547   :  { %v9657_v53 = vadd.f32 1.0, %v4926_v26  ;;  %3950 = vmatpush.msra.mxu1 %v3778_v60  ;;  %3960 = vmatpush.msra.mxu2 %v3755_v9  ;;  %v3747_v26 = vld [vmem:[%s10658_s2 + $0x138] sm:$0xff]  ;;  %v3718_v9 = vld [vmem:[%s10658_s2 + $0x50] sm:$0xff] }
 0x548   :  { %v3399_v13 = vpop.f32.mrf.mxu2  ;;  %3921 = vmatpush.msra.mxu0 %v3750_v55  ;;  %v3715_v55 = vld [vmem:[%s10658_s2 + $0x38] sm:$0xff] }
 0x549   :  { %4929 = vrcp.f32 %v9657_v53  ;;  %v3400_v20 = vadd.f32 %v3399_v13, %v6196_v48  ;;  %3951 = vmatpush.msra.mxu1 %v3774_v19  ;;  %3961 = vmatpush.msra.mxu2 %v3751_v27  ;;  %v3437_v40 = vand.u32 2147483648, %v9657_v53  ;;  %vm3431_vm5 = vweird.f32 %v9657_v53 }
 0x54a   :  { %4931 = vpow2.f32 %v4734_v37  ;;  %v3635_v50 = vpop.f32.mrf.mxu3  ;;  %v3435_v13 = vand.u32 2147483647, %v9657_v53  ;;  %3922 = vmatpush.msra.mxu0 %v3746_v54  ;;  %v3743_v37 = vld [vmem:[%s10658_s2 + $0x118] sm:$0xff] }
 0x54b   :  { %v3420_v4 = vadd.f32 %v3419_v28, %v3400_v20  ;;  %v3641_v1 = vadd.f32 %v3635_v50, %v3493_v8  ;;  %3962 = vmatpush.msra.mxu2 %v3747_v26  ;;  %v3438_v63 = vor.u32 1.1754944e-38, %v3437_v40 }
 0x54c   :  { %v4928_v42 = vpop.eup %4927  ;;  %3923 = vmatpush.msra.mxu0 %v3742_v21  ;;  %vm3436_vm9 = vcmp.eq.f32.partialorder %v3435_v13, 8.507059e+37 }
 0x54d   :  { %v9709_v41 = vadd.f32 1.0, %v4928_v42  ;;  %v4730_v29 = vmul.f32 -1.442695, %v3420_v4  ;;  %v4735_v12 = vmul.f32 -1.442695, %v3641_v1  ;;  %3963 = vmatpush.msra.mxu2 %v3743_v37  ;;  %v3734_v42 = vld [vmem:[%s10658_s2 + $0xd0] sm:$0xff] }
 0x54e   :  { %3924 = vmatpush.msra.mxu0 %v3738_v59  ;;  %v4129_v37 = vld [vmem:[%s10657_s1 + $0x1e8] sm:$0xff] }
 0x54f   :  { %v9723_v16 = vpop.eup %4929  ;;  %4933 = vrcp.f32 %v9709_v41  ;;  %v3456_v23 = vand.u32 2147483648, %v9709_v41  ;;  %vm3450_vm8 = vweird.f32 %v9709_v41  ;;  %3964 = vmatpush.msra.mxu2 %v3739_v33  ;;  %v4121_v33 = vld [vmem:[%s10657_s1 + $0x1a8] sm:$0xff] }
 0x550   :  { %v3427_v35 = vmul.f32 %v9723_v16, %v9657_v53  ;;  %4935 = vpow2.f32 %v4730_v29  ;;  %v4932_v52 = vpop.eup %4931  ;;  %vm3432_vm4 = vweird.f32 %v9723_v16  ;;  %v3454_v53 = vand.u32 2147483647, %v9709_v41  ;;  %3925 = vmatpush.msra.mxu0 %v3734_v42 }
 0x551   :  { %v9764_v43 = vadd.f32 1.0, %v4932_v52  ;;  %4937 = vtanh.f32 %v3380_v47  ;;  %vm9787_vm6 = vmor %vm3431_vm5, %vm3432_vm4  ;;  %v3457_v8 = vor.u32 1.1754944e-38, %v3456_v23  ;;  %3965 = vmatpush.msra.mxu2 %v3735_v2  ;;  %v3719_v52 = vld [vmem:[%s10658_s2 + $0x58] sm:$0xff] }
 0x552   :  { %v3428_v24 = vsub.f32 1.0, %v3427_v35  ;;  %4939 = vpow2.f32 %v4735_v12  ;;  %vm3455_vm11 = vcmp.eq.f32.partialorder %v3454_v53, 8.507059e+37  ;;  %3926 = vmatpush.msra.mxu0 %v3730_v10  ;;  %v3727_v35 = vld [vmem:[%s10658_s2 + $0x98] sm:$0xff]  ;;  %v3714_v12 = vld [vmem:[%s10658_s2 + $0x30] sm:$0xff]  ;;  %v4113_v10 = vld [vmem:[%s10657_s1 + $0x168] sm:$0xff] }
 0x553   :  { %3966 = vmatpush.msra.mxu2 %v3731_v11  ;;  %v4131_v23 = vld [vmem:[%s10657_s1 + $0x1f8] sm:$0xff]  ;;  %vm3670_vm1 = vweird.f32 %v9764_v43  ;;  %v3674_v2 = vand.u32 2147483647, %v9764_v43 }
 0x554   :  { %v3429_v46 = vmul.f32 %v9723_v16, %v3428_v24  ;;  %3927 = vmatpush.msra.mxu0 %v3726_v15  ;;  %v4127_v53 = vld [vmem:[%s10657_s1 + $0x1d8] sm:$0xff] }
 0x555   :  { %v4934_v28 = vpop.eup %4933  ;;  %3967 = vmatpush.msra.mxu2 %v3727_v35  ;;  %v4115_v11 = vld [vmem:[%s10657_s1 + $0x178] sm:$0xff]  ;;  %vm3675_vm5 = vcmp.eq.f32.partialorder %v3674_v2, 8.507059e+37 }
 0x556   :  { %v4936_v51 = vpop.eup %4935  ;;  %v3446_v25 = vmul.f32 %v4934_v28, %v9709_v41  ;;  %v3430_v49 = vadd.f32 %v9723_v16, %v3429_v46  ;;  %vm3451_vm7 = vweird.f32 %v4934_v28  ;;  %v4071_v2 = vld [vmem:[%s10657_s1 + $0x18] sm:$0xff] }
 0x557   :  { %v9773_v56 = vadd.f32 1.0, %v4936_v51  ;;  %v4938_v4 = vpop.eup %4937  ;;  %vm3452_vm10 = vmor %vm3450_vm8, %vm3451_vm7  ;;  %3968 = vmatpush.msra.mxu2 %v3723_v36 }
 0x558   :  { %v3447_v39 = vsub.f32 1.0, %v3446_v25  ;;  %v3434_v38 = vsel %vm9787_vm6, %v9723_v16, %v3430_v49  ;;  %v4940_v50 = vpop.eup %4939  ;;  %v3710_v25 = vld [vmem:[%s10658_s2 + $0x10] sm:$0xff]  ;;  %v3711_v49 = vld [vmem:[%s10658_s2 + $0x18] sm:$0xff] }
 0x559   :  { %4941 = vrcp.f32 %v9773_v56  ;;  %v3439_v57 = vsel %vm3436_vm9, %v3438_v63, %v3434_v38  ;;  %v9837_v14 = vadd.f32 1.0, %v4940_v50  ;;  %v3476_v3 = vand.u32 2147483648, %v9773_v56  ;;  %3969 = vmatpush.msra.mxu2 %v3719_v52  ;;  %v4123_v63 = vld [vmem:[%s10657_s1 + $0x1b8] sm:$0xff]  ;;  %v4101_v52 = vld [vmem:[%s10657_s1 + $0x108] sm:$0xff] }
 0x55a   :  { %v3448_v17 = vmul.f32 %v4934_v28, %v3447_v39  ;;  %4943 = vrcp.f32 %v9764_v43  ;;  %v3575_v20 = vpop.f32.mrf.mxu0  ;;  %v3481_v0 = vmul.f32 %v4938_v4, %v3439_v57  ;;  %v3474_v46 = vand.u32 2147483647, %v9773_v56  ;;  %v4117_v4 = vld [vmem:[%s10657_s1 + $0x188] sm:$0xff]  ;;  %v4108_v57 = vld [vmem:[%s10657_s1 + $0x140] sm:$0xff] }
 0x55b   :  { %v3638_v18 = vadd.f32 %v3575_v20, %v3490_v44  ;;  %vm3470_vm13 = vweird.f32 %v9773_v56  ;;  %v3477_v54 = vor.u32 1.1754944e-38, %v3476_v3  ;;  %3970 = vmatpush.msra.mxu2 %v3715_v55  ;;  %v3492_v44 = vunpack.c.l.bf16 %v9671_v6  ;;  %v4125_v6 = vld [vmem:[%s10657_s1 + $0x1c8] sm:$0xff] }
 0x55c   :  { %v3449_v61 = vadd.f32 %v4934_v28, %v3448_v17  ;;  %vm3475_vm15 = vcmp.eq.f32.partialorder %v3474_v46, 8.507059e+37  ;;  %vm3690_vm9 = vweird.f32 %v9837_v14 }
 0x55d   :  { %v4733_v22 = vmul.f32 -1.442695, %v3638_v18  ;;  %3971 = vmatpush.msra.mxu2 %v3711_v49  ;;  %v3676_v18 = vand.u32 2147483648, %v9764_v43  ;;  %v4089_v49 = vld [vmem:[%s10657_s1 + $0xa8] sm:$0xff] }
 0x55e   :  { %v3453_v41 = vsel %vm3452_vm10, %v4934_v28, %v3449_v61 }
 0x55f   :  { %v4942_v29 = vpop.eup %4941  ;;  %v3458_v31 = vsel %vm3455_vm11, %v3457_v8, %v3453_v41  ;;  %4945 = vpow2.f32 %v4733_v22  ;;  %v4119_v8 = vld [vmem:[%s10657_s1 + $0x198] sm:$0xff] }
 0x560   :  { %v9817_v58 = vpop.eup %4943  ;;  %v3480_v16 = vmul.f32 %v3458_v31, %v9133_v30  ;;  %v3466_v60 = vmul.f32 %v4942_v29, %v9773_v56  ;;  %v3722_v30 = vld [vmem:[%s10658_s2 + $0x70] sm:$0xff]  ;;  %vm3471_vm12 = vweird.f32 %v4942_v29 }
 0x561   :  { %v3666_v19 = vmul.f32 %v9817_v58, %v9764_v43  ;;  %3928 = vmatpush.msra.mxu0 %v3722_v30  ;;  %vm3472_vm14 = vmor %vm3470_vm13, %vm3471_vm12  ;;  %v3615_v13 = vpop.f32.mrf.mxu2  ;;  %vm3671_vm0 = vweird.f32 %v9817_v58  ;;  %v4107_v30 = vld [vmem:[%s10657_s1 + $0x138] sm:$0xff] }
 0x562   :  { %v9827_v1 = vadd.f32 %v3481_v0, %v3480_v16  ;;  %v3467_v32 = vsub.f32 1.0, %v3466_v60  ;;  %v3640_v38 = vadd.f32 %v3615_v13, %v3492_v44  ;;  %vm9901_vm2 = vmor %vm3670_vm1, %vm3671_vm0  ;;  %v4111_v0 = vld [vmem:[%s10657_s1 + $0x158] sm:$0xff] }
 0x563   :  { %3929 = vmatpush.msra.mxu0 %v3718_v9  ;;  %v3667_v51 = vsub.f32 1.0, %v3666_v19  ;;  %v4087_v44 = vld [vmem:[%s10657_s1 + $0x98] sm:$0xff] }
 0x564   :  { %4947 = vtanh.f32 %v9827_v1  ;;  %v3468_v24 = vmul.f32 %v4942_v29, %v3467_v32  ;;  %v4105_v32 = vld [vmem:[%s10657_s1 + $0x128] sm:$0xff] }
 0x565   :  { %v4946_v47 = vpop.eup %4945  ;;  %4949 = vrcp.f32 %v9837_v14  ;;  %3930 = vmatpush.msra.mxu0 %v3714_v12  ;;  %v3668_v39 = vmul.f32 %v9817_v58, %v3667_v51  ;;  %v4097_v12 = vld [vmem:[%s10657_s1 + $0xe8] sm:$0xff]  ;;  %v4095_v51 = vld [vmem:[%s10657_s1 + $0xd8] sm:$0xff] }
 0x566   :  { %v9854_v27 = vadd.f32 1.0, %v4946_v47  ;;  %v3469_v28 = vadd.f32 %v4942_v29, %v3468_v24  ;;  %v4103_v47 = vld [vmem:[%s10657_s1 + $0x118] sm:$0xff] }
 0x567   :  { %3931 = vmatpush.msra.mxu0 %v3710_v25  ;;  %v3669_v59 = vadd.f32 %v9817_v58, %v3668_v39  ;;  %v3694_v25 = vand.u32 2147483647, %v9837_v14 }
 0x568   :  { %4951 = vrcp.f32 %v9854_v27  ;;  %v3473_v26 = vsel %vm3472_vm14, %v4942_v29, %v3469_v28  ;;  %v3657_v22 = vand.u32 2147483648, %v9854_v27  ;;  %v3655_v43 = vand.u32 2147483647, %v9854_v27  ;;  %v4093_v28 = vld [vmem:[%s10657_s1 + $0xc8] sm:$0xff] }
 0x569   :  { %v3478_v56 = vsel %vm3475_vm15, %v3477_v54, %v3473_v26  ;;  %4953 = vtanh.f32 %v3640_v38  ;;  %v3673_v41 = vsel %vm9901_vm2, %v9817_v58, %v3669_v59  ;;  %v3677_v29 = vor.u32 1.1754944e-38, %v3676_v18  ;;  %v4109_v58 = vld [vmem:[%s10657_s1 + $0x148] sm:$0xff]  ;;  %v4091_v54 = vld [vmem:[%s10657_s1 + $0xb8] sm:$0xff]  ;;  %v4122_v59 = vld [vmem:[%s10657_s1 + $0x1b0] sm:$0xff] }
 0x56a   :  { %v4948_v40 = vpop.eup %4947  ;;  %vm3651_vm4 = vweird.f32 %v9854_v27  ;;  %v3658_v60 = vor.u32 1.1754944e-38, %v3657_v22  ;;  %vm3656_vm7 = vcmp.eq.f32.partialorder %v3655_v43, 8.507059e+37  ;;  %vm3695_vm11 = vcmp.eq.f32.partialorder %v3694_v25, 8.507059e+37  ;;  %v4079_v38 = vld [vmem:[%s10657_s1 + $0x58] sm:$0xff]  ;;  %v4116_v18 = vld [vmem:[%s10657_s1 + $0x180] sm:$0xff]  ;;  %v4110_v22 = vld [vmem:[%s10657_s1 + $0x150] sm:$0xff] }
 0x56b   :  { %v3484_v21 = vmul.f32 %v4948_v40, %v3478_v56  ;;  %v9873_v62 = vpop.eup %4949  ;;  %v3678_v15 = vsel %vm3675_vm5, %v3677_v29, %v3673_v41  ;;  %v4106_v43 = vld [vmem:[%s10657_s1 + $0x130] sm:$0xff]  ;;  %v4100_v41 = vld [vmem:[%s10657_s1 + $0x100] sm:$0xff] }
 0x56c   :  { %v3686_v61 = vmul.f32 %v9873_v62, %v9837_v14  ;;  %v3700_v3 = vmul.f32 %v3678_v15, %v9244_v5  ;;  %v4099_v5 = vld [vmem:[%s10657_s1 + $0xf8] sm:$0xff]  ;;  %vm3691_vm8 = vweird.f32 %v9873_v62  ;;  %v4098_v29 = vld [vmem:[%s10657_s1 + $0xf0] sm:$0xff]  ;;  %v4390_v25 = vld [vmem:[%s10658_s2 + $0x360] sm:$0xff] }
 0x56d   :  { %3872 = vmatmul.f32.vlgmr.msrb.gmra.mxu1 %v3484_v21  ;;  %3912 = vmatmul.f32.vlgmr.msrb.gmra.mxu3 %v3484_v21  ;;  %vm3692_vm10 = vmor %vm3690_vm9, %vm3691_vm8  ;;  %v4086_v15 = vld [vmem:[%s10657_s1 + $0x90] sm:$0xff] }
 0x56e   :  { %v4952_v17 = vpop.eup %4951  ;;  %4152 = vmatpush.msrb.mxu1 %v4129_v37  ;;  %4192 = vmatpush.msrb.mxu3 %v4131_v23  ;;  %v3687_v31 = vsub.f32 1.0, %v3686_v61  ;;  %v4130_v37 = vld [vmem:[%s10657_s1 + $0x1f0] sm:$0xff]  ;;  %v4081_v23 = vld [vmem:[%s10657_s1 + $0x68] sm:$0xff] }
 0x56f   :  { %v3647_v20 = vmul.f32 %v4952_v17, %v9854_v27  ;;  %vm3652_vm3 = vweird.f32 %v4952_v17  ;;  %v4954_v36 = vpop.eup %4953  ;;  %v3696_v27 = vand.u32 2147483648, %v9837_v14  ;;  %v4085_v14 = vld [vmem:[%s10657_s1 + $0x88] sm:$0xff]  ;;  %v4118_v61 = vld [vmem:[%s10657_s1 + $0x190] sm:$0xff] }
 0x570   :  { %4153 = vmatpush.msrb.mxu1 %v4125_v6  ;;  %4193 = vmatpush.msrb.mxu3 %v4127_v53  ;;  %vm3653_vm6 = vmor %vm3651_vm4, %vm3652_vm3  ;;  %v3688_v19 = vmul.f32 %v9873_v62, %v3687_v31  ;;  %v4124_v6 = vld [vmem:[%s10657_s1 + $0x1c0] sm:$0xff]  ;;  %v4126_v53 = vld [vmem:[%s10657_s1 + $0x1d0] sm:$0xff] }
 0x571   :  { %v3648_v42 = vsub.f32 1.0, %v3647_v20  ;;  %v3697_v40 = vor.u32 1.1754944e-38, %v3696_v27  ;;  %v4120_v20 = vld [vmem:[%s10657_s1 + $0x1a0] sm:$0xff]  ;;  %v4399_v27 = vld [vmem:[%s10658_s2 + $0x3a8] sm:$0xff] }
 0x572   :  { %4154 = vmatpush.msrb.mxu1 %v4121_v33  ;;  %4194 = vmatpush.msrb.mxu3 %v4123_v63  ;;  %v3689_v55 = vadd.f32 %v9873_v62, %v3688_v19  ;;  %v4073_v33 = vld [vmem:[%s10657_s1 + $0x28] sm:$0xff]  ;;  %v4075_v63 = vld [vmem:[%s10657_s1 + $0x38] sm:$0xff]  ;;  %v4092_v31 = vld [vmem:[%s10657_s1 + $0xc0] sm:$0xff] }
 0x573   :  { %v3649_v50 = vmul.f32 %v4952_v17, %v3648_v42  ;;  %v4069_v42 = vld [vmem:[%s10657_s1 + $0x8] sm:$0xff]  ;;  %v4072_v19 = vld [vmem:[%s10657_s1 + $0x20] sm:$0xff] }
 0x574   :  { %4155 = vmatpush.msrb.mxu1 %v4117_v4  ;;  %4195 = vmatpush.msrb.mxu3 %v4119_v8  ;;  %v3693_v26 = vsel %vm3692_vm10, %v9873_v62, %v3689_v55  ;;  %v4083_v62 = vld [vmem:[%s10657_s1 + $0x78] sm:$0xff]  ;;  %v4112_v4 = vld [vmem:[%s10657_s1 + $0x160] sm:$0xff]  ;;  %v4114_v8 = vld [vmem:[%s10657_s1 + $0x170] sm:$0xff] }
 0x575   :  { %v3650_v16 = vadd.f32 %v4952_v17, %v3649_v50  ;;  %3952 = vmatmul.f32.vlgmr.msra.gmra.mxu1 %v3484_v21  ;;  %3992 = vmatmul.f32.vlgmr.msra.gmra.mxu3 %v3484_v21  ;;  %v3698_v39 = vsel %vm3695_vm11, %v3697_v40, %v3693_v26  ;;  %v4128_v21 = vld [vmem:[%s10657_s1 + $0x1e0] sm:$0xff]  ;;  %v4387_v26 = vld [vmem:[%s10658_s2 + $0x348] sm:$0xff] }
 0x576   :  { %4156 = vmatpush.msrb.mxu1 %v4113_v10  ;;  %4196 = vmatpush.msrb.mxu3 %v4115_v11  ;;  %v4104_v50 = vld [vmem:[%s10657_s1 + $0x120] sm:$0xff]  ;;  %v4102_v10 = vld [vmem:[%s10657_s1 + $0x110] sm:$0xff] }
 0x577   :  { %v3654_v35 = vsel %vm3653_vm6, %v4952_v17, %v3650_v16  ;;  %v4077_v17 = vld [vmem:[%s10657_s1 + $0x48] sm:$0xff]  ;;  %v4096_v11 = vld [vmem:[%s10657_s1 + $0xe0] sm:$0xff]  ;;  %v4094_v16 = vld [vmem:[%s10657_s1 + $0xd0] sm:$0xff] }
 0x578   :  { %v3659_v24 = vsel %vm3656_vm7, %v3658_v60, %v3654_v35  ;;  %4157 = vmatpush.msrb.mxu1 %v4109_v58  ;;  %4197 = vmatpush.msrb.mxu3 %v4111_v0  ;;  %v4088_v58 = vld [vmem:[%s10657_s1 + $0xa0] sm:$0xff]  ;;  %v4090_v0 = vld [vmem:[%s10657_s1 + $0xb0] sm:$0xff] }
 0x579   :  { %v3701_v9 = vmul.f32 %v4954_v36, %v3659_v24  ;;  %v4084_v60 = vld [vmem:[%s10657_s1 + $0x80] sm:$0xff]  ;;  %v4078_v36 = vld [vmem:[%s10657_s1 + $0x50] sm:$0xff] }
 0x57a   :  { %4158 = vmatpush.msrb.mxu1 %v4105_v32  ;;  %4198 = vmatpush.msrb.mxu3 %v4107_v30  ;;  %v4080_v35 = vld [vmem:[%s10657_s1 + $0x60] sm:$0xff]  ;;  %v4082_v32 = vld [vmem:[%s10657_s1 + $0x70] sm:$0xff] }
 0x57b   :  { %v9938_v46 = vadd.f32 %v3701_v9, %v3700_v3  ;;  %v4076_v30 = vld [vmem:[%s10657_s1 + $0x40] sm:$0xff]  ;;  %v4074_v24 = vld [vmem:[%s10657_s1 + $0x30] sm:$0xff] }
 0x57c   :  { %4159 = vmatpush.msrb.mxu1 %v4101_v52  ;;  %4199 = vmatpush.msrb.mxu3 %v4103_v47  ;;  %v4068_v3 = vld [vmem:[%s10657_s1] sm:$0xff]  ;;  %v4070_v9 = vld [vmem:[%s10657_s1 + $0x10] sm:$0xff]  ;;  %v4407_v47 = vld [vmem:[%s10658_s2 + $0x3e8] sm:$0xff] }
 0x57d   :  { %4955 = vtanh.f32 %v9938_v46  ;;  %v4406_v52 = vld [vmem:[%s10658_s2 + $0x3e0] sm:$0xff] }
 0x57e   :  { %4160 = vmatpush.msrb.mxu1 %v4097_v12  ;;  %4200 = vmatpush.msrb.mxu3 %v4099_v5  ;;  %v4402_v12 = vld [vmem:[%s10658_s2 + $0x3c0] sm:$0xff]  ;;  %v4403_v5 = vld [vmem:[%s10658_s2 + $0x3c8] sm:$0xff] }
 0x57f   :  { %v4398_v55 = vld [vmem:[%s10658_s2 + $0x3a0] sm:$0xff] }
 0x580   :  { %4161 = vmatpush.msrb.mxu1 %v4093_v28  ;;  %4201 = vmatpush.msrb.mxu3 %v4095_v51  ;;  %v4394_v28 = vld [vmem:[%s10658_s2 + $0x380] sm:$0xff]  ;;  %v4395_v51 = vld [vmem:[%s10658_s2 + $0x388] sm:$0xff] }
 0x581   :  { %v4382_v40 = vld [vmem:[%s10658_s2 + $0x320] sm:$0xff] }
 0x582   :  { %4162 = vmatpush.msrb.mxu1 %v4089_v49  ;;  %4202 = vmatpush.msrb.mxu3 %v4091_v54  ;;  %v4391_v49 = vld [vmem:[%s10658_s2 + $0x368] sm:$0xff]  ;;  %v4386_v54 = vld [vmem:[%s10658_s2 + $0x340] sm:$0xff] }
 0x583   :  { %v4956_v56 = vpop.eup %4955 }
 0x584   :  { %v9971_v13 = vmul.f32 %v4956_v56, %v3698_v39  ;;  %4163 = vmatpush.msrb.mxu1 %v4085_v14  ;;  %4203 = vmatpush.msrb.mxu3 %v4087_v44  ;;  %v4383_v14 = vld [vmem:[%s10658_s2 + $0x328] sm:$0xff]  ;;  %v4378_v44 = vld [vmem:[%s10658_s2 + $0x300] sm:$0xff] }
 0x585   :  { %v4379_v56 = vld [vmem:[%s10658_s2 + $0x308] sm:$0xff]  ;;  %v4374_v39 = vld [vmem:[%s10658_s2 + $0x2e0] sm:$0xff] }
 0x586   :  { %3852 = vmatmul.f32.vlgmr.msrb.gmra.mxu0 %v9971_v13  ;;  %3892 = vmatmul.f32.vlgmr.msrb.gmra.mxu2 %v9971_v13 }
 0x587   :  { %4132 = vmatpush.msrb.mxu0 %v4128_v21  ;;  %4172 = vmatpush.msrb.mxu2 %v4130_v37  ;;  %v4370_v21 = vld [vmem:[%s10658_s2 + $0x2c0] sm:$0xff]  ;;  %v4371_v37 = vld [vmem:[%s10658_s2 + $0x2c8] sm:$0xff] }
 0x588   :  { %4164 = vmatpush.msrb.mxu1 %v4081_v23  ;;  %4204 = vmatpush.msrb.mxu3 %v4083_v62  ;;  %v4366_v23 = vld [vmem:[%s10658_s2 + $0x2a0] sm:$0xff]  ;;  %v4367_v62 = vld [vmem:[%s10658_s2 + $0x2a8] sm:$0xff] }
 0x589   :  { %4133 = vmatpush.msrb.mxu0 %v4124_v6  ;;  %4173 = vmatpush.msrb.mxu2 %v4126_v53  ;;  %v4362_v53 = vld [vmem:[%s10658_s2 + $0x280] sm:$0xff] }
 0x58a   :  { %4165 = vmatpush.msrb.mxu1 %v4077_v17  ;;  %4205 = vmatpush.msrb.mxu3 %v4079_v38  ;;  %v4363_v17 = vld [vmem:[%s10658_s2 + $0x288] sm:$0xff]  ;;  %v4342_v38 = vld [vmem:[%s10658_s2 + $0x1e0] sm:$0xff] }
 0x58b   :  { %4134 = vmatpush.msrb.mxu0 %v4120_v20  ;;  %4174 = vmatpush.msrb.mxu2 %v4122_v59  ;;  %v4343_v20 = vld [vmem:[%s10658_s2 + $0x1e8] sm:$0xff]  ;;  %v4358_v59 = vld [vmem:[%s10658_s2 + $0x260] sm:$0xff] }
 0x58c   :  { %4166 = vmatpush.msrb.mxu1 %v4073_v33  ;;  %4206 = vmatpush.msrb.mxu3 %v4075_v63  ;;  %v4359_v33 = vld [vmem:[%s10658_s2 + $0x268] sm:$0xff]  ;;  %v4338_v63 = vld [vmem:[%s10658_s2 + $0x1c0] sm:$0xff] }
 0x58d   :  { %4135 = vmatpush.msrb.mxu0 %v4116_v18  ;;  %4175 = vmatpush.msrb.mxu2 %v4118_v61  ;;  %v4339_v18 = vld [vmem:[%s10658_s2 + $0x1c8] sm:$0xff]  ;;  %v4354_v61 = vld [vmem:[%s10658_s2 + $0x240] sm:$0xff] }
 0x58e   :  { %4167 = vmatpush.msrb.mxu1 %v4069_v42  ;;  %4207 = vmatpush.msrb.mxu3 %v4071_v2  ;;  %v4355_v42 = vld [vmem:[%s10658_s2 + $0x248] sm:$0xff]  ;;  %v4334_v2 = vld [vmem:[%s10658_s2 + $0x1a0] sm:$0xff] }
 0x58f   :  { %3932 = vmatmul.f32.vlgmr.msra.gmra.mxu0 %v9971_v13  ;;  %3972 = vmatmul.f32.vlgmr.msra.gmra.mxu2 %v9971_v13 }
 0x590   :  { %4136 = vmatpush.msrb.mxu0 %v4112_v4  ;;  %4168 = vmatmul.f32.vlgmr.msrb.gmra.mxu1 %v9971_v13  ;;  %v4335_v4 = vld [vmem:[%s10658_s2 + $0x1a8] sm:$0xff] }
 0x591   :  { %4176 = vmatpush.msrb.mxu2 %v4114_v8  ;;  %4208 = vmatmul.f32.vlgmr.msrb.gmra.mxu3 %v9971_v13  ;;  %v4350_v8 = vld [vmem:[%s10658_s2 + $0x220] sm:$0xff] }
 0x592   :  { %4137 = vmatpush.msrb.mxu0 %v4108_v57  ;;  %4430 = vmatpush.msra.mxu1 %v4406_v52  ;;  %v4351_v57 = vld [vmem:[%s10658_s2 + $0x228] sm:$0xff]  ;;  %v4400_v52 = vld [vmem:[%s10658_s2 + $0x3b0] sm:$0xff] }
 0x593   :  { %4177 = vmatpush.msrb.mxu2 %v4110_v22  ;;  %4470 = vmatpush.msra.mxu3 %v4407_v47  ;;  %v4330_v22 = vld [vmem:[%s10658_s2 + $0x180] sm:$0xff] }
 0x594   :  { %4138 = vmatpush.msrb.mxu0 %v4104_v50  ;;  %4431 = vmatpush.msra.mxu1 %v4402_v12  ;;  %v4331_v50 = vld [vmem:[%s10658_s2 + $0x188] sm:$0xff]  ;;  %v4401_v12 = vld [vmem:[%s10658_s2 + $0x3b8] sm:$0xff] }
 0x595   :  { %4178 = vmatpush.msrb.mxu2 %v4106_v43  ;;  %4471 = vmatpush.msra.mxu3 %v4403_v5 }
 0x596   :  { %4139 = vmatpush.msrb.mxu0 %v4100_v41  ;;  %4432 = vmatpush.msra.mxu1 %v4398_v55  ;;  %v4346_v41 = vld [vmem:[%s10658_s2 + $0x200] sm:$0xff] }
 0x597   :  { %4179 = vmatpush.msrb.mxu2 %v4102_v10  ;;  %4472 = vmatpush.msra.mxu3 %v4399_v27  ;;  %v4347_v10 = vld [vmem:[%s10658_s2 + $0x208] sm:$0xff]  ;;  %v4314_v55 = vld [vmem:[%s10658_s2 + $0x100] sm:$0xff] }
 0x598   :  { %4140 = vmatpush.msrb.mxu0 %v4096_v11  ;;  %4433 = vmatpush.msra.mxu1 %v4394_v28  ;;  %v4315_v27 = vld [vmem:[%s10658_s2 + $0x108] sm:$0xff]  ;;  %v4396_v28 = vld [vmem:[%s10658_s2 + $0x390] sm:$0xff] }
 0x599   :  { %4180 = vmatpush.msrb.mxu2 %v4098_v29  ;;  %4473 = vmatpush.msra.mxu3 %v4395_v51  ;;  %v4326_v29 = vld [vmem:[%s10658_s2 + $0x160] sm:$0xff] }
 0x59a   :  { %4141 = vmatpush.msrb.mxu0 %v4092_v31  ;;  %4434 = vmatpush.msra.mxu1 %v4390_v25  ;;  %v4327_v31 = vld [vmem:[%s10658_s2 + $0x168] sm:$0xff]  ;;  %v4397_v25 = vld [vmem:[%s10658_s2 + $0x398] sm:$0xff] }
 0x59b   :  { %4181 = vmatpush.msrb.mxu2 %v4094_v16  ;;  %4474 = vmatpush.msra.mxu3 %v4391_v49  ;;  %v4408_v16 = vld [vmem:[%s10658_s2 + $0x3f0] sm:$0xff] }
 0x59c   :  { %4142 = vmatpush.msrb.mxu0 %v4088_v58  ;;  %4435 = vmatpush.msra.mxu1 %v4386_v54  ;;  %v4310_v54 = vld [vmem:[%s10658_s2 + $0xe0] sm:$0xff] }
 0x59d   :  { %4182 = vmatpush.msrb.mxu2 %v4090_v0  ;;  %4475 = vmatpush.msra.mxu3 %v4387_v26  ;;  %v4311_v26 = vld [vmem:[%s10658_s2 + $0xe8] sm:$0xff] }
 0x59e   :  { %4143 = vmatpush.msrb.mxu0 %v4084_v60  ;;  %4436 = vmatpush.msra.mxu1 %v4382_v40  ;;  %v4409_v60 = vld [vmem:[%s10658_s2 + $0x3f8] sm:$0xff]  ;;  %v4392_v40 = vld [vmem:[%s10658_s2 + $0x370] sm:$0xff] }
 0x59f   :  { %4183 = vmatpush.msrb.mxu2 %v4086_v15  ;;  %4476 = vmatpush.msra.mxu3 %v4383_v14 }
 0x5a0   :  { %4144 = vmatpush.msrb.mxu0 %v4080_v35  ;;  %4437 = vmatpush.msra.mxu1 %v4378_v44  ;;  %v4322_v35 = vld [vmem:[%s10658_s2 + $0x140] sm:$0xff]  ;;  %v4393_v44 = vld [vmem:[%s10658_s2 + $0x378] sm:$0xff] }
 0x5a1   :  { %4184 = vmatpush.msrb.mxu2 %v4082_v32  ;;  %4477 = vmatpush.msra.mxu3 %v4379_v56  ;;  %v4323_v32 = vld [vmem:[%s10658_s2 + $0x148] sm:$0xff] }
 0x5a2   :  { %4145 = vmatpush.msrb.mxu0 %v4076_v30  ;;  %4438 = vmatpush.msra.mxu1 %v4374_v39  ;;  %v4404_v30 = vld [vmem:[%s10658_s2 + $0x3d0] sm:$0xff]  ;;  %v4306_v39 = vld [vmem:[%s10658_s2 + $0xc0] sm:$0xff] }
 0x5a3   :  { %4185 = vmatpush.msrb.mxu2 %v4078_v36  ;;  %v10248_v36 = vld [vmem:[%s10659_s0 + $0x70] sm:$0xff] }
 0x5a4   :  { %4146 = vmatpush.msrb.mxu0 %v4072_v19  ;;  %4439 = vmatpush.msra.mxu1 %v4370_v21  ;;  %v4405_v19 = vld [vmem:[%s10658_s2 + $0x3d8] sm:$0xff]  ;;  %v4065_v51 = vunpack.c.h.bf16 %v10248_v36  ;;  %v4388_v21 = vld [vmem:[%s10658_s2 + $0x350] sm:$0xff] }
 0x5a5   :  { %4186 = vmatpush.msrb.mxu2 %v4074_v24 }
 0x5a6   :  { %4147 = vmatpush.msrb.mxu0 %v4068_v3  ;;  %4440 = vmatpush.msra.mxu1 %v4366_v23  ;;  %v4318_v3 = vld [vmem:[%s10658_s2 + $0x120] sm:$0xff] }
 0x5a7   :  { %4187 = vmatpush.msrb.mxu2 %v4070_v9  ;;  %4148 = vmatmul.f32.vlgmr.msrb.gmra.mxu0 %v9971_v13  ;;  %v4319_v9 = vld [vmem:[%s10658_s2 + $0x128] sm:$0xff] }
 0x5a8   :  { %4188 = vmatmul.f32.vlgmr.msrb.gmra.mxu2 %v9971_v13  ;;  %v4375_v13 = vld [vmem:[%s10658_s2 + $0x2e8] sm:$0xff]  ;;  %4441 = vmatpush.msra.mxu1 %v4362_v53  ;;  %v4302_v53 = vld [vmem:[%s10658_s2 + $0xa0] sm:$0xff] }
 0x5a9   :  { %4478 = vmatpush.msra.mxu3 %v4375_v13  ;;  %4410 = vmatpush.msra.mxu0 %v4342_v38  ;;  %v4307_v13 = vld [vmem:[%s10658_s2 + $0xc8] sm:$0xff]  ;;  %v4384_v38 = vld [vmem:[%s10658_s2 + $0x330] sm:$0xff] }
 0x5aa   :  { %4450 = vmatpush.msra.mxu2 %v4343_v20  ;;  %4442 = vmatpush.msra.mxu1 %v4358_v59  ;;  %v4385_v59 = vld [vmem:[%s10658_s2 + $0x338] sm:$0xff] }
 0x5ab   :  { %4479 = vmatpush.msra.mxu3 %v4371_v37  ;;  %4411 = vmatpush.msra.mxu0 %v4338_v63  ;;  %v4298_v63 = vld [vmem:[%s10658_s2 + $0x80] sm:$0xff] }
 0x5ac   :  { %4451 = vmatpush.msra.mxu2 %v4339_v18  ;;  %4443 = vmatpush.msra.mxu1 %v4354_v61  ;;  %v4299_v18 = vld [vmem:[%s10658_s2 + $0x88] sm:$0xff]  ;;  %v4380_v61 = vld [vmem:[%s10658_s2 + $0x310] sm:$0xff] }
 0x5ad   :  { %4480 = vmatpush.msra.mxu3 %v4367_v62  ;;  %4412 = vmatpush.msra.mxu0 %v4334_v2  ;;  %v4389_v62 = vld [vmem:[%s10658_s2 + $0x358] sm:$0xff] }
 0x5ae   :  { %4452 = vmatpush.msra.mxu2 %v4335_v4  ;;  %4444 = vmatpush.msra.mxu1 %v4350_v8  ;;  %v10330_v2 = vld [vmem:[%s10659_s0 + $0x78] sm:$0xff] }
 0x5af   :  { %4481 = vmatpush.msra.mxu3 %v4363_v17  ;;  %4413 = vmatpush.msra.mxu0 %v4330_v22  ;;  %v4303_v17 = vld [vmem:[%s10658_s2 + $0xa8] sm:$0xff]  ;;  %v4381_v4 = vld [vmem:[%s10658_s2 + $0x318] sm:$0xff] }
 0x5b0   :  { %4453 = vmatpush.msra.mxu2 %v4331_v50  ;;  %4445 = vmatpush.msra.mxu1 %v4346_v41  ;;  %v4295_v22 = vld [vmem:[%s10658_s2 + $0x68] sm:$0xff]  ;;  %v4376_v50 = vld [vmem:[%s10658_s2 + $0x2f0] sm:$0xff] }
 0x5b1   :  { %4482 = vmatpush.msra.mxu3 %v4359_v33  ;;  %4414 = vmatpush.msra.mxu0 %v4326_v29  ;;  %v4067_v29 = vunpack.c.h.bf16 %v10330_v2 }
 0x5b2   :  { %4454 = vmatpush.msra.mxu2 %v4327_v31  ;;  %4510 = vmatpush.msrb.mxu1 %v4408_v16  ;;  %v4290_v31 = vld [vmem:[%s10658_s2 + $0x40] sm:$0xff]  ;;  %v4291_v16 = vld [vmem:[%s10658_s2 + $0x48] sm:$0xff] }
 0x5b3   :  { %4483 = vmatpush.msra.mxu3 %v4355_v42  ;;  %4415 = vmatpush.msra.mxu0 %v4322_v35  ;;  %v4373_v35 = vld [vmem:[%s10658_s2 + $0x2d8] sm:$0xff] }
 0x5b4   :  { %4455 = vmatpush.msra.mxu2 %v4323_v32  ;;  %4511 = vmatpush.msrb.mxu1 %v4404_v30  ;;  %v4286_v30 = vld [vmem:[%s10658_s2 + $0x20] sm:$0xff] }
 0x5b5   :  { %4484 = vmatpush.msra.mxu3 %v4351_v57  ;;  %4416 = vmatpush.msra.mxu0 %v4318_v3  ;;  %v4294_v57 = vld [vmem:[%s10658_s2 + $0x60] sm:$0xff] }
 0x5b6   :  { %4456 = vmatpush.msra.mxu2 %v4319_v9  ;;  %4512 = vmatpush.msrb.mxu1 %v4400_v52  ;;  %v4369_v52 = vld [vmem:[%s10658_s2 + $0x2b8] sm:$0xff] }
 0x5b7   :  { %4485 = vmatpush.msra.mxu3 %v4347_v10  ;;  %4417 = vmatpush.msra.mxu0 %v4314_v55  ;;  %v4283_v55 = vld [vmem:[%s10658_s2 + $0x8] sm:$0xff] }
 0x5b8   :  { %4457 = vmatpush.msra.mxu2 %v4315_v27  ;;  %4513 = vmatpush.msrb.mxu1 %v4396_v28  ;;  %v4364_v27 = vld [vmem:[%s10658_s2 + $0x290] sm:$0xff]  ;;  %v4365_v28 = vld [vmem:[%s10658_s2 + $0x298] sm:$0xff] }
 0x5b9   :  { %4550 = vmatpush.msrb.mxu3 %v4409_v60  ;;  %4418 = vmatpush.msra.mxu0 %v4310_v54  ;;  %v4360_v54 = vld [vmem:[%s10658_s2 + $0x270] sm:$0xff] }
 0x5ba   :  { %4458 = vmatpush.msra.mxu2 %v4311_v26  ;;  %4514 = vmatpush.msrb.mxu1 %v4392_v40  ;;  %v4361_v26 = vld [vmem:[%s10658_s2 + $0x278] sm:$0xff] }
 0x5bb   :  { %4551 = vmatpush.msrb.mxu3 %v4405_v19  ;;  %4419 = vmatpush.msra.mxu0 %v4306_v39  ;;  %v4287_v19 = vld [vmem:[%s10658_s2 + $0x28] sm:$0xff] }
 0x5bc   :  { %4459 = vmatpush.msra.mxu2 %v4307_v13  ;;  %4515 = vmatpush.msrb.mxu1 %v4388_v21  ;;  %v4356_v21 = vld [vmem:[%s10658_s2 + $0x250] sm:$0xff] }
 0x5bd   :  { %4552 = vmatpush.msrb.mxu3 %v4401_v12  ;;  %4420 = vmatpush.msra.mxu0 %v4302_v53 }
 0x5be   :  { %4460 = vmatpush.msra.mxu2 %v4303_v17  ;;  %4516 = vmatpush.msrb.mxu1 %v4384_v38 }
 0x5bf   :  { %4553 = vmatpush.msrb.mxu3 %v4397_v25  ;;  %4421 = vmatpush.msra.mxu0 %v4298_v63 }
 0x5c0   :  { %4461 = vmatpush.msra.mxu2 %v4299_v18  ;;  %4517 = vmatpush.msrb.mxu1 %v4380_v61  ;;  %v4064_v61 = vunpack.c.l.bf16 %v10248_v36  ;;  %v4348_v36 = vld [vmem:[%s10658_s2 + $0x210] sm:$0xff] }
 0x5c1   :  { %4554 = vmatpush.msrb.mxu3 %v4393_v44  ;;  %4422 = vmatpush.msra.mxu0 %v4294_v57  ;;  %v4340_v44 = vld [vmem:[%s10658_s2 + $0x1d0] sm:$0xff] }
 0x5c2   :  { %4462 = vmatpush.msra.mxu2 %v4295_v22  ;;  %4518 = vmatpush.msrb.mxu1 %v4376_v50  ;;  %v4349_v22 = vld [vmem:[%s10658_s2 + $0x218] sm:$0xff] }
 0x5c3   :  { %4555 = vmatpush.msrb.mxu3 %v4389_v62  ;;  %4423 = vmatpush.msra.mxu0 %v4290_v31  ;;  %v4337_v62 = vld [vmem:[%s10658_s2 + $0x1b8] sm:$0xff] }
 0x5c4   :  { %4463 = vmatpush.msra.mxu2 %v4291_v16 }
 0x5c5   :  { %4556 = vmatpush.msrb.mxu3 %v4385_v59  ;;  %4424 = vmatpush.msra.mxu0 %v4286_v30  ;;  %v4352_v59 = vld [vmem:[%s10658_s2 + $0x230] sm:$0xff] }
 0x5c6   :  { %4464 = vmatpush.msra.mxu2 %v4287_v19 }
 0x5c7   :  { %4557 = vmatpush.msrb.mxu3 %v4381_v4  ;;  %v4333_v4 = vld [vmem:[%s10658_s2 + $0x198] sm:$0xff] }
 0x5c8   :  { %4465 = vmatpush.msra.mxu2 %v4283_v55 }
 0x5ea   :  { %v3873_v6 = vpop.f32.mrf.mxu1 }
 0x5f0   :  { %v3913_v58 = vpop.f32.mrf.mxu3 }
 0x5f2   :  { %v10231_v0 = vpop.f32.mrf.mxu1 }
 0x5f8   :  { %v3993_v37 = vpop.f32.mrf.mxu3 }
 0x603   :  { %v3853_v43 = vpop.f32.mrf.mxu0 }
 0x604   :  { %v3854_v11 = vadd.f32 %v3853_v43, %v6080_v34  ;;  %v4377_v43 = vld [vmem:[%s10658_s2 + $0x2f8] sm:$0xff] }
 0x605   :  { %4558 = vmatpush.msrb.mxu3 %v4377_v43 }
 0x606   :  { %v3874_v15 = vadd.f32 %v3873_v6, %v3854_v11 }
 0x607   :  { %4559 = vmatpush.msrb.mxu3 %v4373_v35  ;;  %v4325_v35 = vld [vmem:[%s10658_s2 + $0x158] sm:$0xff] }
 0x608   :  { %v4736_v24 = vmul.f32 -1.442695, %v3874_v15 }
 0x609   :  { %v3893_v47 = vpop.f32.mrf.mxu2  ;;  %4560 = vmatpush.msrb.mxu3 %v4369_v52 }
 0x60a   :  { %4957 = vpow2.f32 %v4736_v24  ;;  %v3894_v5 = vadd.f32 %v3893_v47, %v6126_v7  ;;  %v4368_v24 = vld [vmem:[%s10658_s2 + $0x2b0] sm:$0xff] }
 0x60b   :  { %4561 = vmatpush.msrb.mxu3 %v4365_v28 }
 0x60c   :  { %v3914_v49 = vadd.f32 %v3913_v58, %v3894_v5  ;;  %v3933_v10 = vpop.f32.mrf.mxu0  ;;  %v4372_v58 = vld [vmem:[%s10658_s2 + $0x2d0] sm:$0xff]  ;;  %v4282_v5 = vld [vmem:[%s10658_s2] sm:$0xff] }
 0x60d   :  { %v4169_v14 = vpop.f32.mrf.mxu1  ;;  %4519 = vmatpush.msrb.mxu1 %v4372_v58  ;;  %v3934_v9 = vadd.f32 %v3933_v10, %v6251_v45  ;;  %4425 = vmatpush.msra.mxu0 %v4282_v5  ;;  %v4329_v10 = vld [vmem:[%s10658_s2 + $0x178] sm:$0xff] }
 0x60e   :  { %v4737_v56 = vmul.f32 -1.442695, %v3914_v49  ;;  %v4213_v23 = vadd.f32 %v4169_v14, %v4065_v51  ;;  %v4344_v51 = vld [vmem:[%s10658_s2 + $0x1f0] sm:$0xff]  ;;  %v4345_v49 = vld [vmem:[%s10658_s2 + $0x1f8] sm:$0xff]  ;;  %4562 = vmatpush.msrb.mxu3 %v4361_v26 }
 0x60f   :  { %4520 = vmatpush.msrb.mxu1 %v4368_v24  ;;  %v3954_v14 = vadd.f32 %v10231_v0, %v3934_v9  ;;  %4490 = vmatpush.msrb.mxu0 %v4344_v51  ;;  %v4357_v0 = vld [vmem:[%s10658_s2 + $0x258] sm:$0xff]  ;;  %v4320_v9 = vld [vmem:[%s10658_s2 + $0x130] sm:$0xff] }
 0x610   :  { %v4958_v6 = vpop.eup %4957  ;;  %4959 = vpow2.f32 %v4737_v56  ;;  %v4742_v42 = vmul.f32 -1.442695, %v4213_v23  ;;  %4530 = vmatpush.msrb.mxu2 %v4345_v49  ;;  %v4341_v56 = vld [vmem:[%s10658_s2 + $0x1d8] sm:$0xff]  ;;  %v4336_v23 = vld [vmem:[%s10658_s2 + $0x1b0] sm:$0xff]  ;;  %4563 = vmatpush.msrb.mxu3 %v4357_v0 }
 0x611   :  { %v10312_v20 = vadd.f32 1.0, %v4958_v6  ;;  %4521 = vmatpush.msrb.mxu1 %v4364_v27  ;;  %4491 = vmatpush.msrb.mxu0 %v4340_v44  ;;  %v4317_v5 = vld [vmem:[%s10658_s2 + $0x118] sm:$0xff]  ;;  %v5007_v0 = vld [vmem:[%s10658_s2 + $0xd0] sm:$0xff] }
 0x612   :  { %v3973_v33 = vpop.f32.mrf.mxu2  ;;  %4531 = vmatpush.msrb.mxu2 %v4341_v56  ;;  %v4313_v26 = vld [vmem:[%s10658_s2 + $0xf8] sm:$0xff] }
 0x613   :  { %4961 = vrcp.f32 %v10312_v20  ;;  %v3974_v8 = vadd.f32 %v3973_v33, %v6196_v48  ;;  %4522 = vmatpush.msrb.mxu1 %v4360_v54  ;;  %v4353_v33 = vld [vmem:[%s10658_s2 + $0x238] sm:$0xff]  ;;  %v4011_v63 = vand.u32 2147483648, %v10312_v20  ;;  %4492 = vmatpush.msrb.mxu0 %v4336_v23  ;;  %vm4005_vm13 = vweird.f32 %v10312_v20  ;;  %v4312_v54 = vld [vmem:[%s10658_s2 + $0xf0] sm:$0xff] }
 0x614   :  { %4963 = vpow2.f32 %v4742_v42  ;;  %v4209_v15 = vpop.f32.mrf.mxu3  ;;  %4532 = vmatpush.msrb.mxu2 %v4337_v62  ;;  %v4332_v42 = vld [vmem:[%s10658_s2 + $0x190] sm:$0xff]  ;;  %v4009_v57 = vand.u32 2147483647, %v10312_v20  ;;  %4564 = vmatpush.msrb.mxu3 %v4353_v33 }
 0x615   :  { %v3994_v11 = vadd.f32 %v3993_v37, %v3974_v8  ;;  %v4215_v12 = vadd.f32 %v4209_v15, %v4067_v29  ;;  %4523 = vmatpush.msrb.mxu1 %v4356_v21  ;;  %4493 = vmatpush.msrb.mxu0 %v4332_v42  ;;  %v4012_v16 = vor.u32 1.1754944e-38, %v4011_v63  ;;  %v4324_v15 = vld [vmem:[%s10658_s2 + $0x150] sm:$0xff]  ;;  %v4066_v42 = vunpack.c.l.bf16 %v10330_v2 }
 0x616   :  { %v4960_v41 = vpop.eup %4959  ;;  %4533 = vmatpush.msrb.mxu2 %v4333_v4  ;;  %4565 = vmatpush.msrb.mxu3 %v4349_v22  ;;  %vm4010_vm1 = vcmp.eq.f32.partialorder %v4009_v57, 8.507059e+37  ;;  %v5011_v63 = vld [vmem:[%s10658_s2 + $0x90] sm:$0xff] }
 0x617   :  { %v10358_v60 = vadd.f32 1.0, %v4960_v41  ;;  %v4738_v32 = vmul.f32 -1.442695, %v3994_v11  ;;  %v4743_v13 = vmul.f32 -1.442695, %v4215_v12  ;;  %4524 = vmatpush.msrb.mxu1 %v4352_v59  ;;  %v4328_v41 = vld [vmem:[%s10658_s2 + $0x170] sm:$0xff] }
 0x618   :  { %4494 = vmatpush.msrb.mxu0 %v4328_v41  ;;  %4534 = vmatpush.msrb.mxu2 %v4329_v10  ;;  %v4316_v12 = vld [vmem:[%s10658_s2 + $0x110] sm:$0xff]  ;;  %v5016_v10 = vld [vmem:[%s10658_s2 + $0x58] sm:$0xff] }
 0x619   :  { %v10372_v3 = vpop.eup %4961  ;;  %4965 = vrcp.f32 %v10358_v60  ;;  %v4030_v50 = vand.u32 2147483648, %v10358_v60  ;;  %4525 = vmatpush.msrb.mxu1 %v4348_v36  ;;  %vm4024_vm0 = vweird.f32 %v10358_v60  ;;  %v5013_v22 = vld [vmem:[%s10658_s2 + $0x70] sm:$0xff] }
 0x61a   :  { %v4001_v47 = vmul.f32 %v10372_v3, %v10312_v20  ;;  %4967 = vpow2.f32 %v4738_v32  ;;  %v4964_v40 = vpop.eup %4963  ;;  %vm4006_vm12 = vweird.f32 %v10372_v3  ;;  %v4028_v20 = vand.u32 2147483647, %v10358_v60  ;;  %4495 = vmatpush.msrb.mxu0 %v4324_v15  ;;  %4535 = vmatpush.msrb.mxu2 %v4325_v35  ;;  %v5015_v41 = vld [vmem:[%s10658_s2 + $0x50] sm:$0xff]  ;;  %v5018_v15 = vld [vmem:[%s10658_s2 + $0x38] sm:$0xff] }
 0x61b   :  { %v10431_v38 = vadd.f32 1.0, %v4964_v40  ;;  %4969 = vtanh.f32 %v3954_v14  ;;  %vm10460_vm14 = vmor %vm4005_vm13, %vm4006_vm12  ;;  %v4031_v19 = vor.u32 1.1754944e-38, %v4030_v50  ;;  %v5014_v50 = vld [vmem:[%s10658_s2 + $0x78] sm:$0xff] }
 0x61c   :  { %v4002_v25 = vsub.f32 1.0, %v4001_v47  ;;  %4971 = vpow2.f32 %v4743_v13  ;;  %vm4029_vm3 = vcmp.eq.f32.partialorder %v4028_v20, 8.507059e+37  ;;  %4496 = vmatpush.msrb.mxu0 %v4320_v9 }
 0x61d   :  { %vm4244_vm9 = vweird.f32 %v10431_v38 }
 0x61e   :  { %v4003_v39 = vmul.f32 %v10372_v3, %v4002_v25  ;;  %4497 = vmatpush.msrb.mxu0 %v4316_v12 }
 0x61f   :  { %v10419_v37 = vpop.eup %4965 }
 0x620   :  { %v4968_v6 = vpop.eup %4967  ;;  %v4020_v53 = vmul.f32 %v10419_v37, %v10358_v60  ;;  %v4004_v17 = vadd.f32 %v10372_v3, %v4003_v39  ;;  %vm4025_vm15 = vweird.f32 %v10419_v37  ;;  %v4321_v60 = vld [vmem:[%s10658_s2 + $0x138] sm:$0xff]  ;;  %4498 = vmatpush.msrb.mxu0 %v4312_v54 }
 0x621   :  { %v10440_v18 = vadd.f32 1.0, %v4968_v6  ;;  %v4970_v30 = vpop.eup %4969  ;;  %vm4026_vm2 = vmor %vm4024_vm0, %vm4025_vm15  ;;  %4536 = vmatpush.msrb.mxu2 %v4321_v60 }
 0x622   :  { %v4021_v8 = vsub.f32 1.0, %v4020_v53  ;;  %v4008_v29 = vsel %vm10460_vm14, %v10372_v3, %v4004_v17  ;;  %v4972_v52 = vpop.eup %4971  ;;  %4499 = vmatpush.msrb.mxu0 %v5007_v0  ;;  %v5009_v53 = vld [vmem:[%s10658_s2 + $0xb0] sm:$0xff]  ;;  %v5010_v17 = vld [vmem:[%s10658_s2 + $0xb8] sm:$0xff] }
 0x623   :  { %4973 = vrcp.f32 %v10440_v18  ;;  %v4013_v24 = vsel %vm4010_vm1, %v4012_v16, %v4008_v29  ;;  %4537 = vmatpush.msrb.mxu2 %v4317_v5  ;;  %v4050_v39 = vand.u32 2147483648, %v10440_v18  ;;  %v4048_v21 = vand.u32 2147483647, %v10440_v18 }
 0x624   :  { %v4022_v11 = vmul.f32 %v10419_v37, %v4021_v8  ;;  %4975 = vrcp.f32 %v10431_v38  ;;  %v4149_v31 = vpop.f32.mrf.mxu0  ;;  %v4055_v25 = vmul.f32 %v4970_v30, %v4013_v24  ;;  %vm4044_vm5 = vweird.f32 %v10440_v18  ;;  %4500 = vmatpush.msrb.mxu0 %v5009_v53  ;;  %v5019_v24 = vld [vmem:[%s10658_s2 + $0x10] sm:$0xff]  ;;  %v4640_v30 = vld [vmem:[%s10662_s4] sm:$0xff] }
 0x625   :  { %v4212_v58 = vadd.f32 %v4149_v31, %v4064_v61  ;;  %4538 = vmatpush.msrb.mxu2 %v4313_v26  ;;  %v4051_v59 = vor.u32 1.1754944e-38, %v4050_v39  ;;  %vm4049_vm7 = vcmp.eq.f32.partialorder %v4048_v21, 8.507059e+37  ;;  %v4250_v31 = vand.u32 2147483648, %v10431_v38 }
 0x626   :  { %v4023_v32 = vadd.f32 %v10419_v37, %v4022_v11  ;;  %4501 = vmatpush.msrb.mxu0 %v5011_v63  ;;  %v4650_v63 = vld [vmem:[%s10662_s4 + $0x50] sm:$0xff] }
 0x627   :  { %v4741_v3 = vmul.f32 -1.442695, %v4212_v58  ;;  %v5017_v58 = vld [vmem:[%s10658_s2 + $0x30] sm:$0xff] }
 0x628   :  { %v4027_v47 = vsel %vm4026_vm2, %v10419_v37, %v4023_v32  ;;  %v5008_v37 = vld [vmem:[%s10658_s2 + $0xd8] sm:$0xff]  ;;  %4502 = vmatpush.msrb.mxu0 %v5013_v22  ;;  %v4248_v32 = vand.u32 2147483647, %v10431_v38 }
 0x629   :  { %v4974_v55 = vpop.eup %4973  ;;  %v4032_v27 = vsel %vm4029_vm3, %v4031_v19, %v4027_v47  ;;  %4977 = vpow2.f32 %v4741_v3  ;;  %4539 = vmatpush.msrb.mxu2 %v5008_v37  ;;  %v5020_v3 = vld [vmem:[%s10658_s2 + $0x18] sm:$0xff] }
 0x62a   :  { %v10501_v28 = vpop.eup %4975  ;;  %v4054_v51 = vmul.f32 %v4032_v27, %v9827_v1  ;;  %v4040_v49 = vmul.f32 %v4974_v55, %v10440_v18  ;;  %v10515_v1 = vadd.f32 1.0, %v4972_v52  ;;  %vm4045_vm4 = vweird.f32 %v4974_v55  ;;  %v5012_v18 = vld [vmem:[%s10658_s2 + $0x98] sm:$0xff]  ;;  %4503 = vmatpush.msrb.mxu0 %v5015_v41 }
 0x62b   :  { %v4240_v44 = vmul.f32 %v10501_v28, %v10431_v38  ;;  %4540 = vmatpush.msrb.mxu2 %v5010_v17  ;;  %vm4046_vm6 = vmor %vm4044_vm5, %vm4045_vm4  ;;  %v4189_v57 = vpop.f32.mrf.mxu2  ;;  %vm4245_vm8 = vweird.f32 %v10501_v28  ;;  %v4251_v52 = vor.u32 1.1754944e-38, %v4250_v31  ;;  %vm4249_vm13 = vcmp.eq.f32.partialorder %v4248_v32, 8.507059e+37  ;;  %v4655_v37 = vld [vmem:[%s10662_s4 + $0x78] sm:$0xff] }
 0x62c   :  { %v10511_v40 = vadd.f32 %v4055_v25, %v4054_v51  ;;  %v4041_v14 = vsub.f32 1.0, %v4040_v49  ;;  %v4214_v20 = vadd.f32 %v4189_v57, %v4066_v42  ;;  %4504 = vmatpush.msrb.mxu0 %v5017_v58  ;;  %vm10574_vm10 = vmor %vm4244_vm9, %vm4245_vm8  ;;  %vm4264_vm1 = vweird.f32 %v10515_v1  ;;  %v4651_v17 = vld [vmem:[%s10662_s4 + $0x58] sm:$0xff] }
 0x62d   :  { %v4241_v6 = vsub.f32 1.0, %v4240_v44  ;;  %4541 = vmatpush.msrb.mxu2 %v5012_v18  ;;  %v4270_v44 = vand.u32 2147483648, %v10515_v1 }
 0x62e   :  { %4979 = vtanh.f32 %v10511_v40  ;;  %v4042_v56 = vmul.f32 %v4974_v55, %v4041_v14  ;;  %4505 = vmatpush.msrb.mxu0 %v5019_v24 }
 0x62f   :  { %v4978_v13 = vpop.eup %4977  ;;  %4981 = vrcp.f32 %v10515_v1  ;;  %v4242_v8 = vmul.f32 %v10501_v28, %v4241_v6  ;;  %4542 = vmatpush.msrb.mxu2 %v5014_v50  ;;  %v4646_v50 = vld [vmem:[%s10662_s4 + $0x30] sm:$0xff] }
 0x630   :  { %v10526_v23 = vadd.f32 1.0, %v4978_v13  ;;  %v4043_v62 = vadd.f32 %v4974_v55, %v4042_v56  ;;  %v4268_v56 = vand.u32 2147483647, %v10515_v1  ;;  %v4271_v13 = vor.u32 1.1754944e-38, %v4270_v44 }
 0x631   :  { %4543 = vmatpush.msrb.mxu2 %v5016_v10  ;;  %v4243_v29 = vadd.f32 %v10501_v28, %v4242_v8  ;;  %v4648_v8 = vld [vmem:[%s10662_s4 + $0x40] sm:$0xff] }
 0x632   :  { %4983 = vrcp.f32 %v10526_v23  ;;  %v4047_v33 = vsel %vm4046_vm6, %v4974_v55, %v4043_v62  ;;  %v4231_v19 = vand.u32 2147483648, %v10526_v23  ;;  %v4229_v38 = vand.u32 2147483647, %v10526_v23  ;;  %v4652_v62 = vld [vmem:[%s10662_s4 + $0x60] sm:$0xff] }
 0x633   :  { %v4052_v4 = vsel %vm4049_vm7, %v4051_v59, %v4047_v33  ;;  %4544 = vmatpush.msrb.mxu2 %v5018_v15  ;;  %4985 = vtanh.f32 %v4214_v20  ;;  %v4247_v60 = vsel %vm10574_vm10, %v10501_v28, %v4243_v29  ;;  %vm4225_vm12 = vweird.f32 %v10526_v23 }
 0x634   :  { %v4980_v61 = vpop.eup %4979  ;;  %v4232_v5 = vor.u32 1.1754944e-38, %v4231_v19  ;;  %v4252_v55 = vsel %vm4249_vm13, %v4251_v52, %v4247_v60  ;;  %vm4230_vm15 = vcmp.eq.f32.partialorder %v4229_v38, 8.507059e+37  ;;  %vm4269_vm3 = vcmp.eq.f32.partialorder %v4268_v56, 8.507059e+37 }
 0x635   :  { %v4058_v36 = vmul.f32 %v4980_v61, %v4052_v4  ;;  %v10552_v43 = vpop.eup %4981  ;;  %4545 = vmatpush.msrb.mxu2 %v5020_v3  ;;  %v4274_v54 = vmul.f32 %v4252_v55, %v9938_v46  ;;  %v4649_v61 = vld [vmem:[%s10662_s4 + $0x48] sm:$0xff] }
 0x636   :  { %v4260_v16 = vmul.f32 %v10552_v43, %v10515_v1  ;;  %vm4265_vm0 = vweird.f32 %v10552_v43  ;;  %v4654_v1 = vld [vmem:[%s10662_s4 + $0x70] sm:$0xff] }
 0x637   :  { %4446 = vmatmul.f32.vlgmr.msra.gmra.mxu1 %v4058_v36  ;;  %4486 = vmatmul.f32.vlgmr.msra.gmra.mxu3 %v4058_v36  ;;  %vm4266_vm2 = vmor %vm4264_vm1, %vm4265_vm0 }
 0x638   :  { %v4984_v2 = vpop.eup %4983  ;;  %v4261_v47 = vsub.f32 1.0, %v4260_v16  ;;  %v4642_v16 = vld [vmem:[%s10662_s4 + $0x10] sm:$0xff] }
 0x639   :  { %v4221_v11 = vmul.f32 %v4984_v2, %v10526_v23  ;;  %vm4226_vm11 = vweird.f32 %v4984_v2  ;;  %v4986_v51 = vpop.eup %4985  ;;  %v4653_v23 = vld [vmem:[%s10662_s4 + $0x68] sm:$0xff] }
 0x63a   :  { %vm4227_vm14 = vmor %vm4225_vm12, %vm4226_vm11  ;;  %v4262_v49 = vmul.f32 %v10552_v43, %v4261_v47 }
 0x63b   :  { %v4222_v35 = vsub.f32 1.0, %v4221_v11  ;;  %v4643_v11 = vld [vmem:[%s10662_s4 + $0x18] sm:$0xff] }
 0x63c   :  { %v4263_v14 = vadd.f32 %v10552_v43, %v4262_v49 }
 0x63d   :  { %v4223_v9 = vmul.f32 %v4984_v2, %v4222_v35  ;;  %v4641_v35 = vld [vmem:[%s10662_s4 + $0x8] sm:$0xff] }
 0x63e   :  { %v4267_v39 = vsel %vm4266_vm2, %v10552_v43, %v4263_v14 }
 0x63f   :  { %v4224_v12 = vadd.f32 %v4984_v2, %v4223_v9  ;;  %4526 = vmatmul.f32.vlgmr.msrb.gmra.mxu1 %v4058_v36  ;;  %4566 = vmatmul.f32.vlgmr.msrb.gmra.mxu3 %v4058_v36  ;;  %v4272_v46 = vsel %vm4269_vm3, %v4271_v13, %v4267_v39  ;;  %v4647_v36 = vld [vmem:[%s10662_s4 + $0x38] sm:$0xff] }
 0x641   :  { %v4228_v27 = vsel %vm4227_vm14, %v4984_v2, %v4224_v12  ;;  %v4644_v2 = vld [vmem:[%s10662_s4 + $0x20] sm:$0xff] }
 0x642   :  { %v4233_v25 = vsel %vm4230_vm15, %v4232_v5, %v4228_v27 }
 0x643   :  { %v4275_v28 = vmul.f32 %v4986_v51, %v4233_v25 }
 0x645   :  { %v4276_v26 = vadd.f32 %v4275_v28, %v4274_v54 }
 0x647   :  { %4987 = vtanh.f32 %v4276_v26 }
 0x64d   :  { %v4988_v21 = vpop.eup %4987 }
 0x64e   :  { %v4278_v0 = vmul.f32 %v4988_v21, %v4272_v46 }
 0x650   :  { %4426 = vmatmul.f32.vlgmr.msra.gmra.mxu0 %v4278_v0  ;;  %4466 = vmatmul.f32.vlgmr.msra.gmra.mxu2 %v4278_v0 }
 0x651   :  { %4660 = vmatpush.msra.mxu0 %v4655_v37 }
 0x653   :  { %4661 = vmatpush.msra.mxu0 %v4654_v1 }
 0x655   :  { %4662 = vmatpush.msra.mxu0 %v4653_v23 }
 0x657   :  { %4663 = vmatpush.msra.mxu0 %v4652_v62 }
 0x658   :  { %4506 = vmatmul.f32.vlgmr.msrb.gmra.mxu0 %v4278_v0  ;;  %4546 = vmatmul.f32.vlgmr.msrb.gmra.mxu2 %v4278_v0 }
 0x659   :  { %4664 = vmatpush.msra.mxu0 %v4651_v17 }
 0x65b   :  { %4665 = vmatpush.msra.mxu0 %v4650_v63 }
 0x65d   :  { %4666 = vmatpush.msra.mxu0 %v4649_v61 }
 0x65f   :  { %4667 = vmatpush.msra.mxu0 %v4648_v8 }
 0x661   :  { %4668 = vmatpush.msra.mxu0 %v4647_v36 }
 0x663   :  { %4669 = vmatpush.msra.mxu0 %v4646_v50 }
 0x6b4   :  { %v4447_v59 = vpop.f32.mrf.mxu1 }
 0x6ba   :  { %v4487_v42 = vpop.f32.mrf.mxu3 }
 0x6bc   :  { %v4527_v60 = vpop.f32.mrf.mxu1 }
 0x6c2   :  { %v4567_v29 = vpop.f32.mrf.mxu3 }
 0x6cd   :  { %v4427_v6 = vpop.f32.mrf.mxu0 }
 0x6ce   :  { %v4428_v53 = vadd.f32 %v4427_v6, %v6080_v34 }
 0x6d0   :  { %v4448_v33 = vadd.f32 %v4447_v59, %v4428_v53 }
 0x6d2   :  { %v4744_v18 = vmul.f32 -1.442695, %v4448_v33 }
 0x6d3   :  { %v4467_v4 = vpop.f32.mrf.mxu2 }
 0x6d4   :  { %4989 = vpow2.f32 %v4744_v18  ;;  %v4468_v34 = vadd.f32 %v4467_v4, %v6126_v7  ;;  %v4645_v7 = vld [vmem:[%s10662_s4 + $0x28] sm:$0xff] }
 0x6d5   :  { %4670 = vmatpush.msra.mxu0 %v4645_v7  ;;  %v4507_v32 = vpop.f32.mrf.mxu0 }
 0x6d6   :  { %v4488_v57 = vadd.f32 %v4487_v42, %v4468_v34  ;;  %v4508_v3 = vadd.f32 %v4507_v32, %v6251_v45 }
 0x6d7   :  { %4671 = vmatpush.msra.mxu0 %v4644_v2 }
 0x6d8   :  { %v4745_v22 = vmul.f32 -1.442695, %v4488_v57  ;;  %v4528_v12 = vadd.f32 %v4527_v60, %v4508_v3 }
 0x6d9   :  { %4672 = vmatpush.msra.mxu0 %v4643_v11 }
 0x6da   :  { %v4990_v43 = vpop.eup %4989  ;;  %4991 = vpow2.f32 %v4745_v22 }
 0x6db   :  { %v4573_v20 = vadd.f32 1.0, %v4990_v43  ;;  %v4547_v41 = vpop.f32.mrf.mxu2  ;;  %4673 = vmatpush.msra.mxu0 %v4642_v16 }
 0x6dc   :  { %v4548_v10 = vadd.f32 %v4547_v41, %v6196_v48 }
 0x6dd   :  { %4993 = vrcp.f32 %v4573_v20  ;;  %4674 = vmatpush.msra.mxu0 %v4641_v35  ;;  %v4585_v51 = vand.u32 2147483648, %v4573_v20  ;;  %vm4579_vm5 = vweird.f32 %v4573_v20  ;;  %v4583_v49 = vand.u32 2147483647, %v4573_v20 }
 0x6de   :  { %v4568_v31 = vadd.f32 %v4567_v29, %v4548_v10 }
 0x6df   :  { %4675 = vmatpush.msra.mxu0 %v4640_v30  ;;  %v4586_v14 = vor.u32 1.1754944e-38, %v4585_v51  ;;  %vm4584_vm9 = vcmp.eq.f32.partialorder %v4583_v49, 8.507059e+37 }
 0x6e0   :  { %v4992_v58 = vpop.eup %4991  ;;  %v4746_v15 = vmul.f32 -1.442695, %v4568_v31 }
 0x6e1   :  { %v4592_v48 = vadd.f32 1.0, %v4992_v58 }
 0x6e2   :  { %4995 = vpow2.f32 %v4746_v15 }
 0x6e3   :  { %v4994_v19 = vpop.eup %4993  ;;  %4997 = vrcp.f32 %v4592_v48  ;;  %v4604_v54 = vand.u32 2147483648, %v4592_v48  ;;  %v4602_v26 = vand.u32 2147483647, %v4592_v48  ;;  %vm4598_vm8 = vweird.f32 %v4592_v48 }
 0x6e4   :  { %v4575_v24 = vmul.f32 %v4994_v19, %v4573_v20  ;;  %vm4580_vm4 = vweird.f32 %v4994_v19 }
 0x6e5   :  { %vm4581_vm6 = vmor %vm4579_vm5, %vm4580_vm4  ;;  %v4605_v39 = vor.u32 1.1754944e-38, %v4604_v54  ;;  %vm4603_vm11 = vcmp.eq.f32.partialorder %v4602_v26, 8.507059e+37 }
 0x6e6   :  { %v4576_v9 = vsub.f32 1.0, %v4575_v24 }
 0x6e8   :  { %v4996_v38 = vpop.eup %4995  ;;  %v4577_v52 = vmul.f32 %v4994_v19, %v4576_v9 }
 0x6e9   :  { %v4998_v47 = vpop.eup %4997  ;;  %v4612_v5 = vadd.f32 1.0, %v4996_v38 }
 0x6ea   :  { %v4594_v55 = vmul.f32 %v4998_v47, %v4592_v48  ;;  %v4578_v27 = vadd.f32 %v4994_v19, %v4577_v52  ;;  %vm4599_vm7 = vweird.f32 %v4998_v47 }
 0x6eb   :  { %4999 = vrcp.f32 %v4612_v5  ;;  %vm4600_vm10 = vmor %vm4598_vm8, %vm4599_vm7  ;;  %v4624_v17 = vand.u32 2147483648, %v4612_v5  ;;  %vm4618_vm13 = vweird.f32 %v4612_v5  ;;  %v4622_v33 = vand.u32 2147483647, %v4612_v5 }
 0x6ec   :  { %v4595_v25 = vsub.f32 1.0, %v4594_v55  ;;  %5001 = vtanh.f32 %v4528_v12  ;;  %v4582_v28 = vsel %vm4581_vm6, %v4994_v19, %v4578_v27 }
 0x6ed   :  { %v4587_v13 = vsel %vm4584_vm9, %v4586_v14, %v4582_v28  ;;  %v4625_v18 = vor.u32 1.1754944e-38, %v4624_v17  ;;  %vm4623_vm15 = vcmp.eq.f32.partialorder %v4622_v33, 8.507059e+37 }
 0x6ee   :  { %v4596_v45 = vmul.f32 %v4998_v47, %v4595_v25 }
 0x6f0   :  { %v4597_v44 = vadd.f32 %v4998_v47, %v4596_v45 }
 0x6f1   :  { %v5000_v56 = vpop.eup %4999 }
 0x6f2   :  { %v4601_v21 = vsel %vm4600_vm10, %v4998_v47, %v4597_v44  ;;  %v4614_v46 = vmul.f32 %v5000_v56, %v4612_v5  ;;  %v5002_v0 = vpop.eup %5001  ;;  %vm4619_vm12 = vweird.f32 %v5000_v56 }
 0x6f3   :  { %v4606_v37 = vsel %vm4603_vm11, %v4605_v39, %v4601_v21  ;;  %v4629_v23 = vmul.f32 %v5002_v0, %v4587_v13  ;;  %vm4620_vm14 = vmor %vm4618_vm13, %vm4619_vm12 }
 0x6f4   :  { %v4628_v1 = vmul.f32 %v4606_v37, %v10511_v40  ;;  %v4615_v62 = vsub.f32 1.0, %v4614_v46  ;;  %v4748_v40 = vld [vmem:[%s10661_s5] ss:$0 sm:$0xff] }
 0x6f6   :  { %v4630_v6 = vadd.f32 %v4629_v23, %v4628_v1  ;;  %v4616_v53 = vmul.f32 %v5000_v56, %v4615_v62 }
 0x6f8   :  { %5003 = vtanh.f32 %v4630_v6  ;;  %v4617_v59 = vadd.f32 %v5000_v56, %v4616_v53 }
 0x6fa   :  { %v4621_v63 = vsel %vm4620_vm14, %v5000_v56, %v4617_v59 }
 0x6fb   :  { %v4626_v42 = vsel %vm4623_vm15, %v4625_v18, %v4621_v63 }
 0x6fe   :  { %v5004_v61 = vpop.eup %5003 }
 0x6ff   :  { %v4632_v4 = vmul.f32 %v5004_v61, %v4626_v42 }
 0x701   :  { %4676 = vmatmul.f32.vlgmr.msra.gmra.mxu0 %v4632_v4 }
 0x77e   :  { %v4677_v34 = vpop.f32.mrf.mxu0 }
 0x77f   :  { %v4678_v8 = vadd.f32 %v4748_v40, %v4677_v34 }
 0x781   :  { %4680 = vst [vmem:[%s10663_s6] sm:$0xff] %v4678_v8 }

</bundles_post_ra>
